<compile_context>
chip_gen: v6e
topology: v6e:2x2x1
jax: 0.10.0
libtpu: 0.0.40
codegen_flags: <defaults>
</compile_context>

<pallas_src>
import jax
import jax.numpy as jnp
from jax import lax
from jax.experimental import pallas as pl
from jax.experimental.pallas import tpu as pltpu

B = 2        # batch
C_IN = 28    # Conv2d(28, ...)
H_IN = 28    # 28x28 spatial -> 7x7 before fc1
EPS = 1e-5   # BatchNorm eps


def se_hipp_kernel(xcol_ref,                                # (1, 729, 512) conv1 im2col
                   w1_ref, b1_ref, s1_ref, t1_ref,          # (512,32), (1,32)x3
                   w2_ref, b2_ref, s2_ref, t2_ref,          # (128,64), (1,64)x3
                   wf1_ref, bf1_ref, wf2_ref, bf2_ref,      # (448,896), (1,128), (128,128), (1,128)
                   out_ref,                                  # (1, 1, 128)
                   c1_ref, a1_ref, c2_ref):                  # VMEM scratch
    f32 = jnp.float32

    # ---- conv1: one matmul over the wrapper-built 4x4x32 im2col patches ------
    # (729, 512) @ (512, 32) -> (729, 32); flat row index = h*27 + w
    c1_ref[...] = (jnp.dot(xcol_ref[0], w1_ref[...], preferred_element_type=f32)
                   + b1_ref[...])

    # ---- maxpool k=3 s=2 (-> 13x13) + bn1 + relu ------------------------------
    # stride-2 column downsample as a 0/1 selection matmul (lane/sublane aligned)
    wsel1 = (lax.broadcasted_iota(jnp.int32, (13, 25), 1) ==
             2 * lax.broadcasted_iota(jnp.int32, (13, 25), 0)).astype(f32)
    s1 = s1_ref[...]
    t1 = t1_ref[...]
    for i in range(13):
        r0 = c1_ref[54 * i:54 * i + 27, :]
        r1 = c1_ref[54 * i + 27:54 * i + 54, :]
        r2 = c1_ref[54 * i + 54:54 * i + 81, :]
        r = jnp.maximum(jnp.maximum(r0, r1), r2)                          # (27, 32) h-pooled
        m = jnp.maximum(jnp.maximum(r[0:25, :], r[1:26, :]), r[2:27, :])  # (25, 32)
        pooled = jnp.dot(wsel1, m, preferred_element_type=f32)            # (13, 32)
        a1_ref[i] = jnp.maximum(pooled * s1 + t1, 0.0)

    # ---- conv2: 2x2 taps folded into K=128 via lane-concat, 12 matmuls --------
    b2 = b2_ref[...]
    for h in range(12):
        top = a1_ref[h]                                                   # (13, 32)
        bot = a1_ref[h + 1]                                               # (13, 32)
        patch = jnp.concatenate(
            [top[0:12, :], top[1:13, :], bot[0:12, :], bot[1:13, :]],
            axis=1)                                                       # (12, 128)
        c2_ref[h] = jnp.dot(patch, w2_ref[...], preferred_element_type=f32) + b2

    # ---- maxpool k=2 s=2 p=1 (-> 7x7, size-1 edge windows) + bn2 + relu -------
    row = lax.broadcasted_iota(jnp.int32, (7, 12), 0)
    colw = lax.broadcasted_iota(jnp.int32, (7, 12), 1)
    sa = (colw == jnp.clip(2 * row - 1, 0, 11)).astype(f32)               # (7, 12)
    sb = (colw == jnp.clip(2 * row, 0, 11)).astype(f32)                   # (7, 12)
    idx_a = [0, 1, 3, 5, 7, 9, 11]
    idx_b = [0, 2, 4, 6, 8, 10, 11]
    s2 = s2_ref[...]
    t2 = t2_ref[...]
    a2_rows = []
    for i in range(7):
        vi = jnp.maximum(c2_ref[idx_a[i]], c2_ref[idx_b[i]])              # (12, 64)
        pooled = jnp.maximum(jnp.dot(sa, vi, preferred_element_type=f32),
                             jnp.dot(sb, vi, preferred_element_type=f32))  # (7, 64)
        a2_rows.append(jnp.maximum(pooled * s2 + t2, 0.0))

    # ---- flatten + dropout(eval=identity) + fc1 + relu + fc2 ------------------
    # fc1 as one matmul against the block-concatenated 128-padded weight; the
    # contribution of spatial column w lives on diagonal block w' == w.
    # TODO(synk): Dropout is eval-mode identity and BatchNorm uses running stats
    # (folded per-channel scale/shift); training-mode batch stats / RNG mask not implemented.
    a2wide = jnp.concatenate(a2_rows, axis=1)                             # (7, 448) [h*64+c]
    r = jnp.dot(a2wide, wf1_ref[...], preferred_element_type=f32)         # (7, 7*128)
    li = lax.broadcasted_iota(jnp.int32, (7, 896), 1)
    wi = lax.broadcasted_iota(jnp.int32, (7, 896), 0) * 128
    dmask = ((li >= wi) & (li < wi + 128)).astype(f32)
    col = jnp.sum(r * dmask, axis=0, keepdims=True)                       # (1, 896)
    fc1 = col[:, 0:128]
    for w in range(1, 7):
        fc1 = fc1 + col[:, 128 * w:128 * (w + 1)]
    h1 = jnp.maximum(fc1 + bf1_ref[...], 0.0)                             # (1,128); lanes>=120 stay 0
    out_ref[0] = jnp.dot(h1, wf2_ref[...], preferred_element_type=f32) + bf2_ref[...]


def se_hipp_forward(x_nchw, params):
    (w1k, b1, s1, t1, w2k, b2, s2, t2, wf1k, bf1k, wf2k, bf2k) = params
    nb = x_nchw.shape[0]
    x = jnp.transpose(x_nchw, (0, 2, 3, 1)).astype(jnp.float32)           # NHWC
    xp = jnp.pad(x, ((0, 0), (1, 1), (1, 1), (0, 4)))                     # pad spatial by 1, C 28->32
    # conv1 im2col, tap order (kh, kw, c) -> K = 4*4*32 = 512
    patches = jnp.concatenate(
        [xp[:, kh:kh + 27, kw:kw + 27, :] for kh in range(4) for kw in range(4)],
        axis=-1)                                                          # (B, 27, 27, 512)
    xcol = patches.reshape(nb, 729, 512)

    def full(shape):
        return pl.BlockSpec(shape, lambda b, _r=len(shape): (0,) * _r)

    out = pl.pallas_call(
        se_hipp_kernel,
        out_shape=jax.ShapeDtypeStruct((nb, 1, 128), jnp.float32),
        grid_spec=pltpu.PrefetchScalarGridSpec(
            num_scalar_prefetch=0,
            grid=(nb,),
            in_specs=[
                pl.BlockSpec((1, 729, 512), lambda b: (b, 0, 0)),
                full((512, 32)), full((1, 32)), full((1, 32)), full((1, 32)),
                full((128, 64)), full((1, 64)), full((1, 64)), full((1, 64)),
                full((448, 896)), full((1, 128)),
                full((128, 128)), full((1, 128)),
            ],
            out_specs=pl.BlockSpec((1, 1, 128), lambda b: (b, 0, 0)),
            scratch_shapes=[
                pltpu.VMEM((729, 32), jnp.float32),     # conv1 output (flat h*27+w)
                pltpu.VMEM((13, 13, 32), jnp.float32),  # pool1 + bn1 + relu
                pltpu.VMEM((12, 12, 64), jnp.float32),  # conv2 output
            ],
        ),
        compiler_params=pltpu.CompilerParams(
            dimension_semantics=("parallel",),
        ),
    )(xcol, w1k, b1, s1, t1, w2k, b2, s2, t2, wf1k, bf1k, wf2k, bf2k)
    return out[:, 0, :2]


def init_params(key):
    ks = jax.random.split(key, 16)
    n = lambda k, shape, s: (s * jax.random.normal(k, shape)).astype(jnp.float32)

    w1 = n(ks[0], (32, 28, 4, 4), 0.05)                     # OIHW (torch layout)
    b1 = n(ks[1], (32,), 0.05)
    g1, be1, m1 = 1.0 + n(ks[2], (32,), 0.1), n(ks[3], (32,), 0.1), n(ks[4], (32,), 0.1)
    v1 = 1.0 + 0.5 * jax.random.uniform(ks[5], (32,), jnp.float32)

    w2 = n(ks[6], (64, 32, 2, 2), 0.05)
    b2 = n(ks[7], (64,), 0.05)
    g2, be2, m2 = 1.0 + n(ks[8], (64,), 0.1), n(ks[9], (64,), 0.1), n(ks[10], (64,), 0.1)
    v2 = 1.0 + 0.5 * jax.random.uniform(ks[11], (64,), jnp.float32)

    wf1 = n(ks[12], (120, 64 * 7 * 7), 0.02)                # (out, in) torch layout
    bf1 = n(ks[13], (120,), 0.02)
    wf2 = n(ks[14], (2, 120), 0.05)
    bf2 = n(ks[15], (2,), 0.05)

    s1 = g1 / jnp.sqrt(v1 + EPS)
    t1 = be1 - m1 * s1
    s2 = g2 / jnp.sqrt(v2 + EPS)
    t2 = be2 - m2 * s2

    torch_params = dict(w1=w1, b1=b1, s1=s1, t1=t1, w2=w2, b2=b2, s2=s2, t2=t2,
                        wf1=wf1, bf1=bf1, wf2=wf2, bf2=bf2)

    # -- kernel-layout weights -------------------------------------------------
    # conv1: OIHW -> (kh,kw,cin,out), pad cin 28->32, flatten K = kh*128+kw*32+c
    w1k = jnp.transpose(w1, (2, 3, 1, 0))
    w1k = jnp.pad(w1k, ((0, 0), (0, 0), (0, 4), (0, 0))).reshape(512, 32)
    # conv2: OIHW -> (kh,kw,cin,out), flatten K = kh*64+kw*32+c
    w2k = jnp.transpose(w2, (2, 3, 1, 0)).reshape(128, 64)
    # fc1: (120, 64*7*7) -> (h, c, w, n), pad n 120->128, reshape (7*64, 7*128)
    wf1k = jnp.transpose(wf1.reshape(120, 64, 7, 7), (2, 1, 3, 0))
    wf1k = jnp.pad(wf1k, ((0, 0), (0, 0), (0, 0), (0, 8))).reshape(448, 896)
    bf1k = jnp.pad(bf1, (0, 8)).reshape(1, 128)
    # fc2: (2,120) -> (128,128) with K padded 120->128 and N padded 2->128
    wf2k = jnp.pad(wf2.T, ((0, 8), (0, 126)))
    bf2k = jnp.pad(bf2, (0, 126)).reshape(1, 128)

    kernel_params = (
        w1k, b1.reshape(1, 32), s1.reshape(1, 32), t1.reshape(1, 32),
        w2k, b2.reshape(1, 64), s2.reshape(1, 64), t2.reshape(1, 64),
        wf1k, bf1k, wf2k, bf2k,
    )
    return torch_params, kernel_params


def reference_forward(x_nchw, p):
    hi = lax.Precision.HIGHEST
    ninf = -jnp.inf
    y = lax.conv_general_dilated(x_nchw, p['w1'], (1, 1), [(1, 1), (1, 1)],
                                 dimension_numbers=('NCHW', 'OIHW', 'NCHW'),
                                 precision=hi) + p['b1'][None, :, None, None]
    y = lax.reduce_window(y, ninf, lax.max, (1, 1, 3, 3), (1, 1, 2, 2),
                          [(0, 0), (0, 0), (0, 0), (0, 0)])
    y = jnp.maximum(y * p['s1'][None, :, None, None] + p['t1'][None, :, None, None], 0.0)
    y = lax.conv_general_dilated(y, p['w2'], (1, 1), [(0, 0), (0, 0)],
                                 dimension_numbers=('NCHW', 'OIHW', 'NCHW'),
                                 precision=hi) + p['b2'][None, :, None, None]
    y = lax.reduce_window(y, ninf, lax.max, (1, 1, 2, 2), (1, 1, 2, 2),
                          [(0, 0), (0, 0), (1, 1), (1, 1)])
    y = jnp.maximum(y * p['s2'][None, :, None, None] + p['t2'][None, :, None, None], 0.0)
    flat = y.reshape(y.shape[0], -1)                       # NCHW flatten == torch .view order
    h = jnp.maximum(jnp.dot(flat, p['wf1'].T, precision=hi) + p['bf1'], 0.0)
    return jnp.dot(h, p['wf2'].T, precision=hi) + p['bf2']


if __name__ == "__main__":
    key = jax.random.PRNGKey(0)
    k_x, k_p = jax.random.split(key)
    x = jax.random.normal(k_x, (B, C_IN, H_IN, H_IN), jnp.float32)   # NCHW, like torch
    torch_p, kernel_p = init_params(k_p)

    out = jax.jit(se_hipp_forward)(x, kernel_p)
    out = jax.block_until_ready(out)

    ref = reference_forward(x, torch_p)
    err = float(jnp.max(jnp.abs(out - ref)))
    assert out.shape == (B, 2) and err < 1e-2, f"mismatch vs reference: max abs err {err}"
    print("KERNEL_OK")
</pallas_src>

<mosaic_0001>
module attributes {stable_mosaic.version = 11 : i64} {
  func.func @se_hipp_kernel(%arg0: i32, %arg1: memref<1x729x512xf32, #tpu.memory_space<vmem>>, %arg2: memref<512x32xf32, #tpu.memory_space<vmem>>, %arg3: memref<1x32xf32, #tpu.memory_space<vmem>>, %arg4: memref<1x32xf32, #tpu.memory_space<vmem>>, %arg5: memref<1x32xf32, #tpu.memory_space<vmem>>, %arg6: memref<128x64xf32, #tpu.memory_space<vmem>>, %arg7: memref<1x64xf32, #tpu.memory_space<vmem>>, %arg8: memref<1x64xf32, #tpu.memory_space<vmem>>, %arg9: memref<1x64xf32, #tpu.memory_space<vmem>>, %arg10: memref<448x896xf32, #tpu.memory_space<vmem>>, %arg11: memref<1x128xf32, #tpu.memory_space<vmem>>, %arg12: memref<128x128xf32, #tpu.memory_space<vmem>>, %arg13: memref<1x128xf32, #tpu.memory_space<vmem>>, %arg14: memref<1x1x128xf32, #tpu.memory_space<vmem>>, %arg15: memref<729x32xf32, #tpu.memory_space<vmem>>, %arg16: memref<13x13x32xf32, #tpu.memory_space<vmem>>, %arg17: memref<12x12x64xf32, #tpu.memory_space<vmem>>) attributes {dimension_semantics = [#tpu.dimension_semantics<parallel>], iteration_bounds = array<i64: 2>, scalar_prefetch = 0 : i64, scratch_operands = 3 : i64, tpu.core_type = #tpu.core_type<tc>, window_params = [{transform_indices = @transform_0, window_bounds = array<i64: 1, 729, 512>}, {pipeline_mode = #tpu.pipeline_mode<synchronous>, transform_indices = @transform_1, window_bounds = array<i64: 512, 32>}, {pipeline_mode = #tpu.pipeline_mode<synchronous>, transform_indices = @transform_2, window_bounds = array<i64: 1, 32>}, {pipeline_mode = #tpu.pipeline_mode<synchronous>, transform_indices = @transform_3, window_bounds = array<i64: 1, 32>}, {pipeline_mode = #tpu.pipeline_mode<synchronous>, transform_indices = @transform_4, window_bounds = array<i64: 1, 32>}, {pipeline_mode = #tpu.pipeline_mode<synchronous>, transform_indices = @transform_5, window_bounds = array<i64: 128, 64>}, {pipeline_mode = #tpu.pipeline_mode<synchronous>, transform_indices = @transform_6, window_bounds = array<i64: 1, 64>}, {pipeline_mode = #tpu.pipeline_mode<synchronous>, transform_indices = @transform_7, window_bounds = array<i64: 1, 64>}, {pipeline_mode = #tpu.pipeline_mode<synchronous>, transform_indices = @transform_8, window_bounds = array<i64: 1, 64>}, {pipeline_mode = #tpu.pipeline_mode<synchronous>, transform_indices = @transform_9, window_bounds = array<i64: 448, 896>}, {pipeline_mode = #tpu.pipeline_mode<synchronous>, transform_indices = @transform_10, window_bounds = array<i64: 1, 128>}, {pipeline_mode = #tpu.pipeline_mode<synchronous>, transform_indices = @transform_11, window_bounds = array<i64: 128, 128>}, {pipeline_mode = #tpu.pipeline_mode<synchronous>, transform_indices = @transform_12, window_bounds = array<i64: 1, 128>}, {transform_indices = @transform_13, window_bounds = array<i64: 1, 1, 128>}]} {
    %c0 = arith.constant 0 : index
    %c0_0 = arith.constant 0 : index
    %c0_1 = arith.constant 0 : index
    %0 = vector.load %arg1[%c0, %c0_0, %c0_1] : memref<1x729x512xf32, #tpu.memory_space<vmem>>, vector<1x729x512xf32>
    %1 = vector.shape_cast %0 : vector<1x729x512xf32> to vector<729x512xf32>
    %c0_2 = arith.constant 0 : index
    %c0_3 = arith.constant 0 : index
    %2 = vector.load %arg2[%c0_2, %c0_3] : memref<512x32xf32, #tpu.memory_space<vmem>>, vector<512x32xf32>
    %cst = arith.constant dense<0.000000e+00> : vector<729x32xf32>
    %3 = tpu.matmul %1, %2, %cst {dimension_numbers = #tpu.dot_dimension_numbers<[1], [0], [0], [1], [0, 0, 1, 1], [], []>} : vector<729x512xf32>, vector<512x32xf32>, vector<729x32xf32> -> vector<729x32xf32>
    %c0_4 = arith.constant 0 : index
    %c0_5 = arith.constant 0 : index
    %4 = vector.load %arg3[%c0_4, %c0_5] : memref<1x32xf32, #tpu.memory_space<vmem>>, vector<1x32xf32>
    %5 = vector.broadcast %4 : vector<1x32xf32> to vector<729x32xf32>
    %6 = arith.addf %3, %5 : vector<729x32xf32>
    %c0_6 = arith.constant 0 : index
    %c0_7 = arith.constant 0 : index
    %7 = vector.load %arg15[%c0_6, %c0_7] : memref<729x32xf32, #tpu.memory_space<vmem>>, vector<729x32xf32>
    tpu.vector_store %arg15[%c0_6, %c0_7], %6 {strides = array<i32>} : memref<729x32xf32, #tpu.memory_space<vmem>>, vector<729x32xf32>,
    %8 = tpu.iota {dimensions = array<i32: 1>} : vector<13x25xi32>
    %9 = tpu.iota {dimensions = array<i32: 0>} : vector<13x25xi32>
    %c2_i32 = arith.constant 2 : i32
    %10 = vector.broadcast %c2_i32 : i32 to vector<13x25xi32>
    %11 = arith.muli %10, %9 : vector<13x25xi32>
    %12 = arith.cmpi eq, %8, %11 : vector<13x25xi32>
    %13 = arith.extui %12 : vector<13x25xi1> to vector<13x25xi32>
    %14 = arith.sitofp %13 : vector<13x25xi32> to vector<13x25xf32>
    %c0_8 = arith.constant 0 : index
    %c0_9 = arith.constant 0 : index
    %15 = vector.load %arg4[%c0_8, %c0_9] : memref<1x32xf32, #tpu.memory_space<vmem>>, vector<1x32xf32>
    %c0_10 = arith.constant 0 : index
    %c0_11 = arith.constant 0 : index
    %16 = vector.load %arg5[%c0_10, %c0_11] : memref<1x32xf32, #tpu.memory_space<vmem>>, vector<1x32xf32>
    %c0_12 = arith.constant 0 : index
    %c0_13 = arith.constant 0 : index
    %17 = vector.load %arg15[%c0_12, %c0_13] : memref<729x32xf32, #tpu.memory_space<vmem>>, vector<27x32xf32>
    %c27 = arith.constant 27 : index
    %c0_14 = arith.constant 0 : index
    %18 = vector.load %arg15[%c27, %c0_14] : memref<729x32xf32, #tpu.memory_space<vmem>>, vector<27x32xf32>
    %c54 = arith.constant 54 : index
    %c0_15 = arith.constant 0 : index
    %19 = vector.load %arg15[%c54, %c0_15] : memref<729x32xf32, #tpu.memory_space<vmem>>, vector<27x32xf32>
    %20 = arith.maximumf %17, %18 : vector<27x32xf32>
    %21 = arith.maximumf %20, %19 : vector<27x32xf32>
    %22 = vector.extract_strided_slice %21 {offsets = [0, 0], sizes = [25, 32], strides = [1, 1]} : vector<27x32xf32> to vector<25x32xf32>
    %23 = vector.extract_strided_slice %21 {offsets = [1, 0], sizes = [25, 32], strides = [1, 1]} : vector<27x32xf32> to vector<25x32xf32>
    %24 = arith.maximumf %22, %23 : vector<25x32xf32>
    %25 = vector.extract_strided_slice %21 {offsets = [2, 0], sizes = [25, 32], strides = [1, 1]} : vector<27x32xf32> to vector<25x32xf32>
    %26 = arith.maximumf %24, %25 : vector<25x32xf32>
    %cst_16 = arith.constant dense<0.000000e+00> : vector<13x32xf32>
    %27 = tpu.matmul %14, %26, %cst_16 {dimension_numbers = #tpu.dot_dimension_numbers<[1], [0], [0], [1], [0, 0, 1, 1], [], []>} : vector<13x25xf32>, vector<25x32xf32>, vector<13x32xf32> -> vector<13x32xf32>
    %28 = vector.broadcast %15 : vector<1x32xf32> to vector<13x32xf32>
    %29 = arith.mulf %27, %28 : vector<13x32xf32>
    %30 = vector.broadcast %16 : vector<1x32xf32> to vector<13x32xf32>
    %31 = arith.addf %29, %30 : vector<13x32xf32>
    %cst_17 = arith.constant 0.000000e+00 : f32
    %32 = vector.broadcast %cst_17 : f32 to vector<13x32xf32>
    %33 = arith.maximumf %31, %32 : vector<13x32xf32>
    %c0_18 = arith.constant 0 : index
    %c0_19 = arith.constant 0 : index
    %c0_20 = arith.constant 0 : index
    %34 = vector.load %arg16[%c0_18, %c0_19, %c0_20] : memref<13x13x32xf32, #tpu.memory_space<vmem>>, vector<1x13x32xf32>
    %35 = vector.shape_cast %34 : vector<1x13x32xf32> to vector<13x32xf32>
    %36 = vector.shape_cast %33 : vector<13x32xf32> to vector<1x13x32xf32>
    tpu.vector_store %arg16[%c0_18, %c0_19, %c0_20], %36 {strides = array<i32>} : memref<13x13x32xf32, #tpu.memory_space<vmem>>, vector<1x13x32xf32>,
    %c54_21 = arith.constant 54 : index
    %c0_22 = arith.constant 0 : index
    %37 = vector.load %arg15[%c54_21, %c0_22] : memref<729x32xf32, #tpu.memory_space<vmem>>, vector<27x32xf32>
    %c81 = arith.constant 81 : index
    %c0_23 = arith.constant 0 : index
    %38 = vector.load %arg15[%c81, %c0_23] : memref<729x32xf32, #tpu.memory_space<vmem>>, vector<27x32xf32>
    %c108 = arith.constant 108 : index
    %c0_24 = arith.constant 0 : index
    %39 = vector.load %arg15[%c108, %c0_24] : memref<729x32xf32, #tpu.memory_space<vmem>>, vector<27x32xf32>
    %40 = arith.maximumf %37, %38 : vector<27x32xf32>
    %41 = arith.maximumf %40, %39 : vector<27x32xf32>
    %42 = vector.extract_strided_slice %41 {offsets = [0, 0], sizes = [25, 32], strides = [1, 1]} : vector<27x32xf32> to vector<25x32xf32>
    %43 = vector.extract_strided_slice %41 {offsets = [1, 0], sizes = [25, 32], strides = [1, 1]} : vector<27x32xf32> to vector<25x32xf32>
    %44 = arith.maximumf %42, %43 : vector<25x32xf32>
    %45 = vector.extract_strided_slice %41 {offsets = [2, 0], sizes = [25, 32], strides = [1, 1]} : vector<27x32xf32> to vector<25x32xf32>
    %46 = arith.maximumf %44, %45 : vector<25x32xf32>
    %cst_25 = arith.constant dense<0.000000e+00> : vector<13x32xf32>
    %47 = tpu.matmul %14, %46, %cst_25 {dimension_numbers = #tpu.dot_dimension_numbers<[1], [0], [0], [1], [0, 0, 1, 1], [], []>} : vector<13x25xf32>, vector<25x32xf32>, vector<13x32xf32> -> vector<13x32xf32>
    %48 = vector.broadcast %15 : vector<1x32xf32> to vector<13x32xf32>
    %49 = arith.mulf %47, %48 : vector<13x32xf32>
    %50 = vector.broadcast %16 : vector<1x32xf32> to vector<13x32xf32>
    %51 = arith.addf %49, %50 : vector<13x32xf32>
    %cst_26 = arith.constant 0.000000e+00 : f32
    %52 = vector.broadcast %cst_26 : f32 to vector<13x32xf32>
    %53 = arith.maximumf %51, %52 : vector<13x32xf32>
    %c1 = arith.constant 1 : index
    %c0_27 = arith.constant 0 : index
    %c0_28 = arith.constant 0 : index
    %54 = vector.load %arg16[%c1, %c0_27, %c0_28] : memref<13x13x32xf32, #tpu.memory_space<vmem>>, vector<1x13x32xf32>
    %55 = vector.shape_cast %54 : vector<1x13x32xf32> to vector<13x32xf32>
    %56 = vector.shape_cast %53 : vector<13x32xf32> to vector<1x13x32xf32>
    tpu.vector_store %arg16[%c1, %c0_27, %c0_28], %56 {strides = array<i32>} : memref<13x13x32xf32, #tpu.memory_space<vmem>>, vector<1x13x32xf32>,
    %c108_29 = arith.constant 108 : index
    %c0_30 = arith.constant 0 : index
    %57 = vector.load %arg15[%c108_29, %c0_30] : memref<729x32xf32, #tpu.memory_space<vmem>>, vector<27x32xf32>
    %c135 = arith.constant 135 : index
    %c0_31 = arith.constant 0 : index
    %58 = vector.load %arg15[%c135, %c0_31] : memref<729x32xf32, #tpu.memory_space<vmem>>, vector<27x32xf32>
    %c162 = arith.constant 162 : index
    %c0_32 = arith.constant 0 : index
    %59 = vector.load %arg15[%c162, %c0_32] : memref<729x32xf32, #tpu.memory_space<vmem>>, vector<27x32xf32>
    %60 = arith.maximumf %57, %58 : vector<27x32xf32>
    %61 = arith.maximumf %60, %59 : vector<27x32xf32>
    %62 = vector.extract_strided_slice %61 {offsets = [0, 0], sizes = [25, 32], strides = [1, 1]} : vector<27x32xf32> to vector<25x32xf32>
    %63 = vector.extract_strided_slice %61 {offsets = [1, 0], sizes = [25, 32], strides = [1, 1]} : vector<27x32xf32> to vector<25x32xf32>
    %64 = arith.maximumf %62, %63 : vector<25x32xf32>
    %65 = vector.extract_strided_slice %61 {offsets = [2, 0], sizes = [25, 32], strides = [1, 1]} : vector<27x32xf32> to vector<25x32xf32>
    %66 = arith.maximumf %64, %65 : vector<25x32xf32>
    %cst_33 = arith.constant dense<0.000000e+00> : vector<13x32xf32>
    %67 = tpu.matmul %14, %66, %cst_33 {dimension_numbers = #tpu.dot_dimension_numbers<[1], [0], [0], [1], [0, 0, 1, 1], [], []>} : vector<13x25xf32>, vector<25x32xf32>, vector<13x32xf32> -> vector<13x32xf32>
    %68 = vector.broadcast %15 : vector<1x32xf32> to vector<13x32xf32>
    %69 = arith.mulf %67, %68 : vector<13x32xf32>
    %70 = vector.broadcast %16 : vector<1x32xf32> to vector<13x32xf32>
    %71 = arith.addf %69, %70 : vector<13x32xf32>
    %cst_34 = arith.constant 0.000000e+00 : f32
    %72 = vector.broadcast %cst_34 : f32 to vector<13x32xf32>
    %73 = arith.maximumf %71, %72 : vector<13x32xf32>
    %c2 = arith.constant 2 : index
    %c0_35 = arith.constant 0 : index
    %c0_36 = arith.constant 0 : index
    %74 = vector.load %arg16[%c2, %c0_35, %c0_36] : memref<13x13x32xf32, #tpu.memory_space<vmem>>, vector<1x13x32xf32>
    %75 = vector.shape_cast %74 : vector<1x13x32xf32> to vector<13x32xf32>
    %76 = vector.shape_cast %73 : vector<13x32xf32> to vector<1x13x32xf32>
    tpu.vector_store %arg16[%c2, %c0_35, %c0_36], %76 {strides = array<i32>} : memref<13x13x32xf32, #tpu.memory_space<vmem>>, vector<1x13x32xf32>,
    %c162_37 = arith.constant 162 : index
    %c0_38 = arith.constant 0 : index
    %77 = vector.load %arg15[%c162_37, %c0_38] : memref<729x32xf32, #tpu.memory_space<vmem>>, vector<27x32xf32>
    %c189 = arith.constant 189 : index
    %c0_39 = arith.constant 0 : index
    %78 = vector.load %arg15[%c189, %c0_39] : memref<729x32xf32, #tpu.memory_space<vmem>>, vector<27x32xf32>
    %c216 = arith.constant 216 : index
    %c0_40 = arith.constant 0 : index
    %79 = vector.load %arg15[%c216, %c0_40] : memref<729x32xf32, #tpu.memory_space<vmem>>, vector<27x32xf32>
    %80 = arith.maximumf %77, %78 : vector<27x32xf32>
    %81 = arith.maximumf %80, %79 : vector<27x32xf32>
    %82 = vector.extract_strided_slice %81 {offsets = [0, 0], sizes = [25, 32], strides = [1, 1]} : vector<27x32xf32> to vector<25x32xf32>
    %83 = vector.extract_strided_slice %81 {offsets = [1, 0], sizes = [25, 32], strides = [1, 1]} : vector<27x32xf32> to vector<25x32xf32>
    %84 = arith.maximumf %82, %83 : vector<25x32xf32>
    %85 = vector.extract_strided_slice %81 {offsets = [2, 0], sizes = [25, 32], strides = [1, 1]} : vector<27x32xf32> to vector<25x32xf32>
    %86 = arith.maximumf %84, %85 : vector<25x32xf32>
    %cst_41 = arith.constant dense<0.000000e+00> : vector<13x32xf32>
    %87 = tpu.matmul %14, %86, %cst_41 {dimension_numbers = #tpu.dot_dimension_numbers<[1], [0], [0], [1], [0, 0, 1, 1], [], []>} : vector<13x25xf32>, vector<25x32xf32>, vector<13x32xf32> -> vector<13x32xf32>
    %88 = vector.broadcast %15 : vector<1x32xf32> to vector<13x32xf32>
    %89 = arith.mulf %87, %88 : vector<13x32xf32>
    %90 = vector.broadcast %16 : vector<1x32xf32> to vector<13x32xf32>
    %91 = arith.addf %89, %90 : vector<13x32xf32>
    %cst_42 = arith.constant 0.000000e+00 : f32
    %92 = vector.broadcast %cst_42 : f32 to vector<13x32xf32>
    %93 = arith.maximumf %91, %92 : vector<13x32xf32>
    %c3 = arith.constant 3 : index
    %c0_43 = arith.constant 0 : index
    %c0_44 = arith.constant 0 : index
    %94 = vector.load %arg16[%c3, %c0_43, %c0_44] : memref<13x13x32xf32, #tpu.memory_space<vmem>>, vector<1x13x32xf32>
    %95 = vector.shape_cast %94 : vector<1x13x32xf32> to vector<13x32xf32>
    %96 = vector.shape_cast %93 : vector<13x32xf32> to vector<1x13x32xf32>
    tpu.vector_store %arg16[%c3, %c0_43, %c0_44], %96 {strides = array<i32>} : memref<13x13x32xf32, #tpu.memory_space<vmem>>, vector<1x13x32xf32>,
    %c216_45 = arith.constant 216 : index
    %c0_46 = arith.constant 0 : index
    %97 = vector.load %arg15[%c216_45, %c0_46] : memref<729x32xf32, #tpu.memory_space<vmem>>, vector<27x32xf32>
    %c243 = arith.constant 243 : index
    %c0_47 = arith.constant 0 : index
    %98 = vector.load %arg15[%c243, %c0_47] : memref<729x32xf32, #tpu.memory_space<vmem>>, vector<27x32xf32>
    %c270 = arith.constant 270 : index
    %c0_48 = arith.constant 0 : index
    %99 = vector.load %arg15[%c270, %c0_48] : memref<729x32xf32, #tpu.memory_space<vmem>>, vector<27x32xf32>
    %100 = arith.maximumf %97, %98 : vector<27x32xf32>
    %101 = arith.maximumf %100, %99 : vector<27x32xf32>
    %102 = vector.extract_strided_slice %101 {offsets = [0, 0], sizes = [25, 32], strides = [1, 1]} : vector<27x32xf32> to vector<25x32xf32>
    %103 = vector.extract_strided_slice %101 {offsets = [1, 0], sizes = [25, 32], strides = [1, 1]} : vector<27x32xf32> to vector<25x32xf32>
    %104 = arith.maximumf %102, %103 : vector<25x32xf32>
    %105 = vector.extract_strided_slice %101 {offsets = [2, 0], sizes = [25, 32], strides = [1, 1]} : vector<27x32xf32> to vector<25x32xf32>
    %106 = arith.maximumf %104, %105 : vector<25x32xf32>
    %cst_49 = arith.constant dense<0.000000e+00> : vector<13x32xf32>
    %107 = tpu.matmul %14, %106, %cst_49 {dimension_numbers = #tpu.dot_dimension_numbers<[1], [0], [0], [1], [0, 0, 1, 1], [], []>} : vector<13x25xf32>, vector<25x32xf32>, vector<13x32xf32> -> vector<13x32xf32>
    %108 = vector.broadcast %15 : vector<1x32xf32> to vector<13x32xf32>
    %109 = arith.mulf %107, %108 : vector<13x32xf32>
    %110 = vector.broadcast %16 : vector<1x32xf32> to vector<13x32xf32>
    %111 = arith.addf %109, %110 : vector<13x32xf32>
    %cst_50 = arith.constant 0.000000e+00 : f32
    %112 = vector.broadcast %cst_50 : f32 to vector<13x32xf32>
    %113 = arith.maximumf %111, %112 : vector<13x32xf32>
    %c4 = arith.constant 4 : index
    %c0_51 = arith.constant 0 : index
    %c0_52 = arith.constant 0 : index
    %114 = vector.load %arg16[%c4, %c0_51, %c0_52] : memref<13x13x32xf32, #tpu.memory_space<vmem>>, vector<1x13x32xf32>
    %115 = vector.shape_cast %114 : vector<1x13x32xf32> to vector<13x32xf32>
    %116 = vector.shape_cast %113 : vector<13x32xf32> to vector<1x13x32xf32>
    tpu.vector_store %arg16[%c4, %c0_51, %c0_52], %116 {strides = array<i32>} : memref<13x13x32xf32, #tpu.memory_space<vmem>>, vector<1x13x32xf32>,
    %c270_53 = arith.constant 270 : index
    %c0_54 = arith.constant 0 : index
    %117 = vector.load %arg15[%c270_53, %c0_54] : memref<729x32xf32, #tpu.memory_space<vmem>>, vector<27x32xf32>
    %c297 = arith.constant 297 : index
    %c0_55 = arith.constant 0 : index
    %118 = vector.load %arg15[%c297, %c0_55] : memref<729x32xf32, #tpu.memory_space<vmem>>, vector<27x32xf32>
    %c324 = arith.constant 324 : index
    %c0_56 = arith.constant 0 : index
    %119 = vector.load %arg15[%c324, %c0_56] : memref<729x32xf32, #tpu.memory_space<vmem>>, vector<27x32xf32>
    %120 = arith.maximumf %117, %118 : vector<27x32xf32>
    %121 = arith.maximumf %120, %119 : vector<27x32xf32>
    %122 = vector.extract_strided_slice %121 {offsets = [0, 0], sizes = [25, 32], strides = [1, 1]} : vector<27x32xf32> to vector<25x32xf32>
    %123 = vector.extract_strided_slice %121 {offsets = [1, 0], sizes = [25, 32], strides = [1, 1]} : vector<27x32xf32> to vector<25x32xf32>
    %124 = arith.maximumf %122, %123 : vector<25x32xf32>
    %125 = vector.extract_strided_slice %121 {offsets = [2, 0], sizes = [25, 32], strides = [1, 1]} : vector<27x32xf32> to vector<25x32xf32>
    %126 = arith.maximumf %124, %125 : vector<25x32xf32>
    %cst_57 = arith.constant dense<0.000000e+00> : vector<13x32xf32>
    %127 = tpu.matmul %14, %126, %cst_57 {dimension_numbers = #tpu.dot_dimension_numbers<[1], [0], [0], [1], [0, 0, 1, 1], [], []>} : vector<13x25xf32>, vector<25x32xf32>, vector<13x32xf32> -> vector<13x32xf32>
    %128 = vector.broadcast %15 : vector<1x32xf32> to vector<13x32xf32>
    %129 = arith.mulf %127, %128 : vector<13x32xf32>
    %130 = vector.broadcast %16 : vector<1x32xf32> to vector<13x32xf32>
    %131 = arith.addf %129, %130 : vector<13x32xf32>
    %cst_58 = arith.constant 0.000000e+00 : f32
    %132 = vector.broadcast %cst_58 : f32 to vector<13x32xf32>
    %133 = arith.maximumf %131, %132 : vector<13x32xf32>
    %c5 = arith.constant 5 : index
    %c0_59 = arith.constant 0 : index
    %c0_60 = arith.constant 0 : index
    %134 = vector.load %arg16[%c5, %c0_59, %c0_60] : memref<13x13x32xf32, #tpu.memory_space<vmem>>, vector<1x13x32xf32>
    %135 = vector.shape_cast %134 : vector<1x13x32xf32> to vector<13x32xf32>
    %136 = vector.shape_cast %133 : vector<13x32xf32> to vector<1x13x32xf32>
    tpu.vector_store %arg16[%c5, %c0_59, %c0_60], %136 {strides = array<i32>} : memref<13x13x32xf32, #tpu.memory_space<vmem>>, vector<1x13x32xf32>,
    %c324_61 = arith.constant 324 : index
    %c0_62 = arith.constant 0 : index
    %137 = vector.load %arg15[%c324_61, %c0_62] : memref<729x32xf32, #tpu.memory_space<vmem>>, vector<27x32xf32>
    %c351 = arith.constant 351 : index
    %c0_63 = arith.constant 0 : index
    %138 = vector.load %arg15[%c351, %c0_63] : memref<729x32xf32, #tpu.memory_space<vmem>>, vector<27x32xf32>
    %c378 = arith.constant 378 : index
    %c0_64 = arith.constant 0 : index
    %139 = vector.load %arg15[%c378, %c0_64] : memref<729x32xf32, #tpu.memory_space<vmem>>, vector<27x32xf32>
    %140 = arith.maximumf %137, %138 : vector<27x32xf32>
    %141 = arith.maximumf %140, %139 : vector<27x32xf32>
    %142 = vector.extract_strided_slice %141 {offsets = [0, 0], sizes = [25, 32], strides = [1, 1]} : vector<27x32xf32> to vector<25x32xf32>
    %143 = vector.extract_strided_slice %141 {offsets = [1, 0], sizes = [25, 32], strides = [1, 1]} : vector<27x32xf32> to vector<25x32xf32>
    %144 = arith.maximumf %142, %143 : vector<25x32xf32>
    %145 = vector.extract_strided_slice %141 {offsets = [2, 0], sizes = [25, 32], strides = [1, 1]} : vector<27x32xf32> to vector<25x32xf32>
    %146 = arith.maximumf %144, %145 : vector<25x32xf32>
    %cst_65 = arith.constant dense<0.000000e+00> : vector<13x32xf32>
    %147 = tpu.matmul %14, %146, %cst_65 {dimension_numbers = #tpu.dot_dimension_numbers<[1], [0], [0], [1], [0, 0, 1, 1], [], []>} : vector<13x25xf32>, vector<25x32xf32>, vector<13x32xf32> -> vector<13x32xf32>
    %148 = vector.broadcast %15 : vector<1x32xf32> to vector<13x32xf32>
    %149 = arith.mulf %147, %148 : vector<13x32xf32>
    %150 = vector.broadcast %16 : vector<1x32xf32> to vector<13x32xf32>
    %151 = arith.addf %149, %150 : vector<13x32xf32>
    %cst_66 = arith.constant 0.000000e+00 : f32
    %152 = vector.broadcast %cst_66 : f32 to vector<13x32xf32>
    %153 = arith.maximumf %151, %152 : vector<13x32xf32>
    %c6 = arith.constant 6 : index
    %c0_67 = arith.constant 0 : index
    %c0_68 = arith.constant 0 : index
    %154 = vector.load %arg16[%c6, %c0_67, %c0_68] : memref<13x13x32xf32, #tpu.memory_space<vmem>>, vector<1x13x32xf32>
    %155 = vector.shape_cast %154 : vector<1x13x32xf32> to vector<13x32xf32>
    %156 = vector.shape_cast %153 : vector<13x32xf32> to vector<1x13x32xf32>
    tpu.vector_store %arg16[%c6, %c0_67, %c0_68], %156 {strides = array<i32>} : memref<13x13x32xf32, #tpu.memory_space<vmem>>, vector<1x13x32xf32>,
    %c378_69 = arith.constant 378 : index
    %c0_70 = arith.constant 0 : index
    %157 = vector.load %arg15[%c378_69, %c0_70] : memref<729x32xf32, #tpu.memory_space<vmem>>, vector<27x32xf32>
    %c405 = arith.constant 405 : index
    %c0_71 = arith.constant 0 : index
    %158 = vector.load %arg15[%c405, %c0_71] : memref<729x32xf32, #tpu.memory_space<vmem>>, vector<27x32xf32>
    %c432 = arith.constant 432 : index
    %c0_72 = arith.constant 0 : index
    %159 = vector.load %arg15[%c432, %c0_72] : memref<729x32xf32, #tpu.memory_space<vmem>>, vector<27x32xf32>
    %160 = arith.maximumf %157, %158 : vector<27x32xf32>
    %161 = arith.maximumf %160, %159 : vector<27x32xf32>
    %162 = vector.extract_strided_slice %161 {offsets = [0, 0], sizes = [25, 32], strides = [1, 1]} : vector<27x32xf32> to vector<25x32xf32>
    %163 = vector.extract_strided_slice %161 {offsets = [1, 0], sizes = [25, 32], strides = [1, 1]} : vector<27x32xf32> to vector<25x32xf32>
    %164 = arith.maximumf %162, %163 : vector<25x32xf32>
    %165 = vector.extract_strided_slice %161 {offsets = [2, 0], sizes = [25, 32], strides = [1, 1]} : vector<27x32xf32> to vector<25x32xf32>
    %166 = arith.maximumf %164, %165 : vector<25x32xf32>
    %cst_73 = arith.constant dense<0.000000e+00> : vector<13x32xf32>
    %167 = tpu.matmul %14, %166, %cst_73 {dimension_numbers = #tpu.dot_dimension_numbers<[1], [0], [0], [1], [0, 0, 1, 1], [], []>} : vector<13x25xf32>, vector<25x32xf32>, vector<13x32xf32> -> vector<13x32xf32>
    %168 = vector.broadcast %15 : vector<1x32xf32> to vector<13x32xf32>
    %169 = arith.mulf %167, %168 : vector<13x32xf32>
    %170 = vector.broadcast %16 : vector<1x32xf32> to vector<13x32xf32>
    %171 = arith.addf %169, %170 : vector<13x32xf32>
    %cst_74 = arith.constant 0.000000e+00 : f32
    %172 = vector.broadcast %cst_74 : f32 to vector<13x32xf32>
    %173 = arith.maximumf %171, %172 : vector<13x32xf32>
    %c7 = arith.constant 7 : index
    %c0_75 = arith.constant 0 : index
    %c0_76 = arith.constant 0 : index
    %174 = vector.load %arg16[%c7, %c0_75, %c0_76] : memref<13x13x32xf32, #tpu.memory_space<vmem>>, vector<1x13x32xf32>
    %175 = vector.shape_cast %174 : vector<1x13x32xf32> to vector<13x32xf32>
    %176 = vector.shape_cast %173 : vector<13x32xf32> to vector<1x13x32xf32>
    tpu.vector_store %arg16[%c7, %c0_75, %c0_76], %176 {strides = array<i32>} : memref<13x13x32xf32, #tpu.memory_space<vmem>>, vector<1x13x32xf32>,
    %c432_77 = arith.constant 432 : index
    %c0_78 = arith.constant 0 : index
    %177 = vector.load %arg15[%c432_77, %c0_78] : memref<729x32xf32, #tpu.memory_space<vmem>>, vector<27x32xf32>
    %c459 = arith.constant 459 : index
    %c0_79 = arith.constant 0 : index
    %178 = vector.load %arg15[%c459, %c0_79] : memref<729x32xf32, #tpu.memory_space<vmem>>, vector<27x32xf32>
    %c486 = arith.constant 486 : index
    %c0_80 = arith.constant 0 : index
    %179 = vector.load %arg15[%c486, %c0_80] : memref<729x32xf32, #tpu.memory_space<vmem>>, vector<27x32xf32>
    %180 = arith.maximumf %177, %178 : vector<27x32xf32>
    %181 = arith.maximumf %180, %179 : vector<27x32xf32>
    %182 = vector.extract_strided_slice %181 {offsets = [0, 0], sizes = [25, 32], strides = [1, 1]} : vector<27x32xf32> to vector<25x32xf32>
    %183 = vector.extract_strided_slice %181 {offsets = [1, 0], sizes = [25, 32], strides = [1, 1]} : vector<27x32xf32> to vector<25x32xf32>
    %184 = arith.maximumf %182, %183 : vector<25x32xf32>
    %185 = vector.extract_strided_slice %181 {offsets = [2, 0], sizes = [25, 32], strides = [1, 1]} : vector<27x32xf32> to vector<25x32xf32>
    %186 = arith.maximumf %184, %185 : vector<25x32xf32>
    %cst_81 = arith.constant dense<0.000000e+00> : vector<13x32xf32>
    %187 = tpu.matmul %14, %186, %cst_81 {dimension_numbers = #tpu.dot_dimension_numbers<[1], [0], [0], [1], [0, 0, 1, 1], [], []>} : vector<13x25xf32>, vector<25x32xf32>, vector<13x32xf32> -> vector<13x32xf32>
    %188 = vector.broadcast %15 : vector<1x32xf32> to vector<13x32xf32>
    %189 = arith.mulf %187, %188 : vector<13x32xf32>
    %190 = vector.broadcast %16 : vector<1x32xf32> to vector<13x32xf32>
    %191 = arith.addf %189, %190 : vector<13x32xf32>
    %cst_82 = arith.constant 0.000000e+00 : f32
    %192 = vector.broadcast %cst_82 : f32 to vector<13x32xf32>
    %193 = arith.maximumf %191, %192 : vector<13x32xf32>
    %c8 = arith.constant 8 : index
    %c0_83 = arith.constant 0 : index
    %c0_84 = arith.constant 0 : index
    %194 = vector.load %arg16[%c8, %c0_83, %c0_84] : memref<13x13x32xf32, #tpu.memory_space<vmem>>, vector<1x13x32xf32>
    %195 = vector.shape_cast %194 : vector<1x13x32xf32> to vector<13x32xf32>
    %196 = vector.shape_cast %193 : vector<13x32xf32> to vector<1x13x32xf32>
    tpu.vector_store %arg16[%c8, %c0_83, %c0_84], %196 {strides = array<i32>} : memref<13x13x32xf32, #tpu.memory_space<vmem>>, vector<1x13x32xf32>,
    %c486_85 = arith.constant 486 : index
    %c0_86 = arith.constant 0 : index
    %197 = vector.load %arg15[%c486_85, %c0_86] : memref<729x32xf32, #tpu.memory_space<vmem>>, vector<27x32xf32>
    %c513 = arith.constant 513 : index
    %c0_87 = arith.constant 0 : index
    %198 = vector.load %arg15[%c513, %c0_87] : memref<729x32xf32, #tpu.memory_space<vmem>>, vector<27x32xf32>
    %c540 = arith.constant 540 : index
    %c0_88 = arith.constant 0 : index
    %199 = vector.load %arg15[%c540, %c0_88] : memref<729x32xf32, #tpu.memory_space<vmem>>, vector<27x32xf32>
    %200 = arith.maximumf %197, %198 : vector<27x32xf32>
    %201 = arith.maximumf %200, %199 : vector<27x32xf32>
    %202 = vector.extract_strided_slice %201 {offsets = [0, 0], sizes = [25, 32], strides = [1, 1]} : vector<27x32xf32> to vector<25x32xf32>
    %203 = vector.extract_strided_slice %201 {offsets = [1, 0], sizes = [25, 32], strides = [1, 1]} : vector<27x32xf32> to vector<25x32xf32>
    %204 = arith.maximumf %202, %203 : vector<25x32xf32>
    %205 = vector.extract_strided_slice %201 {offsets = [2, 0], sizes = [25, 32], strides = [1, 1]} : vector<27x32xf32> to vector<25x32xf32>
    %206 = arith.maximumf %204, %205 : vector<25x32xf32>
    %cst_89 = arith.constant dense<0.000000e+00> : vector<13x32xf32>
    %207 = tpu.matmul %14, %206, %cst_89 {dimension_numbers = #tpu.dot_dimension_numbers<[1], [0], [0], [1], [0, 0, 1, 1], [], []>} : vector<13x25xf32>, vector<25x32xf32>, vector<13x32xf32> -> vector<13x32xf32>
    %208 = vector.broadcast %15 : vector<1x32xf32> to vector<13x32xf32>
    %209 = arith.mulf %207, %208 : vector<13x32xf32>
    %210 = vector.broadcast %16 : vector<1x32xf32> to vector<13x32xf32>
    %211 = arith.addf %209, %210 : vector<13x32xf32>
    %cst_90 = arith.constant 0.000000e+00 : f32
    %212 = vector.broadcast %cst_90 : f32 to vector<13x32xf32>
    %213 = arith.maximumf %211, %212 : vector<13x32xf32>
    %c9 = arith.constant 9 : index
    %c0_91 = arith.constant 0 : index
    %c0_92 = arith.constant 0 : index
    %214 = vector.load %arg16[%c9, %c0_91, %c0_92] : memref<13x13x32xf32, #tpu.memory_space<vmem>>, vector<1x13x32xf32>
    %215 = vector.shape_cast %214 : vector<1x13x32xf32> to vector<13x32xf32>
    %216 = vector.shape_cast %213 : vector<13x32xf32> to vector<1x13x32xf32>
    tpu.vector_store %arg16[%c9, %c0_91, %c0_92], %216 {strides = array<i32>} : memref<13x13x32xf32, #tpu.memory_space<vmem>>, vector<1x13x32xf32>,
    %c540_93 = arith.constant 540 : index
    %c0_94 = arith.constant 0 : index
    %217 = vector.load %arg15[%c540_93, %c0_94] : memref<729x32xf32, #tpu.memory_space<vmem>>, vector<27x32xf32>
    %c567 = arith.constant 567 : index
    %c0_95 = arith.constant 0 : index
    %218 = vector.load %arg15[%c567, %c0_95] : memref<729x32xf32, #tpu.memory_space<vmem>>, vector<27x32xf32>
    %c594 = arith.constant 594 : index
    %c0_96 = arith.constant 0 : index
    %219 = vector.load %arg15[%c594, %c0_96] : memref<729x32xf32, #tpu.memory_space<vmem>>, vector<27x32xf32>
    %220 = arith.maximumf %217, %218 : vector<27x32xf32>
    %221 = arith.maximumf %220, %219 : vector<27x32xf32>
    %222 = vector.extract_strided_slice %221 {offsets = [0, 0], sizes = [25, 32], strides = [1, 1]} : vector<27x32xf32> to vector<25x32xf32>
    %223 = vector.extract_strided_slice %221 {offsets = [1, 0], sizes = [25, 32], strides = [1, 1]} : vector<27x32xf32> to vector<25x32xf32>
    %224 = arith.maximumf %222, %223 : vector<25x32xf32>
    %225 = vector.extract_strided_slice %221 {offsets = [2, 0], sizes = [25, 32], strides = [1, 1]} : vector<27x32xf32> to vector<25x32xf32>
    %226 = arith.maximumf %224, %225 : vector<25x32xf32>
    %cst_97 = arith.constant dense<0.000000e+00> : vector<13x32xf32>
    %227 = tpu.matmul %14, %226, %cst_97 {dimension_numbers = #tpu.dot_dimension_numbers<[1], [0], [0], [1], [0, 0, 1, 1], [], []>} : vector<13x25xf32>, vector<25x32xf32>, vector<13x32xf32> -> vector<13x32xf32>
    %228 = vector.broadcast %15 : vector<1x32xf32> to vector<13x32xf32>
    %229 = arith.mulf %227, %228 : vector<13x32xf32>
    %230 = vector.broadcast %16 : vector<1x32xf32> to vector<13x32xf32>
    %231 = arith.addf %229, %230 : vector<13x32xf32>
    %cst_98 = arith.constant 0.000000e+00 : f32
    %232 = vector.broadcast %cst_98 : f32 to vector<13x32xf32>
    %233 = arith.maximumf %231, %232 : vector<13x32xf32>
    %c10 = arith.constant 10 : index
    %c0_99 = arith.constant 0 : index
    %c0_100 = arith.constant 0 : index
    %234 = vector.load %arg16[%c10, %c0_99, %c0_100] : memref<13x13x32xf32, #tpu.memory_space<vmem>>, vector<1x13x32xf32>
    %235 = vector.shape_cast %234 : vector<1x13x32xf32> to vector<13x32xf32>
    %236 = vector.shape_cast %233 : vector<13x32xf32> to vector<1x13x32xf32>
    tpu.vector_store %arg16[%c10, %c0_99, %c0_100], %236 {strides = array<i32>} : memref<13x13x32xf32, #tpu.memory_space<vmem>>, vector<1x13x32xf32>,
    %c594_101 = arith.constant 594 : index
    %c0_102 = arith.constant 0 : index
    %237 = vector.load %arg15[%c594_101, %c0_102] : memref<729x32xf32, #tpu.memory_space<vmem>>, vector<27x32xf32>
    %c621 = arith.constant 621 : index
    %c0_103 = arith.constant 0 : index
    %238 = vector.load %arg15[%c621, %c0_103] : memref<729x32xf32, #tpu.memory_space<vmem>>, vector<27x32xf32>
    %c648 = arith.constant 648 : index
    %c0_104 = arith.constant 0 : index
    %239 = vector.load %arg15[%c648, %c0_104] : memref<729x32xf32, #tpu.memory_space<vmem>>, vector<27x32xf32>
    %240 = arith.maximumf %237, %238 : vector<27x32xf32>
    %241 = arith.maximumf %240, %239 : vector<27x32xf32>
    %242 = vector.extract_strided_slice %241 {offsets = [0, 0], sizes = [25, 32], strides = [1, 1]} : vector<27x32xf32> to vector<25x32xf32>
    %243 = vector.extract_strided_slice %241 {offsets = [1, 0], sizes = [25, 32], strides = [1, 1]} : vector<27x32xf32> to vector<25x32xf32>
    %244 = arith.maximumf %242, %243 : vector<25x32xf32>
    %245 = vector.extract_strided_slice %241 {offsets = [2, 0], sizes = [25, 32], strides = [1, 1]} : vector<27x32xf32> to vector<25x32xf32>
    %246 = arith.maximumf %244, %245 : vector<25x32xf32>
    %cst_105 = arith.constant dense<0.000000e+00> : vector<13x32xf32>
    %247 = tpu.matmul %14, %246, %cst_105 {dimension_numbers = #tpu.dot_dimension_numbers<[1], [0], [0], [1], [0, 0, 1, 1], [], []>} : vector<13x25xf32>, vector<25x32xf32>, vector<13x32xf32> -> vector<13x32xf32>
    %248 = vector.broadcast %15 : vector<1x32xf32> to vector<13x32xf32>
    %249 = arith.mulf %247, %248 : vector<13x32xf32>
    %250 = vector.broadcast %16 : vector<1x32xf32> to vector<13x32xf32>
    %251 = arith.addf %249, %250 : vector<13x32xf32>
    %cst_106 = arith.constant 0.000000e+00 : f32
    %252 = vector.broadcast %cst_106 : f32 to vector<13x32xf32>
    %253 = arith.maximumf %251, %252 : vector<13x32xf32>
    %c11 = arith.constant 11 : index
    %c0_107 = arith.constant 0 : index
    %c0_108 = arith.constant 0 : index
    %254 = vector.load %arg16[%c11, %c0_107, %c0_108] : memref<13x13x32xf32, #tpu.memory_space<vmem>>, vector<1x13x32xf32>
    %255 = vector.shape_cast %254 : vector<1x13x32xf32> to vector<13x32xf32>
    %256 = vector.shape_cast %253 : vector<13x32xf32> to vector<1x13x32xf32>
    tpu.vector_store %arg16[%c11, %c0_107, %c0_108], %256 {strides = array<i32>} : memref<13x13x32xf32, #tpu.memory_space<vmem>>, vector<1x13x32xf32>,
    %c648_109 = arith.constant 648 : index
    %c0_110 = arith.constant 0 : index
    %257 = vector.load %arg15[%c648_109, %c0_110] : memref<729x32xf32, #tpu.memory_space<vmem>>, vector<27x32xf32>
    %c675 = arith.constant 675 : index
    %c0_111 = arith.constant 0 : index
    %258 = vector.load %arg15[%c675, %c0_111] : memref<729x32xf32, #tpu.memory_space<vmem>>, vector<27x32xf32>
    %c702 = arith.constant 702 : index
    %c0_112 = arith.constant 0 : index
    %259 = vector.load %arg15[%c702, %c0_112] : memref<729x32xf32, #tpu.memory_space<vmem>>, vector<27x32xf32>
    %260 = arith.maximumf %257, %258 : vector<27x32xf32>
    %261 = arith.maximumf %260, %259 : vector<27x32xf32>
    %262 = vector.extract_strided_slice %261 {offsets = [0, 0], sizes = [25, 32], strides = [1, 1]} : vector<27x32xf32> to vector<25x32xf32>
    %263 = vector.extract_strided_slice %261 {offsets = [1, 0], sizes = [25, 32], strides = [1, 1]} : vector<27x32xf32> to vector<25x32xf32>
    %264 = arith.maximumf %262, %263 : vector<25x32xf32>
    %265 = vector.extract_strided_slice %261 {offsets = [2, 0], sizes = [25, 32], strides = [1, 1]} : vector<27x32xf32> to vector<25x32xf32>
    %266 = arith.maximumf %264, %265 : vector<25x32xf32>
    %cst_113 = arith.constant dense<0.000000e+00> : vector<13x32xf32>
    %267 = tpu.matmul %14, %266, %cst_113 {dimension_numbers = #tpu.dot_dimension_numbers<[1], [0], [0], [1], [0, 0, 1, 1], [], []>} : vector<13x25xf32>, vector<25x32xf32>, vector<13x32xf32> -> vector<13x32xf32>
    %268 = vector.broadcast %15 : vector<1x32xf32> to vector<13x32xf32>
    %269 = arith.mulf %267, %268 : vector<13x32xf32>
    %270 = vector.broadcast %16 : vector<1x32xf32> to vector<13x32xf32>
    %271 = arith.addf %269, %270 : vector<13x32xf32>
    %cst_114 = arith.constant 0.000000e+00 : f32
    %272 = vector.broadcast %cst_114 : f32 to vector<13x32xf32>
    %273 = arith.maximumf %271, %272 : vector<13x32xf32>
    %c12 = arith.constant 12 : index
    %c0_115 = arith.constant 0 : index
    %c0_116 = arith.constant 0 : index
    %274 = vector.load %arg16[%c12, %c0_115, %c0_116] : memref<13x13x32xf32, #tpu.memory_space<vmem>>, vector<1x13x32xf32>
    %275 = vector.shape_cast %274 : vector<1x13x32xf32> to vector<13x32xf32>
    %276 = vector.shape_cast %273 : vector<13x32xf32> to vector<1x13x32xf32>
    tpu.vector_store %arg16[%c12, %c0_115, %c0_116], %276 {strides = array<i32>} : memref<13x13x32xf32, #tpu.memory_space<vmem>>, vector<1x13x32xf32>,
    %c0_117 = arith.constant 0 : index
    %c0_118 = arith.constant 0 : index
    %277 = vector.load %arg7[%c0_117, %c0_118] : memref<1x64xf32, #tpu.memory_space<vmem>>, vector<1x64xf32>
    %c0_119 = arith.constant 0 : index
    %c0_120 = arith.constant 0 : index
    %c0_121 = arith.constant 0 : index
    %278 = vector.load %arg16[%c0_119, %c0_120, %c0_121] : memref<13x13x32xf32, #tpu.memory_space<vmem>>, vector<1x13x32xf32>
    %279 = vector.shape_cast %278 : vector<1x13x32xf32> to vector<13x32xf32>
    %c1_122 = arith.constant 1 : index
    %c0_123 = arith.constant 0 : index
    %c0_124 = arith.constant 0 : index
    %280 = vector.load %arg16[%c1_122, %c0_123, %c0_124] : memref<13x13x32xf32, #tpu.memory_space<vmem>>, vector<1x13x32xf32>
    %281 = vector.shape_cast %280 : vector<1x13x32xf32> to vector<13x32xf32>
    %282 = vector.extract_strided_slice %279 {offsets = [0, 0], sizes = [12, 32], strides = [1, 1]} : vector<13x32xf32> to vector<12x32xf32>
    %283 = vector.extract_strided_slice %279 {offsets = [1, 0], sizes = [12, 32], strides = [1, 1]} : vector<13x32xf32> to vector<12x32xf32>
    %284 = vector.extract_strided_slice %281 {offsets = [0, 0], sizes = [12, 32], strides = [1, 1]} : vector<13x32xf32> to vector<12x32xf32>
    %285 = vector.extract_strided_slice %281 {offsets = [1, 0], sizes = [12, 32], strides = [1, 1]} : vector<13x32xf32> to vector<12x32xf32>
    %286 = tpu.concatenate %282, %283, %284, %285 in 1 : vector<12x32xf32>, vector<12x32xf32>, vector<12x32xf32>, vector<12x32xf32> -> vector<12x128xf32>
    %c0_125 = arith.constant 0 : index
    %c0_126 = arith.constant 0 : index
    %287 = vector.load %arg6[%c0_125, %c0_126] : memref<128x64xf32, #tpu.memory_space<vmem>>, vector<128x64xf32>
    %cst_127 = arith.constant dense<0.000000e+00> : vector<12x64xf32>
    %288 = tpu.matmul %286, %287, %cst_127 {dimension_numbers = #tpu.dot_dimension_numbers<[1], [0], [0], [1], [0, 0, 1, 1], [], []>} : vector<12x128xf32>, vector<128x64xf32>, vector<12x64xf32> -> vector<12x64xf32>
    %289 = vector.broadcast %277 : vector<1x64xf32> to vector<12x64xf32>
    %290 = arith.addf %288, %289 : vector<12x64xf32>
    %c0_128 = arith.constant 0 : index
    %c0_129 = arith.constant 0 : index
    %c0_130 = arith.constant 0 : index
    %291 = vector.load %arg17[%c0_128, %c0_129, %c0_130] : memref<12x12x64xf32, #tpu.memory_space<vmem>>, vector<1x12x64xf32>
    %292 = vector.shape_cast %291 : vector<1x12x64xf32> to vector<12x64xf32>
    %293 = vector.shape_cast %290 : vector<12x64xf32> to vector<1x12x64xf32>
    tpu.vector_store %arg17[%c0_128, %c0_129, %c0_130], %293 {strides = array<i32>} : memref<12x12x64xf32, #tpu.memory_space<vmem>>, vector<1x12x64xf32>,
    %c1_131 = arith.constant 1 : index
    %c0_132 = arith.constant 0 : index
    %c0_133 = arith.constant 0 : index
    %294 = vector.load %arg16[%c1_131, %c0_132, %c0_133] : memref<13x13x32xf32, #tpu.memory_space<vmem>>, vector<1x13x32xf32>
    %295 = vector.shape_cast %294 : vector<1x13x32xf32> to vector<13x32xf32>
    %c2_134 = arith.constant 2 : index
    %c0_135 = arith.constant 0 : index
    %c0_136 = arith.constant 0 : index
    %296 = vector.load %arg16[%c2_134, %c0_135, %c0_136] : memref<13x13x32xf32, #tpu.memory_space<vmem>>, vector<1x13x32xf32>
    %297 = vector.shape_cast %296 : vector<1x13x32xf32> to vector<13x32xf32>
    %298 = vector.extract_strided_slice %295 {offsets = [0, 0], sizes = [12, 32], strides = [1, 1]} : vector<13x32xf32> to vector<12x32xf32>
    %299 = vector.extract_strided_slice %295 {offsets = [1, 0], sizes = [12, 32], strides = [1, 1]} : vector<13x32xf32> to vector<12x32xf32>
    %300 = vector.extract_strided_slice %297 {offsets = [0, 0], sizes = [12, 32], strides = [1, 1]} : vector<13x32xf32> to vector<12x32xf32>
    %301 = vector.extract_strided_slice %297 {offsets = [1, 0], sizes = [12, 32], strides = [1, 1]} : vector<13x32xf32> to vector<12x32xf32>
    %302 = tpu.concatenate %298, %299, %300, %301 in 1 : vector<12x32xf32>, vector<12x32xf32>, vector<12x32xf32>, vector<12x32xf32> -> vector<12x128xf32>
    %c0_137 = arith.constant 0 : index
    %c0_138 = arith.constant 0 : index
    %303 = vector.load %arg6[%c0_137, %c0_138] : memref<128x64xf32, #tpu.memory_space<vmem>>, vector<128x64xf32>
    %cst_139 = arith.constant dense<0.000000e+00> : vector<12x64xf32>
    %304 = tpu.matmul %302, %303, %cst_139 {dimension_numbers = #tpu.dot_dimension_numbers<[1], [0], [0], [1], [0, 0, 1, 1], [], []>} : vector<12x128xf32>, vector<128x64xf32>, vector<12x64xf32> -> vector<12x64xf32>
    %305 = vector.broadcast %277 : vector<1x64xf32> to vector<12x64xf32>
    %306 = arith.addf %304, %305 : vector<12x64xf32>
    %c1_140 = arith.constant 1 : index
    %c0_141 = arith.constant 0 : index
    %c0_142 = arith.constant 0 : index
    %307 = vector.load %arg17[%c1_140, %c0_141, %c0_142] : memref<12x12x64xf32, #tpu.memory_space<vmem>>, vector<1x12x64xf32>
    %308 = vector.shape_cast %307 : vector<1x12x64xf32> to vector<12x64xf32>
    %309 = vector.shape_cast %306 : vector<12x64xf32> to vector<1x12x64xf32>
    tpu.vector_store %arg17[%c1_140, %c0_141, %c0_142], %309 {strides = array<i32>} : memref<12x12x64xf32, #tpu.memory_space<vmem>>, vector<1x12x64xf32>,
    %c2_143 = arith.constant 2 : index
    %c0_144 = arith.constant 0 : index
    %c0_145 = arith.constant 0 : index
    %310 = vector.load %arg16[%c2_143, %c0_144, %c0_145] : memref<13x13x32xf32, #tpu.memory_space<vmem>>, vector<1x13x32xf32>
    %311 = vector.shape_cast %310 : vector<1x13x32xf32> to vector<13x32xf32>
    %c3_146 = arith.constant 3 : index
    %c0_147 = arith.constant 0 : index
    %c0_148 = arith.constant 0 : index
    %312 = vector.load %arg16[%c3_146, %c0_147, %c0_148] : memref<13x13x32xf32, #tpu.memory_space<vmem>>, vector<1x13x32xf32>
    %313 = vector.shape_cast %312 : vector<1x13x32xf32> to vector<13x32xf32>
    %314 = vector.extract_strided_slice %311 {offsets = [0, 0], sizes = [12, 32], strides = [1, 1]} : vector<13x32xf32> to vector<12x32xf32>
    %315 = vector.extract_strided_slice %311 {offsets = [1, 0], sizes = [12, 32], strides = [1, 1]} : vector<13x32xf32> to vector<12x32xf32>
    %316 = vector.extract_strided_slice %313 {offsets = [0, 0], sizes = [12, 32], strides = [1, 1]} : vector<13x32xf32> to vector<12x32xf32>
    %317 = vector.extract_strided_slice %313 {offsets = [1, 0], sizes = [12, 32], strides = [1, 1]} : vector<13x32xf32> to vector<12x32xf32>
    %318 = tpu.concatenate %314, %315, %316, %317 in 1 : vector<12x32xf32>, vector<12x32xf32>, vector<12x32xf32>, vector<12x32xf32> -> vector<12x128xf32>
    %c0_149 = arith.constant 0 : index
    %c0_150 = arith.constant 0 : index
    %319 = vector.load %arg6[%c0_149, %c0_150] : memref<128x64xf32, #tpu.memory_space<vmem>>, vector<128x64xf32>
    %cst_151 = arith.constant dense<0.000000e+00> : vector<12x64xf32>
    %320 = tpu.matmul %318, %319, %cst_151 {dimension_numbers = #tpu.dot_dimension_numbers<[1], [0], [0], [1], [0, 0, 1, 1], [], []>} : vector<12x128xf32>, vector<128x64xf32>, vector<12x64xf32> -> vector<12x64xf32>
    %321 = vector.broadcast %277 : vector<1x64xf32> to vector<12x64xf32>
    %322 = arith.addf %320, %321 : vector<12x64xf32>
    %c2_152 = arith.constant 2 : index
    %c0_153 = arith.constant 0 : index
    %c0_154 = arith.constant 0 : index
    %323 = vector.load %arg17[%c2_152, %c0_153, %c0_154] : memref<12x12x64xf32, #tpu.memory_space<vmem>>, vector<1x12x64xf32>
    %324 = vector.shape_cast %323 : vector<1x12x64xf32> to vector<12x64xf32>
    %325 = vector.shape_cast %322 : vector<12x64xf32> to vector<1x12x64xf32>
    tpu.vector_store %arg17[%c2_152, %c0_153, %c0_154], %325 {strides = array<i32>} : memref<12x12x64xf32, #tpu.memory_space<vmem>>, vector<1x12x64xf32>,
    %c3_155 = arith.constant 3 : index
    %c0_156 = arith.constant 0 : index
    %c0_157 = arith.constant 0 : index
    %326 = vector.load %arg16[%c3_155, %c0_156, %c0_157] : memref<13x13x32xf32, #tpu.memory_space<vmem>>, vector<1x13x32xf32>
    %327 = vector.shape_cast %326 : vector<1x13x32xf32> to vector<13x32xf32>
    %c4_158 = arith.constant 4 : index
    %c0_159 = arith.constant 0 : index
    %c0_160 = arith.constant 0 : index
    %328 = vector.load %arg16[%c4_158, %c0_159, %c0_160] : memref<13x13x32xf32, #tpu.memory_space<vmem>>, vector<1x13x32xf32>
    %329 = vector.shape_cast %328 : vector<1x13x32xf32> to vector<13x32xf32>
    %330 = vector.extract_strided_slice %327 {offsets = [0, 0], sizes = [12, 32], strides = [1, 1]} : vector<13x32xf32> to vector<12x32xf32>
    %331 = vector.extract_strided_slice %327 {offsets = [1, 0], sizes = [12, 32], strides = [1, 1]} : vector<13x32xf32> to vector<12x32xf32>
    %332 = vector.extract_strided_slice %329 {offsets = [0, 0], sizes = [12, 32], strides = [1, 1]} : vector<13x32xf32> to vector<12x32xf32>
    %333 = vector.extract_strided_slice %329 {offsets = [1, 0], sizes = [12, 32], strides = [1, 1]} : vector<13x32xf32> to vector<12x32xf32>
    %334 = tpu.concatenate %330, %331, %332, %333 in 1 : vector<12x32xf32>, vector<12x32xf32>, vector<12x32xf32>, vector<12x32xf32> -> vector<12x128xf32>
    %c0_161 = arith.constant 0 : index
    %c0_162 = arith.constant 0 : index
    %335 = vector.load %arg6[%c0_161, %c0_162] : memref<128x64xf32, #tpu.memory_space<vmem>>, vector<128x64xf32>
    %cst_163 = arith.constant dense<0.000000e+00> : vector<12x64xf32>
    %336 = tpu.matmul %334, %335, %cst_163 {dimension_numbers = #tpu.dot_dimension_numbers<[1], [0], [0], [1], [0, 0, 1, 1], [], []>} : vector<12x128xf32>, vector<128x64xf32>, vector<12x64xf32> -> vector<12x64xf32>
    %337 = vector.broadcast %277 : vector<1x64xf32> to vector<12x64xf32>
    %338 = arith.addf %336, %337 : vector<12x64xf32>
    %c3_164 = arith.constant 3 : index
    %c0_165 = arith.constant 0 : index
    %c0_166 = arith.constant 0 : index
    %339 = vector.load %arg17[%c3_164, %c0_165, %c0_166] : memref<12x12x64xf32, #tpu.memory_space<vmem>>, vector<1x12x64xf32>
    %340 = vector.shape_cast %339 : vector<1x12x64xf32> to vector<12x64xf32>
    %341 = vector.shape_cast %338 : vector<12x64xf32> to vector<1x12x64xf32>
    tpu.vector_store %arg17[%c3_164, %c0_165, %c0_166], %341 {strides = array<i32>} : memref<12x12x64xf32, #tpu.memory_space<vmem>>, vector<1x12x64xf32>,
    %c4_167 = arith.constant 4 : index
    %c0_168 = arith.constant 0 : index
    %c0_169 = arith.constant 0 : index
    %342 = vector.load %arg16[%c4_167, %c0_168, %c0_169] : memref<13x13x32xf32, #tpu.memory_space<vmem>>, vector<1x13x32xf32>
    %343 = vector.shape_cast %342 : vector<1x13x32xf32> to vector<13x32xf32>
    %c5_170 = arith.constant 5 : index
    %c0_171 = arith.constant 0 : index
    %c0_172 = arith.constant 0 : index
    %344 = vector.load %arg16[%c5_170, %c0_171, %c0_172] : memref<13x13x32xf32, #tpu.memory_space<vmem>>, vector<1x13x32xf32>
    %345 = vector.shape_cast %344 : vector<1x13x32xf32> to vector<13x32xf32>
    %346 = vector.extract_strided_slice %343 {offsets = [0, 0], sizes = [12, 32], strides = [1, 1]} : vector<13x32xf32> to vector<12x32xf32>
    %347 = vector.extract_strided_slice %343 {offsets = [1, 0], sizes = [12, 32], strides = [1, 1]} : vector<13x32xf32> to vector<12x32xf32>
    %348 = vector.extract_strided_slice %345 {offsets = [0, 0], sizes = [12, 32], strides = [1, 1]} : vector<13x32xf32> to vector<12x32xf32>
    %349 = vector.extract_strided_slice %345 {offsets = [1, 0], sizes = [12, 32], strides = [1, 1]} : vector<13x32xf32> to vector<12x32xf32>
    %350 = tpu.concatenate %346, %347, %348, %349 in 1 : vector<12x32xf32>, vector<12x32xf32>, vector<12x32xf32>, vector<12x32xf32> -> vector<12x128xf32>
    %c0_173 = arith.constant 0 : index
    %c0_174 = arith.constant 0 : index
    %351 = vector.load %arg6[%c0_173, %c0_174] : memref<128x64xf32, #tpu.memory_space<vmem>>, vector<128x64xf32>
    %cst_175 = arith.constant dense<0.000000e+00> : vector<12x64xf32>
    %352 = tpu.matmul %350, %351, %cst_175 {dimension_numbers = #tpu.dot_dimension_numbers<[1], [0], [0], [1], [0, 0, 1, 1], [], []>} : vector<12x128xf32>, vector<128x64xf32>, vector<12x64xf32> -> vector<12x64xf32>
    %353 = vector.broadcast %277 : vector<1x64xf32> to vector<12x64xf32>
    %354 = arith.addf %352, %353 : vector<12x64xf32>
    %c4_176 = arith.constant 4 : index
    %c0_177 = arith.constant 0 : index
    %c0_178 = arith.constant 0 : index
    %355 = vector.load %arg17[%c4_176, %c0_177, %c0_178] : memref<12x12x64xf32, #tpu.memory_space<vmem>>, vector<1x12x64xf32>
    %356 = vector.shape_cast %355 : vector<1x12x64xf32> to vector<12x64xf32>
    %357 = vector.shape_cast %354 : vector<12x64xf32> to vector<1x12x64xf32>
    tpu.vector_store %arg17[%c4_176, %c0_177, %c0_178], %357 {strides = array<i32>} : memref<12x12x64xf32, #tpu.memory_space<vmem>>, vector<1x12x64xf32>,
    %c5_179 = arith.constant 5 : index
    %c0_180 = arith.constant 0 : index
    %c0_181 = arith.constant 0 : index
    %358 = vector.load %arg16[%c5_179, %c0_180, %c0_181] : memref<13x13x32xf32, #tpu.memory_space<vmem>>, vector<1x13x32xf32>
    %359 = vector.shape_cast %358 : vector<1x13x32xf32> to vector<13x32xf32>
    %c6_182 = arith.constant 6 : index
    %c0_183 = arith.constant 0 : index
    %c0_184 = arith.constant 0 : index
    %360 = vector.load %arg16[%c6_182, %c0_183, %c0_184] : memref<13x13x32xf32, #tpu.memory_space<vmem>>, vector<1x13x32xf32>
    %361 = vector.shape_cast %360 : vector<1x13x32xf32> to vector<13x32xf32>
    %362 = vector.extract_strided_slice %359 {offsets = [0, 0], sizes = [12, 32], strides = [1, 1]} : vector<13x32xf32> to vector<12x32xf32>
    %363 = vector.extract_strided_slice %359 {offsets = [1, 0], sizes = [12, 32], strides = [1, 1]} : vector<13x32xf32> to vector<12x32xf32>
    %364 = vector.extract_strided_slice %361 {offsets = [0, 0], sizes = [12, 32], strides = [1, 1]} : vector<13x32xf32> to vector<12x32xf32>
    %365 = vector.extract_strided_slice %361 {offsets = [1, 0], sizes = [12, 32], strides = [1, 1]} : vector<13x32xf32> to vector<12x32xf32>
    %366 = tpu.concatenate %362, %363, %364, %365 in 1 : vector<12x32xf32>, vector<12x32xf32>, vector<12x32xf32>, vector<12x32xf32> -> vector<12x128xf32>
    %c0_185 = arith.constant 0 : index
    %c0_186 = arith.constant 0 : index
    %367 = vector.load %arg6[%c0_185, %c0_186] : memref<128x64xf32, #tpu.memory_space<vmem>>, vector<128x64xf32>
    %cst_187 = arith.constant dense<0.000000e+00> : vector<12x64xf32>
    %368 = tpu.matmul %366, %367, %cst_187 {dimension_numbers = #tpu.dot_dimension_numbers<[1], [0], [0], [1], [0, 0, 1, 1], [], []>} : vector<12x128xf32>, vector<128x64xf32>, vector<12x64xf32> -> vector<12x64xf32>
    %369 = vector.broadcast %277 : vector<1x64xf32> to vector<12x64xf32>
    %370 = arith.addf %368, %369 : vector<12x64xf32>
    %c5_188 = arith.constant 5 : index
    %c0_189 = arith.constant 0 : index
    %c0_190 = arith.constant 0 : index
    %371 = vector.load %arg17[%c5_188, %c0_189, %c0_190] : memref<12x12x64xf32, #tpu.memory_space<vmem>>, vector<1x12x64xf32>
    %372 = vector.shape_cast %371 : vector<1x12x64xf32> to vector<12x64xf32>
    %373 = vector.shape_cast %370 : vector<12x64xf32> to vector<1x12x64xf32>
    tpu.vector_store %arg17[%c5_188, %c0_189, %c0_190], %373 {strides = array<i32>} : memref<12x12x64xf32, #tpu.memory_space<vmem>>, vector<1x12x64xf32>,
    %c6_191 = arith.constant 6 : index
    %c0_192 = arith.constant 0 : index
    %c0_193 = arith.constant 0 : index
    %374 = vector.load %arg16[%c6_191, %c0_192, %c0_193] : memref<13x13x32xf32, #tpu.memory_space<vmem>>, vector<1x13x32xf32>
    %375 = vector.shape_cast %374 : vector<1x13x32xf32> to vector<13x32xf32>
    %c7_194 = arith.constant 7 : index
    %c0_195 = arith.constant 0 : index
    %c0_196 = arith.constant 0 : index
    %376 = vector.load %arg16[%c7_194, %c0_195, %c0_196] : memref<13x13x32xf32, #tpu.memory_space<vmem>>, vector<1x13x32xf32>
    %377 = vector.shape_cast %376 : vector<1x13x32xf32> to vector<13x32xf32>
    %378 = vector.extract_strided_slice %375 {offsets = [0, 0], sizes = [12, 32], strides = [1, 1]} : vector<13x32xf32> to vector<12x32xf32>
    %379 = vector.extract_strided_slice %375 {offsets = [1, 0], sizes = [12, 32], strides = [1, 1]} : vector<13x32xf32> to vector<12x32xf32>
    %380 = vector.extract_strided_slice %377 {offsets = [0, 0], sizes = [12, 32], strides = [1, 1]} : vector<13x32xf32> to vector<12x32xf32>
    %381 = vector.extract_strided_slice %377 {offsets = [1, 0], sizes = [12, 32], strides = [1, 1]} : vector<13x32xf32> to vector<12x32xf32>
    %382 = tpu.concatenate %378, %379, %380, %381 in 1 : vector<12x32xf32>, vector<12x32xf32>, vector<12x32xf32>, vector<12x32xf32> -> vector<12x128xf32>
    %c0_197 = arith.constant 0 : index
    %c0_198 = arith.constant 0 : index
    %383 = vector.load %arg6[%c0_197, %c0_198] : memref<128x64xf32, #tpu.memory_space<vmem>>, vector<128x64xf32>
    %cst_199 = arith.constant dense<0.000000e+00> : vector<12x64xf32>
    %384 = tpu.matmul %382, %383, %cst_199 {dimension_numbers = #tpu.dot_dimension_numbers<[1], [0], [0], [1], [0, 0, 1, 1], [], []>} : vector<12x128xf32>, vector<128x64xf32>, vector<12x64xf32> -> vector<12x64xf32>
    %385 = vector.broadcast %277 : vector<1x64xf32> to vector<12x64xf32>
    %386 = arith.addf %384, %385 : vector<12x64xf32>
    %c6_200 = arith.constant 6 : index
    %c0_201 = arith.constant 0 : index
    %c0_202 = arith.constant 0 : index
    %387 = vector.load %arg17[%c6_200, %c0_201, %c0_202] : memref<12x12x64xf32, #tpu.memory_space<vmem>>, vector<1x12x64xf32>
    %388 = vector.shape_cast %387 : vector<1x12x64xf32> to vector<12x64xf32>
    %389 = vector.shape_cast %386 : vector<12x64xf32> to vector<1x12x64xf32>
    tpu.vector_store %arg17[%c6_200, %c0_201, %c0_202], %389 {strides = array<i32>} : memref<12x12x64xf32, #tpu.memory_space<vmem>>, vector<1x12x64xf32>,
    %c7_203 = arith.constant 7 : index
    %c0_204 = arith.constant 0 : index
    %c0_205 = arith.constant 0 : index
    %390 = vector.load %arg16[%c7_203, %c0_204, %c0_205] : memref<13x13x32xf32, #tpu.memory_space<vmem>>, vector<1x13x32xf32>
    %391 = vector.shape_cast %390 : vector<1x13x32xf32> to vector<13x32xf32>
    %c8_206 = arith.constant 8 : index
    %c0_207 = arith.constant 0 : index
    %c0_208 = arith.constant 0 : index
    %392 = vector.load %arg16[%c8_206, %c0_207, %c0_208] : memref<13x13x32xf32, #tpu.memory_space<vmem>>, vector<1x13x32xf32>
    %393 = vector.shape_cast %392 : vector<1x13x32xf32> to vector<13x32xf32>
    %394 = vector.extract_strided_slice %391 {offsets = [0, 0], sizes = [12, 32], strides = [1, 1]} : vector<13x32xf32> to vector<12x32xf32>
    %395 = vector.extract_strided_slice %391 {offsets = [1, 0], sizes = [12, 32], strides = [1, 1]} : vector<13x32xf32> to vector<12x32xf32>
    %396 = vector.extract_strided_slice %393 {offsets = [0, 0], sizes = [12, 32], strides = [1, 1]} : vector<13x32xf32> to vector<12x32xf32>
    %397 = vector.extract_strided_slice %393 {offsets = [1, 0], sizes = [12, 32], strides = [1, 1]} : vector<13x32xf32> to vector<12x32xf32>
    %398 = tpu.concatenate %394, %395, %396, %397 in 1 : vector<12x32xf32>, vector<12x32xf32>, vector<12x32xf32>, vector<12x32xf32> -> vector<12x128xf32>
    %c0_209 = arith.constant 0 : index
    %c0_210 = arith.constant 0 : index
    %399 = vector.load %arg6[%c0_209, %c0_210] : memref<128x64xf32, #tpu.memory_space<vmem>>, vector<128x64xf32>
    %cst_211 = arith.constant dense<0.000000e+00> : vector<12x64xf32>
    %400 = tpu.matmul %398, %399, %cst_211 {dimension_numbers = #tpu.dot_dimension_numbers<[1], [0], [0], [1], [0, 0, 1, 1], [], []>} : vector<12x128xf32>, vector<128x64xf32>, vector<12x64xf32> -> vector<12x64xf32>
    %401 = vector.broadcast %277 : vector<1x64xf32> to vector<12x64xf32>
    %402 = arith.addf %400, %401 : vector<12x64xf32>
    %c7_212 = arith.constant 7 : index
    %c0_213 = arith.constant 0 : index
    %c0_214 = arith.constant 0 : index
    %403 = vector.load %arg17[%c7_212, %c0_213, %c0_214] : memref<12x12x64xf32, #tpu.memory_space<vmem>>, vector<1x12x64xf32>
    %404 = vector.shape_cast %403 : vector<1x12x64xf32> to vector<12x64xf32>
    %405 = vector.shape_cast %402 : vector<12x64xf32> to vector<1x12x64xf32>
    tpu.vector_store %arg17[%c7_212, %c0_213, %c0_214], %405 {strides = array<i32>} : memref<12x12x64xf32, #tpu.memory_space<vmem>>, vector<1x12x64xf32>,
    %c8_215 = arith.constant 8 : index
    %c0_216 = arith.constant 0 : index
    %c0_217 = arith.constant 0 : index
    %406 = vector.load %arg16[%c8_215, %c0_216, %c0_217] : memref<13x13x32xf32, #tpu.memory_space<vmem>>, vector<1x13x32xf32>
    %407 = vector.shape_cast %406 : vector<1x13x32xf32> to vector<13x32xf32>
    %c9_218 = arith.constant 9 : index
    %c0_219 = arith.constant 0 : index
    %c0_220 = arith.constant 0 : index
    %408 = vector.load %arg16[%c9_218, %c0_219, %c0_220] : memref<13x13x32xf32, #tpu.memory_space<vmem>>, vector<1x13x32xf32>
    %409 = vector.shape_cast %408 : vector<1x13x32xf32> to vector<13x32xf32>
    %410 = vector.extract_strided_slice %407 {offsets = [0, 0], sizes = [12, 32], strides = [1, 1]} : vector<13x32xf32> to vector<12x32xf32>
    %411 = vector.extract_strided_slice %407 {offsets = [1, 0], sizes = [12, 32], strides = [1, 1]} : vector<13x32xf32> to vector<12x32xf32>
    %412 = vector.extract_strided_slice %409 {offsets = [0, 0], sizes = [12, 32], strides = [1, 1]} : vector<13x32xf32> to vector<12x32xf32>
    %413 = vector.extract_strided_slice %409 {offsets = [1, 0], sizes = [12, 32], strides = [1, 1]} : vector<13x32xf32> to vector<12x32xf32>
    %414 = tpu.concatenate %410, %411, %412, %413 in 1 : vector<12x32xf32>, vector<12x32xf32>, vector<12x32xf32>, vector<12x32xf32> -> vector<12x128xf32>
    %c0_221 = arith.constant 0 : index
    %c0_222 = arith.constant 0 : index
    %415 = vector.load %arg6[%c0_221, %c0_222] : memref<128x64xf32, #tpu.memory_space<vmem>>, vector<128x64xf32>
    %cst_223 = arith.constant dense<0.000000e+00> : vector<12x64xf32>
    %416 = tpu.matmul %414, %415, %cst_223 {dimension_numbers = #tpu.dot_dimension_numbers<[1], [0], [0], [1], [0, 0, 1, 1], [], []>} : vector<12x128xf32>, vector<128x64xf32>, vector<12x64xf32> -> vector<12x64xf32>
    %417 = vector.broadcast %277 : vector<1x64xf32> to vector<12x64xf32>
    %418 = arith.addf %416, %417 : vector<12x64xf32>
    %c8_224 = arith.constant 8 : index
    %c0_225 = arith.constant 0 : index
    %c0_226 = arith.constant 0 : index
    %419 = vector.load %arg17[%c8_224, %c0_225, %c0_226] : memref<12x12x64xf32, #tpu.memory_space<vmem>>, vector<1x12x64xf32>
    %420 = vector.shape_cast %419 : vector<1x12x64xf32> to vector<12x64xf32>
    %421 = vector.shape_cast %418 : vector<12x64xf32> to vector<1x12x64xf32>
    tpu.vector_store %arg17[%c8_224, %c0_225, %c0_226], %421 {strides = array<i32>} : memref<12x12x64xf32, #tpu.memory_space<vmem>>, vector<1x12x64xf32>,
    %c9_227 = arith.constant 9 : index
    %c0_228 = arith.constant 0 : index
    %c0_229 = arith.constant 0 : index
    %422 = vector.load %arg16[%c9_227, %c0_228, %c0_229] : memref<13x13x32xf32, #tpu.memory_space<vmem>>, vector<1x13x32xf32>
    %423 = vector.shape_cast %422 : vector<1x13x32xf32> to vector<13x32xf32>
    %c10_230 = arith.constant 10 : index
    %c0_231 = arith.constant 0 : index
    %c0_232 = arith.constant 0 : index
    %424 = vector.load %arg16[%c10_230, %c0_231, %c0_232] : memref<13x13x32xf32, #tpu.memory_space<vmem>>, vector<1x13x32xf32>
    %425 = vector.shape_cast %424 : vector<1x13x32xf32> to vector<13x32xf32>
    %426 = vector.extract_strided_slice %423 {offsets = [0, 0], sizes = [12, 32], strides = [1, 1]} : vector<13x32xf32> to vector<12x32xf32>
    %427 = vector.extract_strided_slice %423 {offsets = [1, 0], sizes = [12, 32], strides = [1, 1]} : vector<13x32xf32> to vector<12x32xf32>
    %428 = vector.extract_strided_slice %425 {offsets = [0, 0], sizes = [12, 32], strides = [1, 1]} : vector<13x32xf32> to vector<12x32xf32>
    %429 = vector.extract_strided_slice %425 {offsets = [1, 0], sizes = [12, 32], strides = [1, 1]} : vector<13x32xf32> to vector<12x32xf32>
    %430 = tpu.concatenate %426, %427, %428, %429 in 1 : vector<12x32xf32>, vector<12x32xf32>, vector<12x32xf32>, vector<12x32xf32> -> vector<12x128xf32>
    %c0_233 = arith.constant 0 : index
    %c0_234 = arith.constant 0 : index
    %431 = vector.load %arg6[%c0_233, %c0_234] : memref<128x64xf32, #tpu.memory_space<vmem>>, vector<128x64xf32>
    %cst_235 = arith.constant dense<0.000000e+00> : vector<12x64xf32>
    %432 = tpu.matmul %430, %431, %cst_235 {dimension_numbers = #tpu.dot_dimension_numbers<[1], [0], [0], [1], [0, 0, 1, 1], [], []>} : vector<12x128xf32>, vector<128x64xf32>, vector<12x64xf32> -> vector<12x64xf32>
    %433 = vector.broadcast %277 : vector<1x64xf32> to vector<12x64xf32>
    %434 = arith.addf %432, %433 : vector<12x64xf32>
    %c9_236 = arith.constant 9 : index
    %c0_237 = arith.constant 0 : index
    %c0_238 = arith.constant 0 : index
    %435 = vector.load %arg17[%c9_236, %c0_237, %c0_238] : memref<12x12x64xf32, #tpu.memory_space<vmem>>, vector<1x12x64xf32>
    %436 = vector.shape_cast %435 : vector<1x12x64xf32> to vector<12x64xf32>
    %437 = vector.shape_cast %434 : vector<12x64xf32> to vector<1x12x64xf32>
    tpu.vector_store %arg17[%c9_236, %c0_237, %c0_238], %437 {strides = array<i32>} : memref<12x12x64xf32, #tpu.memory_space<vmem>>, vector<1x12x64xf32>,
    %c10_239 = arith.constant 10 : index
    %c0_240 = arith.constant 0 : index
    %c0_241 = arith.constant 0 : index
    %438 = vector.load %arg16[%c10_239, %c0_240, %c0_241] : memref<13x13x32xf32, #tpu.memory_space<vmem>>, vector<1x13x32xf32>
    %439 = vector.shape_cast %438 : vector<1x13x32xf32> to vector<13x32xf32>
    %c11_242 = arith.constant 11 : index
    %c0_243 = arith.constant 0 : index
    %c0_244 = arith.constant 0 : index
    %440 = vector.load %arg16[%c11_242, %c0_243, %c0_244] : memref<13x13x32xf32, #tpu.memory_space<vmem>>, vector<1x13x32xf32>
    %441 = vector.shape_cast %440 : vector<1x13x32xf32> to vector<13x32xf32>
    %442 = vector.extract_strided_slice %439 {offsets = [0, 0], sizes = [12, 32], strides = [1, 1]} : vector<13x32xf32> to vector<12x32xf32>
    %443 = vector.extract_strided_slice %439 {offsets = [1, 0], sizes = [12, 32], strides = [1, 1]} : vector<13x32xf32> to vector<12x32xf32>
    %444 = vector.extract_strided_slice %441 {offsets = [0, 0], sizes = [12, 32], strides = [1, 1]} : vector<13x32xf32> to vector<12x32xf32>
    %445 = vector.extract_strided_slice %441 {offsets = [1, 0], sizes = [12, 32], strides = [1, 1]} : vector<13x32xf32> to vector<12x32xf32>
    %446 = tpu.concatenate %442, %443, %444, %445 in 1 : vector<12x32xf32>, vector<12x32xf32>, vector<12x32xf32>, vector<12x32xf32> -> vector<12x128xf32>
    %c0_245 = arith.constant 0 : index
    %c0_246 = arith.constant 0 : index
    %447 = vector.load %arg6[%c0_245, %c0_246] : memref<128x64xf32, #tpu.memory_space<vmem>>, vector<128x64xf32>
    %cst_247 = arith.constant dense<0.000000e+00> : vector<12x64xf32>
    %448 = tpu.matmul %446, %447, %cst_247 {dimension_numbers = #tpu.dot_dimension_numbers<[1], [0], [0], [1], [0, 0, 1, 1], [], []>} : vector<12x128xf32>, vector<128x64xf32>, vector<12x64xf32> -> vector<12x64xf32>
    %449 = vector.broadcast %277 : vector<1x64xf32> to vector<12x64xf32>
    %450 = arith.addf %448, %449 : vector<12x64xf32>
    %c10_248 = arith.constant 10 : index
    %c0_249 = arith.constant 0 : index
    %c0_250 = arith.constant 0 : index
    %451 = vector.load %arg17[%c10_248, %c0_249, %c0_250] : memref<12x12x64xf32, #tpu.memory_space<vmem>>, vector<1x12x64xf32>
    %452 = vector.shape_cast %451 : vector<1x12x64xf32> to vector<12x64xf32>
    %453 = vector.shape_cast %450 : vector<12x64xf32> to vector<1x12x64xf32>
    tpu.vector_store %arg17[%c10_248, %c0_249, %c0_250], %453 {strides = array<i32>} : memref<12x12x64xf32, #tpu.memory_space<vmem>>, vector<1x12x64xf32>,
    %c11_251 = arith.constant 11 : index
    %c0_252 = arith.constant 0 : index
    %c0_253 = arith.constant 0 : index
    %454 = vector.load %arg16[%c11_251, %c0_252, %c0_253] : memref<13x13x32xf32, #tpu.memory_space<vmem>>, vector<1x13x32xf32>
    %455 = vector.shape_cast %454 : vector<1x13x32xf32> to vector<13x32xf32>
    %c12_254 = arith.constant 12 : index
    %c0_255 = arith.constant 0 : index
    %c0_256 = arith.constant 0 : index
    %456 = vector.load %arg16[%c12_254, %c0_255, %c0_256] : memref<13x13x32xf32, #tpu.memory_space<vmem>>, vector<1x13x32xf32>
    %457 = vector.shape_cast %456 : vector<1x13x32xf32> to vector<13x32xf32>
    %458 = vector.extract_strided_slice %455 {offsets = [0, 0], sizes = [12, 32], strides = [1, 1]} : vector<13x32xf32> to vector<12x32xf32>
    %459 = vector.extract_strided_slice %455 {offsets = [1, 0], sizes = [12, 32], strides = [1, 1]} : vector<13x32xf32> to vector<12x32xf32>
    %460 = vector.extract_strided_slice %457 {offsets = [0, 0], sizes = [12, 32], strides = [1, 1]} : vector<13x32xf32> to vector<12x32xf32>
    %461 = vector.extract_strided_slice %457 {offsets = [1, 0], sizes = [12, 32], strides = [1, 1]} : vector<13x32xf32> to vector<12x32xf32>
    %462 = tpu.concatenate %458, %459, %460, %461 in 1 : vector<12x32xf32>, vector<12x32xf32>, vector<12x32xf32>, vector<12x32xf32> -> vector<12x128xf32>
    %c0_257 = arith.constant 0 : index
    %c0_258 = arith.constant 0 : index
    %463 = vector.load %arg6[%c0_257, %c0_258] : memref<128x64xf32, #tpu.memory_space<vmem>>, vector<128x64xf32>
    %cst_259 = arith.constant dense<0.000000e+00> : vector<12x64xf32>
    %464 = tpu.matmul %462, %463, %cst_259 {dimension_numbers = #tpu.dot_dimension_numbers<[1], [0], [0], [1], [0, 0, 1, 1], [], []>} : vector<12x128xf32>, vector<128x64xf32>, vector<12x64xf32> -> vector<12x64xf32>
    %465 = vector.broadcast %277 : vector<1x64xf32> to vector<12x64xf32>
    %466 = arith.addf %464, %465 : vector<12x64xf32>
    %c11_260 = arith.constant 11 : index
    %c0_261 = arith.constant 0 : index
    %c0_262 = arith.constant 0 : index
    %467 = vector.load %arg17[%c11_260, %c0_261, %c0_262] : memref<12x12x64xf32, #tpu.memory_space<vmem>>, vector<1x12x64xf32>
    %468 = vector.shape_cast %467 : vector<1x12x64xf32> to vector<12x64xf32>
    %469 = vector.shape_cast %466 : vector<12x64xf32> to vector<1x12x64xf32>
    tpu.vector_store %arg17[%c11_260, %c0_261, %c0_262], %469 {strides = array<i32>} : memref<12x12x64xf32, #tpu.memory_space<vmem>>, vector<1x12x64xf32>,
    %470 = tpu.iota {dimensions = array<i32: 0>} : vector<7x12xi32>
    %471 = tpu.iota {dimensions = array<i32: 1>} : vector<7x12xi32>
    %c2_i32_263 = arith.constant 2 : i32
    %472 = vector.broadcast %c2_i32_263 : i32 to vector<7x12xi32>
    %473 = arith.muli %472, %470 : vector<7x12xi32>
    %c1_i32 = arith.constant 1 : i32
    %474 = vector.broadcast %c1_i32 : i32 to vector<7x12xi32>
    %475 = arith.subi %473, %474 : vector<7x12xi32>
    %c0_i32 = arith.constant 0 : i32
    %c11_i32 = arith.constant 11 : i32
    %476 = vector.broadcast %c0_i32 : i32 to vector<7x12xi32>
    %477 = arith.maxsi %476, %475 : vector<7x12xi32>
    %478 = vector.broadcast %c11_i32 : i32 to vector<7x12xi32>
    %479 = arith.minsi %478, %477 : vector<7x12xi32>
    %480 = arith.cmpi eq, %471, %479 : vector<7x12xi32>
    %481 = arith.extui %480 : vector<7x12xi1> to vector<7x12xi32>
    %482 = arith.sitofp %481 : vector<7x12xi32> to vector<7x12xf32>
    %c2_i32_264 = arith.constant 2 : i32
    %483 = vector.broadcast %c2_i32_264 : i32 to vector<7x12xi32>
    %484 = arith.muli %483, %470 : vector<7x12xi32>
    %c0_i32_265 = arith.constant 0 : i32
    %c11_i32_266 = arith.constant 11 : i32
    %485 = vector.broadcast %c0_i32_265 : i32 to vector<7x12xi32>
    %486 = arith.maxsi %485, %484 : vector<7x12xi32>
    %487 = vector.broadcast %c11_i32_266 : i32 to vector<7x12xi32>
    %488 = arith.minsi %487, %486 : vector<7x12xi32>
    %489 = arith.cmpi eq, %471, %488 : vector<7x12xi32>
    %490 = arith.extui %489 : vector<7x12xi1> to vector<7x12xi32>
    %491 = arith.sitofp %490 : vector<7x12xi32> to vector<7x12xf32>
    %c0_267 = arith.constant 0 : index
    %c0_268 = arith.constant 0 : index
    %492 = vector.load %arg8[%c0_267, %c0_268] : memref<1x64xf32, #tpu.memory_space<vmem>>, vector<1x64xf32>
    %c0_269 = arith.constant 0 : index
    %c0_270 = arith.constant 0 : index
    %493 = vector.load %arg9[%c0_269, %c0_270] : memref<1x64xf32, #tpu.memory_space<vmem>>, vector<1x64xf32>
    %c0_271 = arith.constant 0 : index
    %c0_272 = arith.constant 0 : index
    %c0_273 = arith.constant 0 : index
    %494 = vector.load %arg17[%c0_271, %c0_272, %c0_273] : memref<12x12x64xf32, #tpu.memory_space<vmem>>, vector<1x12x64xf32>
    %495 = vector.shape_cast %494 : vector<1x12x64xf32> to vector<12x64xf32>
    %c0_274 = arith.constant 0 : index
    %c0_275 = arith.constant 0 : index
    %c0_276 = arith.constant 0 : index
    %496 = vector.load %arg17[%c0_274, %c0_275, %c0_276] : memref<12x12x64xf32, #tpu.memory_space<vmem>>, vector<1x12x64xf32>
    %497 = vector.shape_cast %496 : vector<1x12x64xf32> to vector<12x64xf32>
    %498 = arith.maximumf %495, %497 : vector<12x64xf32>
    %cst_277 = arith.constant dense<0.000000e+00> : vector<7x64xf32>
    %499 = tpu.matmul %482, %498, %cst_277 {dimension_numbers = #tpu.dot_dimension_numbers<[1], [0], [0], [1], [0, 0, 1, 1], [], []>} : vector<7x12xf32>, vector<12x64xf32>, vector<7x64xf32> -> vector<7x64xf32>
    %cst_278 = arith.constant dense<0.000000e+00> : vector<7x64xf32>
    %500 = tpu.matmul %491, %498, %cst_278 {dimension_numbers = #tpu.dot_dimension_numbers<[1], [0], [0], [1], [0, 0, 1, 1], [], []>} : vector<7x12xf32>, vector<12x64xf32>, vector<7x64xf32> -> vector<7x64xf32>
    %501 = arith.maximumf %499, %500 : vector<7x64xf32>
    %502 = vector.broadcast %492 : vector<1x64xf32> to vector<7x64xf32>
    %503 = arith.mulf %501, %502 : vector<7x64xf32>
    %504 = vector.broadcast %493 : vector<1x64xf32> to vector<7x64xf32>
    %505 = arith.addf %503, %504 : vector<7x64xf32>
    %cst_279 = arith.constant 0.000000e+00 : f32
    %506 = vector.broadcast %cst_279 : f32 to vector<7x64xf32>
    %507 = arith.maximumf %505, %506 : vector<7x64xf32>
    %c1_280 = arith.constant 1 : index
    %c0_281 = arith.constant 0 : index
    %c0_282 = arith.constant 0 : index
    %508 = vector.load %arg17[%c1_280, %c0_281, %c0_282] : memref<12x12x64xf32, #tpu.memory_space<vmem>>, vector<1x12x64xf32>
    %509 = vector.shape_cast %508 : vector<1x12x64xf32> to vector<12x64xf32>
    %c2_283 = arith.constant 2 : index
    %c0_284 = arith.constant 0 : index
    %c0_285 = arith.constant 0 : index
    %510 = vector.load %arg17[%c2_283, %c0_284, %c0_285] : memref<12x12x64xf32, #tpu.memory_space<vmem>>, vector<1x12x64xf32>
    %511 = vector.shape_cast %510 : vector<1x12x64xf32> to vector<12x64xf32>
    %512 = arith.maximumf %509, %511 : vector<12x64xf32>
    %cst_286 = arith.constant dense<0.000000e+00> : vector<7x64xf32>
    %513 = tpu.matmul %482, %512, %cst_286 {dimension_numbers = #tpu.dot_dimension_numbers<[1], [0], [0], [1], [0, 0, 1, 1], [], []>} : vector<7x12xf32>, vector<12x64xf32>, vector<7x64xf32> -> vector<7x64xf32>
    %cst_287 = arith.constant dense<0.000000e+00> : vector<7x64xf32>
    %514 = tpu.matmul %491, %512, %cst_287 {dimension_numbers = #tpu.dot_dimension_numbers<[1], [0], [0], [1], [0, 0, 1, 1], [], []>} : vector<7x12xf32>, vector<12x64xf32>, vector<7x64xf32> -> vector<7x64xf32>
    %515 = arith.maximumf %513, %514 : vector<7x64xf32>
    %516 = vector.broadcast %492 : vector<1x64xf32> to vector<7x64xf32>
    %517 = arith.mulf %515, %516 : vector<7x64xf32>
    %518 = vector.broadcast %493 : vector<1x64xf32> to vector<7x64xf32>
    %519 = arith.addf %517, %518 : vector<7x64xf32>
    %cst_288 = arith.constant 0.000000e+00 : f32
    %520 = vector.broadcast %cst_288 : f32 to vector<7x64xf32>
    %521 = arith.maximumf %519, %520 : vector<7x64xf32>
    %c3_289 = arith.constant 3 : index
    %c0_290 = arith.constant 0 : index
    %c0_291 = arith.constant 0 : index
    %522 = vector.load %arg17[%c3_289, %c0_290, %c0_291] : memref<12x12x64xf32, #tpu.memory_space<vmem>>, vector<1x12x64xf32>
    %523 = vector.shape_cast %522 : vector<1x12x64xf32> to vector<12x64xf32>
    %c4_292 = arith.constant 4 : index
    %c0_293 = arith.constant 0 : index
    %c0_294 = arith.constant 0 : index
    %524 = vector.load %arg17[%c4_292, %c0_293, %c0_294] : memref<12x12x64xf32, #tpu.memory_space<vmem>>, vector<1x12x64xf32>
    %525 = vector.shape_cast %524 : vector<1x12x64xf32> to vector<12x64xf32>
    %526 = arith.maximumf %523, %525 : vector<12x64xf32>
    %cst_295 = arith.constant dense<0.000000e+00> : vector<7x64xf32>
    %527 = tpu.matmul %482, %526, %cst_295 {dimension_numbers = #tpu.dot_dimension_numbers<[1], [0], [0], [1], [0, 0, 1, 1], [], []>} : vector<7x12xf32>, vector<12x64xf32>, vector<7x64xf32> -> vector<7x64xf32>
    %cst_296 = arith.constant dense<0.000000e+00> : vector<7x64xf32>
    %528 = tpu.matmul %491, %526, %cst_296 {dimension_numbers = #tpu.dot_dimension_numbers<[1], [0], [0], [1], [0, 0, 1, 1], [], []>} : vector<7x12xf32>, vector<12x64xf32>, vector<7x64xf32> -> vector<7x64xf32>
    %529 = arith.maximumf %527, %528 : vector<7x64xf32>
    %530 = vector.broadcast %492 : vector<1x64xf32> to vector<7x64xf32>
    %531 = arith.mulf %529, %530 : vector<7x64xf32>
    %532 = vector.broadcast %493 : vector<1x64xf32> to vector<7x64xf32>
    %533 = arith.addf %531, %532 : vector<7x64xf32>
    %cst_297 = arith.constant 0.000000e+00 : f32
    %534 = vector.broadcast %cst_297 : f32 to vector<7x64xf32>
    %535 = arith.maximumf %533, %534 : vector<7x64xf32>
    %c5_298 = arith.constant 5 : index
    %c0_299 = arith.constant 0 : index
    %c0_300 = arith.constant 0 : index
    %536 = vector.load %arg17[%c5_298, %c0_299, %c0_300] : memref<12x12x64xf32, #tpu.memory_space<vmem>>, vector<1x12x64xf32>
    %537 = vector.shape_cast %536 : vector<1x12x64xf32> to vector<12x64xf32>
    %c6_301 = arith.constant 6 : index
    %c0_302 = arith.constant 0 : index
    %c0_303 = arith.constant 0 : index
    %538 = vector.load %arg17[%c6_301, %c0_302, %c0_303] : memref<12x12x64xf32, #tpu.memory_space<vmem>>, vector<1x12x64xf32>
    %539 = vector.shape_cast %538 : vector<1x12x64xf32> to vector<12x64xf32>
    %540 = arith.maximumf %537, %539 : vector<12x64xf32>
    %cst_304 = arith.constant dense<0.000000e+00> : vector<7x64xf32>
    %541 = tpu.matmul %482, %540, %cst_304 {dimension_numbers = #tpu.dot_dimension_numbers<[1], [0], [0], [1], [0, 0, 1, 1], [], []>} : vector<7x12xf32>, vector<12x64xf32>, vector<7x64xf32> -> vector<7x64xf32>
    %cst_305 = arith.constant dense<0.000000e+00> : vector<7x64xf32>
    %542 = tpu.matmul %491, %540, %cst_305 {dimension_numbers = #tpu.dot_dimension_numbers<[1], [0], [0], [1], [0, 0, 1, 1], [], []>} : vector<7x12xf32>, vector<12x64xf32>, vector<7x64xf32> -> vector<7x64xf32>
    %543 = arith.maximumf %541, %542 : vector<7x64xf32>
    %544 = vector.broadcast %492 : vector<1x64xf32> to vector<7x64xf32>
    %545 = arith.mulf %543, %544 : vector<7x64xf32>
    %546 = vector.broadcast %493 : vector<1x64xf32> to vector<7x64xf32>
    %547 = arith.addf %545, %546 : vector<7x64xf32>
    %cst_306 = arith.constant 0.000000e+00 : f32
    %548 = vector.broadcast %cst_306 : f32 to vector<7x64xf32>
    %549 = arith.maximumf %547, %548 : vector<7x64xf32>
    %c7_307 = arith.constant 7 : index
    %c0_308 = arith.constant 0 : index
    %c0_309 = arith.constant 0 : index
    %550 = vector.load %arg17[%c7_307, %c0_308, %c0_309] : memref<12x12x64xf32, #tpu.memory_space<vmem>>, vector<1x12x64xf32>
    %551 = vector.shape_cast %550 : vector<1x12x64xf32> to vector<12x64xf32>
    %c8_310 = arith.constant 8 : index
    %c0_311 = arith.constant 0 : index
    %c0_312 = arith.constant 0 : index
    %552 = vector.load %arg17[%c8_310, %c0_311, %c0_312] : memref<12x12x64xf32, #tpu.memory_space<vmem>>, vector<1x12x64xf32>
    %553 = vector.shape_cast %552 : vector<1x12x64xf32> to vector<12x64xf32>
    %554 = arith.maximumf %551, %553 : vector<12x64xf32>
    %cst_313 = arith.constant dense<0.000000e+00> : vector<7x64xf32>
    %555 = tpu.matmul %482, %554, %cst_313 {dimension_numbers = #tpu.dot_dimension_numbers<[1], [0], [0], [1], [0, 0, 1, 1], [], []>} : vector<7x12xf32>, vector<12x64xf32>, vector<7x64xf32> -> vector<7x64xf32>
    %cst_314 = arith.constant dense<0.000000e+00> : vector<7x64xf32>
    %556 = tpu.matmul %491, %554, %cst_314 {dimension_numbers = #tpu.dot_dimension_numbers<[1], [0], [0], [1], [0, 0, 1, 1], [], []>} : vector<7x12xf32>, vector<12x64xf32>, vector<7x64xf32> -> vector<7x64xf32>
    %557 = arith.maximumf %555, %556 : vector<7x64xf32>
    %558 = vector.broadcast %492 : vector<1x64xf32> to vector<7x64xf32>
    %559 = arith.mulf %557, %558 : vector<7x64xf32>
    %560 = vector.broadcast %493 : vector<1x64xf32> to vector<7x64xf32>
    %561 = arith.addf %559, %560 : vector<7x64xf32>
    %cst_315 = arith.constant 0.000000e+00 : f32
    %562 = vector.broadcast %cst_315 : f32 to vector<7x64xf32>
    %563 = arith.maximumf %561, %562 : vector<7x64xf32>
    %c9_316 = arith.constant 9 : index
    %c0_317 = arith.constant 0 : index
    %c0_318 = arith.constant 0 : index
    %564 = vector.load %arg17[%c9_316, %c0_317, %c0_318] : memref<12x12x64xf32, #tpu.memory_space<vmem>>, vector<1x12x64xf32>
    %565 = vector.shape_cast %564 : vector<1x12x64xf32> to vector<12x64xf32>
    %c10_319 = arith.constant 10 : index
    %c0_320 = arith.constant 0 : index
    %c0_321 = arith.constant 0 : index
    %566 = vector.load %arg17[%c10_319, %c0_320, %c0_321] : memref<12x12x64xf32, #tpu.memory_space<vmem>>, vector<1x12x64xf32>
    %567 = vector.shape_cast %566 : vector<1x12x64xf32> to vector<12x64xf32>
    %568 = arith.maximumf %565, %567 : vector<12x64xf32>
    %cst_322 = arith.constant dense<0.000000e+00> : vector<7x64xf32>
    %569 = tpu.matmul %482, %568, %cst_322 {dimension_numbers = #tpu.dot_dimension_numbers<[1], [0], [0], [1], [0, 0, 1, 1], [], []>} : vector<7x12xf32>, vector<12x64xf32>, vector<7x64xf32> -> vector<7x64xf32>
    %cst_323 = arith.constant dense<0.000000e+00> : vector<7x64xf32>
    %570 = tpu.matmul %491, %568, %cst_323 {dimension_numbers = #tpu.dot_dimension_numbers<[1], [0], [0], [1], [0, 0, 1, 1], [], []>} : vector<7x12xf32>, vector<12x64xf32>, vector<7x64xf32> -> vector<7x64xf32>
    %571 = arith.maximumf %569, %570 : vector<7x64xf32>
    %572 = vector.broadcast %492 : vector<1x64xf32> to vector<7x64xf32>
    %573 = arith.mulf %571, %572 : vector<7x64xf32>
    %574 = vector.broadcast %493 : vector<1x64xf32> to vector<7x64xf32>
    %575 = arith.addf %573, %574 : vector<7x64xf32>
    %cst_324 = arith.constant 0.000000e+00 : f32
    %576 = vector.broadcast %cst_324 : f32 to vector<7x64xf32>
    %577 = arith.maximumf %575, %576 : vector<7x64xf32>
    %c11_325 = arith.constant 11 : index
    %c0_326 = arith.constant 0 : index
    %c0_327 = arith.constant 0 : index
    %578 = vector.load %arg17[%c11_325, %c0_326, %c0_327] : memref<12x12x64xf32, #tpu.memory_space<vmem>>, vector<1x12x64xf32>
    %579 = vector.shape_cast %578 : vector<1x12x64xf32> to vector<12x64xf32>
    %c11_328 = arith.constant 11 : index
    %c0_329 = arith.constant 0 : index
    %c0_330 = arith.constant 0 : index
    %580 = vector.load %arg17[%c11_328, %c0_329, %c0_330] : memref<12x12x64xf32, #tpu.memory_space<vmem>>, vector<1x12x64xf32>
    %581 = vector.shape_cast %580 : vector<1x12x64xf32> to vector<12x64xf32>
    %582 = arith.maximumf %579, %581 : vector<12x64xf32>
    %cst_331 = arith.constant dense<0.000000e+00> : vector<7x64xf32>
    %583 = tpu.matmul %482, %582, %cst_331 {dimension_numbers = #tpu.dot_dimension_numbers<[1], [0], [0], [1], [0, 0, 1, 1], [], []>} : vector<7x12xf32>, vector<12x64xf32>, vector<7x64xf32> -> vector<7x64xf32>
    %cst_332 = arith.constant dense<0.000000e+00> : vector<7x64xf32>
    %584 = tpu.matmul %491, %582, %cst_332 {dimension_numbers = #tpu.dot_dimension_numbers<[1], [0], [0], [1], [0, 0, 1, 1], [], []>} : vector<7x12xf32>, vector<12x64xf32>, vector<7x64xf32> -> vector<7x64xf32>
    %585 = arith.maximumf %583, %584 : vector<7x64xf32>
    %586 = vector.broadcast %492 : vector<1x64xf32> to vector<7x64xf32>
    %587 = arith.mulf %585, %586 : vector<7x64xf32>
    %588 = vector.broadcast %493 : vector<1x64xf32> to vector<7x64xf32>
    %589 = arith.addf %587, %588 : vector<7x64xf32>
    %cst_333 = arith.constant 0.000000e+00 : f32
    %590 = vector.broadcast %cst_333 : f32 to vector<7x64xf32>
    %591 = arith.maximumf %589, %590 : vector<7x64xf32>
    %592 = tpu.concatenate %507, %521, %535, %549, %563, %577, %591 in 1 : vector<7x64xf32>, vector<7x64xf32>, vector<7x64xf32>, vector<7x64xf32>, vector<7x64xf32>, vector<7x64xf32>, vector<7x64xf32> -> vector<7x448xf32>
    %c0_334 = arith.constant 0 : index
    %c0_335 = arith.constant 0 : index
    %593 = vector.load %arg10[%c0_334, %c0_335] : memref<448x896xf32, #tpu.memory_space<vmem>>, vector<448x896xf32>
    %cst_336 = arith.constant dense<0.000000e+00> : vector<7x896xf32>
    %594 = tpu.matmul %592, %593, %cst_336 {dimension_numbers = #tpu.dot_dimension_numbers<[1], [0], [0], [1], [0, 0, 1, 1], [], []>} : vector<7x448xf32>, vector<448x896xf32>, vector<7x896xf32> -> vector<7x896xf32>
    %595 = tpu.iota {dimensions = array<i32: 1>} : vector<7x896xi32>
    %596 = tpu.iota {dimensions = array<i32: 0>} : vector<7x896xi32>
    %c128_i32 = arith.constant 128 : i32
    %597 = vector.broadcast %c128_i32 : i32 to vector<7x896xi32>
    %598 = arith.muli %596, %597 : vector<7x896xi32>
    %599 = arith.cmpi sge, %595, %598 : vector<7x896xi32>
    %c128_i32_337 = arith.constant 128 : i32
    %600 = vector.broadcast %c128_i32_337 : i32 to vector<7x896xi32>
    %601 = arith.addi %598, %600 : vector<7x896xi32>
    %602 = arith.cmpi slt, %595, %601 : vector<7x896xi32>
    %603 = arith.andi %599, %602 : vector<7x896xi1>
    %604 = arith.extui %603 : vector<7x896xi1> to vector<7x896xi32>
    %605 = arith.sitofp %604 : vector<7x896xi32> to vector<7x896xf32>
    %606 = arith.mulf %594, %605 : vector<7x896xf32>
    %cst_338 = arith.constant dense<0.000000e+00> : vector<896xf32>
    %607 = vector.multi_reduction <add>, %606, %cst_338 [0] : vector<7x896xf32> to vector<896xf32>
    %608 = vector.shape_cast %607 : vector<896xf32> to vector<1x896xf32>
    %609 = vector.extract_strided_slice %608 {offsets = [0, 0], sizes = [1, 128], strides = [1, 1]} : vector<1x896xf32> to vector<1x128xf32>
    %610 = vector.extract_strided_slice %608 {offsets = [0, 128], sizes = [1, 128], strides = [1, 1]} : vector<1x896xf32> to vector<1x128xf32>
    %611 = arith.addf %609, %610 : vector<1x128xf32>
    %612 = vector.extract_strided_slice %608 {offsets = [0, 256], sizes = [1, 128], strides = [1, 1]} : vector<1x896xf32> to vector<1x128xf32>
    %613 = arith.addf %611, %612 : vector<1x128xf32>
    %614 = vector.extract_strided_slice %608 {offsets = [0, 384], sizes = [1, 128], strides = [1, 1]} : vector<1x896xf32> to vector<1x128xf32>
    %615 = arith.addf %613, %614 : vector<1x128xf32>
    %616 = vector.extract_strided_slice %608 {offsets = [0, 512], sizes = [1, 128], strides = [1, 1]} : vector<1x896xf32> to vector<1x128xf32>
    %617 = arith.addf %615, %616 : vector<1x128xf32>
    %618 = vector.extract_strided_slice %608 {offsets = [0, 640], sizes = [1, 128], strides = [1, 1]} : vector<1x896xf32> to vector<1x128xf32>
    %619 = arith.addf %617, %618 : vector<1x128xf32>
    %620 = vector.extract_strided_slice %608 {offsets = [0, 768], sizes = [1, 128], strides = [1, 1]} : vector<1x896xf32> to vector<1x128xf32>
    %621 = arith.addf %619, %620 : vector<1x128xf32>
    %c0_339 = arith.constant 0 : index
    %c0_340 = arith.constant 0 : index
    %622 = vector.load %arg11[%c0_339, %c0_340] : memref<1x128xf32, #tpu.memory_space<vmem>>, vector<1x128xf32>
    %623 = arith.addf %621, %622 : vector<1x128xf32>
    %cst_341 = arith.constant 0.000000e+00 : f32
    %624 = vector.broadcast %cst_341 : f32 to vector<1x128xf32>
    %625 = arith.maximumf %623, %624 : vector<1x128xf32>
    %c0_342 = arith.constant 0 : index
    %c0_343 = arith.constant 0 : index
    %626 = vector.load %arg12[%c0_342, %c0_343] : memref<128x128xf32, #tpu.memory_space<vmem>>, vector<128x128xf32>
    %cst_344 = arith.constant dense<0.000000e+00> : vector<1x128xf32>
    %627 = tpu.matmul %625, %626, %cst_344 {dimension_numbers = #tpu.dot_dimension_numbers<[1], [0], [0], [1], [0, 0, 1, 1], [], []>} : vector<1x128xf32>, vector<128x128xf32>, vector<1x128xf32> -> vector<1x128xf32>
    %c0_345 = arith.constant 0 : index
    %c0_346 = arith.constant 0 : index
    %628 = vector.load %arg13[%c0_345, %c0_346] : memref<1x128xf32, #tpu.memory_space<vmem>>, vector<1x128xf32>
    %629 = arith.addf %627, %628 : vector<1x128xf32>
    %c0_347 = arith.constant 0 : index
    %c0_348 = arith.constant 0 : index
    %c0_349 = arith.constant 0 : index
    %630 = vector.load %arg14[%c0_347, %c0_348, %c0_349] : memref<1x1x128xf32, #tpu.memory_space<vmem>>, vector<1x1x128xf32>
    %631 = vector.shape_cast %630 : vector<1x1x128xf32> to vector<1x128xf32>
    %632 = vector.shape_cast %629 : vector<1x128xf32> to vector<1x1x128xf32>
    tpu.vector_store %arg14[%c0_347, %c0_348, %c0_349], %632 {strides = array<i32>} : memref<1x1x128xf32, #tpu.memory_space<vmem>>, vector<1x1x128xf32>,
    return
  }
  func.func @transform_0(%arg0: i32) -> (i32, i32, i32) {
    %c0_i32 = arith.constant 0 : i32
    %c0_i32_0 = arith.constant 0 : i32
    %c0_i32_1 = arith.constant 0 : i32
    return %arg0, %c0_i32, %c0_i32_0 : i32, i32, i32
  }
  func.func @transform_1(%arg0: i32) -> (i32, i32) {
    %c0_i32 = arith.constant 0 : i32
    %c0_i32_0 = arith.constant 0 : i32
    %c0_i32_1 = arith.constant 0 : i32
    return %c0_i32, %c0_i32_0 : i32, i32
  }
  func.func @transform_2(%arg0: i32) -> (i32, i32) {
    %c0_i32 = arith.constant 0 : i32
    %c0_i32_0 = arith.constant 0 : i32
    %c0_i32_1 = arith.constant 0 : i32
    return %c0_i32, %c0_i32_0 : i32, i32
  }
  func.func @transform_3(%arg0: i32) -> (i32, i32) {
    %c0_i32 = arith.constant 0 : i32
    %c0_i32_0 = arith.constant 0 : i32
    %c0_i32_1 = arith.constant 0 : i32
    return %c0_i32, %c0_i32_0 : i32, i32
  }
  func.func @transform_4(%arg0: i32) -> (i32, i32) {
    %c0_i32 = arith.constant 0 : i32
    %c0_i32_0 = arith.constant 0 : i32
    %c0_i32_1 = arith.constant 0 : i32
    return %c0_i32, %c0_i32_0 : i32, i32
  }
  func.func @transform_5(%arg0: i32) -> (i32, i32) {
    %c0_i32 = arith.constant 0 : i32
    %c0_i32_0 = arith.constant 0 : i32
    %c0_i32_1 = arith.constant 0 : i32
    return %c0_i32, %c0_i32_0 : i32, i32
  }
  func.func @transform_6(%arg0: i32) -> (i32, i32) {
    %c0_i32 = arith.constant 0 : i32
    %c0_i32_0 = arith.constant 0 : i32
    %c0_i32_1 = arith.constant 0 : i32
    return %c0_i32, %c0_i32_0 : i32, i32
  }
  func.func @transform_7(%arg0: i32) -> (i32, i32) {
    %c0_i32 = arith.constant 0 : i32
    %c0_i32_0 = arith.constant 0 : i32
    %c0_i32_1 = arith.constant 0 : i32
    return %c0_i32, %c0_i32_0 : i32, i32
  }
  func.func @transform_8(%arg0: i32) -> (i32, i32) {
    %c0_i32 = arith.constant 0 : i32
    %c0_i32_0 = arith.constant 0 : i32
    %c0_i32_1 = arith.constant 0 : i32
    return %c0_i32, %c0_i32_0 : i32, i32
  }
  func.func @transform_9(%arg0: i32) -> (i32, i32) {
    %c0_i32 = arith.constant 0 : i32
    %c0_i32_0 = arith.constant 0 : i32
    %c0_i32_1 = arith.constant 0 : i32
    return %c0_i32, %c0_i32_0 : i32, i32
  }
  func.func @transform_10(%arg0: i32) -> (i32, i32) {
    %c0_i32 = arith.constant 0 : i32
    %c0_i32_0 = arith.constant 0 : i32
    %c0_i32_1 = arith.constant 0 : i32
    return %c0_i32, %c0_i32_0 : i32, i32
  }
  func.func @transform_11(%arg0: i32) -> (i32, i32) {
    %c0_i32 = arith.constant 0 : i32
    %c0_i32_0 = arith.constant 0 : i32
    %c0_i32_1 = arith.constant 0 : i32
    return %c0_i32, %c0_i32_0 : i32, i32
  }
  func.func @transform_12(%arg0: i32) -> (i32, i32) {
    %c0_i32 = arith.constant 0 : i32
    %c0_i32_0 = arith.constant 0 : i32
    %c0_i32_1 = arith.constant 0 : i32
    return %c0_i32, %c0_i32_0 : i32, i32
  }
  func.func @transform_13(%arg0: i32) -> (i32, i32, i32) {
    %c0_i32 = arith.constant 0 : i32
    %c0_i32_0 = arith.constant 0 : i32
    %c0_i32_1 = arith.constant 0 : i32
    return %arg0, %c0_i32, %c0_i32_0 : i32, i32, i32
  }
}

</mosaic_0001>

<bundles_post_ra>
// kernel: se_hipp_forward.1
= control target key start
LH: loop header
LB: loop body
LE: loop exit
PB: predicated region body
PF: predicated region fallthrough
CT: control target
= control target key end

     0   :  { %s13266_s0 = inlined_call_operand.vmem [shape: f32[2,729,512], index: 0, kind: input, shape index: {}]   ;;  %s13267_s1 = inlined_call_operand.vmem [shape: f32[512,32], index: 1, kind: input, shape index: {}]   ;;  %s13268_s2 = inlined_call_operand.vmem [shape: f32[1,32], index: 2, kind: input, shape index: {}]   ;;  %s13269_s3 = inlined_call_operand.vmem [shape: f32[1,32], index: 3, kind: input, shape index: {}]   ;;  %s13270_s4 = inlined_call_operand.vmem [shape: f32[1,32], index: 4, kind: input, shape index: {}]   ;;  %s13271_s5 = inlined_call_operand.vmem [shape: f32[128,64], index: 5, kind: input, shape index: {}]   ;;  %s13272_s6 = inlined_call_operand.vmem [shape: f32[1,64], index: 6, kind: input, shape index: {}]   ;;  %s13273_s7 = inlined_call_operand.vmem [shape: f32[1,64], index: 7, kind: input, shape index: {}]   ;;  %s13274_s8 = inlined_call_operand.vmem [shape: f32[1,64], index: 8, kind: input, shape index: {}]   ;;  %s13275_s9 = inlined_call_operand.vmem [shape: f32[448,896], index: 9, kind: input, shape index: {}]   ;;  %s13276_s10 = inlined_call_operand.vmem [shape: f32[1,128], index: 10, kind: input, shape index: {}]   ;;  %s13277_s11 = inlined_call_operand.vmem [shape: f32[128,128], index: 11, kind: input, shape index: {}]   ;;  %s13278_s12 = inlined_call_operand.vmem [shape: f32[1,128], index: 12, kind: input, shape index: {}]   ;;  %s13279_s13 = inlined_call_operand.hbm [shape: f32[2,1,128], index: 13, kind: output, shape index: {}]  }
   0x1   :  { %13283 = sst [smem:[#allocation10_spill]] %s13266_s0 }
   0x2   :  { %18 = vsyncpa [#allocation6], 0 }
   0x3   :  { %20 = vsyncpa [#allocation6 + $0x1], 0  ;;  %s9395_s25 = smov 0   ;;  %s9397_s26 = smov 0  }
   0x4   :  { %s9399_s27 = smov 0   ;;  %s9401_s28 = smov 0  }
   0x5 LB: > { %13284 = sst [smem:[#allocation8_spill]] %s9313_s27  ;;  %s9416_s29 = sadd.s32 4294967295, %s9317_s28   ;;  %s9317_s28 = sphi %s9401_s28, %s13296_s28   ;;  %s9313_s27 = sphi %s9399_s27, %s13293_s27   ;;  %s9309_s26 = sphi %s9397_s26, %s13295_s26   ;;  %s9305_s25 = sphi %s9395_s25, %s13294_s25  }
   0x6   : > { %s7824_s30 = sadd.s32 4294967294, %s9317_s28   ;;  %s9420_s14 = sadd.s32 1, %s9317_s28  }
   0x7   : > { %s311_s15 = sadd.s32 1, %s9313_s27  ;;  %s308_s16 = ssub.s32 %s9317_s28, %s9420_s14 }
   0x8   : > { %p321_p0 = scmp.ne.s32.totalorder %s9313_s27, %s9309_s26  ;;  %p309_p1 = scmp.eq.s32.totalorder %s308_s16, 0 }
   0x9   : > { %p322_p2 = scmp.eq.s32.totalorder %s9416_s29, 1  ;;  %p327_p3 = scmp.ne.s32.totalorder %s9309_s26, %s9305_s25 }
   0xa   : > { %p328_p4 = scmp.eq.s32.totalorder %s7824_s30, 1  ;;  %p7827_p7 = scmp.ge.s32.totalorder %s9317_s28, 1 }
   0xb   : > { %s9431_s17 = scalar_select %p309_p1, %s9313_s27, %s311_s15  }
   0xc   : > { %p9433_p5 = por %p322_p2, %p321_p0  ;;  %p9437_p6 = por %p328_p4, %p327_p3 }
   0xd   : > { %13285 = sst [smem:[#allocation9_spill]] %s9431_s17  ;;  %p390_p8 = scmp.lt.s32.totalorder %s9317_s28, 3 }
   0xf   : > { %p391_p9 = pnand %p7827_p7, %p390_p8 }
  0x10   : > { %p433_p10 = scmp.lt.s32.totalorder (!%p391_p9), %s9416_s29, 1  ;;  %s13288_s0 = sld [smem:[#allocation10_spill]] (!%p391_p9) }
  0x11   : > { %394 = sbr.rel (%p391_p9) target bundleno = 2076 (0x81c), region = 72  ;;  %s9320_s15 = smov (!%p391_p9), 32  }
  0x12   : > { %s9321_s22 = smov (!%p391_p9), 96   ;;  %s7918_s30 = sshll.u32 (!%p391_p9), %s9416_s29, 4 }
  0x13   : > { %s13231_s24 = scalar_lea.hbm (!%p391_p9), %s13279_s13, %s7918_s30 }
  0x16   : > { %v821_v0 = vld [vmem:[%s13267_s1 + $0x78] sm:$0xff]  ;;  %v9319_v2 = vmov 0.0   ;;  %v820_v3 = vld [vmem:[%s13267_s1 + $0x70] sm:$0xff]  ;;  %v819_v5 = vld [vmem:[%s13267_s1 + $0x68] sm:$0xff]  ;;  %s434_s20 = scalar_select %p433_p10, %s9416_s29, 1  ;;  %vm1927_vm0 = vcmask 261120  }
  0x17   : > { %v853_v1 = vld [vmem:[%s13267_s1 + $0x178] sm:$0xff]  ;;  %877 = vmatprep.subr.mxu0 %v9319_v2  ;;  %1402 = vmatprep.subr.mxu1 %v9319_v2  ;;  %v852_v4 = vld [vmem:[%s13267_s1 + $0x170] sm:$0xff]  ;;  %v851_v6 = vld [vmem:[%s13267_s1 + $0x168] sm:$0xff]  ;;  %vm2060_vm1 = vcmask 1046528   ;;  %vm2099_vm2 = vcmask 1040384   ;;  %vm2076_vm3 = vcmask 1045504  }
  0x18   : > { %878 = vmatpush1.msra.mxu0 %v821_v0  ;;  %1403 = vmatpush1.msra.mxu1 %v853_v1  ;;  %v818_v7 = vld [vmem:[%s13267_s1 + $0x60] sm:$0xff]  ;;  %v817_v9 = vld [vmem:[%s13267_s1 + $0x58] sm:$0xff]  ;;  %v816_v11 = vld [vmem:[%s13267_s1 + $0x50] sm:$0xff]  ;;  %s9005_s21 = smul.u32 2944, %s434_s20  ;;  %vm2092_vm5 = vcmask 203776   ;;  %vm2019_vm7 = vcmask 253952  }
  0x19   : > { %879 = vmatprep.subr.mxu0 %v9319_v2  ;;  %1404 = vmatprep.subr.mxu1 %v9319_v2  ;;  %v850_v8 = vld [vmem:[%s13267_s1 + $0x160] sm:$0xff]  ;;  %v849_v10 = vld [vmem:[%s13267_s1 + $0x158] sm:$0xff]  ;;  %v848_v12 = vld [vmem:[%s13267_s1 + $0x150] sm:$0xff]  ;;  %vm2197_vm8 = vcmask 258048   ;;  %vm3926_vm9 = vcmask 523264   ;;  %vm3929_vm10 = vcmask 785408  }
  0x1a   : > { %880 = vmatpush1.msra.mxu0 %v820_v3  ;;  %1405 = vmatpush1.msra.mxu1 %v852_v4  ;;  %v815_v13 = vld [vmem:[%s13267_s1 + $0x48] sm:$0xff]  ;;  %v814_v15 = vld [vmem:[%s13267_s1 + $0x40] sm:$0xff]  ;;  %v813_v17 = vld [vmem:[%s13267_s1 + $0x38] sm:$0xff]  ;;  %s9686_s27 = scalar_lea.vmem %s13288_s0, %s9005_s21  ;;  %vm9323_vm11 = vmmov 0   ;;  %vm4030_vm13 = vcmask 519168   ;;  %s13291_s20 = smov 64  }
  0x1b   : > { %881 = vmatprep.subr.mxu0 %v9319_v2  ;;  %1406 = vmatprep.subr.mxu1 %v9319_v2  ;;  %v847_v14 = vld [vmem:[%s13267_s1 + $0x148] sm:$0xff]  ;;  %v846_v16 = vld [vmem:[%s13267_s1 + $0x140] sm:$0xff]  ;;  %v845_v18 = vld [vmem:[%s13267_s1 + $0x138] sm:$0xff]  ;;  %s431_s0 = sand.u32 1, %s9309_s26  }
  0x1c   : > { %882 = vmatpush1.msra.mxu0 %v819_v5  ;;  %1407 = vmatpush1.msra.mxu1 %v851_v6  ;;  %v812_v19 = vld [vmem:[%s13267_s1 + $0x30] sm:$0xff]  ;;  %v811_v21 = vld [vmem:[%s13267_s1 + $0x28] sm:$0xff]  ;;  %v810_v23 = vld [vmem:[%s13267_s1 + $0x20] sm:$0xff] }
  0x1d   : > { %883 = vmatprep.subr.mxu0 %v9319_v2  ;;  %1408 = vmatprep.subr.mxu1 %v9319_v2  ;;  %v844_v20 = vld [vmem:[%s13267_s1 + $0x130] sm:$0xff]  ;;  %v843_v22 = vld [vmem:[%s13267_s1 + $0x128] sm:$0xff]  ;;  %v842_v24 = vld [vmem:[%s13267_s1 + $0x120] sm:$0xff] }
  0x1e   : > { %884 = vmatpush1.msra.mxu0 %v818_v7  ;;  %1409 = vmatpush1.msra.mxu1 %v850_v8  ;;  %v809_v25 = vld [vmem:[%s13267_s1 + $0x18] sm:$0xff]  ;;  %v808_v27 = vld [vmem:[%s13267_s1 + $0x10] sm:$0xff]  ;;  %v807_v29 = vld [vmem:[%s13267_s1 + $0x8] sm:$0xff] }
  0x1f   : > { %885 = vmatprep.subr.mxu0 %v9319_v2  ;;  %1410 = vmatprep.subr.mxu1 %v9319_v2  ;;  %v841_v26 = vld [vmem:[%s13267_s1 + $0x118] sm:$0xff]  ;;  %v840_v28 = vld [vmem:[%s13267_s1 + $0x110] sm:$0xff]  ;;  %v839_v30 = vld [vmem:[%s13267_s1 + $0x108] sm:$0xff] }
  0x20   : > { %886 = vmatpush1.msra.mxu0 %v817_v9  ;;  %1411 = vmatpush1.msra.mxu1 %v849_v10  ;;  %v806_v31 = vld [vmem:[%s13267_s1] sm:$0xff]  ;;  %v837_v33 = vld [vmem:[%s13267_s1 + $0xf8] sm:$0xff]  ;;  %v836_v35 = vld [vmem:[%s13267_s1 + $0xf0] sm:$0xff] }
  0x21   : > { %887 = vmatprep.subr.mxu0 %v9319_v2  ;;  %1412 = vmatprep.subr.mxu1 %v9319_v2  ;;  %v838_v32 = vld [vmem:[%s13267_s1 + $0x100] sm:$0xff]  ;;  %v869_v34 = vld [vmem:[%s13267_s1 + $0x1f8] sm:$0xff]  ;;  %v868_v36 = vld [vmem:[%s13267_s1 + $0x1f0] sm:$0xff] }
  0x22   : > { %888 = vmatpush1.msra.mxu0 %v816_v11  ;;  %1413 = vmatpush1.msra.mxu1 %v848_v12  ;;  %v835_v37 = vld [vmem:[%s13267_s1 + $0xe8] sm:$0xff]  ;;  %v834_v39 = vld [vmem:[%s13267_s1 + $0xe0] sm:$0xff]  ;;  %v833_v41 = vld [vmem:[%s13267_s1 + $0xd8] sm:$0xff] }
  0x23   : > { %889 = vmatprep.subr.mxu0 %v9319_v2  ;;  %1414 = vmatprep.subr.mxu1 %v9319_v2  ;;  %v867_v38 = vld [vmem:[%s13267_s1 + $0x1e8] sm:$0xff]  ;;  %v866_v40 = vld [vmem:[%s13267_s1 + $0x1e0] sm:$0xff]  ;;  %v865_v42 = vld [vmem:[%s13267_s1 + $0x1d8] sm:$0xff] }
  0x24   : > { %890 = vmatpush1.msra.mxu0 %v815_v13  ;;  %1415 = vmatpush1.msra.mxu1 %v847_v14  ;;  %v832_v43 = vld [vmem:[%s13267_s1 + $0xd0] sm:$0xff]  ;;  %v831_v45 = vld [vmem:[%s13267_s1 + $0xc8] sm:$0xff]  ;;  %v830_v47 = vld [vmem:[%s13267_s1 + $0xc0] sm:$0xff] }
  0x25   : > { %891 = vmatprep.subr.mxu0 %v9319_v2  ;;  %1416 = vmatprep.subr.mxu1 %v9319_v2  ;;  %v864_v44 = vld [vmem:[%s13267_s1 + $0x1d0] sm:$0xff]  ;;  %v863_v46 = vld [vmem:[%s13267_s1 + $0x1c8] sm:$0xff]  ;;  %v862_v48 = vld [vmem:[%s13267_s1 + $0x1c0] sm:$0xff] }
  0x26   : > { %892 = vmatpush1.msra.mxu0 %v814_v15  ;;  %1417 = vmatpush1.msra.mxu1 %v846_v16  ;;  %v829_v49 = vld [vmem:[%s13267_s1 + $0xb8] sm:$0xff]  ;;  %v828_v51 = vld [vmem:[%s13267_s1 + $0xb0] sm:$0xff]  ;;  %v827_v53 = vld [vmem:[%s13267_s1 + $0xa8] sm:$0xff] }
  0x27   : > { %893 = vmatprep.subr.mxu0 %v9319_v2  ;;  %1418 = vmatprep.subr.mxu1 %v9319_v2  ;;  %v861_v50 = vld [vmem:[%s13267_s1 + $0x1b8] sm:$0xff]  ;;  %v860_v52 = vld [vmem:[%s13267_s1 + $0x1b0] sm:$0xff]  ;;  %v859_v54 = vld [vmem:[%s13267_s1 + $0x1a8] sm:$0xff] }
  0x28   : > { %894 = vmatpush1.msra.mxu0 %v813_v17  ;;  %1419 = vmatpush1.msra.mxu1 %v845_v18  ;;  %v826_v55 = vld [vmem:[%s13267_s1 + $0xa0] sm:$0xff]  ;;  %v825_v57 = vld [vmem:[%s13267_s1 + $0x98] sm:$0xff]  ;;  %v824_v59 = vld [vmem:[%s13267_s1 + $0x90] sm:$0xff] }
  0x29   : > { %895 = vmatprep.subr.mxu0 %v9319_v2  ;;  %1420 = vmatprep.subr.mxu1 %v9319_v2  ;;  %v858_v56 = vld [vmem:[%s13267_s1 + $0x1a0] sm:$0xff]  ;;  %v857_v58 = vld [vmem:[%s13267_s1 + $0x198] sm:$0xff]  ;;  %v856_v60 = vld [vmem:[%s13267_s1 + $0x190] sm:$0xff] }
  0x2a   : > { %896 = vmatpush1.msra.mxu0 %v812_v19  ;;  %1421 = vmatpush1.msra.mxu1 %v844_v20  ;;  %v823_v61 = vld [vmem:[%s13267_s1 + $0x88] sm:$0xff]  ;;  %v822_v63 = vld [vmem:[%s13267_s1 + $0x80] sm:$0xff]  ;;  %v441_v3 = vld [vmem:[%s9686_s27 + $0x18] sm:$0xff] }
  0x2b   : > { %897 = vmatprep.subr.mxu0 %v9319_v2  ;;  %1422 = vmatprep.subr.mxu1 %v9319_v2  ;;  %v855_v62 = vld [vmem:[%s13267_s1 + $0x188] sm:$0xff]  ;;  %v854_v1 = vld [vmem:[%s13267_s1 + $0x180] sm:$0xff]  ;;  %v440_v5 = vld [vmem:[%s9686_s27 + $0x10] sm:$0xff] }
  0x2c   : > { %898 = vmatpush1.msra.mxu0 %v811_v21  ;;  %1423 = vmatpush1.msra.mxu1 %v843_v22  ;;  %v439_v0 = vld [vmem:[%s9686_s27 + $0x8] sm:$0xff]  ;;  %v438_v4 = vld [vmem:[%s9686_s27] sm:$0xff]  ;;  %v445_v7 = vld [vmem:[%s9686_s27 + $0x38] sm:$0xff] }
  0x2d   : > { %899 = vmatprep.subr.mxu0 %v9319_v2  ;;  %1424 = vmatprep.subr.mxu1 %v9319_v2  ;;  %v443_v6 = vld [vmem:[%s9686_s27 + $0x28] sm:$0xff]  ;;  %v442_v8 = vld [vmem:[%s9686_s27 + $0x20] sm:$0xff]  ;;  %v444_v9 = vld [vmem:[%s9686_s27 + $0x30] sm:$0xff] }
  0x2e   : > { %900 = vmatpush1.msra.mxu0 %v810_v23  ;;  %1425 = vmatpush1.msra.mxu1 %v842_v24  ;;  %v447_v10 = vld [vmem:[%s9686_s27 + $0x48] sm:$0xff]  ;;  %v449_v11 = vld [vmem:[%s9686_s27 + $0x58] sm:$0xff]  ;;  %v446_v12 = vld [vmem:[%s9686_s27 + $0x40] sm:$0xff] }
  0x2f   : > { %901 = vmatprep.subr.mxu0 %v9319_v2  ;;  %1426 = vmatprep.subr.mxu1 %v9319_v2  ;;  %v448_v13 = vld [vmem:[%s9686_s27 + $0x50] sm:$0xff]  ;;  %v451_v14 = vld [vmem:[%s9686_s27 + $0x68] sm:$0xff]  ;;  %v453_v15 = vld [vmem:[%s9686_s27 + $0x78] sm:$0xff] }
  0x30   : > { %902 = vmatpush1.msra.mxu0 %v809_v25  ;;  %1427 = vmatpush1.msra.mxu1 %v841_v26  ;;  %v450_v16 = vld [vmem:[%s9686_s27 + $0x60] sm:$0xff]  ;;  %v452_v17 = vld [vmem:[%s9686_s27 + $0x70] sm:$0xff]  ;;  %v455_v18 = vld [vmem:[%s9686_s27 + $0x88] sm:$0xff] }
  0x31   : > { %903 = vmatprep.subr.mxu0 %v9319_v2  ;;  %1428 = vmatprep.subr.mxu1 %v9319_v2  ;;  %v457_v19 = vld [vmem:[%s9686_s27 + $0x98] sm:$0xff]  ;;  %v454_v20 = vld [vmem:[%s9686_s27 + $0x80] sm:$0xff]  ;;  %v456_v21 = vld [vmem:[%s9686_s27 + $0x90] sm:$0xff] }
  0x32   : > { %904 = vmatpush1.msra.mxu0 %v808_v27  ;;  %1429 = vmatpush1.msra.mxu1 %v840_v28  ;;  %v459_v22 = vld [vmem:[%s9686_s27 + $0xa8] sm:$0xff]  ;;  %v461_v23 = vld [vmem:[%s9686_s27 + $0xb8] sm:$0xff]  ;;  %v458_v24 = vld [vmem:[%s9686_s27 + $0xa0] sm:$0xff] }
  0x33   : > { %905 = vmatprep.subr.mxu0 %v9319_v2  ;;  %1430 = vmatprep.subr.mxu1 %v9319_v2  ;;  %v460_v25 = vld [vmem:[%s9686_s27 + $0xb0] sm:$0xff]  ;;  %v463_v26 = vld [vmem:[%s9686_s27 + $0xc8] sm:$0xff]  ;;  %v465_v27 = vld [vmem:[%s9686_s27 + $0xd8] sm:$0xff] }
  0x34   : > { %906 = vmatpush1.msra.mxu0 %v807_v29  ;;  %1431 = vmatpush1.msra.mxu1 %v839_v30  ;;  %v462_v28 = vld [vmem:[%s9686_s27 + $0xc0] sm:$0xff]  ;;  %v464_v29 = vld [vmem:[%s9686_s27 + $0xd0] sm:$0xff]  ;;  %v467_v30 = vld [vmem:[%s9686_s27 + $0xe8] sm:$0xff] }
  0x35   : > { %907 = vmatprep.subr.mxu0 %v9319_v2  ;;  %1432 = vmatprep.subr.mxu1 %v9319_v2 }
  0x36   : > { %908 = vmatpush1.msra.mxu0 %v806_v31  ;;  %1433 = vmatpush1.msra.mxu1 %v838_v32  ;;  %v469_v31 = vld [vmem:[%s9686_s27 + $0xf8] sm:$0xff]  ;;  %v466_v32 = vld [vmem:[%s9686_s27 + $0xe0] sm:$0xff] }
  0x37   : > { %909 = vmatprep.subr.mxu0 %v9319_v2  ;;  %1434 = vmatprep.subr.mxu1 %v9319_v2 }
  0x38   : > { %910 = vmatpush2.msra.mxu0 %v837_v33  ;;  %1435 = vmatpush2.msra.mxu1 %v869_v34  ;;  %v468_v33 = vld [vmem:[%s9686_s27 + $0xf0] sm:$0xff]  ;;  %v471_v34 = vld [vmem:[%s9686_s27 + $0x108] sm:$0xff] }
  0x39   : > { %911 = vmatprep.subr.mxu0 %v9319_v2  ;;  %1436 = vmatprep.subr.mxu1 %v9319_v2 }
  0x3a   : > { %912 = vmatpush2.msra.mxu0 %v836_v35  ;;  %1437 = vmatpush2.msra.mxu1 %v868_v36  ;;  %v473_v35 = vld [vmem:[%s9686_s27 + $0x118] sm:$0xff]  ;;  %v470_v36 = vld [vmem:[%s9686_s27 + $0x100] sm:$0xff] }
  0x3b   : > { %913 = vmatprep.subr.mxu0 %v9319_v2  ;;  %1438 = vmatprep.subr.mxu1 %v9319_v2 }
  0x3c   : > { %914 = vmatpush2.msra.mxu0 %v835_v37  ;;  %1439 = vmatpush2.msra.mxu1 %v867_v38  ;;  %v472_v37 = vld [vmem:[%s9686_s27 + $0x110] sm:$0xff]  ;;  %v475_v38 = vld [vmem:[%s9686_s27 + $0x128] sm:$0xff] }
  0x3d   : > { %915 = vmatprep.subr.mxu0 %v9319_v2  ;;  %1440 = vmatprep.subr.mxu1 %v9319_v2 }
  0x3e   : > { %916 = vmatpush2.msra.mxu0 %v834_v39  ;;  %1441 = vmatpush2.msra.mxu1 %v866_v40  ;;  %v477_v39 = vld [vmem:[%s9686_s27 + $0x138] sm:$0xff]  ;;  %v474_v40 = vld [vmem:[%s9686_s27 + $0x120] sm:$0xff] }
  0x3f   : > { %917 = vmatprep.subr.mxu0 %v9319_v2  ;;  %1442 = vmatprep.subr.mxu1 %v9319_v2 }
  0x40   : > { %918 = vmatpush2.msra.mxu0 %v833_v41  ;;  %1443 = vmatpush2.msra.mxu1 %v865_v42  ;;  %v476_v41 = vld [vmem:[%s9686_s27 + $0x130] sm:$0xff]  ;;  %v479_v42 = vld [vmem:[%s9686_s27 + $0x148] sm:$0xff] }
  0x41   : > { %919 = vmatprep.subr.mxu0 %v9319_v2  ;;  %1444 = vmatprep.subr.mxu1 %v9319_v2 }
  0x42   : > { %920 = vmatpush2.msra.mxu0 %v832_v43  ;;  %1445 = vmatpush2.msra.mxu1 %v864_v44  ;;  %v481_v43 = vld [vmem:[%s9686_s27 + $0x158] sm:$0xff]  ;;  %v478_v44 = vld [vmem:[%s9686_s27 + $0x140] sm:$0xff] }
  0x43   : > { %921 = vmatprep.subr.mxu0 %v9319_v2  ;;  %1446 = vmatprep.subr.mxu1 %v9319_v2 }
  0x44   : > { %922 = vmatpush2.msra.mxu0 %v831_v45  ;;  %1447 = vmatpush2.msra.mxu1 %v863_v46  ;;  %v480_v45 = vld [vmem:[%s9686_s27 + $0x150] sm:$0xff]  ;;  %v483_v46 = vld [vmem:[%s9686_s27 + $0x168] sm:$0xff] }
  0x45   : > { %923 = vmatprep.subr.mxu0 %v9319_v2  ;;  %1448 = vmatprep.subr.mxu1 %v9319_v2 }
  0x46   : > { %924 = vmatpush2.msra.mxu0 %v830_v47  ;;  %1449 = vmatpush2.msra.mxu1 %v862_v48  ;;  %v485_v47 = vld [vmem:[%s9686_s27 + $0x178] sm:$0xff]  ;;  %v482_v48 = vld [vmem:[%s9686_s27 + $0x160] sm:$0xff] }
  0x47   : > { %925 = vmatprep.subr.mxu0 %v9319_v2  ;;  %1450 = vmatprep.subr.mxu1 %v9319_v2 }
  0x48   : > { %926 = vmatpush2.msra.mxu0 %v829_v49  ;;  %1451 = vmatpush2.msra.mxu1 %v861_v50  ;;  %v484_v49 = vld [vmem:[%s9686_s27 + $0x170] sm:$0xff]  ;;  %v487_v50 = vld [vmem:[%s9686_s27 + $0x188] sm:$0xff] }
  0x49   : > { %927 = vmatprep.subr.mxu0 %v9319_v2  ;;  %1452 = vmatprep.subr.mxu1 %v9319_v2 }
  0x4a   : > { %928 = vmatpush2.msra.mxu0 %v828_v51  ;;  %1453 = vmatpush2.msra.mxu1 %v860_v52  ;;  %v489_v51 = vld [vmem:[%s9686_s27 + $0x198] sm:$0xff]  ;;  %v486_v52 = vld [vmem:[%s9686_s27 + $0x180] sm:$0xff] }
  0x4b   : > { %929 = vmatprep.subr.mxu0 %v9319_v2  ;;  %1454 = vmatprep.subr.mxu1 %v9319_v2 }
  0x4c   : > { %930 = vmatpush2.msra.mxu0 %v827_v53  ;;  %1455 = vmatpush2.msra.mxu1 %v859_v54  ;;  %v488_v53 = vld [vmem:[%s9686_s27 + $0x190] sm:$0xff]  ;;  %v491_v54 = vld [vmem:[%s9686_s27 + $0x1a8] sm:$0xff] }
  0x4d   : > { %931 = vmatprep.subr.mxu0 %v9319_v2  ;;  %1456 = vmatprep.subr.mxu1 %v9319_v2 }
  0x4e   : > { %932 = vmatpush2.msra.mxu0 %v826_v55  ;;  %1457 = vmatpush2.msra.mxu1 %v858_v56  ;;  %v493_v55 = vld [vmem:[%s9686_s27 + $0x1b8] sm:$0xff]  ;;  %v490_v56 = vld [vmem:[%s9686_s27 + $0x1a0] sm:$0xff] }
  0x4f   : > { %933 = vmatprep.subr.mxu0 %v9319_v2  ;;  %1458 = vmatprep.subr.mxu1 %v9319_v2 }
  0x50   : > { %934 = vmatpush2.msra.mxu0 %v825_v57  ;;  %1459 = vmatpush2.msra.mxu1 %v857_v58  ;;  %v492_v57 = vld [vmem:[%s9686_s27 + $0x1b0] sm:$0xff]  ;;  %v495_v58 = vld [vmem:[%s9686_s27 + $0x1c8] sm:$0xff] }
  0x51   : > { %935 = vmatprep.subr.mxu0 %v9319_v2  ;;  %1460 = vmatprep.subr.mxu1 %v9319_v2 }
  0x52   : > { %936 = vmatpush2.msra.mxu0 %v824_v59  ;;  %1461 = vmatpush2.msra.mxu1 %v856_v60  ;;  %v497_v59 = vld [vmem:[%s9686_s27 + $0x1d8] sm:$0xff]  ;;  %v494_v60 = vld [vmem:[%s9686_s27 + $0x1c0] sm:$0xff] }
  0x53   : > { %937 = vmatprep.subr.mxu0 %v9319_v2  ;;  %1462 = vmatprep.subr.mxu1 %v9319_v2 }
  0x54   : > { %938 = vmatpush2.msra.mxu0 %v823_v61  ;;  %1463 = vmatpush2.msra.mxu1 %v855_v62  ;;  %v496_v61 = vld [vmem:[%s9686_s27 + $0x1d0] sm:$0xff]  ;;  %v499_v62 = vld [vmem:[%s9686_s27 + $0x1e8] sm:$0xff] }
  0x55   : > { %939 = vmatprep.subr.mxu0 %v9319_v2  ;;  %1464 = vmatprep.subr.mxu1 %v9319_v2 }
  0x56   : > { %940 = vmatpush2.msra.mxu0 %v822_v63  ;;  %941 = vmatprep.mubr.f32.mxu0 %v439_v0  ;;  %v501_v63 = vld [vmem:[%s9686_s27 + $0x1f8] sm:$0xff]  ;;  %v498_v0 = vld [vmem:[%s9686_s27 + $0x1e0] sm:$0xff] }
  0x57   : > { %1465 = vmatpush2.msra.mxu1 %v854_v1  ;;  %1466 = vmatprep.mubr.f32.mxu1 %v441_v3  ;;  %v500_v1 = vld [vmem:[%s9686_s27 + $0x1f0] sm:$0xff]  ;;  %v503_v3 = vld [vmem:[%s9686_s27 + $0x208] sm:$0xff] }
  0x58   : > { %942 = vmatmul.mubr.f32.vlgmr.msra.gmra.mxu0 %v438_v4  ;;  %1467 = vmatmul.mubr.f32.vlgmr.msra.gmra.mxu1 %v440_v5  ;;  %v505_v4 = vld [vmem:[%s9686_s27 + $0x218] sm:$0xff]  ;;  %v502_v5 = vld [vmem:[%s9686_s27 + $0x200] sm:$0xff] }
  0x59   : > { %946 = vmatprep.mubr.f32.mxu0 %v443_v6  ;;  %1471 = vmatprep.mubr.f32.mxu1 %v445_v7  ;;  %v504_v6 = vld [vmem:[%s9686_s27 + $0x210] sm:$0xff]  ;;  %v507_v7 = vld [vmem:[%s9686_s27 + $0x228] sm:$0xff] }
  0x5c   : > { %947 = vmatmul.mubr.f32.gmra.mxu0 %v442_v8  ;;  %1472 = vmatmul.mubr.f32.gmra.mxu1 %v444_v9  ;;  %v509_v8 = vld [vmem:[%s9686_s27 + $0x238] sm:$0xff]  ;;  %v506_v9 = vld [vmem:[%s9686_s27 + $0x220] sm:$0xff] }
  0x5d   : > { %951 = vmatprep.mubr.f32.mxu0 %v447_v10  ;;  %1476 = vmatprep.mubr.f32.mxu1 %v449_v11  ;;  %v508_v10 = vld [vmem:[%s9686_s27 + $0x230] sm:$0xff]  ;;  %v511_v11 = vld [vmem:[%s9686_s27 + $0x248] sm:$0xff] }
  0x60   : > { %952 = vmatmul.mubr.f32.gmra.mxu0 %v446_v12  ;;  %1477 = vmatmul.mubr.f32.gmra.mxu1 %v448_v13  ;;  %v513_v12 = vld [vmem:[%s9686_s27 + $0x258] sm:$0xff]  ;;  %v510_v13 = vld [vmem:[%s9686_s27 + $0x240] sm:$0xff] }
  0x61   : > { %956 = vmatprep.mubr.f32.mxu0 %v451_v14  ;;  %1481 = vmatprep.mubr.f32.mxu1 %v453_v15  ;;  %v512_v14 = vld [vmem:[%s9686_s27 + $0x250] sm:$0xff]  ;;  %v515_v15 = vld [vmem:[%s9686_s27 + $0x268] sm:$0xff] }
  0x64   : > { %957 = vmatmul.mubr.f32.gmra.mxu0 %v450_v16  ;;  %1482 = vmatmul.mubr.f32.gmra.mxu1 %v452_v17  ;;  %v517_v16 = vld [vmem:[%s9686_s27 + $0x278] sm:$0xff]  ;;  %v514_v17 = vld [vmem:[%s9686_s27 + $0x260] sm:$0xff] }
  0x65   : > { %961 = vmatprep.mubr.f32.mxu0 %v455_v18  ;;  %1486 = vmatprep.mubr.f32.mxu1 %v457_v19  ;;  %v516_v18 = vld [vmem:[%s9686_s27 + $0x270] sm:$0xff]  ;;  %v519_v19 = vld [vmem:[%s9686_s27 + $0x288] sm:$0xff] }
  0x68   : > { %962 = vmatmul.mubr.f32.gmra.mxu0 %v454_v20  ;;  %1487 = vmatmul.mubr.f32.gmra.mxu1 %v456_v21  ;;  %v521_v20 = vld [vmem:[%s9686_s27 + $0x298] sm:$0xff]  ;;  %v518_v21 = vld [vmem:[%s9686_s27 + $0x280] sm:$0xff] }
  0x69   : > { %966 = vmatprep.mubr.f32.mxu0 %v459_v22  ;;  %1491 = vmatprep.mubr.f32.mxu1 %v461_v23  ;;  %v520_v22 = vld [vmem:[%s9686_s27 + $0x290] sm:$0xff]  ;;  %v523_v23 = vld [vmem:[%s9686_s27 + $0x2a8] sm:$0xff] }
  0x6c   : > { %967 = vmatmul.mubr.f32.gmra.mxu0 %v458_v24  ;;  %1492 = vmatmul.mubr.f32.gmra.mxu1 %v460_v25  ;;  %v525_v24 = vld [vmem:[%s9686_s27 + $0x2b8] sm:$0xff]  ;;  %v522_v25 = vld [vmem:[%s9686_s27 + $0x2a0] sm:$0xff] }
  0x6d   : > { %971 = vmatprep.mubr.f32.mxu0 %v463_v26  ;;  %1496 = vmatprep.mubr.f32.mxu1 %v465_v27  ;;  %v524_v26 = vld [vmem:[%s9686_s27 + $0x2b0] sm:$0xff]  ;;  %v527_v27 = vld [vmem:[%s9686_s27 + $0x2c8] sm:$0xff] }
  0x70   : > { %972 = vmatmul.mubr.f32.gmra.mxu0 %v462_v28  ;;  %1497 = vmatmul.mubr.f32.gmra.mxu1 %v464_v29  ;;  %v529_v28 = vld [vmem:[%s9686_s27 + $0x2d8] sm:$0xff]  ;;  %v526_v29 = vld [vmem:[%s9686_s27 + $0x2c0] sm:$0xff] }
  0x71   : > { %976 = vmatprep.mubr.f32.mxu0 %v467_v30  ;;  %1501 = vmatprep.mubr.f32.mxu1 %v469_v31  ;;  %v528_v30 = vld [vmem:[%s9686_s27 + $0x2d0] sm:$0xff]  ;;  %v531_v31 = vld [vmem:[%s9686_s27 + $0x2e8] sm:$0xff] }
  0x74   : > { %977 = vmatmul.mubr.f32.gmra.mxu0 %v466_v32  ;;  %1502 = vmatmul.mubr.f32.gmra.mxu1 %v468_v33  ;;  %v533_v32 = vld [vmem:[%s9686_s27 + $0x2f8] sm:$0xff]  ;;  %v530_v33 = vld [vmem:[%s9686_s27 + $0x2e0] sm:$0xff] }
  0x75   : > { %981 = vmatprep.mubr.f32.mxu0 %v471_v34  ;;  %1506 = vmatprep.mubr.f32.mxu1 %v473_v35  ;;  %v532_v34 = vld [vmem:[%s9686_s27 + $0x2f0] sm:$0xff]  ;;  %v535_v35 = vld [vmem:[%s9686_s27 + $0x308] sm:$0xff] }
  0x78   : > { %982 = vmatmul.mubr.f32.gmra.mxu0 %v470_v36  ;;  %1507 = vmatmul.mubr.f32.gmra.mxu1 %v472_v37  ;;  %v537_v36 = vld [vmem:[%s9686_s27 + $0x318] sm:$0xff]  ;;  %v534_v37 = vld [vmem:[%s9686_s27 + $0x300] sm:$0xff] }
  0x79   : > { %986 = vmatprep.mubr.f32.mxu0 %v475_v38  ;;  %1511 = vmatprep.mubr.f32.mxu1 %v477_v39  ;;  %v536_v38 = vld [vmem:[%s9686_s27 + $0x310] sm:$0xff]  ;;  %v539_v39 = vld [vmem:[%s9686_s27 + $0x328] sm:$0xff] }
  0x7c   : > { %987 = vmatmul.mubr.f32.gmra.mxu0 %v474_v40  ;;  %1512 = vmatmul.mubr.f32.gmra.mxu1 %v476_v41  ;;  %v541_v40 = vld [vmem:[%s9686_s27 + $0x338] sm:$0xff]  ;;  %v538_v41 = vld [vmem:[%s9686_s27 + $0x320] sm:$0xff] }
  0x7d   : > { %991 = vmatprep.mubr.f32.mxu0 %v479_v42  ;;  %1516 = vmatprep.mubr.f32.mxu1 %v481_v43  ;;  %v540_v42 = vld [vmem:[%s9686_s27 + $0x330] sm:$0xff]  ;;  %v543_v43 = vld [vmem:[%s9686_s27 + $0x348] sm:$0xff] }
  0x80   : > { %992 = vmatmul.mubr.f32.gmra.mxu0 %v478_v44  ;;  %1517 = vmatmul.mubr.f32.gmra.mxu1 %v480_v45  ;;  %v545_v44 = vld [vmem:[%s9686_s27 + $0x358] sm:$0xff]  ;;  %v542_v45 = vld [vmem:[%s9686_s27 + $0x340] sm:$0xff] }
  0x81   : > { %996 = vmatprep.mubr.f32.mxu0 %v483_v46  ;;  %1521 = vmatprep.mubr.f32.mxu1 %v485_v47  ;;  %v544_v46 = vld [vmem:[%s9686_s27 + $0x350] sm:$0xff]  ;;  %v547_v47 = vld [vmem:[%s9686_s27 + $0x368] sm:$0xff] }
  0x84   : > { %997 = vmatmul.mubr.f32.gmra.mxu0 %v482_v48  ;;  %1522 = vmatmul.mubr.f32.gmra.mxu1 %v484_v49  ;;  %v549_v48 = vld [vmem:[%s9686_s27 + $0x378] sm:$0xff]  ;;  %v546_v49 = vld [vmem:[%s9686_s27 + $0x360] sm:$0xff] }
  0x85   : > { %1001 = vmatprep.mubr.f32.mxu0 %v487_v50  ;;  %1526 = vmatprep.mubr.f32.mxu1 %v489_v51  ;;  %v548_v50 = vld [vmem:[%s9686_s27 + $0x370] sm:$0xff]  ;;  %v551_v51 = vld [vmem:[%s9686_s27 + $0x388] sm:$0xff] }
  0x88   : > { %1002 = vmatmul.mubr.f32.gmra.mxu0 %v486_v52  ;;  %1527 = vmatmul.mubr.f32.gmra.mxu1 %v488_v53  ;;  %v553_v52 = vld [vmem:[%s9686_s27 + $0x398] sm:$0xff]  ;;  %v550_v53 = vld [vmem:[%s9686_s27 + $0x380] sm:$0xff] }
  0x89   : > { %1006 = vmatprep.mubr.f32.mxu0 %v491_v54  ;;  %1531 = vmatprep.mubr.f32.mxu1 %v493_v55  ;;  %v552_v54 = vld [vmem:[%s9686_s27 + $0x390] sm:$0xff]  ;;  %v555_v55 = vld [vmem:[%s9686_s27 + $0x3a8] sm:$0xff] }
  0x8c   : > { %1007 = vmatmul.mubr.f32.gmra.mxu0 %v490_v56  ;;  %1532 = vmatmul.mubr.f32.gmra.mxu1 %v492_v57  ;;  %v557_v56 = vld [vmem:[%s9686_s27 + $0x3b8] sm:$0xff]  ;;  %v554_v57 = vld [vmem:[%s9686_s27 + $0x3a0] sm:$0xff] }
  0x8d   : > { %1011 = vmatprep.mubr.f32.mxu0 %v495_v58  ;;  %1536 = vmatprep.mubr.f32.mxu1 %v497_v59  ;;  %v556_v58 = vld [vmem:[%s9686_s27 + $0x3b0] sm:$0xff]  ;;  %v559_v59 = vld [vmem:[%s9686_s27 + $0x3c8] sm:$0xff] }
  0x90   : > { %1012 = vmatmul.mubr.f32.gmra.mxu0 %v494_v60  ;;  %1537 = vmatmul.mubr.f32.gmra.mxu1 %v496_v61  ;;  %v561_v60 = vld [vmem:[%s9686_s27 + $0x3d8] sm:$0xff]  ;;  %v558_v61 = vld [vmem:[%s9686_s27 + $0x3c0] sm:$0xff] }
  0x91   : > { %1016 = vmatprep.mubr.f32.mxu0 %v499_v62  ;;  %1541 = vmatprep.mubr.f32.mxu1 %v501_v63  ;;  %v560_v62 = vld [vmem:[%s9686_s27 + $0x3d0] sm:$0xff]  ;;  %v563_v63 = vld [vmem:[%s9686_s27 + $0x3e8] sm:$0xff] }
  0x94   : > { %1017 = vmatmul.mubr.f32.gmra.mxu0 %v498_v0  ;;  %1542 = vmatmul.mubr.f32.gmra.mxu1 %v500_v1  ;;  %v565_v0 = vld [vmem:[%s9686_s27 + $0x3f8] sm:$0xff]  ;;  %v562_v1 = vld [vmem:[%s9686_s27 + $0x3e0] sm:$0xff] }
  0x95   : > { %1021 = vmatprep.mubr.f32.mxu0 %v503_v3  ;;  %1546 = vmatprep.mubr.f32.mxu1 %v505_v4  ;;  %v564_v3 = vld [vmem:[%s9686_s27 + $0x3f0] sm:$0xff]  ;;  %v567_v4 = vld [vmem:[%s9686_s27 + $0x408] sm:$0xff] }
  0x98   : > { %1022 = vmatmul.mubr.f32.gmra.mxu0 %v502_v5  ;;  %1547 = vmatmul.mubr.f32.gmra.mxu1 %v504_v6  ;;  %v569_v5 = vld [vmem:[%s9686_s27 + $0x418] sm:$0xff]  ;;  %v566_v6 = vld [vmem:[%s9686_s27 + $0x400] sm:$0xff] }
  0x99   : > { %1026 = vmatprep.mubr.f32.mxu0 %v507_v7  ;;  %1551 = vmatprep.mubr.f32.mxu1 %v509_v8  ;;  %v568_v7 = vld [vmem:[%s9686_s27 + $0x410] sm:$0xff]  ;;  %v571_v8 = vld [vmem:[%s9686_s27 + $0x428] sm:$0xff] }
  0x9c   : > { %1027 = vmatmul.mubr.f32.gmra.mxu0 %v506_v9  ;;  %1552 = vmatmul.mubr.f32.gmra.mxu1 %v508_v10  ;;  %v573_v9 = vld [vmem:[%s9686_s27 + $0x438] sm:$0xff]  ;;  %v570_v10 = vld [vmem:[%s9686_s27 + $0x420] sm:$0xff] }
  0x9d   : > { %1031 = vmatprep.mubr.f32.mxu0 %v511_v11  ;;  %1556 = vmatprep.mubr.f32.mxu1 %v513_v12  ;;  %v572_v11 = vld [vmem:[%s9686_s27 + $0x430] sm:$0xff]  ;;  %v575_v12 = vld [vmem:[%s9686_s27 + $0x448] sm:$0xff] }
  0xa0   : > { %1032 = vmatmul.mubr.f32.gmra.mxu0 %v510_v13  ;;  %1557 = vmatmul.mubr.f32.gmra.mxu1 %v512_v14  ;;  %v577_v13 = vld [vmem:[%s9686_s27 + $0x458] sm:$0xff]  ;;  %v574_v14 = vld [vmem:[%s9686_s27 + $0x440] sm:$0xff] }
  0xa1   : > { %1036 = vmatprep.mubr.f32.mxu0 %v515_v15  ;;  %1561 = vmatprep.mubr.f32.mxu1 %v517_v16  ;;  %v576_v15 = vld [vmem:[%s9686_s27 + $0x450] sm:$0xff]  ;;  %v579_v16 = vld [vmem:[%s9686_s27 + $0x468] sm:$0xff] }
  0xa4   : > { %1037 = vmatmul.mubr.f32.gmra.mxu0 %v514_v17  ;;  %1562 = vmatmul.mubr.f32.gmra.mxu1 %v516_v18  ;;  %v581_v17 = vld [vmem:[%s9686_s27 + $0x478] sm:$0xff]  ;;  %v578_v18 = vld [vmem:[%s9686_s27 + $0x460] sm:$0xff] }
  0xa5   : > { %1041 = vmatprep.mubr.f32.mxu0 %v519_v19  ;;  %1566 = vmatprep.mubr.f32.mxu1 %v521_v20  ;;  %v580_v19 = vld [vmem:[%s9686_s27 + $0x470] sm:$0xff]  ;;  %v583_v20 = vld [vmem:[%s9686_s27 + $0x488] sm:$0xff] }
  0xa8   : > { %1042 = vmatmul.mubr.f32.gmra.mxu0 %v518_v21  ;;  %1567 = vmatmul.mubr.f32.gmra.mxu1 %v520_v22  ;;  %v585_v21 = vld [vmem:[%s9686_s27 + $0x498] sm:$0xff]  ;;  %v582_v22 = vld [vmem:[%s9686_s27 + $0x480] sm:$0xff] }
  0xa9   : > { %1046 = vmatprep.mubr.f32.mxu0 %v523_v23  ;;  %1571 = vmatprep.mubr.f32.mxu1 %v525_v24  ;;  %v584_v23 = vld [vmem:[%s9686_s27 + $0x490] sm:$0xff]  ;;  %v587_v24 = vld [vmem:[%s9686_s27 + $0x4a8] sm:$0xff] }
  0xac   : > { %1047 = vmatmul.mubr.f32.gmra.mxu0 %v522_v25  ;;  %1572 = vmatmul.mubr.f32.gmra.mxu1 %v524_v26  ;;  %v589_v25 = vld [vmem:[%s9686_s27 + $0x4b8] sm:$0xff]  ;;  %v586_v26 = vld [vmem:[%s9686_s27 + $0x4a0] sm:$0xff] }
  0xad   : > { %1051 = vmatprep.mubr.f32.mxu0 %v527_v27  ;;  %1576 = vmatprep.mubr.f32.mxu1 %v529_v28  ;;  %v588_v27 = vld [vmem:[%s9686_s27 + $0x4b0] sm:$0xff]  ;;  %v591_v28 = vld [vmem:[%s9686_s27 + $0x4c8] sm:$0xff] }
  0xb0   : > { %1052 = vmatmul.mubr.f32.gmra.mxu0 %v526_v29  ;;  %1577 = vmatmul.mubr.f32.gmra.mxu1 %v528_v30  ;;  %v593_v29 = vld [vmem:[%s9686_s27 + $0x4d8] sm:$0xff]  ;;  %v590_v30 = vld [vmem:[%s9686_s27 + $0x4c0] sm:$0xff] }
  0xb1   : > { %1056 = vmatprep.mubr.f32.mxu0 %v531_v31  ;;  %1581 = vmatprep.mubr.f32.mxu1 %v533_v32  ;;  %v592_v31 = vld [vmem:[%s9686_s27 + $0x4d0] sm:$0xff]  ;;  %v595_v32 = vld [vmem:[%s9686_s27 + $0x4e8] sm:$0xff] }
  0xb4   : > { %1057 = vmatmul.mubr.f32.gmra.mxu0 %v530_v33  ;;  %1582 = vmatmul.mubr.f32.gmra.mxu1 %v532_v34  ;;  %v597_v33 = vld [vmem:[%s9686_s27 + $0x4f8] sm:$0xff]  ;;  %v594_v34 = vld [vmem:[%s9686_s27 + $0x4e0] sm:$0xff] }
  0xb5   : > { %1061 = vmatprep.mubr.f32.mxu0 %v535_v35  ;;  %1586 = vmatprep.mubr.f32.mxu1 %v537_v36  ;;  %v596_v35 = vld [vmem:[%s9686_s27 + $0x4f0] sm:$0xff]  ;;  %v599_v36 = vld [vmem:[%s9686_s27 + $0x508] sm:$0xff] }
  0xb8   : > { %1062 = vmatmul.mubr.f32.gmra.mxu0 %v534_v37  ;;  %1587 = vmatmul.mubr.f32.gmra.mxu1 %v536_v38  ;;  %v601_v37 = vld [vmem:[%s9686_s27 + $0x518] sm:$0xff]  ;;  %v598_v38 = vld [vmem:[%s9686_s27 + $0x500] sm:$0xff] }
  0xb9   : > { %1066 = vmatprep.mubr.f32.mxu0 %v539_v39  ;;  %1591 = vmatprep.mubr.f32.mxu1 %v541_v40  ;;  %v600_v39 = vld [vmem:[%s9686_s27 + $0x510] sm:$0xff]  ;;  %v603_v40 = vld [vmem:[%s9686_s27 + $0x528] sm:$0xff] }
  0xbc   : > { %1067 = vmatmul.mubr.f32.gmra.mxu0 %v538_v41  ;;  %1592 = vmatmul.mubr.f32.gmra.mxu1 %v540_v42  ;;  %v605_v41 = vld [vmem:[%s9686_s27 + $0x538] sm:$0xff]  ;;  %v602_v42 = vld [vmem:[%s9686_s27 + $0x520] sm:$0xff] }
  0xbd   : > { %1071 = vmatprep.mubr.f32.mxu0 %v543_v43  ;;  %1596 = vmatprep.mubr.f32.mxu1 %v545_v44  ;;  %v604_v43 = vld [vmem:[%s9686_s27 + $0x530] sm:$0xff]  ;;  %v607_v44 = vld [vmem:[%s9686_s27 + $0x548] sm:$0xff] }
  0xc0   : > { %1072 = vmatmul.mubr.f32.gmra.mxu0 %v542_v45  ;;  %1597 = vmatmul.mubr.f32.gmra.mxu1 %v544_v46  ;;  %v609_v45 = vld [vmem:[%s9686_s27 + $0x558] sm:$0xff]  ;;  %v606_v46 = vld [vmem:[%s9686_s27 + $0x540] sm:$0xff] }
  0xc1   : > { %1076 = vmatprep.mubr.f32.mxu0 %v547_v47  ;;  %1601 = vmatprep.mubr.f32.mxu1 %v549_v48  ;;  %v608_v47 = vld [vmem:[%s9686_s27 + $0x550] sm:$0xff]  ;;  %v611_v48 = vld [vmem:[%s9686_s27 + $0x568] sm:$0xff] }
  0xc4   : > { %1077 = vmatmul.mubr.f32.gmra.mxu0 %v546_v49  ;;  %1602 = vmatmul.mubr.f32.gmra.mxu1 %v548_v50  ;;  %v613_v49 = vld [vmem:[%s9686_s27 + $0x578] sm:$0xff]  ;;  %v610_v50 = vld [vmem:[%s9686_s27 + $0x560] sm:$0xff] }
  0xc5   : > { %1081 = vmatprep.mubr.f32.mxu0 %v551_v51  ;;  %1606 = vmatprep.mubr.f32.mxu1 %v553_v52  ;;  %v612_v51 = vld [vmem:[%s9686_s27 + $0x570] sm:$0xff]  ;;  %v615_v52 = vld [vmem:[%s9686_s27 + $0x588] sm:$0xff] }
  0xc8   : > { %1082 = vmatmul.mubr.f32.gmra.mxu0 %v550_v53  ;;  %1607 = vmatmul.mubr.f32.gmra.mxu1 %v552_v54  ;;  %v617_v53 = vld [vmem:[%s9686_s27 + $0x598] sm:$0xff]  ;;  %v614_v54 = vld [vmem:[%s9686_s27 + $0x580] sm:$0xff] }
  0xc9   : > { %1086 = vmatprep.mubr.f32.mxu0 %v555_v55  ;;  %1611 = vmatprep.mubr.f32.mxu1 %v557_v56  ;;  %v616_v55 = vld [vmem:[%s9686_s27 + $0x590] sm:$0xff]  ;;  %v619_v56 = vld [vmem:[%s9686_s27 + $0x5a8] sm:$0xff] }
  0xcc   : > { %1087 = vmatmul.mubr.f32.gmra.mxu0 %v554_v57  ;;  %1612 = vmatmul.mubr.f32.gmra.mxu1 %v556_v58  ;;  %v621_v57 = vld [vmem:[%s9686_s27 + $0x5b8] sm:$0xff]  ;;  %v618_v58 = vld [vmem:[%s9686_s27 + $0x5a0] sm:$0xff] }
  0xcd   : > { %1091 = vmatprep.mubr.f32.mxu0 %v559_v59  ;;  %1616 = vmatprep.mubr.f32.mxu1 %v561_v60  ;;  %v620_v59 = vld [vmem:[%s9686_s27 + $0x5b0] sm:$0xff]  ;;  %v623_v60 = vld [vmem:[%s9686_s27 + $0x5c8] sm:$0xff] }
  0xd0   : > { %1092 = vmatmul.mubr.f32.gmra.mxu0 %v558_v61  ;;  %1617 = vmatmul.mubr.f32.gmra.mxu1 %v560_v62  ;;  %v625_v61 = vld [vmem:[%s9686_s27 + $0x5d8] sm:$0xff]  ;;  %v622_v62 = vld [vmem:[%s9686_s27 + $0x5c0] sm:$0xff] }
  0xd1   : > { %1096 = vmatprep.mubr.f32.mxu0 %v563_v63  ;;  %1621 = vmatprep.mubr.f32.mxu1 %v565_v0  ;;  %v624_v63 = vld [vmem:[%s9686_s27 + $0x5d0] sm:$0xff]  ;;  %v627_v0 = vld [vmem:[%s9686_s27 + $0x5e8] sm:$0xff] }
  0xd4   : > { %1097 = vmatmul.mubr.f32.gmra.mxu0 %v562_v1  ;;  %1622 = vmatmul.mubr.f32.gmra.mxu1 %v564_v3  ;;  %v629_v1 = vld [vmem:[%s9686_s27 + $0x5f8] sm:$0xff]  ;;  %v626_v3 = vld [vmem:[%s9686_s27 + $0x5e0] sm:$0xff] }
  0xd5   : > { %1101 = vmatprep.mubr.f32.mxu0 %v567_v4  ;;  %1626 = vmatprep.mubr.f32.mxu1 %v569_v5  ;;  %v628_v4 = vld [vmem:[%s9686_s27 + $0x5f0] sm:$0xff]  ;;  %v631_v5 = vld [vmem:[%s9686_s27 + $0x608] sm:$0xff] }
  0xd8   : > { %1102 = vmatmul.mubr.f32.gmra.mxu0 %v566_v6  ;;  %1627 = vmatmul.mubr.f32.gmra.mxu1 %v568_v7  ;;  %v633_v6 = vld [vmem:[%s9686_s27 + $0x618] sm:$0xff]  ;;  %v630_v7 = vld [vmem:[%s9686_s27 + $0x600] sm:$0xff] }
  0xd9   : > { %1106 = vmatprep.mubr.f32.mxu0 %v571_v8  ;;  %1631 = vmatprep.mubr.f32.mxu1 %v573_v9  ;;  %v632_v8 = vld [vmem:[%s9686_s27 + $0x610] sm:$0xff]  ;;  %v9905_v9 = vld [vmem:[%s13268_s2] ss:$0 sm:$0xff] }
  0xdc   : > { %1107 = vmatmul.mubr.f32.gmra.mxu0 %v570_v10  ;;  %1632 = vmatmul.mubr.f32.gmra.mxu1 %v572_v11  ;;  %v635_v10 = vld [vmem:[%s9686_s27 + $0x628] sm:$0xff]  ;;  %v637_v11 = vld [vmem:[%s9686_s27 + $0x638] sm:$0xff] }
  0xdd   : > { %1111 = vmatprep.mubr.f32.mxu0 %v575_v12  ;;  %1636 = vmatprep.mubr.f32.mxu1 %v577_v13 }
  0xe0   : > { %1112 = vmatmul.mubr.f32.gmra.mxu0 %v574_v14  ;;  %1637 = vmatmul.mubr.f32.gmra.mxu1 %v576_v15  ;;  %v634_v15 = vld [vmem:[%s9686_s27 + $0x620] sm:$0xff] }
  0xe1   : > { %1116 = vmatprep.mubr.f32.mxu0 %v579_v16  ;;  %1641 = vmatprep.mubr.f32.mxu1 %v581_v17  ;;  %v636_v16 = vld [vmem:[%s9686_s27 + $0x630] sm:$0xff] }
  0xe4   : > { %1117 = vmatmul.mubr.f32.gmra.mxu0 %v578_v18  ;;  %1642 = vmatmul.mubr.f32.gmra.mxu1 %v580_v19  ;;  %v639_v19 = vld [vmem:[%s9686_s27 + $0x648] sm:$0xff] }
  0xe5   : > { %1121 = vmatprep.mubr.f32.mxu0 %v583_v20  ;;  %1646 = vmatprep.mubr.f32.mxu1 %v585_v21  ;;  %v641_v20 = vld [vmem:[%s9686_s27 + $0x658] sm:$0xff] }
  0xe8   : > { %1122 = vmatmul.mubr.f32.gmra.mxu0 %v582_v22  ;;  %1647 = vmatmul.mubr.f32.gmra.mxu1 %v584_v23 }
  0xe9   : > { %1126 = vmatprep.mubr.f32.mxu0 %v587_v24  ;;  %1651 = vmatprep.mubr.f32.mxu1 %v589_v25  ;;  %v638_v25 = vld [vmem:[%s9686_s27 + $0x640] sm:$0xff] }
  0xec   : > { %1127 = vmatmul.mubr.f32.gmra.mxu0 %v586_v26  ;;  %1652 = vmatmul.mubr.f32.gmra.mxu1 %v588_v27  ;;  %v640_v26 = vld [vmem:[%s9686_s27 + $0x650] sm:$0xff] }
  0xed   : > { %1131 = vmatprep.mubr.f32.mxu0 %v591_v28  ;;  %1656 = vmatprep.mubr.f32.mxu1 %v593_v29  ;;  %v643_v29 = vld [vmem:[%s9686_s27 + $0x668] sm:$0xff] }
  0xf0   : > { %1132 = vmatmul.mubr.f32.gmra.mxu0 %v590_v30  ;;  %1657 = vmatmul.mubr.f32.gmra.mxu1 %v592_v31  ;;  %v645_v30 = vld [vmem:[%s9686_s27 + $0x678] sm:$0xff] }
  0xf1   : > { %1136 = vmatprep.mubr.f32.mxu0 %v595_v32  ;;  %1661 = vmatprep.mubr.f32.mxu1 %v597_v33 }
  0xf4   : > { %1137 = vmatmul.mubr.f32.gmra.mxu0 %v594_v34  ;;  %1662 = vmatmul.mubr.f32.gmra.mxu1 %v596_v35  ;;  %v642_v35 = vld [vmem:[%s9686_s27 + $0x660] sm:$0xff] }
  0xf5   : > { %1141 = vmatprep.mubr.f32.mxu0 %v599_v36  ;;  %1666 = vmatprep.mubr.f32.mxu1 %v601_v37  ;;  %v644_v36 = vld [vmem:[%s9686_s27 + $0x670] sm:$0xff] }
  0xf8   : > { %1142 = vmatmul.mubr.f32.gmra.mxu0 %v598_v38  ;;  %1667 = vmatmul.mubr.f32.gmra.mxu1 %v600_v39  ;;  %v647_v39 = vld [vmem:[%s9686_s27 + $0x688] sm:$0xff] }
  0xf9   : > { %1146 = vmatprep.mubr.f32.mxu0 %v603_v40  ;;  %1671 = vmatprep.mubr.f32.mxu1 %v605_v41  ;;  %v649_v40 = vld [vmem:[%s9686_s27 + $0x698] sm:$0xff] }
  0xfc   : > { %1147 = vmatmul.mubr.f32.gmra.mxu0 %v602_v42  ;;  %1672 = vmatmul.mubr.f32.gmra.mxu1 %v604_v43 }
  0xfd   : > { %1151 = vmatprep.mubr.f32.mxu0 %v607_v44  ;;  %1676 = vmatprep.mubr.f32.mxu1 %v609_v45  ;;  %v646_v45 = vld [vmem:[%s9686_s27 + $0x680] sm:$0xff] }
 0x100   : > { %1152 = vmatmul.mubr.f32.gmra.mxu0 %v606_v46  ;;  %1677 = vmatmul.mubr.f32.gmra.mxu1 %v608_v47  ;;  %v648_v46 = vld [vmem:[%s9686_s27 + $0x690] sm:$0xff] }
 0x101   : > { %1156 = vmatprep.mubr.f32.mxu0 %v611_v48  ;;  %1681 = vmatprep.mubr.f32.mxu1 %v613_v49  ;;  %v651_v49 = vld [vmem:[%s9686_s27 + $0x6a8] sm:$0xff] }
 0x104   : > { %1157 = vmatmul.mubr.f32.gmra.mxu0 %v610_v50  ;;  %1682 = vmatmul.mubr.f32.gmra.mxu1 %v612_v51  ;;  %v653_v50 = vld [vmem:[%s9686_s27 + $0x6b8] sm:$0xff] }
 0x105   : > { %1161 = vmatprep.mubr.f32.mxu0 %v615_v52  ;;  %1686 = vmatprep.mubr.f32.mxu1 %v617_v53 }
 0x108   : > { %1162 = vmatmul.mubr.f32.gmra.mxu0 %v614_v54  ;;  %1687 = vmatmul.mubr.f32.gmra.mxu1 %v616_v55  ;;  %v650_v55 = vld [vmem:[%s9686_s27 + $0x6a0] sm:$0xff] }
 0x109   : > { %1166 = vmatprep.mubr.f32.mxu0 %v619_v56  ;;  %1691 = vmatprep.mubr.f32.mxu1 %v621_v57  ;;  %v652_v56 = vld [vmem:[%s9686_s27 + $0x6b0] sm:$0xff] }
 0x10c   : > { %1167 = vmatmul.mubr.f32.gmra.mxu0 %v618_v58  ;;  %1692 = vmatmul.mubr.f32.gmra.mxu1 %v620_v59  ;;  %v655_v59 = vld [vmem:[%s9686_s27 + $0x6c8] sm:$0xff] }
 0x10d   : > { %1171 = vmatprep.mubr.f32.mxu0 %v623_v60  ;;  %1696 = vmatprep.mubr.f32.mxu1 %v625_v61  ;;  %v657_v60 = vld [vmem:[%s9686_s27 + $0x6d8] sm:$0xff] }
 0x110   : > { %1172 = vmatmul.mubr.f32.gmra.mxu0 %v622_v62  ;;  %1697 = vmatmul.mubr.f32.gmra.mxu1 %v624_v63 }
 0x111   : > { %1176 = vmatprep.mubr.f32.mxu0 %v627_v0  ;;  %1701 = vmatprep.mubr.f32.mxu1 %v629_v1  ;;  %v654_v1 = vld [vmem:[%s9686_s27 + $0x6c0] sm:$0xff] }
 0x114   : > { %1177 = vmatmul.mubr.f32.gmra.mxu0 %v626_v3  ;;  %1702 = vmatmul.mubr.f32.gmra.mxu1 %v628_v4  ;;  %v656_v3 = vld [vmem:[%s9686_s27 + $0x6d0] sm:$0xff] }
 0x115   : > { %1181 = vmatprep.mubr.f32.mxu0 %v631_v5  ;;  %1706 = vmatprep.mubr.f32.mxu1 %v633_v6  ;;  %v659_v6 = vld [vmem:[%s9686_s27 + $0x6e8] sm:$0xff] }
 0x118   : > { %v943_v12 = vpop.f32.mrf.mxu0  ;;  %1182 = vmatmul.mubr.f32.gmra.mxu0 %v630_v7  ;;  %v1468_v13 = vpop.f32.mrf.mxu1  ;;  %1707 = vmatmul.mubr.f32.gmra.mxu1 %v632_v8  ;;  %v661_v7 = vld [vmem:[%s9686_s27 + $0x6f8] sm:$0xff] }
 0x119   : > { %v944_v14 = vadd.f32 %v9905_v9, %v943_v12  ;;  %1186 = vmatprep.mubr.f32.mxu0 %v635_v10  ;;  %1711 = vmatprep.mubr.f32.mxu1 %v637_v11 }
 0x11a   : > { %v945_v17 = vpop.f32.mrf.mxu0  ;;  %v1470_v18 = vpop.f32.mrf.mxu1 }
 0x11b   : > { %v1469_v21 = vadd.f32 %v1468_v13, %v944_v14  ;;  %v658_v13 = vld [vmem:[%s9686_s27 + $0x6e0] sm:$0xff]  ;;  %v660_v14 = vld [vmem:[%s9686_s27 + $0x6f0] sm:$0xff]  ;;  %v663_v17 = vld [vmem:[%s9686_s27 + $0x708] sm:$0xff] }
 0x11c   : > { %v948_v22 = vpop.f32.mrf.mxu0  ;;  %1187 = vmatmul.mubr.f32.gmra.mxu0 %v634_v15  ;;  %v1473_v23 = vpop.f32.mrf.mxu1  ;;  %1712 = vmatmul.mubr.f32.gmra.mxu1 %v636_v16  ;;  %v665_v18 = vld [vmem:[%s9686_s27 + $0x718] sm:$0xff] }
 0x11d   : > { %1928 = vst.msk [vmem:[#allocation2] sm:$0xff] %vm1927_vm0, %v1469_v21  ;;  %v949_v24 = vadd.f32 %v9905_v9, %v948_v22  ;;  %1191 = vmatprep.mubr.f32.mxu0 %v639_v19  ;;  %1716 = vmatprep.mubr.f32.mxu1 %v641_v20 }
 0x11e   : > { %v950_v27 = vpop.f32.mrf.mxu0  ;;  %v1475_v28 = vpop.f32.mrf.mxu1 }
 0x11f   : > { %v1474_v31 = vadd.f32 %v1473_v23, %v949_v24  ;;  %v662_v23 = vld [vmem:[%s9686_s27 + $0x700] sm:$0xff]  ;;  %v664_v24 = vld [vmem:[%s9686_s27 + $0x710] sm:$0xff]  ;;  %v667_v27 = vld [vmem:[%s9686_s27 + $0x728] sm:$0xff] }
 0x120   : > { %v953_v32 = vpop.f32.mrf.mxu0  ;;  %1192 = vmatmul.mubr.f32.gmra.mxu0 %v638_v25  ;;  %v1478_v33 = vpop.f32.mrf.mxu1  ;;  %1717 = vmatmul.mubr.f32.gmra.mxu1 %v640_v26  ;;  %v669_v28 = vld [vmem:[%s9686_s27 + $0x738] sm:$0xff] }
 0x121   : > { %1929 = vst.msk [vmem:[#allocation2 + $0x8] sm:$0xff] %vm1927_vm0, %v1474_v31  ;;  %v954_v34 = vadd.f32 %v9905_v9, %v953_v32  ;;  %1196 = vmatprep.mubr.f32.mxu0 %v643_v29  ;;  %1721 = vmatprep.mubr.f32.mxu1 %v645_v30 }
 0x122   : > { %v955_v37 = vpop.f32.mrf.mxu0  ;;  %v1480_v38 = vpop.f32.mrf.mxu1 }
 0x123   : > { %v1479_v41 = vadd.f32 %v1478_v33, %v954_v34  ;;  %v666_v33 = vld [vmem:[%s9686_s27 + $0x720] sm:$0xff]  ;;  %v668_v34 = vld [vmem:[%s9686_s27 + $0x730] sm:$0xff]  ;;  %v671_v37 = vld [vmem:[%s9686_s27 + $0x748] sm:$0xff] }
 0x124   : > { %v958_v42 = vpop.f32.mrf.mxu0  ;;  %1197 = vmatmul.mubr.f32.gmra.mxu0 %v642_v35  ;;  %v1483_v43 = vpop.f32.mrf.mxu1  ;;  %1722 = vmatmul.mubr.f32.gmra.mxu1 %v644_v36  ;;  %v673_v38 = vld [vmem:[%s9686_s27 + $0x758] sm:$0xff] }
 0x125   : > { %1930 = vst.msk [vmem:[#allocation2 + $0x10] sm:$0xff] %vm1927_vm0, %v1479_v41  ;;  %v959_v44 = vadd.f32 %v9905_v9, %v958_v42  ;;  %1201 = vmatprep.mubr.f32.mxu0 %v647_v39  ;;  %1726 = vmatprep.mubr.f32.mxu1 %v649_v40 }
 0x126   : > { %v960_v47 = vpop.f32.mrf.mxu0  ;;  %v1485_v48 = vpop.f32.mrf.mxu1 }
 0x127   : > { %v1484_v51 = vadd.f32 %v1483_v43, %v959_v44  ;;  %v670_v43 = vld [vmem:[%s9686_s27 + $0x740] sm:$0xff]  ;;  %v672_v44 = vld [vmem:[%s9686_s27 + $0x750] sm:$0xff]  ;;  %v675_v47 = vld [vmem:[%s9686_s27 + $0x768] sm:$0xff] }
 0x128   : > { %v963_v52 = vpop.f32.mrf.mxu0  ;;  %1202 = vmatmul.mubr.f32.gmra.mxu0 %v646_v45  ;;  %v1488_v53 = vpop.f32.mrf.mxu1  ;;  %1727 = vmatmul.mubr.f32.gmra.mxu1 %v648_v46  ;;  %v677_v48 = vld [vmem:[%s9686_s27 + $0x778] sm:$0xff] }
 0x129   : > { %1931 = vst.msk [vmem:[#allocation2 + $0x18] sm:$0xff] %vm1927_vm0, %v1484_v51  ;;  %v964_v54 = vadd.f32 %v9905_v9, %v963_v52  ;;  %1206 = vmatprep.mubr.f32.mxu0 %v651_v49  ;;  %1731 = vmatprep.mubr.f32.mxu1 %v653_v50 }
 0x12a   : > { %v965_v57 = vpop.f32.mrf.mxu0  ;;  %v1490_v58 = vpop.f32.mrf.mxu1 }
 0x12b   : > { %v1489_v61 = vadd.f32 %v1488_v53, %v964_v54  ;;  %v674_v53 = vld [vmem:[%s9686_s27 + $0x760] sm:$0xff]  ;;  %v676_v54 = vld [vmem:[%s9686_s27 + $0x770] sm:$0xff]  ;;  %v679_v57 = vld [vmem:[%s9686_s27 + $0x788] sm:$0xff] }
 0x12c   : > { %v968_v62 = vpop.f32.mrf.mxu0  ;;  %1207 = vmatmul.mubr.f32.gmra.mxu0 %v650_v55  ;;  %v1493_v63 = vpop.f32.mrf.mxu1  ;;  %1732 = vmatmul.mubr.f32.gmra.mxu1 %v652_v56  ;;  %v681_v58 = vld [vmem:[%s9686_s27 + $0x798] sm:$0xff] }
 0x12d   : > { %1932 = vst.msk [vmem:[#allocation2 + $0x20] sm:$0xff] %vm1927_vm0, %v1489_v61  ;;  %v969_v0 = vadd.f32 %v9905_v9, %v968_v62  ;;  %1211 = vmatprep.mubr.f32.mxu0 %v655_v59  ;;  %1736 = vmatprep.mubr.f32.mxu1 %v657_v60 }
 0x12e   : > { %v970_v4 = vpop.f32.mrf.mxu0  ;;  %v1495_v5 = vpop.f32.mrf.mxu1 }
 0x12f   : > { %v1494_v8 = vadd.f32 %v1493_v63, %v969_v0  ;;  %v678_v0 = vld [vmem:[%s9686_s27 + $0x780] sm:$0xff] }
 0x130   : > { %v973_v10 = vpop.f32.mrf.mxu0  ;;  %1212 = vmatmul.mubr.f32.gmra.mxu0 %v654_v1  ;;  %v1498_v11 = vpop.f32.mrf.mxu1  ;;  %1737 = vmatmul.mubr.f32.gmra.mxu1 %v656_v3  ;;  %v680_v1 = vld [vmem:[%s9686_s27 + $0x790] sm:$0xff] }
 0x131   : > { %1933 = vst.msk [vmem:[#allocation2 + $0x28] sm:$0xff] %vm1927_vm0, %v1494_v8  ;;  %v974_v12 = vadd.f32 %v9905_v9, %v973_v10  ;;  %1216 = vmatprep.mubr.f32.mxu0 %v659_v6  ;;  %1741 = vmatprep.mubr.f32.mxu1 %v661_v7  ;;  %v683_v6 = vld [vmem:[%s9686_s27 + $0x7a8] sm:$0xff]  ;;  %v685_v7 = vld [vmem:[%s9686_s27 + $0x7b8] sm:$0xff]  ;;  %v2038_v8 = vld [vmem:[#allocation2 + $0x10] sm:$0xff] }
 0x132   : > { %v975_v15 = vpop.f32.mrf.mxu0  ;;  %v1500_v16 = vpop.f32.mrf.mxu1 }
 0x133   : > { %v1499_v19 = vadd.f32 %v1498_v11, %v974_v12  ;;  %v2037_v12 = vld [vmem:[#allocation2 + $0x8] sm:$0xff] }
 0x134   : > { %v978_v20 = vpop.f32.mrf.mxu0  ;;  %1217 = vmatmul.mubr.f32.gmra.mxu0 %v658_v13  ;;  %v1503_v21 = vpop.f32.mrf.mxu1  ;;  %1742 = vmatmul.mubr.f32.gmra.mxu1 %v660_v14  ;;  %v2040_v14 = vld [vmem:[#allocation2 + $0x1b] sm:$0xff] }
 0x135   : > { %1934 = vst.msk [vmem:[#allocation2 + $0x30] sm:$0xff] %vm1927_vm0, %v1499_v19  ;;  %v979_v22 = vadd.f32 %v9905_v9, %v978_v20  ;;  %1221 = vmatprep.mubr.f32.mxu0 %v663_v17  ;;  %1746 = vmatprep.mubr.f32.mxu1 %v665_v18  ;;  %v682_v17 = vld [vmem:[%s9686_s27 + $0x7a0] sm:$0xff] }
 0x136   : > { %v980_v25 = vpop.f32.mrf.mxu0  ;;  %v1505_v26 = vpop.f32.mrf.mxu1 }
 0x137   : > { %v1504_v29 = vadd.f32 %v1503_v21, %v979_v22  ;;  %v684_v22 = vld [vmem:[%s9686_s27 + $0x7b0] sm:$0xff] }
 0x138   : > { %v983_v30 = vpop.f32.mrf.mxu0  ;;  %1222 = vmatmul.mubr.f32.gmra.mxu0 %v662_v23  ;;  %v1508_v31 = vpop.f32.mrf.mxu1  ;;  %1747 = vmatmul.mubr.f32.gmra.mxu1 %v664_v24  ;;  %v2041_v3 = vld [vmem:[#allocation2 + $0x23] sm:$0xff] }
 0x139   : > { %1935 = vst.msk [vmem:[#allocation2 + $0x38] sm:$0xff] %vm1927_vm0, %v1504_v29  ;;  %v984_v32 = vadd.f32 %v9905_v9, %v983_v30  ;;  %1226 = vmatprep.mubr.f32.mxu0 %v667_v27  ;;  %1751 = vmatprep.mubr.f32.mxu1 %v669_v28  ;;  %v2049_v20 = vmax.f32 %v2037_v12, %v2041_v3  ;;  %v2036_v24 = vld [vmem:[#allocation2] sm:$0xff]  ;;  %v687_v28 = vld [vmem:[%s9686_s27 + $0x7c8] sm:$0xff]  ;;  %v689_v29 = vld [vmem:[%s9686_s27 + $0x7d8] sm:$0xff] }
 0x13a   : > { %v985_v35 = vpop.f32.mrf.mxu0  ;;  %v1510_v36 = vpop.f32.mrf.mxu1  ;;  %v2039_v30 = vld [vmem:[#allocation2 + $0x18] sm:$0x7] }
 0x13b   : > { %v1509_v39 = vadd.f32 %v1508_v31, %v984_v32  ;;  %v2048_v32 = vmax.f32 %v2036_v24, %v2040_v14 }
 0x13c   : > { %v988_v40 = vpop.f32.mrf.mxu0  ;;  %1227 = vmatmul.mubr.f32.gmra.mxu0 %v666_v33  ;;  %v1513_v41 = vpop.f32.mrf.mxu1  ;;  %1752 = vmatmul.mubr.f32.gmra.mxu1 %v668_v34  ;;  %v2042_v62 = vld [vmem:[#allocation2 + $0x2b] sm:$0xff]  ;;  %v2043_v18 = vld [vmem:[#allocation2 + $0x33] sm:$0x7] }
 0x13d   : > { %1936 = vst.msk [vmem:[#allocation2 + $0x40] sm:$0xff] %vm1927_vm0, %v1509_v39  ;;  %v989_v42 = vadd.f32 %v9905_v9, %v988_v40  ;;  %1231 = vmatprep.mubr.f32.mxu0 %v671_v37  ;;  %1756 = vmatprep.mubr.f32.mxu1 %v673_v38  ;;  %v2050_v11 = vmax.f32 %v2038_v8, %v2042_v62 }
 0x13e   : > { %v990_v45 = vpop.f32.mrf.mxu0  ;;  %v1515_v46 = vpop.f32.mrf.mxu1  ;;  %v2051_v34 = vmax.f32 %v2039_v30, %v2043_v18 }
 0x13f   : > { %v1514_v49 = vadd.f32 %v1513_v41, %v989_v42  ;;  %v686_v41 = vld [vmem:[%s9686_s27 + $0x7c0] sm:$0xff]  ;;  %v688_v42 = vld [vmem:[%s9686_s27 + $0x7d0] sm:$0xff]  ;;  %v691_v46 = vld [vmem:[%s9686_s27 + $0x7e8] sm:$0xff] }
 0x140   : > { %v993_v50 = vpop.f32.mrf.mxu0  ;;  %1232 = vmatmul.mubr.f32.gmra.mxu0 %v670_v43  ;;  %v1518_v51 = vpop.f32.mrf.mxu1  ;;  %1757 = vmatmul.mubr.f32.gmra.mxu1 %v672_v44  ;;  %v9991_v25 = vld [vmem:[#allocation2 + $0x36] sm:$0xff] }
 0x141   : > { %1937 = vst.msk [vmem:[#allocation2 + $0x48] sm:$0xff] %vm1927_vm0, %v1514_v49  ;;  %v994_v52 = vadd.f32 %v9905_v9, %v993_v50  ;;  %1236 = vmatprep.mubr.f32.mxu0 %v675_v47  ;;  %1761 = vmatprep.mubr.f32.mxu1 %v677_v48  ;;  %v10000_v39 = vmax.f32 %v2048_v32, %v9991_v25  ;;  %v693_v47 = vld [vmem:[%s9686_s27 + $0x7f8] sm:$0xff] }
 0x142   : > { %v995_v55 = vpop.f32.mrf.mxu0  ;;  %v1520_v56 = vpop.f32.mrf.mxu1 }
 0x143   : > { %v1519_v59 = vadd.f32 %v1518_v51, %v994_v52  ;;  %v2061_v55 = vrot.slane %v10000_v39, 1 }
 0x144   : > { %v998_v60 = vpop.f32.mrf.mxu0  ;;  %1237 = vmatmul.mubr.f32.gmra.mxu0 %v674_v53  ;;  %v1523_v61 = vpop.f32.mrf.mxu1  ;;  %1762 = vmatmul.mubr.f32.gmra.mxu1 %v676_v54  ;;  %v9980_v13 = vld [vmem:[#allocation2 + $0x3e] sm:$0xff] }
 0x145   : > { %1938 = vst.msk [vmem:[#allocation2 + $0x50] sm:$0xff] %vm1927_vm0, %v1519_v59  ;;  %v999_v63 = vadd.f32 %v9905_v9, %v998_v60  ;;  %1241 = vmatprep.mubr.f32.mxu0 %v679_v57  ;;  %1766 = vmatprep.mubr.f32.mxu1 %v681_v58  ;;  %v9996_v31 = vmax.f32 %v2049_v20, %v9980_v13  ;;  %v690_v57 = vld [vmem:[%s9686_s27 + $0x7e0] sm:$0xff]  ;;  %v692_v59 = vld [vmem:[%s9686_s27 + $0x7f0] sm:$0xff] }
 0x146   : > { %v1000_v4 = vpop.f32.mrf.mxu0  ;;  %v1525_v5 = vpop.f32.mrf.mxu1 }
 0x147   : > { %v1524_v10 = vadd.f32 %v1523_v61, %v999_v63  ;;  %v2062_v48 = vrot.slane %v9996_v31, 1 }
 0x148   : > { %v1003_v15 = vpop.f32.mrf.mxu0  ;;  %1242 = vmatmul.mubr.f32.gmra.mxu0 %v678_v0  ;;  %v1528_v16 = vpop.f32.mrf.mxu1  ;;  %1767 = vmatmul.mubr.f32.gmra.mxu1 %v680_v1  ;;  %v9983_v19 = vld [vmem:[#allocation2 + $0x46] sm:$0xff] }
 0x149   : > { %1939 = vst.msk [vmem:[#allocation2 + $0x58] sm:$0xff] %vm1927_vm0, %v1524_v10  ;;  %v1004_v21 = vadd.f32 %v9905_v9, %v1003_v15  ;;  %1246 = vmatprep.mubr.f32.mxu0 %v683_v6  ;;  %1771 = vmatprep.mubr.f32.mxu1 %v685_v7  ;;  %v9989_v23 = vmax.f32 %v2050_v11, %v9983_v19  ;;  %v695_v0 = vld [vmem:[%s9686_s27 + $0x808] sm:$0xff]  ;;  %v697_v6 = vld [vmem:[%s9686_s27 + $0x818] sm:$0xff]  ;;  %v694_v15 = vld [vmem:[%s9686_s27 + $0x800] sm:$0xff] }
 0x14a   : > { %v1005_v26 = vpop.f32.mrf.mxu0  ;;  %v1530_v27 = vpop.f32.mrf.mxu1  ;;  %v2063_v7 = vsel %vm2060_vm1, %v2061_v55, %v2062_v48 }
 0x14b   : > { %v1529_v33 = vadd.f32 %v1528_v16, %v1004_v21  ;;  %v2064_v38 = vrot.slane %v9989_v23, 1  ;;  %v2080_v61 = vrot.slane %v9989_v23, 2  ;;  %v2078_v16 = vrot.slane %v9996_v31, 2  ;;  %v699_v21 = vld [vmem:[%s9686_s27 + $0x828] sm:$0xff]  ;;  %v701_v27 = vld [vmem:[%s9686_s27 + $0x838] sm:$0xff] }
 0x14c   : > { %v1008_v35 = vpop.f32.mrf.mxu0  ;;  %1247 = vmatmul.mubr.f32.gmra.mxu0 %v682_v17  ;;  %v1533_v36 = vpop.f32.mrf.mxu1  ;;  %1772 = vmatmul.mubr.f32.gmra.mxu1 %v684_v22  ;;  %v2047_v37 = vld [vmem:[#allocation2 + $0x4e] sm:$0x7]  ;;  %v2072_v22 = vmax.f32 %v10000_v39, %v2063_v7  ;;  %v2077_v26 = vrot.slane %v10000_v39, 2 }
 0x14d   : > { %1940 = vst.msk [vmem:[#allocation2 + $0x60] sm:$0xff] %vm1927_vm0, %v1529_v33  ;;  %v1009_v40 = vadd.f32 %v9905_v9, %v1008_v35  ;;  %1251 = vmatprep.mubr.f32.mxu0 %v687_v28  ;;  %1776 = vmatprep.mubr.f32.mxu1 %v689_v29  ;;  %v2055_v43 = vmax.f32 %v2051_v34, %v2047_v37  ;;  %v696_v17 = vld [vmem:[%s9686_s27 + $0x810] sm:$0xff]  ;;  %v698_v33 = vld [vmem:[%s9686_s27 + $0x820] sm:$0xff]  ;;  %v703_v39 = vld [vmem:[%s9686_s27 + $0x848] sm:$0xff] }
 0x14e   : > { %v1010_v44 = vpop.f32.mrf.mxu0  ;;  %v1535_v45 = vpop.f32.mrf.mxu1  ;;  %v2065_v54 = vsel %vm2060_vm1, %v2062_v48, %v2064_v38  ;;  %v2081_v24 = vsel %vm2076_vm3, %v2078_v16, %v2080_v61  ;;  %v2079_v32 = vsel %vm2076_vm3, %v2077_v26, %v2078_v16  ;;  %v700_v37 = vld [vmem:[%s9686_s27 + $0x830] sm:$0xff]  ;;  %v710_v16 = vld [vmem:[%s9686_s27 + $0x880] sm:$0xff]  ;;  %v717_v26 = vld [vmem:[%s9686_s27 + $0x8b8] sm:$0xff] }
 0x14f   : > { %v1534_v49 = vadd.f32 %v1533_v36, %v1009_v40  ;;  %v2066_v50 = vrot.slane %v2055_v43, 1  ;;  %v2082_v51 = vrot.slane %v2055_v43, 2  ;;  %v2073_v12 = vmax.f32 %v9996_v31, %v2065_v54  ;;  %v705_v40 = vld [vmem:[%s9686_s27 + $0x858] sm:$0xff]  ;;  %v702_v44 = vld [vmem:[%s9686_s27 + $0x840] sm:$0xff]  ;;  %v704_v48 = vld [vmem:[%s9686_s27 + $0x850] sm:$0xff] }
 0x150   : > { %v1013_v52 = vpop.f32.mrf.mxu0  ;;  %1252 = vmatmul.mubr.f32.gmra.mxu0 %v686_v41  ;;  %v1538_v53 = vpop.f32.mrf.mxu1  ;;  %1777 = vmatmul.mubr.f32.gmra.mxu1 %v688_v42  ;;  %v2088_v36 = vmax.f32 %v2072_v22, %v2079_v32  ;;  %v715_v22 = vld [vmem:[%s9686_s27 + $0x8a8] sm:$0xff] }
 0x151   : > { %1941 = vst.msk [vmem:[#allocation2 + $0x68] sm:$0xff] %vm1927_vm0, %v1534_v49  ;;  %v1014_v56 = vadd.f32 %v9905_v9, %v1013_v52  ;;  %1256 = vmatprep.mubr.f32.mxu0 %v691_v46  ;;  %1781 = vmatprep.mubr.f32.mxu1 %v693_v47  ;;  %v2075_v58 = vmax.f32 %v2055_v43, %v2066_v50  ;;  %v707_v49 = vld [vmem:[%s9686_s27 + $0x868] sm:$0xff]  ;;  %v2203_v52 = vld [vmem:[#allocation2 + $0x51] sm:$0xff] }
 0x152   : > { %v2067_v60 = vsel %vm2060_vm1, %v2064_v38, %v2066_v50  ;;  %v1015_v62 = vpop.f32.mrf.mxu0  ;;  %v1540_v63 = vpop.f32.mrf.mxu1  ;;  %v2083_v5 = vsel %vm2076_vm3, %v2080_v61, %v2082_v51  ;;  %v2089_v30 = vmax.f32 %v2073_v12, %v2081_v24 }
 0x153   : > { %v2074_v1 = vmax.f32 %v9989_v23, %v2067_v60  ;;  %v1539_v3 = vadd.f32 %v1538_v53, %v1014_v56  ;;  %v2091_v4 = vmax.f32 %v2075_v58, %v2082_v51  ;;  %v709_v51 = vld [vmem:[%s9686_s27 + $0x878] sm:$0xff]  ;;  %v706_v60 = vld [vmem:[%s9686_s27 + $0x860] sm:$0xff] }
 0x154   : > { %v1018_v8 = vpop.f32.mrf.mxu0  ;;  %1257 = vmatmul.mubr.f32.gmra.mxu0 %v690_v57  ;;  %v1543_v10 = vpop.f32.mrf.mxu1  ;;  %1782 = vmatmul.mubr.f32.gmra.mxu1 %v692_v59  ;;  %v2204_v45 = vld [vmem:[#allocation2 + $0x59] sm:$0xff] }
 0x155   : > { %v2090_v11 = vmax.f32 %v2074_v1, %v2083_v5  ;;  %1942 = vst.msk [vmem:[#allocation2 + $0x70] sm:$0xff] %vm1927_vm0, %v1539_v3  ;;  %v1019_v14 = vadd.f32 %v9905_v9, %v1018_v8  ;;  %8309 = vmatprep.subr.msk.mxu0 %vm2099_vm2, %v2091_v4  ;;  %1261 = vmatprep.mubr.f32.mxu0 %v695_v0  ;;  %v708_v0 = vld [vmem:[%s9686_s27 + $0x870] sm:$0xff]  ;;  %v711_v1 = vld [vmem:[%s9686_s27 + $0x888] sm:$0xff] }
 0x156   : > { %v1020_v18 = vpop.f32.mrf.mxu0  ;;  %v1545_v20 = vpop.f32.mrf.mxu1  ;;  %8310 = vmatpush3.msk.msra.mxu0 %vm2099_vm2, %v2091_v4  ;;  %1786 = vmatprep.mubr.f32.mxu1 %v697_v6  ;;  %v2212_v58 = vmax.f32 %v9980_v13, %v2204_v45  ;;  %v2202_v3 = vld [vmem:[#allocation2 + $0x4e] sm:$0x7]  ;;  %v2211_v13 = vmax.f32 %v9991_v25, %v2203_v52  ;;  %v713_v6 = vld [vmem:[%s9686_s27 + $0x898] sm:$0xff] }
 0x157   : > { %v1544_v23 = vadd.f32 %v1543_v10, %v1019_v14  ;;  %8311 = vmatprep.subr.mxu0 %v2090_v11  ;;  %v721_v52 = vld [vmem:[%s9686_s27 + $0x8d8] sm:$0xff] }
 0x158   : > { %v1023_v28 = vpop.f32.mrf.mxu0  ;;  %1262 = vmatmul.mubr.f32.gmra.mxu0 %v694_v15  ;;  %v1548_v29 = vpop.f32.mrf.mxu1  ;;  %1787 = vmatmul.mubr.f32.gmra.mxu1 %v696_v17  ;;  %v2206_v55 = vld [vmem:[#allocation2 + $0x69] sm:$0x7]  ;;  %v2205_v56 = vld [vmem:[#allocation2 + $0x61] sm:$0xff] }
 0x159   : > { %1943 = vst.msk [vmem:[#allocation2 + $0x78] sm:$0xff] %vm1927_vm0, %v1544_v23  ;;  %v1024_v31 = vadd.f32 %v9905_v9, %v1023_v28  ;;  %8312 = vmatpush3.msra.mxu0 %v2090_v11  ;;  %1266 = vmatprep.mubr.f32.mxu0 %v699_v21  ;;  %v2214_v7 = vmax.f32 %v2202_v3, %v2206_v55  ;;  %v712_v21 = vld [vmem:[%s9686_s27 + $0x890] sm:$0xff]  ;;  %v718_v55 = vld [vmem:[%s9686_s27 + $0x8c0] sm:$0xff]  ;;  %v723_v3 = vld [vmem:[%s9686_s27 + $0x8e8] sm:$0xff] }
 0x15a   : > { %8313 = vmatprep.subr.mxu0 %v2089_v30  ;;  %v1025_v34 = vpop.f32.mrf.mxu0  ;;  %v1550_v35 = vpop.f32.mrf.mxu1  ;;  %1791 = vmatprep.mubr.f32.mxu1 %v701_v27  ;;  %v2213_v8 = vmax.f32 %v9983_v19, %v2205_v56 }
 0x15b   : > { %v1549_v38 = vadd.f32 %v1548_v29, %v1024_v31  ;;  %8314 = vmatpush3.msra.mxu0 %v2089_v30  ;;  %v714_v35 = vld [vmem:[%s9686_s27 + $0x8a0] sm:$0xff] }
 0x15c   : > { %8315 = vmatprep.subr.mxu0 %v2088_v36  ;;  %v1028_v41 = vpop.f32.mrf.mxu0  ;;  %1267 = vmatmul.mubr.f32.gmra.mxu0 %v698_v33  ;;  %v1553_v42 = vpop.f32.mrf.mxu1  ;;  %v10054_v61 = vld [vmem:[#allocation2 + $0x6c] sm:$0xff] }
 0x15d   : > { %1944 = vst.msk [vmem:[#allocation2 + $0x80] sm:$0xff] %vm1927_vm0, %v1549_v38  ;;  %v1029_v43 = vadd.f32 %v9905_v9, %v1028_v41  ;;  %8316 = vmatpush3.msra.mxu0 %v2088_v36  ;;  %1792 = vmatmul.mubr.f32.gmra.mxu1 %v700_v37  ;;  %v10067_v15 = vmax.f32 %v2211_v13, %v10054_v61 }
 0x15e   : > { %v1030_v46 = vpop.f32.mrf.mxu0  ;;  %1271 = vmatprep.mubr.f32.mxu0 %v703_v39  ;;  %v1555_v47 = vpop.f32.mrf.mxu1  ;;  %1796 = vmatprep.mubr.f32.mxu1 %v705_v40  ;;  %v716_v40 = vld [vmem:[%s9686_s27 + $0x8b0] sm:$0xff] }
 0x15f   : > { %v1554_v50 = vadd.f32 %v1553_v42, %v1029_v43  ;;  %v2223_v33 = vrot.slane %v10067_v15, 1  ;;  %v719_v46 = vld [vmem:[%s9686_s27 + $0x8c8] sm:$0xff] }
 0x160   : > { %v1033_v53 = vpop.f32.mrf.mxu0  ;;  %1272 = vmatmul.mubr.f32.gmra.mxu0 %v702_v44  ;;  %v1558_v54 = vpop.f32.mrf.mxu1  ;;  %v10048_v57 = vld [vmem:[#allocation2 + $0x74] sm:$0xff] }
 0x161   : > { %1945 = vst.msk [vmem:[#allocation2 + $0x88] sm:$0xff] %vm1927_vm0, %v1554_v50  ;;  %v1034_v59 = vadd.f32 %v9905_v9, %v1033_v53  ;;  %1797 = vmatmul.mubr.f32.gmra.mxu1 %v704_v48  ;;  %1276 = vmatprep.mubr.f32.mxu0 %v707_v49  ;;  %v10059_v4 = vmax.f32 %v2212_v58, %v10048_v57 }
 0x162   : > { %v1035_v62 = vpop.f32.mrf.mxu0  ;;  %v1560_v63 = vpop.f32.mrf.mxu1  ;;  %1801 = vmatprep.mubr.f32.mxu1 %v709_v51 }
 0x163   : > { %v1559_v5 = vadd.f32 %v1558_v54, %v1034_v59  ;;  %v2224_v23 = vrot.slane %v10059_v4, 1  ;;  %v2239_v53 = vrot.slane %v10059_v4, 2  ;;  %v720_v62 = vld [vmem:[%s9686_s27 + $0x8d0] sm:$0xff]  ;;  %v2238_v63 = vrot.slane %v10067_v15, 2 }
 0x164   : > { %v1038_v10 = vpop.f32.mrf.mxu0  ;;  %1277 = vmatmul.mubr.f32.gmra.mxu0 %v706_v60  ;;  %v1563_v11 = vpop.f32.mrf.mxu1  ;;  %v2210_v12 = vld [vmem:[#allocation2 + $0x84] sm:$0x7]  ;;  %v10064_v14 = vld [vmem:[#allocation2 + $0x7c] sm:$0xff] }
 0x165   : > { %1946 = vst.msk [vmem:[#allocation2 + $0x90] sm:$0xff] %vm1927_vm0, %v1559_v5  ;;  %v1039_v25 = vadd.f32 %v9905_v9, %v1038_v10  ;;  %1802 = vmatmul.mubr.f32.gmra.mxu1 %v708_v0  ;;  %1281 = vmatprep.mubr.f32.mxu0 %v711_v1  ;;  %v2218_v19 = vmax.f32 %v2214_v7, %v2210_v12  ;;  %v722_v10 = vld [vmem:[%s9686_s27 + $0x8e0] sm:$0xff] }
 0x166   : > { %v2217_v17 = vmax.f32 %v2213_v8, %v10064_v14  ;;  %v1040_v18 = vpop.f32.mrf.mxu0  ;;  %v1565_v20 = vpop.f32.mrf.mxu1  ;;  %1806 = vmatprep.mubr.f32.mxu1 %v713_v6  ;;  %v2225_v43 = vsel %vm2060_vm1, %v2223_v33, %v2224_v23  ;;  %v2240_v5 = vsel %vm2076_vm3, %v2238_v63, %v2239_v53  ;;  %v725_v6 = vld [vmem:[%s9686_s27 + $0x8f8] sm:$0xff] }
 0x167   : > { %v1564_v24 = vadd.f32 %v1563_v11, %v1039_v25  ;;  %v2228_v27 = vrot.slane %v2218_v19, 1  ;;  %v2243_v28 = vrot.slane %v2218_v19, 2  ;;  %v2234_v56 = vmax.f32 %v10067_v15, %v2225_v43  ;;  %v724_v15 = vld [vmem:[%s9686_s27 + $0x8f0] sm:$0xff]  ;;  %v727_v25 = vld [vmem:[%s9686_s27 + $0x908] sm:$0xff] }
 0x168   : > { %v2226_v29 = vrot.slane %v2217_v17, 1  ;;  %v1043_v30 = vpop.f32.mrf.mxu0  ;;  %1282 = vmatmul.mubr.f32.gmra.mxu0 %v710_v16  ;;  %v1568_v31 = vpop.f32.mrf.mxu1  ;;  %v2241_v32 = vrot.slane %v2217_v17, 2 }
 0x169   : > { %1947 = vst.msk [vmem:[#allocation2 + $0x98] sm:$0xff] %vm1927_vm0, %v1564_v24  ;;  %v1044_v34 = vadd.f32 %v9905_v9, %v1043_v30  ;;  %1807 = vmatmul.mubr.f32.gmra.mxu1 %v712_v21  ;;  %1286 = vmatprep.mubr.f32.mxu0 %v715_v22  ;;  %v2237_v36 = vmax.f32 %v2218_v19, %v2228_v27  ;;  %v729_v19 = vld [vmem:[%s9686_s27 + $0x918] sm:$0xff]  ;;  %v726_v21 = vld [vmem:[%s9686_s27 + $0x900] sm:$0xff]  ;;  %v728_v24 = vld [vmem:[%s9686_s27 + $0x910] sm:$0xff] }
 0x16a   : > { %v2229_v37 = vsel %vm2060_vm1, %v2226_v29, %v2228_v27  ;;  %v1045_v38 = vpop.f32.mrf.mxu0  ;;  %v1570_v39 = vpop.f32.mrf.mxu1  ;;  %1811 = vmatprep.mubr.f32.mxu1 %v717_v26  ;;  %v2227_v42 = vsel %vm2060_vm1, %v2224_v23, %v2226_v29  ;;  %v2244_v47 = vsel %vm2076_vm3, %v2241_v32, %v2243_v28  ;;  %v2242_v60 = vsel %vm2076_vm3, %v2239_v53, %v2241_v32  ;;  %v731_v26 = vld [vmem:[%s9686_s27 + $0x928] sm:$0xff]  ;;  %v736_v53 = vld [vmem:[%s9686_s27 + $0x950] sm:$0xff] }
 0x16b   : > { %v2236_v41 = vmax.f32 %v2217_v17, %v2229_v37  ;;  %v1569_v44 = vadd.f32 %v1568_v31, %v1044_v34  ;;  %v2252_v45 = vmax.f32 %v2237_v36, %v2243_v28  ;;  %v2235_v48 = vmax.f32 %v10059_v4, %v2227_v42  ;;  %v733_v28 = vld [vmem:[%s9686_s27 + $0x938] sm:$0xff]  ;;  %v2344_v29 = vld [vmem:[#allocation2 + $0x87] sm:$0xff]  ;;  %v732_v38 = vld [vmem:[%s9686_s27 + $0x930] sm:$0xff] }
 0x16c   : > { %v1048_v49 = vpop.f32.mrf.mxu0  ;;  %1287 = vmatmul.mubr.f32.gmra.mxu0 %v714_v35  ;;  %v1573_v50 = vpop.f32.mrf.mxu1  ;;  %v2249_v8 = vmax.f32 %v2234_v56, %v2240_v5  ;;  %v2345_v32 = vld [vmem:[#allocation2 + $0x8f] sm:$0xff]  ;;  %v730_v34 = vld [vmem:[%s9686_s27 + $0x920] sm:$0xff]  ;;  %v737_v42 = vld [vmem:[%s9686_s27 + $0x958] sm:$0xff] }
 0x16d   : > { %v2251_v51 = vmax.f32 %v2236_v41, %v2244_v47  ;;  %1948 = vst.msk [vmem:[#allocation2 + $0xa0] sm:$0xff] %vm1927_vm0, %v1569_v44  ;;  %v1049_v54 = vadd.f32 %v9905_v9, %v1048_v49  ;;  %8320 = vmatprep.subr.msk.mxu1 %vm2099_vm2, %v2252_v45  ;;  %1812 = vmatmul.mubr.f32.gmra.mxu1 %v716_v40  ;;  %v735_v39 = vld [vmem:[%s9686_s27 + $0x948] sm:$0xff] }
 0x16e   : > { %v1050_v58 = vpop.f32.mrf.mxu0  ;;  %8321 = vmatpush3.msk.msra.mxu1 %vm2099_vm2, %v2252_v45  ;;  %1291 = vmatprep.mubr.f32.mxu0 %v719_v46  ;;  %v1575_v59 = vpop.f32.mrf.mxu1  ;;  %v2250_v1 = vmax.f32 %v2235_v48, %v2242_v60  ;;  %v2352_v40 = vmax.f32 %v10054_v61, %v2344_v29  ;;  %v2353_v44 = vmax.f32 %v10048_v57, %v2345_v32 }
 0x16f   : > { %v1574_v0 = vadd.f32 %v1573_v50, %v1049_v54  ;;  %8322 = vmatprep.subr.mxu1 %v2251_v51  ;;  %1816 = vmatprep.mubr.f32.mxu1 %v721_v52  ;;  %v734_v50 = vld [vmem:[%s9686_s27 + $0x940] sm:$0xff]  ;;  %v739_v54 = vld [vmem:[%s9686_s27 + $0x968] sm:$0xff]  ;;  %v741_v59 = vld [vmem:[%s9686_s27 + $0x978] sm:$0xff] }
 0x170   : > { %v1053_v4 = vpop.f32.mrf.mxu0  ;;  %1292 = vmatmul.mubr.f32.gmra.mxu0 %v718_v55  ;;  %8323 = vmatpush3.msra.mxu1 %v2251_v51  ;;  %v1578_v13 = vpop.f32.mrf.mxu1  ;;  %v2346_v43 = vld [vmem:[#allocation2 + $0x97] sm:$0xff]  ;;  %v2343_v55 = vld [vmem:[#allocation2 + $0x84] sm:$0x7] }
 0x171   : > { %1949 = vst.msk [vmem:[#allocation2 + $0xa8] sm:$0xff] %vm1927_vm0, %v1574_v0  ;;  %v1054_v7 = vadd.f32 %v9905_v9, %v1053_v4  ;;  %8324 = vmatprep.subr.mxu1 %v2250_v1  ;;  %1817 = vmatmul.mubr.f32.gmra.mxu1 %v720_v62  ;;  %v2354_v56 = vmax.f32 %v10064_v14, %v2346_v43 }
 0x172   : > { %v1055_v11 = vpop.f32.mrf.mxu0  ;;  %8325 = vmatpush3.msra.mxu1 %v2250_v1  ;;  %1296 = vmatprep.mubr.f32.mxu0 %v723_v3  ;;  %v1580_v12 = vpop.f32.mrf.mxu1 }
 0x173   : > { %v1579_v16 = vadd.f32 %v1578_v13, %v1054_v7  ;;  %8326 = vmatprep.subr.mxu1 %v2249_v8  ;;  %1821 = vmatprep.mubr.f32.mxu1 %v725_v6  ;;  %v10149_v13 = vld [vmem:[%s13268_s2] ss:$0 sm:$0xff]  ;;  %v740_v12 = vld [vmem:[%s9686_s27 + $0x970] sm:$0xff] }
 0x174   : > { %v1058_v17 = vpop.f32.mrf.mxu0  ;;  %1297 = vmatmul.mubr.f32.gmra.mxu0 %v722_v10  ;;  %8327 = vmatpush3.msra.mxu1 %v2249_v8  ;;  %v1583_v18 = vpop.f32.mrf.mxu1  ;;  %v2347_v47 = vld [vmem:[#allocation2 + $0x9f] sm:$0x7] }
 0x175   : > { %1950 = vst.msk [vmem:[#allocation2 + $0xb0] sm:$0xff] %vm1927_vm0, %v1579_v16  ;;  %v1059_v20 = vadd.f32 %v9905_v9, %v1058_v17  ;;  %1822 = vmatmul.mubr.f32.gmra.mxu1 %v724_v15  ;;  %1301 = vmatprep.mubr.f32.mxu0 %v727_v25  ;;  %v2355_v60 = vmax.f32 %v2343_v55, %v2347_v47  ;;  %v738_v6 = vld [vmem:[%s9686_s27 + $0x960] sm:$0xff]  ;;  %v743_v15 = vld [vmem:[%s9686_s27 + $0x988] sm:$0xff]  ;;  %v745_v17 = vld [vmem:[%s9686_s27 + $0x998] sm:$0xff] }
 0x176   : > { %v1060_v22 = vpop.f32.mrf.mxu0  ;;  %v1585_v23 = vpop.f32.mrf.mxu1  ;;  %1826 = vmatprep.mubr.f32.mxu1 %v729_v19  ;;  %v753_v55 = vld [vmem:[%s9686_s27 + $0x9d8] sm:$0xff] }
 0x177   : > { %v1584_v27 = vadd.f32 %v1583_v18, %v1059_v20 }
 0x178   : > { %v1063_v30 = vpop.f32.mrf.mxu0  ;;  %1302 = vmatmul.mubr.f32.gmra.mxu0 %v726_v21  ;;  %v1588_v31 = vpop.f32.mrf.mxu1  ;;  %v10117_v35 = vld [vmem:[#allocation2 + $0xa2] sm:$0xff] }
 0x179   : > { %1951 = vst.msk [vmem:[#allocation2 + $0xb8] sm:$0xff] %vm1927_vm0, %v1584_v27  ;;  %v1064_v33 = vadd.f32 %v9905_v9, %v1063_v30  ;;  %1827 = vmatmul.mubr.f32.gmra.mxu1 %v728_v24  ;;  %1306 = vmatprep.mubr.f32.mxu0 %v731_v26  ;;  %v10127_v49 = vmax.f32 %v2352_v40, %v10117_v35 }
 0x17a   : > { %v1065_v36 = vpop.f32.mrf.mxu0  ;;  %v1590_v37 = vpop.f32.mrf.mxu1  ;;  %1831 = vmatprep.mubr.f32.mxu1 %v733_v28  ;;  %v742_v28 = vld [vmem:[%s9686_s27 + $0x980] sm:$0xff] }
 0x17b   : > { %v1589_v41 = vadd.f32 %v1588_v31, %v1064_v33  ;;  %v2364_v4 = vrot.slane %v10127_v49, 1  ;;  %v2379_v14 = vrot.slane %v10127_v49, 2  ;;  %v744_v33 = vld [vmem:[%s9686_s27 + $0x990] sm:$0xff] }
 0x17c   : > { %v1068_v45 = vpop.f32.mrf.mxu0  ;;  %1307 = vmatmul.mubr.f32.gmra.mxu0 %v730_v34  ;;  %v1593_v46 = vpop.f32.mrf.mxu1  ;;  %v10124_v48 = vld [vmem:[#allocation2 + $0xaa] sm:$0xff] }
 0x17d   : > { %1952 = vst.msk [vmem:[#allocation2 + $0xc0] sm:$0xff] %vm1927_vm0, %v1589_v41  ;;  %v1069_v61 = vadd.f32 %v9905_v9, %v1068_v45  ;;  %1832 = vmatmul.mubr.f32.gmra.mxu1 %v732_v38  ;;  %1311 = vmatprep.mubr.f32.mxu0 %v735_v39  ;;  %v10133_v57 = vmax.f32 %v2353_v44, %v10124_v48  ;;  %v747_v41 = vld [vmem:[%s9686_s27 + $0x9a8] sm:$0xff] }
 0x17e   : > { %v1070_v51 = vpop.f32.mrf.mxu0  ;;  %v1595_v52 = vpop.f32.mrf.mxu1  ;;  %1836 = vmatprep.mubr.f32.mxu1 %v737_v42  ;;  %v749_v42 = vld [vmem:[%s9686_s27 + $0x9b8] sm:$0xff] }
 0x17f   : > { %v1594_v58 = vadd.f32 %v1593_v46, %v1069_v61  ;;  %v2365_v9 = vrot.slane %v10133_v57, 1  ;;  %v2380_v62 = vrot.slane %v10133_v57, 2  ;;  %v746_v61 = vld [vmem:[%s9686_s27 + $0x9a0] sm:$0xff]  ;;  %v748_v52 = vld [vmem:[%s9686_s27 + $0x9b0] sm:$0xff] }
 0x180   : > { %v1073_v63 = vpop.f32.mrf.mxu0  ;;  %1312 = vmatmul.mubr.f32.gmra.mxu0 %v734_v50  ;;  %v1598_v0 = vpop.f32.mrf.mxu1  ;;  %v2351_v1 = vld [vmem:[#allocation2 + $0xba] sm:$0x7]  ;;  %v10141_v3 = vld [vmem:[#allocation2 + $0xb2] sm:$0xff] }
 0x181   : > { %1953 = vst.msk [vmem:[#allocation2 + $0xc8] sm:$0xff] %vm1927_vm0, %v1594_v58  ;;  %v1074_v5 = vadd.f32 %v10149_v13, %v1073_v63  ;;  %1837 = vmatmul.mubr.f32.gmra.mxu1 %v736_v53  ;;  %1316 = vmatprep.mubr.f32.mxu0 %v739_v54  ;;  %v2359_v7 = vmax.f32 %v2355_v60, %v2351_v1  ;;  %v751_v53 = vld [vmem:[%s9686_s27 + $0x9c8] sm:$0xff]  ;;  %v750_v60 = vld [vmem:[%s9686_s27 + $0x9c0] sm:$0xff]  ;;  %v752_v63 = vld [vmem:[%s9686_s27 + $0x9d0] sm:$0xff] }
 0x182   : > { %v2358_v8 = vmax.f32 %v2354_v56, %v10141_v3  ;;  %v1075_v10 = vpop.f32.mrf.mxu0  ;;  %v1600_v11 = vpop.f32.mrf.mxu1  ;;  %1841 = vmatprep.mubr.f32.mxu1 %v741_v59  ;;  %v2366_v25 = vsel %vm2060_vm1, %v2364_v4, %v2365_v9  ;;  %v2381_v16 = vsel %vm2076_vm3, %v2379_v14, %v2380_v62  ;;  %v757_v4 = vld [vmem:[%s9686_s27 + $0x9f8] sm:$0xff] }
 0x183   : > { %v1599_v19 = vadd.f32 %v1598_v0, %v1074_v5  ;;  %v2369_v18 = vrot.slane %v2359_v7, 1  ;;  %v2384_v20 = vrot.slane %v2359_v7, 2  ;;  %v2375_v26 = vmax.f32 %v10127_v49, %v2366_v25  ;;  %v755_v0 = vld [vmem:[%s9686_s27 + $0x9e8] sm:$0xff]  ;;  %v756_v11 = vld [vmem:[%s9686_s27 + $0x9f0] sm:$0xff]  ;;  %v761_v25 = vld [vmem:[%s9686_s27 + $0xa18] sm:$0xff] }
 0x184   : > { %v2367_v21 = vrot.slane %v2358_v8, 1  ;;  %v1078_v22 = vpop.f32.mrf.mxu0  ;;  %1317 = vmatmul.mubr.f32.gmra.mxu0 %v738_v6  ;;  %v1603_v23 = vpop.f32.mrf.mxu1  ;;  %v2382_v24 = vrot.slane %v2358_v8, 2 }
 0x185   : > { %1954 = vst.msk [vmem:[#allocation2 + $0xd0] sm:$0xff] %vm1927_vm0, %v1599_v19  ;;  %v1079_v27 = vadd.f32 %v10149_v13, %v1078_v22  ;;  %1842 = vmatmul.mubr.f32.gmra.mxu1 %v740_v12  ;;  %1321 = vmatprep.mubr.f32.mxu0 %v743_v15  ;;  %v2378_v29 = vmax.f32 %v2359_v7, %v2369_v18  ;;  %v754_v7 = vld [vmem:[%s9686_s27 + $0x9e0] sm:$0xff]  ;;  %v759_v12 = vld [vmem:[%s9686_s27 + $0xa08] sm:$0xff]  ;;  %v760_v22 = vld [vmem:[%s9686_s27 + $0xa10] sm:$0xff] }
 0x186   : > { %v2370_v30 = vsel %vm2060_vm1, %v2367_v21, %v2369_v18  ;;  %v1080_v31 = vpop.f32.mrf.mxu0  ;;  %v1605_v32 = vpop.f32.mrf.mxu1  ;;  %1846 = vmatprep.mubr.f32.mxu1 %v745_v17  ;;  %v2385_v36 = vsel %vm2076_vm3, %v2382_v24, %v2384_v20  ;;  %v2368_v37 = vsel %vm2060_vm1, %v2365_v9, %v2367_v21  ;;  %v2383_v38 = vsel %vm2076_vm3, %v2380_v62, %v2382_v24  ;;  %v758_v18 = vld [vmem:[%s9686_s27 + $0xa00] sm:$0xff] }
 0x187   : > { %v2377_v34 = vmax.f32 %v2358_v8, %v2370_v30  ;;  %v1604_v39 = vadd.f32 %v1603_v23, %v1079_v27  ;;  %v10168_v40 = vmax.f32 %v2378_v29, %v2384_v20  ;;  %v2376_v43 = vmax.f32 %v10133_v57, %v2368_v37  ;;  %v763_v23 = vld [vmem:[%s9686_s27 + $0xa28] sm:$0xff]  ;;  %v762_v31 = vld [vmem:[%s9686_s27 + $0xa20] sm:$0xff]  ;;  %v2484_v37 = vld [vmem:[#allocation2 + $0xba] sm:$0x7] }
 0x188   : > { %v10173_v44 = vmax.f32 %v2375_v26, %v2381_v16  ;;  %v1083_v45 = vpop.f32.mrf.mxu0  ;;  %1322 = vmatmul.mubr.f32.gmra.mxu0 %v742_v28  ;;  %v1608_v46 = vpop.f32.mrf.mxu1  ;;  %v765_v26 = vld [vmem:[%s9686_s27 + $0xa38] sm:$0xff] }
 0x189   : > { %v10175_v47 = vmax.f32 %v2377_v34, %v2385_v36  ;;  %1955 = vst.msk [vmem:[#allocation2 + $0xd8] sm:$0xff] %vm1927_vm0, %v1604_v39  ;;  %v1084_v49 = vadd.f32 %v10149_v13, %v1083_v45  ;;  %8331 = vmatprep.subr.msk.mxu0 %vm2099_vm2, %v10168_v40  ;;  %1847 = vmatmul.mubr.f32.gmra.mxu1 %v744_v33  ;;  %v764_v34 = vld [vmem:[%s9686_s27 + $0xa30] sm:$0xff]  ;;  %v767_v36 = vld [vmem:[%s9686_s27 + $0xa48] sm:$0xff]  ;;  %v769_v39 = vld [vmem:[%s9686_s27 + $0xa58] sm:$0xff] }
 0x18a   : > { %v10182_v50 = vmax.f32 %v2376_v43, %v2383_v38  ;;  %v1085_v57 = vpop.f32.mrf.mxu0  ;;  %1326 = vmatprep.mubr.f32.mxu0 %v747_v41  ;;  %v1610_v51 = vpop.f32.mrf.mxu1  ;;  %1851 = vmatprep.mubr.f32.mxu1 %v749_v42 }
 0x18b   : > { %v1609_v54 = vadd.f32 %v1608_v46, %v1084_v49  ;;  %v766_v49 = vld [vmem:[%s9686_s27 + $0xa40] sm:$0xff] }
 0x18c   : > { %v1088_v56 = vpop.f32.mrf.mxu0  ;;  %1327 = vmatmul.mubr.f32.gmra.mxu0 %v746_v61  ;;  %v1613_v58 = vpop.f32.mrf.mxu1  ;;  %v2488_v29 = vld [vmem:[#allocation2 + $0xd5] sm:$0x7] }
 0x18d   : > { %1956 = vst.msk [vmem:[#allocation2 + $0xe0] sm:$0xff] %vm1927_vm0, %v1609_v54  ;;  %v1089_v59 = vadd.f32 %v10149_v13, %v1088_v56  ;;  %1852 = vmatmul.mubr.f32.gmra.mxu1 %v748_v52  ;;  %1331 = vmatprep.mubr.f32.mxu0 %v751_v53  ;;  %v2496_v41 = vmax.f32 %v2484_v37, %v2488_v29  ;;  %v768_v52 = vld [vmem:[%s9686_s27 + $0xa50] sm:$0xff]  ;;  %v771_v53 = vld [vmem:[%s9686_s27 + $0xa68] sm:$0xff] }
 0x18e   : > { %v1090_v9 = vpop.f32.mrf.mxu0  ;;  %v1615_v62 = vpop.f32.mrf.mxu1  ;;  %1856 = vmatprep.mubr.f32.mxu1 %v753_v55  ;;  %v773_v55 = vld [vmem:[%s9686_s27 + $0xa78] sm:$0xff] }
 0x18f   : > { %v1614_v1 = vadd.f32 %v1613_v58, %v1089_v59  ;;  %v770_v9 = vld [vmem:[%s9686_s27 + $0xa60] sm:$0xff] }
 0x190   : > { %v1093_v14 = vpop.f32.mrf.mxu0  ;;  %1332 = vmatmul.mubr.f32.gmra.mxu0 %v750_v60  ;;  %v1618_v5 = vpop.f32.mrf.mxu1 }
 0x191   : > { %1957 = vst.msk [vmem:[#allocation2 + $0xe8] sm:$0xff] %vm1927_vm0, %v1614_v1  ;;  %v1094_v6 = vadd.f32 %v10149_v13, %v1093_v14  ;;  %1857 = vmatmul.mubr.f32.gmra.mxu1 %v752_v63  ;;  %1336 = vmatprep.mubr.f32.mxu0 %v755_v0  ;;  %v775_v14 = vld [vmem:[%s9686_s27 + $0xa88] sm:$0xff] }
 0x192   : > { %v1095_v8 = vpop.f32.mrf.mxu0  ;;  %v1620_v10 = vpop.f32.mrf.mxu1  ;;  %1861 = vmatprep.mubr.f32.mxu1 %v757_v4  ;;  %v772_v4 = vld [vmem:[%s9686_s27 + $0xa70] sm:$0xff] }
 0x193   : > { %v1619_v15 = vadd.f32 %v1618_v5, %v1094_v6  ;;  %v777_v6 = vld [vmem:[%s9686_s27 + $0xa98] sm:$0xff] }
 0x194   : > { %v1098_v16 = vpop.f32.mrf.mxu0  ;;  %1337 = vmatmul.mubr.f32.gmra.mxu0 %v754_v7  ;;  %v1623_v19 = vpop.f32.mrf.mxu1 }
 0x195   : > { %1958 = vst.msk [vmem:[#allocation2 + $0xf0] sm:$0xff] %vm1927_vm0, %v1619_v15  ;;  %v1099_v17 = vadd.f32 %v10149_v13, %v1098_v16  ;;  %1862 = vmatmul.mubr.f32.gmra.mxu1 %v756_v11  ;;  %1341 = vmatprep.mubr.f32.mxu0 %v759_v12  ;;  %v774_v12 = vld [vmem:[%s9686_s27 + $0xa80] sm:$0xff]  ;;  %v776_v16 = vld [vmem:[%s9686_s27 + $0xa90] sm:$0xff] }
 0x196   : > { %v1100_v20 = vpop.f32.mrf.mxu0  ;;  %v1625_v21 = vpop.f32.mrf.mxu1  ;;  %1866 = vmatprep.mubr.f32.mxu1 %v761_v25 }
 0x197   : > { %v1624_v24 = vadd.f32 %v1623_v19, %v1099_v17  ;;  %v779_v19 = vld [vmem:[%s9686_s27 + $0xaa8] sm:$0xff] }
 0x198   : > { %v1103_v27 = vpop.f32.mrf.mxu0  ;;  %1342 = vmatmul.mubr.f32.gmra.mxu0 %v758_v18  ;;  %v1628_v28 = vpop.f32.mrf.mxu1  ;;  %v781_v18 = vld [vmem:[%s9686_s27 + $0xab8] sm:$0xff] }
 0x199   : > { %1959 = vst.msk [vmem:[#allocation2 + $0xf8] sm:$0xff] %vm1927_vm0, %v1624_v24  ;;  %v1104_v30 = vadd.f32 %v10149_v13, %v1103_v27  ;;  %1867 = vmatmul.mubr.f32.gmra.mxu1 %v760_v22  ;;  %1346 = vmatprep.mubr.f32.mxu0 %v763_v23  ;;  %v778_v23 = vld [vmem:[%s9686_s27 + $0xaa0] sm:$0xff]  ;;  %v783_v27 = vld [vmem:[%s9686_s27 + $0xac8] sm:$0xff] }
 0x19a   : > { %v1105_v32 = vpop.f32.mrf.mxu0  ;;  %v1630_v33 = vpop.f32.mrf.mxu1  ;;  %1871 = vmatprep.mubr.f32.mxu1 %v765_v26 }
 0x19b   : > { %v1629_v38 = vadd.f32 %v1628_v28, %v1104_v30  ;;  %v780_v28 = vld [vmem:[%s9686_s27 + $0xab0] sm:$0xff]  ;;  %v785_v30 = vld [vmem:[%s9686_s27 + $0xad8] sm:$0xff] }
 0x19c   : > { %v1108_v42 = vpop.f32.mrf.mxu0  ;;  %1347 = vmatmul.mubr.f32.gmra.mxu0 %v762_v31  ;;  %v1633_v43 = vpop.f32.mrf.mxu1  ;;  %v2492_v45 = vld [vmem:[#allocation2 + $0xf0] sm:$0x7] }
 0x19d   : > { %1960 = vst.msk [vmem:[#allocation2 + $0x100] sm:$0xff] %vm1927_vm0, %v1629_v38  ;;  %v1109_v46 = vadd.f32 %v10149_v13, %v1108_v42  ;;  %1872 = vmatmul.mubr.f32.gmra.mxu1 %v764_v34  ;;  %1351 = vmatprep.mubr.f32.mxu0 %v767_v36  ;;  %v10214_v61 = vmax.f32 %v2496_v41, %v2492_v45  ;;  %v782_v34 = vld [vmem:[%s9686_s27 + $0xac0] sm:$0xff]  ;;  %v787_v38 = vld [vmem:[%s9686_s27 + $0xae8] sm:$0xff]  ;;  %v789_v42 = vld [vmem:[%s9686_s27 + $0xaf8] sm:$0xff] }
 0x19e   : > { %v1110_v57 = vpop.f32.mrf.mxu0  ;;  %v1635_v51 = vpop.f32.mrf.mxu1  ;;  %1876 = vmatprep.mubr.f32.mxu1 %v769_v39  ;;  %v784_v39 = vld [vmem:[%s9686_s27 + $0xad0] sm:$0xff] }
 0x19f   : > { %v1634_v54 = vadd.f32 %v1633_v43, %v1109_v46  ;;  %v2510_v56 = vrot.slane %v10214_v61, 1  ;;  %v2525_v63 = vrot.slane %v10214_v61, 2  ;;  %v2021_v46 = vlaneseq  ;;  %v786_v57 = vld [vmem:[%s9686_s27 + $0xae0] sm:$0xff] }
 0x1a0   : > { %v1113_v58 = vpop.f32.mrf.mxu0  ;;  %1352 = vmatmul.mubr.f32.gmra.mxu0 %v766_v49  ;;  %v1638_v59 = vpop.f32.mrf.mxu1 }
 0x1a1   : > { %1961 = vst.msk [vmem:[#allocation2 + $0x108] sm:$0xff] %vm1927_vm0, %v1634_v54  ;;  %v1114_v60 = vadd.f32 %v10149_v13, %v1113_v58  ;;  %1877 = vmatmul.mubr.f32.gmra.mxu1 %v768_v52  ;;  %1356 = vmatprep.mubr.f32.mxu0 %v771_v53  ;;  %v2519_v62 = vmax.f32 %v10214_v61, %v2510_v56  ;;  %v791_v53 = vld [vmem:[%s9686_s27 + $0xb08] sm:$0xff]  ;;  %v788_v54 = vld [vmem:[%s9686_s27 + $0xaf0] sm:$0xff]  ;;  %v793_v58 = vld [vmem:[%s9686_s27 + $0xb18] sm:$0xff] }
 0x1a2   : > { %v1115_v0 = vpop.f32.mrf.mxu0  ;;  %v1640_v1 = vpop.f32.mrf.mxu1  ;;  %1881 = vmatprep.mubr.f32.mxu1 %v773_v55 }
 0x1a3   : > { %v1639_v5 = vadd.f32 %v1638_v59, %v1114_v60  ;;  %v10232_v7 = vmax.f32 %v2519_v62, %v2525_v63  ;;  %v790_v0 = vld [vmem:[%s9686_s27 + $0xb00] sm:$0xff] }
 0x1a4   : > { %v1118_v8 = vpop.f32.mrf.mxu0  ;;  %1357 = vmatmul.mubr.f32.gmra.mxu0 %v770_v9  ;;  %v1643_v10 = vpop.f32.mrf.mxu1  ;;  %v10260_v9 = vshrl.u32 %v2021_v46, 7 }
 0x1a5   : > { %1962 = vst.msk [vmem:[#allocation2 + $0x110] sm:$0xff] %vm1927_vm0, %v1639_v5  ;;  %v1119_v11 = vadd.f32 %v10149_v13, %v1118_v8  ;;  %1882 = vmatmul.mubr.f32.gmra.mxu1 %v772_v4  ;;  %1361 = vmatprep.mubr.f32.mxu0 %v775_v14  ;;  %v795_v14 = vld [vmem:[%s9686_s27 + $0xb28] sm:$0xff]  ;;  %v792_v5 = vld [vmem:[%s9686_s27 + $0xb10] sm:$0xff]  ;;  %v797_v8 = vld [vmem:[%s9686_s27 + $0xb38] sm:$0xff] }
 0x1a6   : > { %v1120_v15 = vpop.f32.mrf.mxu0  ;;  %v1645_v25 = vpop.f32.mrf.mxu1  ;;  %1886 = vmatprep.mubr.f32.mxu1 %v777_v6  ;;  %8342 = vmatprep.subr.msk.mxu1 %vm2099_vm2, %v10232_v7 }
 0x1a7   : > { %v1644_v17 = vadd.f32 %v1643_v10, %v1119_v11  ;;  %v2487_v10 = vld [vmem:[#allocation2 + $0xcd] sm:$0xff]  ;;  %v2486_v11 = vld [vmem:[#allocation2 + $0xc5] sm:$0xff] }
 0x1a8   : > { %v1123_v20 = vpop.f32.mrf.mxu0  ;;  %1362 = vmatmul.mubr.f32.gmra.mxu0 %v774_v12  ;;  %v1648_v21 = vpop.f32.mrf.mxu1  ;;  %v794_v25 = vld [vmem:[%s9686_s27 + $0xb20] sm:$0xff] }
 0x1a9   : > { %1963 = vst.msk [vmem:[#allocation2 + $0x118] sm:$0xff] %vm1927_vm0, %v1644_v17  ;;  %v1124_v22 = vadd.f32 %v10149_v13, %v1123_v20  ;;  %1887 = vmatmul.mubr.f32.gmra.mxu1 %v776_v16  ;;  %1366 = vmatprep.mubr.f32.mxu0 %v779_v19  ;;  %v10269_v16 = vand.u32 127, %v2021_v46  ;;  %v10272_v19 = vmul.u32 2, %v10260_v9  ;;  %v10277_v20 = vld [vmem:[#allocation2 + $0xe8] sm:$0xff]  ;;  %v800_v46 = vld [vmem:[%s9686_s27 + $0xb50] sm:$0xff] }
 0x1aa   : > { %v1125_v24 = vpop.f32.mrf.mxu0  ;;  %v1650_v26 = vpop.f32.mrf.mxu1  ;;  %1891 = vmatprep.mubr.f32.mxu1 %v781_v18  ;;  %v2025_v18 = vadd.s32 8, %v10260_v9 }
 0x1ab   : > { %v1649_v29 = vadd.f32 %v1648_v21, %v1124_v22  ;;  %v10279_v21 = vld [vmem:[#allocation2 + $0xe0] sm:$0xff]  ;;  %v799_v26 = vld [vmem:[%s9686_s27 + $0xb48] sm:$0xff]  ;;  %vm2028_vm4 = vcmp.eq.s32.totalorder %v10269_v16, %v10272_v19  ;;  %vm5492_vm15 = vcmp.gt.s32.totalorder %v10272_v19, 0 }
 0x1ac   : > { %v1128_v31 = vpop.f32.mrf.mxu0  ;;  %1367 = vmatmul.mubr.f32.gmra.mxu0 %v778_v23  ;;  %v1653_v32 = vpop.f32.mrf.mxu1  ;;  %v2485_v22 = vld [vmem:[#allocation2 + $0xbd] sm:$0xff] }
 0x1ad   : > { %1964 = vst.msk [vmem:[#allocation2 + $0x120] sm:$0xff] %vm1927_vm0, %v1649_v29  ;;  %v1129_v33 = vadd.f32 %v10149_v13, %v1128_v31  ;;  %1371 = vmatprep.mubr.f32.mxu0 %v783_v27  ;;  %1892 = vmatmul.mubr.f32.gmra.mxu1 %v780_v28  ;;  %v796_v27 = vld [vmem:[%s9686_s27 + $0xb30] sm:$0xff]  ;;  %v2495_v28 = vmax.f32 %v10141_v3, %v2487_v10  ;;  %v801_v31 = vld [vmem:[%s9686_s27 + $0xb58] sm:$0xff] }
 0x1ae   : > { %v1130_v36 = vpop.f32.mrf.mxu0  ;;  %v1655_v37 = vpop.f32.mrf.mxu1  ;;  %1896 = vmatprep.mubr.f32.mxu1 %v785_v30  ;;  %v2494_v29 = vmax.f32 %v10124_v48, %v2486_v11  ;;  %v2493_v48 = vmax.f32 %v10117_v35, %v2485_v22 }
 0x1af   : > { %v1654_v41 = vadd.f32 %v1653_v32, %v1129_v33  ;;  %v10286_v32 = vld [vmem:[#allocation2 + $0xd8] sm:$0xff]  ;;  %v10291_v36 = vmax.f32 %v2495_v28, %v10277_v20 }
 0x1b0   : > { %v1133_v43 = vpop.f32.mrf.mxu0  ;;  %1372 = vmatmul.mubr.f32.gmra.mxu0 %v782_v34  ;;  %v1658_v45 = vpop.f32.mrf.mxu1  ;;  %v10294_v37 = vmax.f32 %v2494_v29, %v10279_v21  ;;  %v10343_v29 = vld [vmem:[#allocation2 + $0x10e] sm:$0xff] }
 0x1b1   : > { %1965 = vst.msk [vmem:[#allocation2 + $0x128] sm:$0xff] %vm1927_vm0, %v1654_v41  ;;  %v1134_v49 = vadd.f32 %v10149_v13, %v1133_v43  ;;  %1376 = vmatprep.mubr.f32.mxu0 %v787_v38  ;;  %1897 = vmatmul.mubr.f32.gmra.mxu1 %v784_v39  ;;  %v798_v38 = vld [vmem:[%s9686_s27 + $0xb40] sm:$0xff]  ;;  %v2027_v39 = vmul.u32 2, %v2025_v18 }
 0x1b2   : > { %v1135_v51 = vpop.f32.mrf.mxu0  ;;  %v1660_v52 = vpop.f32.mrf.mxu1  ;;  %1901 = vmatprep.mubr.f32.mxu1 %v789_v42  ;;  %v2628_v41 = vld [vmem:[#allocation2 + $0x103] sm:$0xff] }
 0x1b3   : > { %v1659_v55 = vadd.f32 %v1658_v45, %v1134_v49  ;;  %v803_v45 = vld [vmem:[%s9686_s27 + $0xb68] sm:$0x1]  ;;  %v10303_v49 = vmax.f32 %v2493_v48, %v10286_v32  ;;  %v10309_v51 = vsel %vm2028_vm4, 1.0, %v9319_v2  ;;  %v805_v52 = vld [vmem:[%s9686_s27 + $0xb78] sm:$0x1]  ;;  %vm10321_vm6 = vcmp.eq.s32.totalorder %v10269_v16, %v2027_v39 }
 0x1b4   : > { %v1138_v59 = vpop.f32.mrf.mxu0  ;;  %1377 = vmatmul.mubr.f32.gmra.mxu0 %v786_v57  ;;  %v1663_v60 = vpop.f32.mrf.mxu1  ;;  %v2629_v57 = vld [vmem:[#allocation2 + $0x10b] sm:$0x7] }
 0x1b5   : > { %1966 = vst.msk [vmem:[#allocation2 + $0x130] sm:$0xff] %vm1927_vm0, %v1659_v55  ;;  %v1139_v62 = vadd.f32 %v10149_v13, %v1138_v59  ;;  %1381 = vmatprep.mubr.f32.mxu0 %v791_v53  ;;  %1902 = vmatmul.mubr.f32.gmra.mxu1 %v788_v54  ;;  %v10312_v53 = vld [vmem:[#allocation2 + $0x11e] sm:$0xff]  ;;  %v2508_v59 = vrot.slane %v10291_v36, 1 }
 0x1b6   : > { %v1140_v1 = vpop.f32.mrf.mxu0  ;;  %v1665_v4 = vpop.f32.mrf.mxu1  ;;  %1906 = vmatprep.mubr.f32.mxu1 %v793_v58  ;;  %v2627_v54 = vld [vmem:[#allocation2 + $0xfb] sm:$0xff] }
 0x1b7   : > { %v1664_v6 = vadd.f32 %v1663_v60, %v1139_v62  ;;  %v2506_v60 = vrot.slane %v10294_v37, 1  ;;  %v2625_v62 = vld [vmem:[#allocation2 + $0xf0] sm:$0x7]  ;;  %v2636_v1 = vmax.f32 %v10277_v20, %v2628_v41  ;;  %v2635_v18 = vmax.f32 %v10279_v21, %v2627_v54  ;;  %v2626_v20 = vld [vmem:[#allocation2 + $0xf3] sm:$0xff] }
 0x1b8   : > { %v1143_v12 = vpop.f32.mrf.mxu0  ;;  %1382 = vmatmul.mubr.f32.gmra.mxu0 %v790_v0  ;;  %v1668_v15 = vpop.f32.mrf.mxu1  ;;  %v2633_v0 = vld [vmem:[#allocation2 + $0x126] sm:$0x7] }
 0x1b9   : > { %1967 = vst.msk [vmem:[#allocation2 + $0x138] sm:$0xff] %vm1927_vm0, %v1664_v6  ;;  %v1144_v17 = vadd.f32 %v10149_v13, %v1143_v12  ;;  %1386 = vmatprep.mubr.f32.mxu0 %v795_v14  ;;  %1907 = vmatmul.mubr.f32.gmra.mxu1 %v792_v5  ;;  %v802_v14 = vld [vmem:[%s9686_s27 + $0xb60] sm:$0x1]  ;;  %v2637_v6 = vmax.f32 %v2625_v62, %v2629_v57  ;;  %v804_v12 = vld [vmem:[%s9686_s27 + $0xb70] sm:$0x1]  ;;  %s13281_s27 = smov 64  }
 0x1ba   : > { %v1145_v23 = vpop.f32.mrf.mxu0  ;;  %v1670_v24 = vpop.f32.mrf.mxu1  ;;  %1911 = vmatprep.mubr.f32.mxu1 %v797_v8  ;;  %v10325_v8 = vld [vmem:[#allocation2 + $0x116] sm:$0xff] }
 0x1bb   : > { %v1669_v30 = vadd.f32 %v1668_v15, %v1144_v17  ;;  %v2511_v15 = vsel %vm2060_vm1, %v2508_v59, %v2510_v56  ;;  %v10333_v17 = vmax.f32 %v2636_v1, %v10312_v53  ;;  %v10336_v23 = vmax.f32 %v2637_v6, %v2633_v0 }
 0x1bc   : > { %v1148_v33 = vpop.f32.mrf.mxu0  ;;  %1387 = vmatmul.mubr.f32.gmra.mxu0 %v794_v25  ;;  %v1673_v34 = vpop.f32.mrf.mxu1  ;;  %v2505_v25 = vrot.slane %v10303_v49, 1  ;;  %v10341_v56 = vmax.f32 %v2635_v18, %v10325_v8  ;;  %v2767_v1 = vld [vmem:[#allocation2 + $0x129] sm:$0xff] }
 0x1bd   : > { %1968 = vst.msk [vmem:[#allocation2 + $0x140] sm:$0xff] %vm1927_vm0, %v1669_v30  ;;  %v1149_v3 = vadd.f32 %v10149_v13, %v1148_v33  ;;  %1391 = vmatprep.mubr.f32.mxu0 %v799_v26  ;;  %1912 = vmatmul.mubr.f32.gmra.mxu1 %v796_v27  ;;  %v2509_v27 = vsel %vm2060_vm1, %v2506_v60, %v2508_v59  ;;  %v10352_v30 = vsel %vm10321_vm6, 1.0, %v9319_v2  ;;  %v2649_v39 = vrot.slane %v10333_v17, 1 }
 0x1be   : > { %v1150_v42 = vpop.f32.mrf.mxu0  ;;  %v1675_v43 = vpop.f32.mrf.mxu1  ;;  %1916 = vmatprep.mubr.f32.mxu1 %v801_v31  ;;  %v2507_v28 = vsel %vm2060_vm1, %v2505_v25, %v2506_v60  ;;  %v2518_v31 = vmax.f32 %v10291_v36, %v2511_v15  ;;  %v2634_v33 = vmax.f32 %v10286_v32, %v2626_v20  ;;  %v2666_v6 = vrot.slane %v10336_v23, 2 }
 0x1bf   : > { %v1674_v35 = vadd.f32 %v1673_v34, %v1149_v3  ;;  %v2523_v3 = vrot.slane %v10291_v36, 2  ;;  %v2517_v42 = vmax.f32 %v10294_v37, %v2509_v27  ;;  %v2651_v43 = vrot.slane %v10336_v23, 1 }
 0x1c0   : > { %v1153_v55 = vpop.f32.mrf.mxu0  ;;  %1392 = vmatmul.mubr.f32.gmra.mxu0 %v798_v38  ;;  %v1678_v58 = vpop.f32.mrf.mxu1  ;;  %v2521_v38 = vrot.slane %v10294_v37, 2  ;;  %v2516_v57 = vmax.f32 %v10303_v49, %v2507_v28  ;;  %v2647_v37 = vrot.slane %v10341_v56, 1  ;;  %v2768_v61 = vld [vmem:[#allocation2 + $0x131] sm:$0xff]  ;;  %v2775_v27 = vmax.f32 %v10343_v29, %v2767_v1 }
 0x1c1   : > { %1969 = vst.msk [vmem:[#allocation2 + $0x148] sm:$0xff] %vm1927_vm0, %v1674_v35  ;;  %v1154_v4 = vadd.f32 %v10149_v13, %v1153_v55  ;;  %1396 = vmatprep.mubr.f32.mxu0 %v803_v45  ;;  %1917 = vmatmul.mubr.f32.gmra.mxu1 %v800_v46  ;;  %v10364_v45 = vmax.f32 %v2634_v33, %v10343_v29  ;;  %v2520_v35 = vrot.slane %v10303_v49, 2 }
 0x1c2   : > { %v1155_v10 = vpop.f32.mrf.mxu0  ;;  %v1680_v11 = vpop.f32.mrf.mxu1  ;;  %1921 = vmatprep.mubr.f32.mxu1 %v805_v52  ;;  %v2526_v36 = vsel %vm2076_vm3, %v2523_v3, %v2525_v63  ;;  %v2524_v49 = vsel %vm2076_vm3, %v2521_v38, %v2523_v3  ;;  %v10386_v59 = vsel %vm2060_vm1, %v2647_v37, %v2649_v39  ;;  %v2652_v62 = vsel %vm2060_vm1, %v2649_v39, %v2651_v43 }
 0x1c3   : > { %v1679_v22 = vadd.f32 %v1678_v58, %v1154_v4  ;;  %v2533_v54 = vmax.f32 %v2518_v31, %v2526_v36  ;;  %v2522_v58 = vsel %vm2076_vm3, %v2520_v35, %v2521_v38  ;;  %v2532_v60 = vmax.f32 %v2517_v42, %v2524_v49 }
 0x1c4   : > { %v1158_v24 = vpop.f32.mrf.mxu0  ;;  %1397 = vmatmul.mubr.f32.gmra.mxu0 %v802_v14  ;;  %v1683_v26 = vpop.f32.mrf.mxu1  ;;  %v2646_v0 = vrot.slane %v10364_v45, 1  ;;  %v2531_v14 = vmax.f32 %v2516_v57, %v2522_v58  ;;  %v2660_v5 = vmax.f32 %v10336_v23, %v2651_v43  ;;  %v2770_v10 = vld [vmem:[#allocation2 + $0x141] sm:$0x7]  ;;  %v2769_v11 = vld [vmem:[#allocation2 + $0x139] sm:$0xff]  ;;  %v2658_v25 = vmax.f32 %v10341_v56, %v10386_v59 }
 0x1c5   : > { %1970 = vst.msk [vmem:[#allocation2 + $0x150] sm:$0xff] %vm1927_vm0, %v1679_v22  ;;  %v1159_v21 = vadd.f32 %v10149_v13, %v1158_v24  ;;  %8317 = vmatprep.mubr.msk.f32.mxu0 %vm2092_vm5, %v10309_v51  ;;  %1922 = vmatmul.mubr.f32.gmra.mxu1 %v804_v12  ;;  %v2776_v12 = vmax.f32 %v10325_v8, %v2768_v61  ;;  %v2664_v24 = vrot.slane %v10333_v17, 2  ;;  %v2662_v3 = vrot.slane %v10341_v56, 2 }
 0x1c6   : > { %v1160_v34 = vpop.f32.mrf.mxu0  ;;  %v1685_v48 = vpop.f32.mrf.mxu1  ;;  %8328 = vmatprep.mubr.msk.f32.mxu1 %vm2092_vm5, %v10309_v51  ;;  %v10403_v18 = vsel %vm2060_vm1, %v2646_v0, %v2647_v37  ;;  %v2659_v8 = vmax.f32 %v10333_v17, %v2652_v62  ;;  %v2777_v31 = vmax.f32 %v10312_v53, %v2769_v11  ;;  %v2675_v17 = vmax.f32 %v2660_v5, %v2666_v6 }
 0x1c7   : > { %v1684_v41 = vadd.f32 %v1683_v26, %v1159_v21  ;;  %v2766_v26 = vld [vmem:[#allocation2 + $0x126] sm:$0x7]  ;;  %v2667_v48 = vsel %vm2076_vm3, %v2664_v24, %v2666_v6  ;;  %v2661_v39 = vrot.slane %v10364_v45, 2  ;;  %v2657_v36 = vmax.f32 %v10364_v45, %v10403_v18 }
 0x1c8   : > { %v1163_v32 = vpop.f32.mrf.mxu0  ;;  %8318 = vmatmul.mubr.msk.f32.vlgmr.msra.gmra.mxu0 %vm2092_vm5, %v10352_v30  ;;  %v1688_v46 = vpop.f32.mrf.mxu1  ;;  %v10405_v20 = vld [vmem:[#allocation2 + $0x144] sm:$0xff]  ;;  %v2778_v21 = vmax.f32 %v2766_v26, %v2770_v10 }
 0x1c9   : > { %1971 = vst.msk [vmem:[#allocation2 + $0x158] sm:$0xff] %vm1927_vm0, %v1684_v41  ;;  %v1164_v52 = vadd.f32 %v10149_v13, %v1163_v32  ;;  %8332 = vmatpush3.msk.msra.mxu0 %vm2099_vm2, %v10168_v40  ;;  %8329 = vmatmul.mubr.msk.f32.vlgmr.msra.gmra.mxu1 %vm2092_vm5, %v10352_v30  ;;  %v2674_v32 = vmax.f32 %v2659_v8, %v2667_v48 }
 0x1ca   : > { %8333 = vmatprep.subr.mxu0 %v10175_v47  ;;  %v1165_v63 = vpop.f32.mrf.mxu0  ;;  %v1690_v55 = vpop.f32.mrf.mxu1  ;;  %8343 = vmatpush3.msk.msra.mxu1 %vm2099_vm2, %v10232_v7  ;;  %v2663_v49 = vsel %vm2076_vm3, %v2661_v39, %v2662_v3 }
 0x1cb   : > { %v1689_v40 = vadd.f32 %v1688_v46, %v1164_v52  ;;  %8334 = vmatpush3.msra.mxu0 %v10175_v47  ;;  %8344 = vmatprep.subr.mxu1 %v2533_v54  ;;  %v2665_v46 = vsel %vm2076_vm3, %v2662_v3, %v2664_v24 }
 0x1cc   : > { %8335 = vmatprep.subr.mxu0 %v10182_v50  ;;  %v1168_v7 = vpop.f32.mrf.mxu0  ;;  %v1693_v4 = vpop.f32.mrf.mxu1  ;;  %8345 = vmatpush3.msra.mxu1 %v2533_v54  ;;  %v10394_v47 = vld [vmem:[#allocation2 + $0x14c] sm:$0xff]  ;;  %v2673_v55 = vmax.f32 %v2658_v25, %v2665_v46 }
 0x1cd   : > { %1972 = vst.msk [vmem:[#allocation2 + $0x160] sm:$0xff] %vm1927_vm0, %v1689_v40  ;;  %v1169_v15 = vadd.f32 %v10149_v13, %v1168_v7  ;;  %8336 = vmatpush3.msra.mxu0 %v10182_v50  ;;  %8346 = vmatprep.subr.mxu1 %v2532_v60  ;;  %v10411_v50 = vmax.f32 %v2776_v12, %v10394_v47 }
 0x1ce   : > { %8337 = vmatprep.subr.mxu0 %v10173_v44  ;;  %v1170_v22 = vpop.f32.mrf.mxu0  ;;  %v1695_v23 = vpop.f32.mrf.mxu1  ;;  %8347 = vmatpush3.msra.mxu1 %v2532_v60  ;;  %v2672_v7 = vmax.f32 %v2657_v36, %v2663_v49 }
 0x1cf   : > { %v1694_v28 = vadd.f32 %v1693_v4, %v1169_v15  ;;  %8338 = vmatpush3.msra.mxu0 %v10173_v44  ;;  %8348 = vmatprep.subr.mxu1 %v2531_v14  ;;  %v10423_v44 = vmax.f32 %v2775_v27, %v10405_v20  ;;  %v2788_v57 = vrot.slane %v10411_v50, 1  ;;  %v2803_v18 = vrot.slane %v10411_v50, 2 }
 0x1d0   : > { %v1173_v33 = vpop.f32.mrf.mxu0  ;;  %v1698_v34 = vpop.f32.mrf.mxu1  ;;  %8339 = vmatprep.mubr.msk.f32.mxu0 %vm2092_vm5, %v10309_v51  ;;  %8349 = vmatpush3.msra.mxu1 %v2531_v14  ;;  %v2774_v38 = vld [vmem:[#allocation2 + $0x15c] sm:$0x7]  ;;  %v10420_v29 = vld [vmem:[#allocation2 + $0x154] sm:$0xff] }
 0x1d1   : > { %1973 = vst.msk [vmem:[#allocation2 + $0x168] sm:$0xff] %vm1927_vm0, %v1694_v28  ;;  %v1174_v53 = vadd.f32 %v10149_v13, %v1173_v33  ;;  %8350 = vmatprep.mubr.msk.f32.mxu1 %vm2092_vm5, %v10309_v51  ;;  %8340 = vmatmul.mubr.msk.f32.vlgmr.msra.gmra.mxu0 %vm2092_vm5, %v10352_v30  ;;  %v2782_v41 = vmax.f32 %v2778_v21, %v2774_v38  ;;  %v2787_v45 = vrot.slane %v10423_v44, 1 }
 0x1d2   : > { %v2781_v56 = vmax.f32 %v2777_v31, %v10420_v29  ;;  %v1175_v42 = vpop.f32.mrf.mxu0  ;;  %v1700_v43 = vpop.f32.mrf.mxu1  ;;  %8351 = vmatmul.mubr.msk.f32.vlgmr.msra.gmra.mxu1 %vm2092_vm5, %v10352_v30  ;;  %8353 = vmatprep.subr.msk.mxu0 %vm2099_vm2, %v2675_v17 }
 0x1d3   : > { %v1699_v35 = vadd.f32 %v1698_v34, %v1174_v53  ;;  %8354 = vmatpush3.msk.msra.mxu0 %vm2099_vm2, %v2675_v17  ;;  %8361 = vmatprep.mubr.msk.f32.mxu0 %vm2092_vm5, %v10309_v51  ;;  %v2792_v37 = vrot.slane %v2782_v41, 1  ;;  %v2807_v52 = vrot.slane %v2782_v41, 2  ;;  %v2789_v14 = vsel %vm2060_vm1, %v2787_v45, %v2788_v57  ;;  %v10484_v45 = vld [vmem:[%s13268_s2] ss:$0 sm:$0xff] }
 0x1d4   : > { %v2790_v54 = vrot.slane %v2781_v56, 1  ;;  %v1178_v61 = vpop.f32.mrf.mxu0  ;;  %v1703_v63 = vpop.f32.mrf.mxu1  ;;  %8355 = vmatprep.subr.mxu0 %v2674_v32  ;;  %v2805_v58 = vrot.slane %v2781_v56, 2  ;;  %8372 = vmatprep.mubr.msk.f32.mxu1 %vm2092_vm5, %v10309_v51  ;;  %v2798_v23 = vmax.f32 %v10423_v44, %v2789_v14 }
 0x1d5   : > { %1974 = vst.msk [vmem:[#allocation2 + $0x170] sm:$0xff] %vm1927_vm0, %v1699_v35  ;;  %v1179_v59 = vadd.f32 %v10149_v13, %v1178_v61  ;;  %8356 = vmatpush3.msra.mxu0 %v2674_v32  ;;  %v2801_v40 = vmax.f32 %v2782_v41, %v2792_v37 }
 0x1d6   : > { %v2793_v60 = vsel %vm2060_vm1, %v2790_v54, %v2792_v37  ;;  %v2791_v62 = vsel %vm2060_vm1, %v2788_v57, %v2790_v54  ;;  %v1180_v0 = vpop.f32.mrf.mxu0  ;;  %v1705_v1 = vpop.f32.mrf.mxu1  ;;  %8357 = vmatprep.subr.mxu0 %v2673_v55  ;;  %v2808_v10 = vsel %vm2076_vm3, %v2805_v58, %v2807_v52  ;;  %v2806_v26 = vsel %vm2076_vm3, %v2803_v18, %v2805_v58 }
 0x1d7   : > { %v2800_v4 = vmax.f32 %v2781_v56, %v2793_v60  ;;  %v1704_v5 = vadd.f32 %v1703_v63, %v1179_v59  ;;  %8358 = vmatpush3.msra.mxu0 %v2673_v55  ;;  %v2816_v6 = vmax.f32 %v2801_v40, %v2807_v52  ;;  %v2799_v11 = vmax.f32 %v10411_v50, %v2791_v62  ;;  %v2908_v52 = vld [vmem:[#allocation2 + $0x15f] sm:$0xff]  ;;  %v2907_v62 = vld [vmem:[#allocation2 + $0x15c] sm:$0x7] }
 0x1d8   : > { %v1183_v12 = vpop.f32.mrf.mxu0  ;;  %v1708_v15 = vpop.f32.mrf.mxu1  ;;  %8359 = vmatprep.subr.mxu0 %v2672_v7  ;;  %v2802_v50 = vrot.slane %v10423_v44, 2  ;;  %v2909_v36 = vld [vmem:[#allocation2 + $0x167] sm:$0xff]  ;;  %v2916_v1 = vmax.f32 %v10405_v20, %v2908_v52 }
 0x1d9   : > { %v2815_v25 = vmax.f32 %v2800_v4, %v2808_v10  ;;  %1975 = vst.msk [vmem:[#allocation2 + $0x178] sm:$0xff] %vm1927_vm0, %v1704_v5  ;;  %v1184_v22 = vadd.f32 %v10149_v13, %v1183_v12  ;;  %8360 = vmatpush3.msra.mxu0 %v2672_v7  ;;  %8364 = vmatprep.subr.msk.mxu1 %vm2099_vm2, %v2816_v6 }
 0x1da   : > { %v1185_v8 = vpop.f32.mrf.mxu0  ;;  %v1710_v24 = vpop.f32.mrf.mxu1  ;;  %8362 = vmatmul.mubr.msk.f32.vlgmr.msra.gmra.mxu0 %vm2092_vm5, %v10352_v30  ;;  %8365 = vmatpush3.msk.msra.mxu1 %vm2099_vm2, %v2816_v6  ;;  %v2814_v28 = vmax.f32 %v2799_v11, %v2806_v26  ;;  %v2804_v33 = vsel %vm2076_vm3, %v2802_v50, %v2803_v18  ;;  %v2917_v58 = vmax.f32 %v10394_v47, %v2909_v36 }
 0x1db   : > { %v1709_v27 = vadd.f32 %v1708_v15, %v1184_v22  ;;  %8366 = vmatprep.subr.mxu1 %v2815_v25  ;;  %8383 = vmatprep.mubr.msk.f32.mxu0 %vm2092_vm5, %v10309_v51  ;;  %v2813_v17 = vmax.f32 %v2798_v23, %v2804_v33 }
 0x1dc   : > { %v1188_v21 = vpop.f32.mrf.mxu0  ;;  %v1713_v31 = vpop.f32.mrf.mxu1  ;;  %8367 = vmatpush3.msra.mxu1 %v2815_v25  ;;  %v2910_v55 = vld [vmem:[#allocation2 + $0x16f] sm:$0xff] }
 0x1dd   : > { %1976 = vst.msk [vmem:[#allocation2 + $0x180] sm:$0xff] %vm1927_vm0, %v1709_v27  ;;  %v1189_v34 = vadd.f32 %v10149_v13, %v1188_v21  ;;  %8368 = vmatprep.subr.mxu1 %v2814_v28  ;;  %v2918_v4 = vmax.f32 %v10420_v29, %v2910_v55 }
 0x1de   : > { %v1190_v48 = vpop.f32.mrf.mxu0  ;;  %v1715_v3 = vpop.f32.mrf.mxu1  ;;  %8369 = vmatpush3.msra.mxu1 %v2814_v28 }
 0x1df   : > { %v1714_v38 = vadd.f32 %v1713_v31, %v1189_v34  ;;  %8370 = vmatprep.subr.mxu1 %v2813_v17 }
 0x1e0   : > { %v1193_v44 = vpop.f32.mrf.mxu0  ;;  %v1718_v53 = vpop.f32.mrf.mxu1  ;;  %8371 = vmatpush3.msra.mxu1 %v2813_v17  ;;  %v2911_v63 = vld [vmem:[#allocation2 + $0x177] sm:$0x7] }
 0x1e1   : > { %1977 = vst.msk [vmem:[#allocation2 + $0x188] sm:$0xff] %vm1927_vm0, %v1714_v38  ;;  %v1194_v39 = vadd.f32 %v10149_v13, %v1193_v44  ;;  %8373 = vmatmul.mubr.msk.f32.vlgmr.msra.gmra.mxu1 %vm2092_vm5, %v10352_v30  ;;  %v2919_v47 = vmax.f32 %v2907_v62, %v2911_v63 }
 0x1e2   : > { %v1195_v41 = vpop.f32.mrf.mxu0  ;;  %v1720_v56 = vpop.f32.mrf.mxu1  ;;  %8394 = vmatprep.mubr.msk.f32.mxu1 %vm2092_vm5, %v10309_v51 }
 0x1e3   : > { %v1719_v42 = vadd.f32 %v1718_v53, %v1194_v39 }
 0x1e4   : > { %v1198_v43 = vpop.f32.mrf.mxu0  ;;  %v1723_v32 = vpop.f32.mrf.mxu1  ;;  %v10487_v59 = vld [vmem:[#allocation2 + $0x17a] sm:$0xff] }
 0x1e5   : > { %1978 = vst.msk [vmem:[#allocation2 + $0x190] sm:$0xff] %vm1927_vm0, %v1719_v42  ;;  %v1199_v46 = vadd.f32 %v10149_v13, %v1198_v43  ;;  %v2920_v11 = vmax.f32 %v2916_v1, %v10487_v59 }
 0x1e6   : > { %v1200_v57 = vpop.f32.mrf.mxu0  ;;  %v1725_v35 = vpop.f32.mrf.mxu1 }
 0x1e7   : > { %v1724_v37 = vadd.f32 %v1723_v32, %v1199_v46  ;;  %v2928_v28 = vrot.slane %v2920_v11, 1  ;;  %v2943_v52 = vrot.slane %v2920_v11, 2 }
 0x1e8   : > { %v1203_v54 = vpop.f32.mrf.mxu0  ;;  %v1728_v61 = vpop.f32.mrf.mxu1  ;;  %v10477_v49 = vld [vmem:[#allocation2 + $0x182] sm:$0xff] }
 0x1e9   : > { %1979 = vst.msk [vmem:[#allocation2 + $0x198] sm:$0xff] %vm1927_vm0, %v1724_v37  ;;  %v1204_v13 = vadd.f32 %v10484_v45, %v1203_v54  ;;  %v2921_v0 = vmax.f32 %v2917_v58, %v10477_v49 }
 0x1ea   : > { %v1205_v40 = vpop.f32.mrf.mxu0  ;;  %v1730_v60 = vpop.f32.mrf.mxu1 }
 0x1eb   : > { %v1729_v7 = vadd.f32 %v1728_v61, %v1204_v13  ;;  %v2929_v22 = vrot.slane %v2921_v0, 1  ;;  %v2944_v32 = vrot.slane %v2921_v0, 2 }
 0x1ec   : > { %v1208_v14 = vpop.f32.mrf.mxu0  ;;  %v1733_v5 = vpop.f32.mrf.mxu1  ;;  %v2915_v6 = vld [vmem:[#allocation2 + $0x192] sm:$0x7]  ;;  %v10492_v10 = vld [vmem:[#allocation2 + $0x18a] sm:$0xff] }
 0x1ed   : > { %1980 = vst.msk [vmem:[#allocation2 + $0x1a0] sm:$0xff] %vm1927_vm0, %v1729_v7  ;;  %v1209_v12 = vadd.f32 %v10484_v45, %v1208_v14  ;;  %v2923_v15 = vmax.f32 %v2919_v47, %v2915_v6  ;;  %v2922_v25 = vmax.f32 %v2918_v4, %v10492_v10  ;;  %v2930_v38 = vsel %vm2060_vm1, %v2928_v28, %v2929_v22 }
 0x1ee   : > { %v1210_v18 = vpop.f32.mrf.mxu0  ;;  %v1735_v20 = vpop.f32.mrf.mxu1  ;;  %v2939_v36 = vmax.f32 %v2920_v11, %v2930_v38  ;;  %v2945_v58 = vsel %vm2076_vm3, %v2943_v52, %v2944_v32 }
 0x1ef   : > { %v1734_v23 = vadd.f32 %v1733_v5, %v1209_v12  ;;  %v2933_v8 = vrot.slane %v2923_v15, 1  ;;  %v2948_v29 = vrot.slane %v2923_v15, 2  ;;  %v2931_v24 = vrot.slane %v2922_v25, 1 }
 0x1f0   : > { %v1213_v26 = vpop.f32.mrf.mxu0  ;;  %v1738_v50 = vpop.f32.mrf.mxu1  ;;  %v2946_v27 = vrot.slane %v2922_v25, 2  ;;  %v2954_v40 = vmax.f32 %v2939_v36, %v2945_v58 }
 0x1f1   : > { %1981 = vst.msk [vmem:[#allocation2 + $0x1a8] sm:$0xff] %vm1927_vm0, %v1734_v23  ;;  %v1214_v21 = vadd.f32 %v10484_v45, %v1213_v26  ;;  %v2942_v31 = vmax.f32 %v2923_v15, %v2933_v8  ;;  %v2934_v33 = vsel %vm2060_vm1, %v2931_v24, %v2933_v8  ;;  %v2932_v34 = vsel %vm2060_vm1, %v2929_v22, %v2931_v24 }
 0x1f2   : > { %v1215_v17 = vpop.f32.mrf.mxu0  ;;  %v1740_v48 = vpop.f32.mrf.mxu1  ;;  %v2941_v3 = vmax.f32 %v2922_v25, %v2934_v33  ;;  %v2949_v39 = vsel %vm2076_vm3, %v2946_v27, %v2948_v29  ;;  %v2940_v41 = vmax.f32 %v2921_v0, %v2932_v34  ;;  %v2947_v37 = vsel %vm2076_vm3, %v2944_v32, %v2946_v27 }
 0x1f3   : > { %v1739_v44 = vadd.f32 %v1738_v50, %v1214_v21  ;;  %v2957_v53 = vmax.f32 %v2942_v31, %v2948_v29  ;;  %v3049_v29 = vld [vmem:[#allocation2 + $0x195] sm:$0xff]  ;;  %v3048_v17 = vld [vmem:[#allocation2 + $0x192] sm:$0x7] }
 0x1f4   : > { %v1218_v56 = vpop.f32.mrf.mxu0  ;;  %v1743_v42 = vpop.f32.mrf.mxu1  ;;  %v2956_v43 = vmax.f32 %v2941_v3, %v2949_v39  ;;  %v2955_v61 = vmax.f32 %v2940_v41, %v2947_v37  ;;  %v3050_v25 = vld [vmem:[#allocation2 + $0x19d] sm:$0xff]  ;;  %v3057_v3 = vmax.f32 %v10487_v59, %v3049_v29 }
 0x1f5   : > { %1982 = vst.msk [vmem:[#allocation2 + $0x1b0] sm:$0xff] %vm1927_vm0, %v1739_v44  ;;  %v1219_v46 = vadd.f32 %v10484_v45, %v1218_v56  ;;  %8375 = vmatprep.subr.msk.mxu0 %vm2099_vm2, %v2957_v53  ;;  %v3058_v28 = vmax.f32 %v10477_v49, %v3050_v25 }
 0x1f6   : > { %v1220_v57 = vpop.f32.mrf.mxu0  ;;  %v1745_v35 = vpop.f32.mrf.mxu1  ;;  %8376 = vmatpush3.msk.msra.mxu0 %vm2099_vm2, %v2957_v53 }
 0x1f7   : > { %v1744_v54 = vadd.f32 %v1743_v42, %v1219_v46  ;;  %8377 = vmatprep.subr.mxu0 %v2956_v43 }
 0x1f8   : > { %v1223_v63 = vpop.f32.mrf.mxu0  ;;  %v1748_v55 = vpop.f32.mrf.mxu1  ;;  %8378 = vmatpush3.msra.mxu0 %v2956_v43  ;;  %v3051_v12 = vld [vmem:[#allocation2 + $0x1a5] sm:$0xff]  ;;  %v3052_v50 = vld [vmem:[#allocation2 + $0x1ad] sm:$0x7] }
 0x1f9   : > { %1983 = vst.msk [vmem:[#allocation2 + $0x1b8] sm:$0xff] %vm1927_vm0, %v1744_v54  ;;  %v1224_v13 = vadd.f32 %v10484_v45, %v1223_v63  ;;  %8379 = vmatprep.subr.mxu0 %v2955_v61  ;;  %v3059_v23 = vmax.f32 %v10492_v10, %v3051_v12  ;;  %v3060_v44 = vmax.f32 %v3048_v17, %v3052_v50 }
 0x1fa   : > { %v1225_v60 = vpop.f32.mrf.mxu0  ;;  %v1750_v62 = vpop.f32.mrf.mxu1  ;;  %8380 = vmatpush3.msra.mxu0 %v2955_v61 }
 0x1fb   : > { %v1749_v0 = vadd.f32 %v1748_v55, %v1224_v13  ;;  %8381 = vmatprep.subr.mxu0 %v2954_v40 }
 0x1fc   : > { %v1228_v1 = vpop.f32.mrf.mxu0  ;;  %v1753_v7 = vpop.f32.mrf.mxu1  ;;  %8382 = vmatpush3.msra.mxu0 %v2954_v40  ;;  %v10529_v33 = vld [vmem:[#allocation2 + $0x1b0] sm:$0xff] }
 0x1fd   : > { %1984 = vst.msk [vmem:[#allocation2 + $0x1c0] sm:$0xff] %vm1927_vm0, %v1749_v0  ;;  %v1229_v47 = vadd.f32 %v10484_v45, %v1228_v1  ;;  %8384 = vmatmul.mubr.msk.f32.vlgmr.msra.gmra.mxu0 %vm2092_vm5, %v10352_v30  ;;  %v3061_v56 = vmax.f32 %v3057_v3, %v10529_v33 }
 0x1fe   : > { %v1230_v4 = vpop.f32.mrf.mxu0  ;;  %v1755_v14 = vpop.f32.mrf.mxu1  ;;  %8405 = vmatprep.mubr.msk.f32.mxu0 %vm2092_vm5, %v10309_v51 }
 0x1ff   : > { %v1754_v5 = vadd.f32 %v1753_v7, %v1229_v47  ;;  %v3069_v61 = vrot.slane %v3061_v56, 1 }
 0x200   : > { %v1233_v6 = vpop.f32.mrf.mxu0  ;;  %v1758_v11 = vpop.f32.mrf.mxu1  ;;  %v10521_v8 = vld [vmem:[#allocation2 + $0x1b8] sm:$0xff] }
 0x201   : > { %1985 = vst.msk [vmem:[#allocation2 + $0x1c8] sm:$0xff] %vm1927_vm0, %v1754_v5  ;;  %v1234_v15 = vadd.f32 %v10484_v45, %v1233_v6  ;;  %v3062_v48 = vmax.f32 %v3058_v28, %v10521_v8 }
 0x202   : > { %v1235_v18 = vpop.f32.mrf.mxu0  ;;  %v1760_v20 = vpop.f32.mrf.mxu1 }
 0x203   : > { %v1759_v22 = vadd.f32 %v1758_v11, %v1234_v15  ;;  %v3070_v36 = vrot.slane %v3062_v48, 1  ;;  %v3085_v11 = vrot.slane %v3062_v48, 2 }
 0x204   : > { %v1238_v24 = vpop.f32.mrf.mxu0  ;;  %v1763_v26 = vpop.f32.mrf.mxu1  ;;  %v10523_v27 = vld [vmem:[#allocation2 + $0x1c0] sm:$0xff] }
 0x205   : > { %1986 = vst.msk [vmem:[#allocation2 + $0x1d0] sm:$0xff] %vm1927_vm0, %v1759_v22  ;;  %v1239_v21 = vadd.f32 %v10484_v45, %v1238_v24  ;;  %v3063_v31 = vmax.f32 %v3059_v23, %v10523_v27  ;;  %v3071_v0 = vsel %vm2060_vm1, %v3069_v61, %v3070_v36  ;;  %v3084_v22 = vrot.slane %v3061_v56, 2 }
 0x206   : > { %v1240_v34 = vpop.f32.mrf.mxu0  ;;  %v1765_v10 = vpop.f32.mrf.mxu1  ;;  %v3080_v15 = vmax.f32 %v3061_v56, %v3071_v0 }
 0x207   : > { %v1764_v38 = vadd.f32 %v1763_v26, %v1239_v21  ;;  %v3072_v41 = vrot.slane %v3063_v31, 1  ;;  %v3087_v13 = vrot.slane %v3063_v31, 2  ;;  %v3086_v50 = vsel %vm2076_vm3, %v3084_v22, %v3085_v11 }
 0x208   : > { %v1243_v53 = vpop.f32.mrf.mxu0  ;;  %v1768_v39 = vpop.f32.mrf.mxu1  ;;  %v3056_v49 = vld [vmem:[#allocation2 + $0x1c8] sm:$0x7]  ;;  %v3095_v21 = vmax.f32 %v3080_v15, %v3086_v50 }
 0x209   : > { %1987 = vst.msk [vmem:[#allocation2 + $0x1d8] sm:$0xff] %vm1927_vm0, %v1764_v38  ;;  %v1244_v42 = vadd.f32 %v10484_v45, %v1243_v53  ;;  %v3064_v43 = vmax.f32 %v3060_v44, %v3056_v49  ;;  %v3073_v54 = vsel %vm2060_vm1, %v3070_v36, %v3072_v41  ;;  %v3088_v20 = vsel %vm2076_vm3, %v3085_v11, %v3087_v13 }
 0x20a   : > { %v1245_v32 = vpop.f32.mrf.mxu0  ;;  %v1770_v46 = vpop.f32.mrf.mxu1  ;;  %v3081_v4 = vmax.f32 %v3062_v48, %v3073_v54 }
 0x20b   : > { %v1769_v57 = vadd.f32 %v1768_v39, %v1244_v42  ;;  %v3074_v35 = vrot.slane %v3064_v43, 1  ;;  %v3089_v37 = vrot.slane %v3064_v43, 2 }
 0x20c   : > { %v1248_v59 = vpop.f32.mrf.mxu0  ;;  %v1773_v52 = vpop.f32.mrf.mxu1  ;;  %v3096_v29 = vmax.f32 %v3081_v4, %v3088_v20 }
 0x20d   : > { %1988 = vst.msk [vmem:[#allocation2 + $0x1e0] sm:$0xff] %vm1927_vm0, %v1769_v57  ;;  %v1249_v63 = vadd.f32 %v10484_v45, %v1248_v59  ;;  %v3083_v55 = vmax.f32 %v3064_v43, %v3074_v35  ;;  %v3075_v58 = vsel %vm2060_vm1, %v3072_v41, %v3074_v35  ;;  %v3090_v47 = vsel %vm2076_vm3, %v3087_v13, %v3089_v37  ;;  %v3190_v35 = vld [vmem:[#allocation2 + $0x1cb] sm:$0xff] }
 0x20e   : > { %v1250_v40 = vpop.f32.mrf.mxu0  ;;  %v1775_v60 = vpop.f32.mrf.mxu1  ;;  %v3082_v62 = vmax.f32 %v3063_v31, %v3075_v58 }
 0x20f   : > { %v1774_v1 = vadd.f32 %v1773_v52, %v1249_v63  ;;  %v3098_v7 = vmax.f32 %v3083_v55, %v3089_v37  ;;  %v3198_v60 = vmax.f32 %v10529_v33, %v3190_v35 }
 0x210   : > { %v1253_v14 = vpop.f32.mrf.mxu0  ;;  %v1778_v5 = vpop.f32.mrf.mxu1  ;;  %v3097_v6 = vmax.f32 %v3082_v62, %v3090_v47  ;;  %v3191_v42 = vld [vmem:[#allocation2 + $0x1d3] sm:$0xff] }
 0x211   : > { %1989 = vst.msk [vmem:[#allocation2 + $0x1e8] sm:$0xff] %vm1927_vm0, %v1774_v1  ;;  %v1254_v12 = vadd.f32 %v10484_v45, %v1253_v14  ;;  %8386 = vmatprep.subr.msk.mxu1 %vm2099_vm2, %v3098_v7  ;;  %v3199_v54 = vmax.f32 %v10521_v8, %v3191_v42 }
 0x212   : > { %v1255_v25 = vpop.f32.mrf.mxu0  ;;  %v1780_v18 = vpop.f32.mrf.mxu1  ;;  %8387 = vmatpush3.msk.msra.mxu1 %vm2099_vm2, %v3098_v7 }
 0x213   : > { %v1779_v23 = vadd.f32 %v1778_v5, %v1254_v12  ;;  %8388 = vmatprep.subr.mxu1 %v3097_v6 }
 0x214   : > { %v1258_v24 = vpop.f32.mrf.mxu0  ;;  %v1783_v26 = vpop.f32.mrf.mxu1  ;;  %8389 = vmatpush3.msra.mxu1 %v3097_v6  ;;  %v3192_v49 = vld [vmem:[#allocation2 + $0x1db] sm:$0xff]  ;;  %v3193_v59 = vld [vmem:[#allocation2 + $0x1e3] sm:$0x7] }
 0x215   : > { %1990 = vst.msk [vmem:[#allocation2 + $0x1f0] sm:$0xff] %vm1927_vm0, %v1779_v23  ;;  %v1259_v28 = vadd.f32 %v10484_v45, %v1258_v24  ;;  %8390 = vmatprep.subr.mxu1 %v3096_v29  ;;  %v3200_v36 = vmax.f32 %v10523_v27, %v3192_v49  ;;  %v3189_v27 = vld [vmem:[#allocation2 + $0x1c8] sm:$0x7] }
 0x216   : > { %v1260_v31 = vpop.f32.mrf.mxu0  ;;  %v1785_v34 = vpop.f32.mrf.mxu1  ;;  %8391 = vmatpush3.msra.mxu1 %v3096_v29  ;;  %v3201_v1 = vmax.f32 %v3189_v27, %v3193_v59 }
 0x217   : > { %v1784_v10 = vadd.f32 %v1783_v26, %v1259_v28  ;;  %8392 = vmatprep.subr.mxu1 %v3095_v21 }
 0x218   : > { %v1263_v17 = vpop.f32.mrf.mxu0  ;;  %v1788_v48 = vpop.f32.mrf.mxu1  ;;  %8393 = vmatpush3.msra.mxu1 %v3095_v21  ;;  %v10567_v58 = vld [vmem:[#allocation2 + $0x1e6] sm:$0xff] }
 0x219   : > { %1991 = vst.msk [vmem:[#allocation2 + $0x1f8] sm:$0xff] %vm1927_vm0, %v1784_v10  ;;  %v1264_v3 = vadd.f32 %v10484_v45, %v1263_v17  ;;  %8395 = vmatmul.mubr.msk.f32.vlgmr.msra.gmra.mxu1 %vm2092_vm5, %v10352_v30  ;;  %v3202_v4 = vmax.f32 %v3198_v60, %v10567_v58 }
 0x21a   : > { %v1265_v38 = vpop.f32.mrf.mxu0  ;;  %v1790_v44 = vpop.f32.mrf.mxu1  ;;  %8416 = vmatprep.mubr.msk.f32.mxu1 %vm2092_vm5, %v10309_v51 }
 0x21b   : > { %v1789_v53 = vadd.f32 %v1788_v48, %v1264_v3  ;;  %v3210_v23 = vrot.slane %v3202_v4, 1 }
 0x21c   : > { %v1268_v39 = vpop.f32.mrf.mxu0  ;;  %v10559_v57 = vld [vmem:[#allocation2 + $0x1ee] sm:$0xff] }
 0x21d   : > { %1992 = vst.msk [vmem:[#allocation2 + $0x200] sm:$0xff] %vm1927_vm0, %v1789_v53  ;;  %v1269_v41 = vadd.f32 %v10484_v45, %v1268_v39  ;;  %v1793_v56 = vpop.f32.mrf.mxu1  ;;  %v3203_v40 = vmax.f32 %v3199_v54, %v10559_v57 }
 0x21e   : > { %v1270_v43 = vpop.f32.mrf.mxu0 }
 0x21f   : > { %v1794_v32 = vadd.f32 %v1793_v56, %v1269_v41  ;;  %v1795_v46 = vpop.f32.mrf.mxu1  ;;  %v3211_v12 = vrot.slane %v3203_v40, 1  ;;  %v3226_v39 = vrot.slane %v3203_v40, 2 }
 0x220   : > { %v1273_v37 = vpop.f32.mrf.mxu0  ;;  %v10561_v52 = vld [vmem:[#allocation2 + $0x1f6] sm:$0xff] }
 0x221   : > { %1993 = vst.msk [vmem:[#allocation2 + $0x208] sm:$0xff] %vm1927_vm0, %v1794_v32  ;;  %v1274_v61 = vadd.f32 %v10484_v45, %v1273_v37  ;;  %v1798_v63 = vpop.f32.mrf.mxu1  ;;  %v3204_v55 = vmax.f32 %v3200_v36, %v10561_v52  ;;  %v3212_v34 = vsel %vm2060_vm1, %v3210_v23, %v3211_v12  ;;  %v3225_v32 = vrot.slane %v3202_v4, 2 }
 0x222   : > { %v1275_v13 = vpop.f32.mrf.mxu0  ;;  %v3221_v56 = vmax.f32 %v3202_v4, %v3212_v34 }
 0x223   : > { %v1799_v62 = vadd.f32 %v1798_v63, %v1274_v61  ;;  %v1800_v0 = vpop.f32.mrf.mxu1  ;;  %v3213_v47 = vrot.slane %v3204_v55, 1  ;;  %v3228_v28 = vrot.slane %v3204_v55, 2  ;;  %v3227_v59 = vsel %vm2076_vm3, %v3225_v32, %v3226_v39 }
 0x224   : > { %v1278_v7 = vpop.f32.mrf.mxu0  ;;  %v3197_v8 = vld [vmem:[#allocation2 + $0x1fe] sm:$0x7]  ;;  %v3236_v63 = vmax.f32 %v3221_v56, %v3227_v59 }
 0x225   : > { %1994 = vst.msk [vmem:[#allocation2 + $0x210] sm:$0xff] %vm1927_vm0, %v1799_v62  ;;  %v1279_v14 = vadd.f32 %v10484_v45, %v1278_v7  ;;  %v1803_v5 = vpop.f32.mrf.mxu1  ;;  %v3205_v6 = vmax.f32 %v3201_v1, %v3197_v8  ;;  %v3214_v22 = vsel %vm2060_vm1, %v3211_v12, %v3213_v47  ;;  %v3229_v43 = vsel %vm2076_vm3, %v3226_v39, %v3228_v28 }
 0x226   : > { %v1280_v11 = vpop.f32.mrf.mxu0  ;;  %v3222_v38 = vmax.f32 %v3203_v40, %v3214_v22 }
 0x227   : > { %v1804_v15 = vadd.f32 %v1803_v5, %v1279_v14  ;;  %v1805_v25 = vpop.f32.mrf.mxu1  ;;  %v3215_v18 = vrot.slane %v3205_v6, 1  ;;  %v3230_v33 = vrot.slane %v3205_v6, 2 }
 0x228   : > { %v1283_v20 = vpop.f32.mrf.mxu0  ;;  %v3237_v35 = vmax.f32 %v3222_v38, %v3229_v43 }
 0x229   : > { %1995 = vst.msk [vmem:[#allocation2 + $0x218] sm:$0xff] %vm1927_vm0, %v1804_v15  ;;  %v1284_v29 = vadd.f32 %v10484_v45, %v1283_v20  ;;  %v1808_v24 = vpop.f32.mrf.mxu1  ;;  %v3224_v26 = vmax.f32 %v3205_v6, %v3215_v18  ;;  %v3216_v50 = vsel %vm2060_vm1, %v3213_v47, %v3215_v18  ;;  %v3231_v3 = vsel %vm2076_vm3, %v3228_v28, %v3230_v33  ;;  %v3331_v47 = vld [vmem:[#allocation2 + $0x201] sm:$0xff] }
 0x22a   : > { %v1285_v21 = vpop.f32.mrf.mxu0  ;;  %v3223_v31 = vmax.f32 %v3204_v55, %v3216_v50  ;;  %v3339_v22 = vmax.f32 %v10567_v58, %v3331_v47 }
 0x22b   : > { %v1809_v10 = vadd.f32 %v1808_v24, %v1284_v29  ;;  %v1810_v17 = vpop.f32.mrf.mxu1  ;;  %v3239_v48 = vmax.f32 %v3224_v26, %v3230_v33  ;;  %v3330_v33 = vld [vmem:[#allocation2 + $0x1fe] sm:$0x7] }
 0x22c   : > { %v1288_v44 = vpop.f32.mrf.mxu0  ;;  %v3238_v53 = vmax.f32 %v3223_v31, %v3231_v3  ;;  %v3332_v0 = vld [vmem:[#allocation2 + $0x209] sm:$0xff] }
 0x22d   : > { %1996 = vst.msk [vmem:[#allocation2 + $0x220] sm:$0xff] %vm1927_vm0, %v1809_v10  ;;  %v1289_v49 = vadd.f32 %v10484_v45, %v1288_v44  ;;  %v1813_v41 = vpop.f32.mrf.mxu1  ;;  %8397 = vmatprep.subr.msk.mxu0 %vm2099_vm2, %v3239_v48  ;;  %v3340_v11 = vmax.f32 %v10559_v57, %v3332_v0 }
 0x22e   : > { %v1290_v42 = vpop.f32.mrf.mxu0  ;;  %8398 = vmatpush3.msk.msra.mxu0 %vm2099_vm2, %v3239_v48 }
 0x22f   : > { %v1814_v46 = vadd.f32 %v1813_v41, %v1289_v49  ;;  %v1815_v36 = vpop.f32.mrf.mxu1  ;;  %8399 = vmatprep.subr.mxu0 %v3238_v53 }
 0x230   : > { %v1293_v37 = vpop.f32.mrf.mxu0  ;;  %8400 = vmatpush3.msra.mxu0 %v3238_v53  ;;  %v3334_v14 = vld [vmem:[#allocation2 + $0x219] sm:$0x7]  ;;  %v3333_v5 = vld [vmem:[#allocation2 + $0x211] sm:$0xff] }
 0x231   : > { %1997 = vst.msk [vmem:[#allocation2 + $0x228] sm:$0xff] %vm1927_vm0, %v1814_v46  ;;  %v1294_v54 = vadd.f32 %v10484_v45, %v1293_v37  ;;  %v1818_v61 = vpop.f32.mrf.mxu1  ;;  %8401 = vmatprep.subr.mxu0 %v3237_v35  ;;  %v3342_v24 = vmax.f32 %v3330_v33, %v3334_v14  ;;  %v3341_v26 = vmax.f32 %v10561_v52, %v3333_v5 }
 0x232   : > { %v1295_v55 = vpop.f32.mrf.mxu0  ;;  %8402 = vmatpush3.msra.mxu0 %v3237_v35 }
 0x233   : > { %v1819_v13 = vadd.f32 %v1818_v61, %v1294_v54  ;;  %v1820_v27 = vpop.f32.mrf.mxu1  ;;  %8403 = vmatprep.subr.mxu0 %v3236_v63 }
 0x234   : > { %v1298_v40 = vpop.f32.mrf.mxu0  ;;  %8404 = vmatpush3.msra.mxu0 %v3236_v63  ;;  %v10599_v25 = vld [vmem:[#allocation2 + $0x21c] sm:$0xff] }
 0x235   : > { %1998 = vst.msk [vmem:[#allocation2 + $0x230] sm:$0xff] %vm1927_vm0, %v1819_v13  ;;  %v1299_v60 = vadd.f32 %v10484_v45, %v1298_v40  ;;  %v1823_v62 = vpop.f32.mrf.mxu1  ;;  %8406 = vmatmul.mubr.msk.f32.vlgmr.msra.gmra.mxu0 %vm2092_vm5, %v10352_v30  ;;  %v3343_v21 = vmax.f32 %v3339_v22, %v10599_v25 }
 0x236   : > { %v1300_v1 = vpop.f32.mrf.mxu0  ;;  %8427 = vmatprep.mubr.msk.f32.mxu0 %vm2092_vm5, %v10309_v51 }
 0x237   : > { %v1824_v7 = vadd.f32 %v1823_v62, %v1299_v60  ;;  %v1825_v8 = vpop.f32.mrf.mxu1  ;;  %v3351_v41 = vrot.slane %v3343_v21, 1 }
 0x238   : > { %v1303_v4 = vpop.f32.mrf.mxu0  ;;  %v10594_v6 = vld [vmem:[#allocation2 + $0x224] sm:$0xff]  ;;  %v3366_v8 = vrot.slane %v3343_v21, 2 }
 0x239   : > { %1999 = vst.msk [vmem:[#allocation2 + $0x238] sm:$0xff] %vm1927_vm0, %v1824_v7  ;;  %v1304_v12 = vadd.f32 %v10484_v45, %v1303_v4  ;;  %v1828_v15 = vpop.f32.mrf.mxu1  ;;  %v3344_v20 = vmax.f32 %v3340_v11, %v10594_v6 }
 0x23a   : > { %v1305_v18 = vpop.f32.mrf.mxu0 }
 0x23b   : > { %v1829_v23 = vadd.f32 %v1828_v15, %v1304_v12  ;;  %v1830_v29 = vpop.f32.mrf.mxu1  ;;  %v3352_v48 = vrot.slane %v3344_v20, 1  ;;  %v3367_v40 = vrot.slane %v3344_v20, 2 }
 0x23c   : > { %v1308_v50 = vpop.f32.mrf.mxu0  ;;  %v3338_v57 = vld [vmem:[#allocation2 + $0x234] sm:$0x7]  ;;  %v10604_v28 = vld [vmem:[#allocation2 + $0x22c] sm:$0xff] }
 0x23d   : > { %2000 = vst.msk [vmem:[#allocation2 + $0x240] sm:$0xff] %vm1927_vm0, %v1829_v23  ;;  %v1309_v31 = vadd.f32 %v10484_v45, %v1308_v50  ;;  %v1833_v34 = vpop.f32.mrf.mxu1  ;;  %v3346_v10 = vmax.f32 %v3342_v24, %v3338_v57  ;;  %v3345_v17 = vmax.f32 %v3341_v26, %v10604_v28  ;;  %v3353_v37 = vsel %vm2060_vm1, %v3351_v41, %v3352_v48 }
 0x23e   : > { %v1310_v58 = vpop.f32.mrf.mxu0  ;;  %v3362_v0 = vmax.f32 %v3343_v21, %v3353_v37  ;;  %v3368_v11 = vsel %vm2076_vm3, %v3366_v8, %v3367_v40 }
 0x23f   : > { %v1834_v3 = vadd.f32 %v1833_v34, %v1309_v31  ;;  %v1835_v38 = vpop.f32.mrf.mxu1  ;;  %v3356_v44 = vrot.slane %v3346_v10, 1  ;;  %v3371_v52 = vrot.slane %v3346_v10, 2  ;;  %v3354_v53 = vrot.slane %v3345_v17, 1 }
 0x240   : > { %v1313_v39 = vpop.f32.mrf.mxu0  ;;  %v3369_v49 = vrot.slane %v3345_v17, 2  ;;  %v3377_v18 = vmax.f32 %v3362_v0, %v3368_v11 }
 0x241   : > { %2001 = vst.msk [vmem:[#allocation2 + $0x248] sm:$0xff] %vm1927_vm0, %v1834_v3  ;;  %v1314_v56 = vadd.f32 %v10484_v45, %v1313_v39  ;;  %v1838_v42 = vpop.f32.mrf.mxu1  ;;  %v3365_v43 = vmax.f32 %v3346_v10, %v3356_v44  ;;  %v3357_v32 = vsel %vm2060_vm1, %v3354_v53, %v3356_v44  ;;  %v3355_v46 = vsel %vm2060_vm1, %v3352_v48, %v3354_v53  ;;  %v3472_v3 = vld [vmem:[#allocation2 + $0x237] sm:$0xff] }
 0x242   : > { %v1315_v36 = vpop.f32.mrf.mxu0  ;;  %v3364_v35 = vmax.f32 %v3345_v17, %v3357_v32  ;;  %v3372_v63 = vsel %vm2076_vm3, %v3369_v49, %v3371_v52  ;;  %v3363_v55 = vmax.f32 %v3344_v20, %v3355_v46  ;;  %v3370_v7 = vsel %vm2076_vm3, %v3367_v40, %v3369_v49 }
 0x243   : > { %v1839_v59 = vadd.f32 %v1838_v42, %v1314_v56  ;;  %v1840_v54 = vpop.f32.mrf.mxu1  ;;  %v3380_v61 = vmax.f32 %v3365_v43, %v3371_v52  ;;  %v3471_v43 = vld [vmem:[#allocation2 + $0x234] sm:$0x7]  ;;  %v3480_v46 = vmax.f32 %v10599_v25, %v3472_v3 }
 0x244   : > { %v1318_v13 = vpop.f32.mrf.mxu0  ;;  %v3379_v27 = vmax.f32 %v3364_v35, %v3372_v63  ;;  %v3378_v14 = vmax.f32 %v3363_v55, %v3370_v7  ;;  %v3473_v10 = vld [vmem:[#allocation2 + $0x23f] sm:$0xff] }
 0x245   : > { %2002 = vst.msk [vmem:[#allocation2 + $0x250] sm:$0xff] %vm1927_vm0, %v1839_v59  ;;  %v1319_v60 = vadd.f32 %v10484_v45, %v1318_v13  ;;  %v1843_v62 = vpop.f32.mrf.mxu1  ;;  %8408 = vmatprep.subr.msk.mxu1 %vm2099_vm2, %v3380_v61  ;;  %v3481_v39 = vmax.f32 %v10594_v6, %v3473_v10 }
 0x246   : > { %v1320_v1 = vpop.f32.mrf.mxu0  ;;  %8409 = vmatpush3.msk.msra.mxu1 %vm2099_vm2, %v3380_v61 }
 0x247   : > { %v1844_v47 = vadd.f32 %v1843_v62, %v1319_v60  ;;  %v1845_v4 = vpop.f32.mrf.mxu1  ;;  %8410 = vmatprep.subr.mxu1 %v3379_v27 }
 0x248   : > { %v1323_v5 = vpop.f32.mrf.mxu0  ;;  %8411 = vmatpush3.msra.mxu1 %v3379_v27  ;;  %v3474_v52 = vld [vmem:[#allocation2 + $0x247] sm:$0xff] }
 0x249   : > { %2003 = vst.msk [vmem:[#allocation2 + $0x258] sm:$0xff] %vm1927_vm0, %v1844_v47  ;;  %v1324_v12 = vadd.f32 %v10484_v45, %v1323_v5  ;;  %v1848_v15 = vpop.f32.mrf.mxu1  ;;  %8412 = vmatprep.subr.mxu1 %v3378_v14  ;;  %v3482_v59 = vmax.f32 %v10604_v28, %v3474_v52 }
 0x24a   : > { %v1325_v33 = vpop.f32.mrf.mxu0  ;;  %8413 = vmatpush3.msra.mxu1 %v3378_v14 }
 0x24b   : > { %v1849_v20 = vadd.f32 %v1848_v15, %v1324_v12  ;;  %v1850_v22 = vpop.f32.mrf.mxu1  ;;  %8414 = vmatprep.subr.mxu1 %v3377_v18 }
 0x24c   : > { %v1328_v23 = vpop.f32.mrf.mxu0  ;;  %8415 = vmatpush3.msra.mxu1 %v3377_v18  ;;  %v3475_v44 = vld [vmem:[#allocation2 + $0x24f] sm:$0x7] }
 0x24d   : > { %2004 = vst.msk [vmem:[#allocation2 + $0x260] sm:$0xff] %vm1927_vm0, %v1849_v20  ;;  %v1329_v29 = vadd.f32 %v10484_v45, %v1328_v23  ;;  %v1853_v24 = vpop.f32.mrf.mxu1  ;;  %8417 = vmatmul.mubr.msk.f32.vlgmr.msra.gmra.mxu1 %vm2092_vm5, %v10352_v30  ;;  %v3483_v37 = vmax.f32 %v3471_v43, %v3475_v44 }
 0x24e   : > { %v1330_v26 = vpop.f32.mrf.mxu0  ;;  %8438 = vmatprep.mubr.msk.f32.mxu1 %vm2092_vm5, %v10309_v51 }
 0x24f   : > { %v1854_v50 = vadd.f32 %v1853_v24, %v1329_v29  ;;  %v1855_v57 = vpop.f32.mrf.mxu1 }
 0x250   : > { %v1333_v21 = vpop.f32.mrf.mxu0  ;;  %v10637_v56 = vld [vmem:[#allocation2 + $0x252] sm:$0xff] }
 0x251   : > { %2005 = vst.msk [vmem:[#allocation2 + $0x268] sm:$0xff] %vm1927_vm0, %v1854_v50  ;;  %v1334_v31 = vadd.f32 %v10484_v45, %v1333_v21  ;;  %v1858_v34 = vpop.f32.mrf.mxu1  ;;  %v3484_v63 = vmax.f32 %v3480_v46, %v10637_v56 }
 0x252   : > { %v1335_v17 = vpop.f32.mrf.mxu0 }
 0x253   : > { %v1859_v58 = vadd.f32 %v1858_v34, %v1334_v31  ;;  %v1860_v48 = vpop.f32.mrf.mxu1  ;;  %v3492_v4 = vrot.slane %v3484_v63, 1 }
 0x254   : > { %v1338_v38 = vpop.f32.mrf.mxu0  ;;  %v10632_v53 = vld [vmem:[#allocation2 + $0x25a] sm:$0xff]  ;;  %v3507_v48 = vrot.slane %v3484_v63, 2 }
 0x255   : > { %2006 = vst.msk [vmem:[#allocation2 + $0x270] sm:$0xff] %vm1927_vm0, %v1859_v58  ;;  %v1339_v49 = vadd.f32 %v10484_v45, %v1338_v38  ;;  %v1863_v41 = vpop.f32.mrf.mxu1  ;;  %v3485_v32 = vmax.f32 %v3481_v39, %v10632_v53 }
 0x256   : > { %v1340_v42 = vpop.f32.mrf.mxu0 }
 0x257   : > { %v1864_v36 = vadd.f32 %v1863_v41, %v1339_v49  ;;  %v1865_v35 = vpop.f32.mrf.mxu1  ;;  %v3493_v60 = vrot.slane %v3485_v32, 1  ;;  %v3508_v21 = vrot.slane %v3485_v32, 2 }
 0x258   : > { %v1343_v54 = vpop.f32.mrf.mxu0  ;;  %v3479_v6 = vld [vmem:[#allocation2 + $0x26a] sm:$0x7]  ;;  %v10642_v61 = vld [vmem:[#allocation2 + $0x262] sm:$0xff] }
 0x259   : > { %2007 = vst.msk [vmem:[#allocation2 + $0x278] sm:$0xff] %vm1927_vm0, %v1864_v36  ;;  %v1344_v55 = vadd.f32 %v10484_v45, %v1343_v54  ;;  %v1868_v13 = vpop.f32.mrf.mxu1  ;;  %v3487_v27 = vmax.f32 %v3483_v37, %v3479_v6  ;;  %v3486_v40 = vmax.f32 %v3482_v59, %v10642_v61  ;;  %v3494_v20 = vsel %vm2060_vm1, %v3492_v4, %v3493_v60 }
 0x25a   : > { %v1345_v25 = vpop.f32.mrf.mxu0  ;;  %v3503_v10 = vmax.f32 %v3484_v63, %v3494_v20  ;;  %v3509_v39 = vsel %vm2076_vm3, %v3507_v48, %v3508_v21 }
 0x25b   : > { %v1869_v62 = vadd.f32 %v1868_v13, %v1344_v55  ;;  %v1870_v0 = vpop.f32.mrf.mxu1  ;;  %v3497_v1 = vrot.slane %v3487_v27, 1  ;;  %v3512_v28 = vrot.slane %v3487_v27, 2  ;;  %v3495_v7 = vrot.slane %v3486_v40, 1 }
 0x25c   : > { %v1348_v8 = vpop.f32.mrf.mxu0  ;;  %v3510_v47 = vrot.slane %v3486_v40, 2  ;;  %v3518_v42 = vmax.f32 %v3503_v10, %v3509_v39  ;;  %v3613_v0 = vld [vmem:[#allocation2 + $0x26d] sm:$0xff] }
 0x25d   : > { %2008 = vst.msk [vmem:[#allocation2 + $0x280] sm:$0xff] %vm1927_vm0, %v1869_v62  ;;  %v1349_v14 = vadd.f32 %v10484_v45, %v1348_v8  ;;  %v1873_v5 = vpop.f32.mrf.mxu1  ;;  %v3506_v11 = vmax.f32 %v3487_v27, %v3497_v1  ;;  %v3498_v12 = vsel %vm2060_vm1, %v3495_v7, %v3497_v1  ;;  %v3496_v15 = vsel %vm2060_vm1, %v3493_v60, %v3495_v7 }
 0x25e   : > { %v1350_v18 = vpop.f32.mrf.mxu0  ;;  %v3505_v33 = vmax.f32 %v3486_v40, %v3498_v12  ;;  %v3513_v24 = vsel %vm2076_vm3, %v3510_v47, %v3512_v28  ;;  %v3504_v26 = vmax.f32 %v3485_v32, %v3496_v15  ;;  %v3511_v58 = vsel %vm2076_vm3, %v3508_v21, %v3510_v47 }
 0x25f   : > { %v1874_v22 = vadd.f32 %v1873_v5, %v1349_v14  ;;  %v1875_v23 = vpop.f32.mrf.mxu1  ;;  %v3521_v29 = vmax.f32 %v3506_v11, %v3512_v28  ;;  %v3612_v11 = vld [vmem:[#allocation2 + $0x26a] sm:$0x7]  ;;  %v3621_v15 = vmax.f32 %v10637_v56, %v3613_v0 }
 0x260   : > { %v1353_v50 = vpop.f32.mrf.mxu0  ;;  %v3520_v57 = vmax.f32 %v3505_v33, %v3513_v24  ;;  %v3519_v44 = vmax.f32 %v3504_v26, %v3511_v58  ;;  %v3614_v13 = vld [vmem:[#allocation2 + $0x275] sm:$0xff] }
 0x261   : > { %2009 = vst.msk [vmem:[#allocation2 + $0x288] sm:$0xff] %vm1927_vm0, %v1874_v22  ;;  %v1354_v31 = vadd.f32 %v10484_v45, %v1353_v50  ;;  %v1878_v34 = vpop.f32.mrf.mxu1  ;;  %8419 = vmatprep.subr.msk.mxu0 %vm2099_vm2, %v3521_v29  ;;  %v3622_v8 = vmax.f32 %v10632_v53, %v3614_v13 }
 0x262   : > { %v1355_v17 = vpop.f32.mrf.mxu0  ;;  %8420 = vmatpush3.msk.msra.mxu0 %vm2099_vm2, %v3521_v29 }
 0x263   : > { %v1879_v3 = vadd.f32 %v1878_v34, %v1354_v31  ;;  %v1880_v38 = vpop.f32.mrf.mxu1  ;;  %8421 = vmatprep.subr.mxu0 %v3520_v57 }
 0x264   : > { %v1358_v52 = vpop.f32.mrf.mxu0  ;;  %8422 = vmatpush3.msra.mxu0 %v3520_v57  ;;  %v3615_v63 = vld [vmem:[#allocation2 + $0x27d] sm:$0xff]  ;;  %v3616_v7 = vld [vmem:[#allocation2 + $0x285] sm:$0x7] }
 0x265   : > { %2010 = vst.msk [vmem:[#allocation2 + $0x290] sm:$0xff] %vm1927_vm0, %v1879_v3  ;;  %v1359_v49 = vadd.f32 %v10484_v45, %v1358_v52  ;;  %v1883_v41 = vpop.f32.mrf.mxu1  ;;  %8423 = vmatprep.subr.mxu0 %v3519_v44  ;;  %v3623_v60 = vmax.f32 %v10642_v61, %v3615_v63  ;;  %v3624_v33 = vmax.f32 %v3612_v11, %v3616_v7 }
 0x266   : > { %v1360_v43 = vpop.f32.mrf.mxu0  ;;  %8424 = vmatpush3.msra.mxu0 %v3519_v44 }
 0x267   : > { %v1884_v32 = vadd.f32 %v1883_v41, %v1359_v49  ;;  %v1885_v46 = vpop.f32.mrf.mxu1  ;;  %8425 = vmatprep.subr.mxu0 %v3518_v42 }
 0x268   : > { %v1363_v36 = vpop.f32.mrf.mxu0  ;;  %8426 = vmatpush3.msra.mxu0 %v3518_v42  ;;  %v10677_v14 = vld [vmem:[#allocation2 + $0x288] sm:$0xff] }
 0x269   : > { %2011 = vst.msk [vmem:[#allocation2 + $0x298] sm:$0xff] %vm1927_vm0, %v1884_v32  ;;  %v1364_v35 = vadd.f32 %v10484_v45, %v1363_v36  ;;  %v1888_v37 = vpop.f32.mrf.mxu1  ;;  %8428 = vmatmul.mubr.msk.f32.vlgmr.msra.gmra.mxu0 %vm2092_vm5, %v10352_v30  ;;  %v3625_v29 = vmax.f32 %v3621_v15, %v10677_v14 }
 0x26a   : > { %v1365_v59 = vpop.f32.mrf.mxu0  ;;  %8449 = vmatprep.mubr.msk.f32.mxu0 %vm2092_vm5, %v10309_v51 }
 0x26b   : > { %v1889_v54 = vadd.f32 %v1888_v37, %v1364_v35  ;;  %v1890_v6 = vpop.f32.mrf.mxu1  ;;  %v3633_v48 = vrot.slane %v3625_v29, 1 }
 0x26c   : > { %v1368_v55 = vpop.f32.mrf.mxu0  ;;  %v10671_v62 = vld [vmem:[#allocation2 + $0x290] sm:$0xff] }
 0x26d   : > { %2012 = vst.msk [vmem:[#allocation2 + $0x2a0] sm:$0xff] %vm1927_vm0, %v1889_v54  ;;  %v1369_v27 = vadd.f32 %v10484_v45, %v1368_v55  ;;  %v1893_v40 = vpop.f32.mrf.mxu1  ;;  %v3626_v12 = vmax.f32 %v3622_v8, %v10671_v62 }
 0x26e   : > { %v1370_v25 = vpop.f32.mrf.mxu0 }
 0x26f   : > { %v1894_v1 = vadd.f32 %v1893_v40, %v1369_v27  ;;  %v1895_v28 = vpop.f32.mrf.mxu1  ;;  %v3634_v21 = vrot.slane %v3626_v12, 1  ;;  %v3649_v54 = vrot.slane %v3626_v12, 2  ;;  %v3648_v40 = vrot.slane %v3625_v29, 2 }
 0x270   : > { %v10673_v51 = vld [vmem:[#allocation2 + $0x298] sm:$0xff]  ;;  %v1373_v47 = vpop.f32.mrf.mxu0 }
 0x271   : > { %v3627_v4 = vmax.f32 %v3623_v60, %v10673_v51  ;;  %v1374_v5 = vadd.f32 %v10484_v45, %v1373_v47  ;;  %2013 = vst.msk [vmem:[#allocation2 + $0x2a8] sm:$0xff] %vm1927_vm0, %v1894_v1  ;;  %v1898_v61 = vpop.f32.mrf.mxu1  ;;  %v3635_v42 = vsel %vm2060_vm1, %v3633_v48, %v3634_v21  ;;  %v3650_v28 = vsel %vm2076_vm3, %v3648_v40, %v3649_v54 }
 0x272   : > { %v1375_v18 = vpop.f32.mrf.mxu0  ;;  %v3644_v63 = vmax.f32 %v3625_v29, %v3635_v42  ;;  %v10723_v29 = vld [vmem:[%s13271_s5 + $0x68] sm:$0xff] }
 0x273   : > { %v1899_v20 = vadd.f32 %v1898_v61, %v1374_v5  ;;  %v1900_v22 = vpop.f32.mrf.mxu1  ;;  %v3636_v23 = vrot.slane %v3627_v4, 1  ;;  %v3651_v52 = vrot.slane %v3627_v4, 2  ;;  %v10703_v61 = vld [vmem:[%s13271_s5 + $0x78] sm:$0xff]  ;;  %v10708_v18 = vld [vmem:[%s13271_s5 + $0x70] sm:$0xff] }
 0x274   : > { %v3620_v53 = vld [vmem:[#allocation2 + $0x2a0] sm:$0x7]  ;;  %v1378_v24 = vpop.f32.mrf.mxu0  ;;  %v3659_v8 = vmax.f32 %v3644_v63, %v3650_v28  ;;  %v10773_v63 = vld [vmem:[%s13271_s5 + $0x48] sm:$0xff] }
 0x275   : > { %v3628_v26 = vmax.f32 %v3624_v33, %v3620_v53  ;;  %v1379_v50 = vadd.f32 %v10484_v45, %v1378_v24  ;;  %2014 = vst.msk [vmem:[#allocation2 + $0x2b0] sm:$0xff] %vm1927_vm0, %v1899_v20  ;;  %v1903_v57 = vpop.f32.mrf.mxu1  ;;  %v3637_v58 = vsel %vm2060_vm1, %v3634_v21, %v3636_v23  ;;  %v9237_v45 = vld [vmem:[%s13268_s2] ss:$0 sm:$0xff]  ;;  %v3652_v27 = vsel %vm2076_vm3, %v3649_v54, %v3651_v52 }
 0x276   : > { %v1380_v31 = vpop.f32.mrf.mxu0  ;;  %v3645_v36 = vmax.f32 %v3626_v12, %v3637_v58  ;;  %v10717_v53 = vld [vmem:[%s13269_s3] ss:$0 sm:$0xff] }
 0x277   : > { %v3638_v34 = vrot.slane %v3628_v26, 1  ;;  %v3653_v10 = vrot.slane %v3628_v26, 2  ;;  %v1904_v56 = vadd.f32 %v1903_v57, %v1379_v50  ;;  %v1905_v17 = vpop.f32.mrf.mxu1  ;;  %v10728_v24 = vld [vmem:[%s13270_s4] ss:$0 sm:$0xff] }
 0x278   : > { %v1383_v3 = vpop.f32.mrf.mxu0  ;;  %v3660_v60 = vmax.f32 %v3645_v36, %v3652_v27  ;;  %v3754_v57 = vld [vmem:[#allocation2 + $0x2a3] sm:$0xff] }
 0x279   : > { %v3647_v38 = vmax.f32 %v3628_v26, %v3638_v34  ;;  %v3639_v44 = vsel %vm2060_vm1, %v3636_v23, %v3638_v34  ;;  %v1384_v39 = vadd.f32 %v9237_v45, %v1383_v3  ;;  %2015 = vst.msk [vmem:[#allocation2 + $0x2b8] sm:$0xff] %vm1927_vm0, %v1904_v56  ;;  %v1908_v49 = vpop.f32.mrf.mxu1  ;;  %v3654_v46 = vsel %vm2076_vm3, %v3651_v52, %v3653_v10  ;;  %v10746_v52 = vld [vmem:[%s13271_s5 + $0x58] sm:$0xff] }
 0x27a   : > { %v3646_v41 = vmax.f32 %v3627_v4, %v3639_v44  ;;  %v1385_v43 = vpop.f32.mrf.mxu0  ;;  %v3762_v44 = vmax.f32 %v10677_v14, %v3754_v57 }
 0x27b   : > { %v3662_v32 = vmax.f32 %v3647_v38, %v3653_v10  ;;  %v1909_v35 = vadd.f32 %v1908_v49, %v1384_v39  ;;  %v1910_v37 = vpop.f32.mrf.mxu1  ;;  %v10735_v10 = vld [vmem:[%s13271_s5 + $0x60] sm:$0xff] }
 0x27c   : > { %v3661_v59 = vmax.f32 %v3646_v41, %v3654_v46  ;;  %v1388_v6 = vpop.f32.mrf.mxu0  ;;  %v3755_v23 = vld [vmem:[#allocation2 + $0x2ab] sm:$0xff] }
 0x27d   : > { %8430 = vmatprep.subr.msk.mxu1 %vm2099_vm2, %v3662_v32  ;;  %v1389_v55 = vadd.f32 %v9237_v45, %v1388_v6  ;;  %2016 = vst.msk [vmem:[#allocation2 + $0x2c0] sm:$0xff] %vm1927_vm0, %v1909_v35  ;;  %v1913_v13 = vpop.f32.mrf.mxu1  ;;  %v3763_v58 = vmax.f32 %v10671_v62, %v3755_v23  ;;  %v10760_v46 = vld [vmem:[%s13271_s5 + $0x50] sm:$0xff]  ;;  %v3753_v6 = vld [vmem:[#allocation2 + $0x2a0] sm:$0x7] }
 0x27e   : > { %8431 = vmatpush3.msk.msra.mxu1 %vm2099_vm2, %v3662_v32  ;;  %v1390_v25 = vpop.f32.mrf.mxu0 }
 0x27f   : > { %8432 = vmatprep.subr.mxu1 %v3661_v59  ;;  %v1914_v0 = vadd.f32 %v1913_v13, %v1389_v55  ;;  %v1915_v1 = vpop.f32.mrf.mxu1 }
 0x280   : > { %8433 = vmatpush3.msra.mxu1 %v3661_v59  ;;  %v1393_v7 = vpop.f32.mrf.mxu0  ;;  %v3756_v31 = vld [vmem:[#allocation2 + $0x2b3] sm:$0xff]  ;;  %v3757_v43 = vld [vmem:[#allocation2 + $0x2bb] sm:$0x7] }
 0x281   : > { %8434 = vmatprep.subr.mxu1 %v3660_v60  ;;  %v1394_v47 = vadd.f32 %v9237_v45, %v1393_v7  ;;  %2017 = vst.msk [vmem:[#allocation2 + $0x2c8] sm:$0xff] %vm1927_vm0, %v1914_v0  ;;  %v1918_v4 = vpop.f32.mrf.mxu1  ;;  %v3764_v49 = vmax.f32 %v10673_v51, %v3756_v31  ;;  %v3765_v13 = vmax.f32 %v3753_v6, %v3757_v43  ;;  %v10784_v0 = vld [vmem:[%s13271_s5 + $0x40] sm:$0xff] }
 0x282   : > { %8435 = vmatpush3.msra.mxu1 %v3660_v60  ;;  %v1395_v5 = vpop.f32.mrf.mxu0 }
 0x283   : > { %8436 = vmatprep.subr.mxu1 %v3659_v8  ;;  %v1919_v11 = vadd.f32 %v1918_v4, %v1394_v47  ;;  %v1920_v12 = vpop.f32.mrf.mxu1 }
 0x284   : > { %8437 = vmatpush3.msra.mxu1 %v3659_v8  ;;  %v1398_v15 = vpop.f32.mrf.mxu0  ;;  %v3758_v38 = vld [vmem:[#allocation2 + $0x2be] sm:$0xff] }
 0x285   : > { %8439 = vmatmul.mubr.msk.f32.vlgmr.msra.gmra.mxu1 %vm2092_vm5, %v10352_v30  ;;  %v1399_v33 = vadd.f32 %v9237_v45, %v1398_v15  ;;  %2018 = vst.msk [vmem:[#allocation2 + $0x2d0] sm:$0xff] %vm1927_vm0, %v1919_v11  ;;  %v1923_v20 = vpop.f32.mrf.mxu1  ;;  %8452 = vmatprep.subr.mxu1 %v10703_v61  ;;  %v10765_v37 = vmax.f32 %v3762_v44, %v3758_v38  ;;  %v10800_v12 = vld [vmem:[%s13271_s5 + $0x38] sm:$0xff] }
 0x286   : > { %v1400_v22 = vpop.f32.mrf.mxu0  ;;  %8453 = vmatpush3.msra.mxu1 %v10703_v61 }
 0x287   : > { %v1924_v26 = vadd.f32 %v1923_v20, %v1399_v33  ;;  %v1925_v50 = vpop.f32.mrf.mxu1  ;;  %8454 = vmatprep.subr.mxu1 %v10708_v18  ;;  %v3774_v8 = vrot.slane %v10765_v37, 1  ;;  %v3789_v11 = vrot.slane %v10765_v37, 2 }
 0x288   : > { %v8319_v21 = vpop.f32.mrf.mxu0  ;;  %v3759_v34 = vld [vmem:[#allocation2 + $0x2c6] sm:$0xff]  ;;  %8455 = vmatpush3.msra.mxu1 %v10708_v18 }
 0x289   : > { %v2185_v56 = vmul.f32 %v8319_v21, %v10717_v53  ;;  %2020 = vst.msk [vmem:[#allocation2 + $0x2d8] sm:$0x1] %vm2019_vm7, %v1924_v26  ;;  %v8330_v17 = vpop.f32.mrf.mxu1  ;;  %8456 = vmatprep.subr.mxu1 %v10723_v29  ;;  %v10751_v41 = vmax.f32 %v3763_v58, %v3759_v34  ;;  %v10814_v34 = vld [vmem:[%s13271_s5 + $0x30] sm:$0xff] }
 0x28a   : > { %v2169_v48 = vpop.f32.mrf.mxu0  ;;  %v2332_v3 = vmul.f32 %v8330_v17, %v10717_v53  ;;  %8457 = vmatpush3.msra.mxu1 %v10723_v29 }
 0x28b   : > { %v2193_v45 = vadd.f32 %v10728_v24, %v2185_v56  ;;  %v2184_v39 = vmul.f32 %v10717_v53, %v2169_v48  ;;  %v2322_v62 = vpop.f32.mrf.mxu1  ;;  %8458 = vmatprep.subr.mxu1 %v10735_v10  ;;  %v3775_v40 = vrot.slane %v10751_v41, 1  ;;  %v3790_v5 = vrot.slane %v10751_v41, 2 }
 0x28c   : > { %v2334_v14 = vadd.f32 %v10728_v24, %v2332_v3  ;;  %v2331_v42 = vmul.f32 %v10717_v53, %v2322_v62  ;;  %v3760_v32 = vld [vmem:[#allocation2 + $0x2ce] sm:$0xff]  ;;  %8459 = vmatpush3.msra.mxu1 %v10735_v10 }
 0x28d   : > { %v2195_v36 = vmax.f32 %v2193_v45, 0.0  ;;  %v2192_v51 = vadd.f32 %v10728_v24, %v2184_v39  ;;  %v10763_v35 = vmax.f32 %v3764_v49, %v3760_v32  ;;  %8460 = vmatprep.subr.mxu1 %v10746_v52  ;;  %v3776_v23 = vsel %vm2060_vm1, %v3774_v8, %v3775_v40  ;;  %v10829_v62 = vld [vmem:[%s13271_s5 + $0x28] sm:$0xff] }
 0x28e   : > { %v2336_v59 = vmax.f32 %v2334_v14, 0.0  ;;  %v2333_v54 = vadd.f32 %v10728_v24, %v2331_v42  ;;  %8461 = vmatpush3.msra.mxu1 %v10746_v52 }
 0x28f   : > { %2198 = vst.msk [vmem:[#allocation3 + $0x8] sm:$0x1f] %vm2197_vm8, %v2195_v36  ;;  %v2194_v55 = vmax.f32 %v2192_v51, 0.0  ;;  %v3777_v27 = vrot.slane %v10763_v35, 1  ;;  %8462 = vmatprep.subr.mxu1 %v10760_v46  ;;  %v3792_v21 = vrot.slane %v10763_v35, 2 }
 0x290   : > { %2339 = vst.msk [vmem:[#allocation3 + $0x18] sm:$0x1f] %vm2197_vm8, %v2336_v59  ;;  %v2335_v25 = vmax.f32 %v2333_v54, 0.0  ;;  %v3761_v60 = vld [vmem:[#allocation2 + $0x2d6] sm:$0x7]  ;;  %8463 = vmatpush3.msra.mxu1 %v10760_v46  ;;  %v3785_v59 = vmax.f32 %v10765_v37, %v3776_v23  ;;  %v10845_v54 = vld [vmem:[%s13271_s5 + $0x20] sm:$0xff] }
 0x291   : > { %2196 = vst.msk [vmem:[#allocation3] sm:$0xff] %vm1927_vm0, %v2194_v55  ;;  %v8341_v1 = vpop.f32.mrf.mxu0  ;;  %v3769_v28 = vmax.f32 %v3765_v13, %v3761_v60  ;;  %v10788_v7 = vsel %vm2060_vm1, %v3775_v40, %v3777_v27  ;;  %8464 = vmatprep.subr.mxu1 %v10773_v63  ;;  %v3791_v60 = vsel %vm2076_vm3, %v3789_v11, %v3790_v5 }
 0x292   : > { %2338 = vst.msk [vmem:[#allocation3 + $0x10] sm:$0xff] %vm1927_vm0, %v2335_v25  ;;  %v2473_v47 = vmul.f32 %v8341_v1, %v10717_v53  ;;  %v8352_v4 = vpop.f32.mrf.mxu1  ;;  %8465 = vmatpush3.msra.mxu1 %v10773_v63  ;;  %v3786_v31 = vmax.f32 %v10751_v41, %v10788_v7  ;;  %v3793_v25 = vsel %vm2076_vm3, %v3790_v5, %v3792_v21  ;;  %v10864_v1 = vld [vmem:[%s13271_s5 + $0x18] sm:$0xff] }
 0x293   : > { %v2614_v15 = vmul.f32 %v8352_v4, %v10717_v53  ;;  %v2463_v33 = vpop.f32.mrf.mxu0  ;;  %v3779_v20 = vrot.slane %v3769_v28, 1  ;;  %v3794_v22 = vrot.slane %v3769_v28, 2  ;;  %8466 = vmatprep.subr.mxu1 %v10784_v0  ;;  %v3800_v11 = vmax.f32 %v3785_v59, %v3791_v60 }
 0x294   : > { %v2475_v26 = vadd.f32 %v10728_v24, %v2473_v47  ;;  %v2472_v50 = vmul.f32 %v10717_v53, %v2463_v33  ;;  %v2604_v57 = vpop.f32.mrf.mxu1  ;;  %8467 = vmatpush3.msra.mxu1 %v10784_v0  ;;  %v3801_v8 = vmax.f32 %v3786_v31, %v3793_v25 }
 0x295   : > { %v2616_v56 = vadd.f32 %v10728_v24, %v2614_v15  ;;  %v2613_v17 = vmul.f32 %v10717_v53, %v2604_v57  ;;  %v3788_v58 = vmax.f32 %v3769_v28, %v3779_v20  ;;  %v3780_v48 = vsel %vm2060_vm1, %v3777_v27, %v3779_v20  ;;  %8468 = vmatprep.subr.mxu1 %v10800_v12 }
 0x296   : > { %v10820_v3 = vld [vmem:[#allocation3 + $0x8] sm:$0x1f]  ;;  %v2477_v38 = vmax.f32 %v2475_v26, 0.0  ;;  %v2474_v44 = vadd.f32 %v10728_v24, %v2472_v50  ;;  %v3787_v45 = vmax.f32 %v10763_v35, %v3780_v48  ;;  %v3795_v39 = vsel %vm2076_vm3, %v3792_v21, %v3794_v22  ;;  %8469 = vmatpush3.msra.mxu1 %v10800_v12  ;;  %v10882_v26 = vld [vmem:[%s13271_s5 + $0x10] sm:$0xff] }
 0x297   : > { %v3899_v49 = vrot.slane %v10820_v3, 1  ;;  %v10832_v41 = vld [vmem:[#allocation3 + $0x18] sm:$0x1f]  ;;  %v2618_v14 = vmax.f32 %v2616_v56, 0.0  ;;  %v2615_v42 = vadd.f32 %v10728_v24, %v2613_v17  ;;  %v3803_v43 = vmax.f32 %v3788_v58, %v3794_v22  ;;  %8470 = vmatprep.subr.mxu1 %v10814_v34  ;;  %v10893_v58 = vld [vmem:[%s13271_s5 + $0x8] sm:$0xff] }
 0x298   : > { %v10836_v32 = vld [vmem:[#allocation3] sm:$0xff]  ;;  %v3916_v36 = vrot.slane %v10832_v41, 1  ;;  %2480 = vst.msk [vmem:[#allocation3 + $0x28] sm:$0x1f] %vm2197_vm8, %v2477_v38  ;;  %v2476_v51 = vmax.f32 %v2474_v44, 0.0  ;;  %v3802_v35 = vmax.f32 %v3787_v45, %v3795_v39  ;;  %8471 = vmatpush3.msra.mxu1 %v10814_v34 }
 0x299   : > { %v3898_v6 = vrot.slane %v10836_v32, 1  ;;  %v10848_v55 = vld [vmem:[#allocation3 + $0x10] sm:$0xff]  ;;  %2621 = vst.msk [vmem:[#allocation3 + $0x38] sm:$0x1f] %vm2197_vm8, %v2618_v14  ;;  %v2617_v13 = vmax.f32 %v2615_v42, 0.0  ;;  %8441 = vmatprep.subr.msk.mxu0 %vm2099_vm2, %v3803_v43  ;;  %8472 = vmatprep.subr.mxu1 %v10829_v62 }
 0x29a   : > { %v3915_v37 = vrot.slane %v10848_v55, 1  ;;  %2479 = vst.msk [vmem:[#allocation3 + $0x20] sm:$0xff] %vm1927_vm0, %v2476_v51  ;;  %v10855_v27 = vld [vmem:[#allocation3 + $0x18] sm:$0x1f]  ;;  %v8363_v40 = vpop.f32.mrf.mxu0  ;;  %8442 = vmatpush3.msk.msra.mxu0 %vm2099_vm2, %v3803_v43  ;;  %8473 = vmatpush3.msra.mxu1 %v10829_v62  ;;  %v9055_v23 = vpack.i.bf16 %v10832_v41, %v10848_v55  ;;  %vm5507_vm2 = vcmask 1043456  }
 0x29b   : > { %v3900_v28 = vsel %vm2060_vm1, %v3898_v6, %v3899_v49  ;;  %2620 = vst.msk [vmem:[#allocation3 + $0x30] sm:$0xff] %vm1927_vm0, %v2617_v13  ;;  %v2755_v7 = vmul.f32 %v8363_v40, %v10717_v53  ;;  %8443 = vmatprep.subr.mxu0 %v3802_v35  ;;  %8474 = vmatprep.subr.mxu1 %v10845_v54  ;;  %v4039_v33 = vrot.slane %v10855_v27, 1 }
 0x29c   : > { %v9050_v47 = vpack.i.bf16 %v3899_v49, %v3900_v28  ;;  %v3917_v4 = vsel %vm2060_vm1, %v3915_v37, %v3916_v36  ;;  %v2745_v5 = vpop.f32.mrf.mxu0  ;;  %8444 = vmatpush3.msra.mxu0 %v3802_v35  ;;  %8475 = vmatpush3.msra.mxu1 %v10845_v54 }
 0x29d   : > { %v9060_v15 = vpack.i.bf16 %v3916_v36, %v3917_v4  ;;  %v2757_v20 = vadd.f32 %v10728_v24, %v2755_v7  ;;  %v2754_v22 = vmul.f32 %v10717_v53, %v2745_v5  ;;  %8445 = vmatprep.subr.mxu0 %v3801_v8  ;;  %8476 = vmatprep.subr.mxu1 %v10864_v1  ;;  %v10911_v36 = vld [vmem:[%s13271_s5] sm:$0xff] }
 0x29e   : > { %9051 = vrot.lane.b32.xlu0 %v9050_v47, %s9320_s15  ;;  %8446 = vmatpush3.msra.mxu0 %v3801_v8  ;;  %v4040_v44 = vsel %vm2060_vm1, %v3915_v37, %v4039_v33 }
 0x29f   : > { %9061 = vrot.lane.b32.xlu1 %v9060_v15, %s9321_s22  ;;  %v4035_v50 = vld [vmem:[#allocation3 + $0x28] sm:$0x1f]  ;;  %v2759_v21 = vmax.f32 %v2757_v20, 0.0  ;;  %v2756_v31 = vadd.f32 %v10728_v24, %v2754_v22  ;;  %8447 = vmatprep.subr.mxu0 %v3800_v11 }
 0x2a0   : > { %v10885_v57 = vld [vmem:[#allocation3 + $0x28] sm:$0x1f]  ;;  %v4167_v56 = vld [vmem:[#allocation3 + $0x38] sm:$0x1f]  ;;  %8448 = vmatpush3.msra.mxu0 %v3800_v11  ;;  %8477 = vmatpush3.msra.mxu1 %v10864_v1  ;;  %v4056_v38 = vrot.slane %v4035_v50, 1 }
 0x2a1   : > { %v4171_v17 = vrot.slane %v10885_v57, 1  ;;  %v10895_v48 = vld [vmem:[#allocation3 + $0x20] sm:$0xff]  ;;  %2762 = vst.msk [vmem:[#allocation3 + $0x48] sm:$0x1f] %vm2197_vm8, %v2759_v21  ;;  %v2758_v45 = vmax.f32 %v2756_v31, 0.0  ;;  %v8374_v39 = vpop.f32.mrf.mxu1  ;;  %8450 = vmatmul.mubr.msk.f32.vlgmr.msra.gmra.mxu0 %vm2092_vm5, %v10352_v30  ;;  %8478 = vmatprep.subr.mxu1 %v10882_v26  ;;  %v4188_v14 = vrot.slane %v4167_v56, 1  ;;  %v9065_v42 = vpack.i.bf16 %v4167_v56, %v4035_v50 }
 0x2a2   : > { %9056 = vrot.lane.b32.xlu0 %v9055_v23, %s13281_s27  ;;  %v10903_v49 = vld [vmem:[#allocation3 + $0x30] sm:$0xff]  ;;  %v4055_v41 = vrot.slane %v10895_v48, 1  ;;  %v2896_v43 = vmul.f32 %v8374_v39, %v10717_v53  ;;  %8479 = vmatpush3.msra.mxu1 %v10882_v26  ;;  %v10922_v37 = vld [vmem:[#allocation3 + $0x38] sm:$0x1f]  ;;  %vm5503_vm5 = vcmask 97280  }
 0x2a3   : > { %v4187_v30 = vrot.slane %v10903_v49, 1  ;;  %v9075_v51 = vpack.i.bf16 %v10903_v49, %v10895_v48  ;;  %2761 = vst.msk [vmem:[#allocation3 + $0x40] sm:$0xff] %vm1927_vm0, %v2758_v45  ;;  %v2886_v35 = vpop.f32.mrf.mxu1  ;;  %8480 = vmatprep.subr.mxu1 %v10893_v58  ;;  %8487 = vmatprep.subr.mxu0 %v10703_v61  ;;  %v9070_v25 = vpack.i.bf16 %v4171_v17, %v4039_v33  ;;  %v4303_v47 = vrot.slane %v10922_v37, 1 }
 0x2a4   : > { %v4172_v59 = vsel %vm2060_vm1, %v4055_v41, %v4171_v17  ;;  %v2898_v6 = vadd.f32 %v10728_v24, %v2896_v43  ;;  %v2895_v13 = vmul.f32 %v10717_v53, %v2886_v35  ;;  %8481 = vmatpush3.msra.mxu1 %v10893_v58  ;;  %v4057_v60 = vsel %vm2060_vm1, %v4055_v41, %v4056_v38 }
 0x2a5   : > { %9076 = vrot.lane.b32.xlu1 %v9075_v51, %s13281_s27  ;;  %v9080_v40 = vpack.i.bf16 %v4172_v59, %v4040_v44  ;;  %8482 = vmatprep.subr.mxu1 %v10911_v36  ;;  %v4189_v28 = vsel %vm2060_vm1, %v4187_v30, %v4188_v14  ;;  %v9090_v33 = vpack.i.bf16 %v4188_v14, %v4056_v38 }
 0x2a6   : > { %9066 = vrot.lane.b32.xlu0 %v9065_v42, %s13281_s27  ;;  %v2900_v7 = vmax.f32 %v2898_v6, 0.0  ;;  %v2897_v8 = vadd.f32 %v10728_v24, %v2895_v13  ;;  %8483 = vmatpush3.msra.mxu1 %v10911_v36  ;;  %v9085_v11 = vpack.i.bf16 %v4189_v28, %v4057_v60  ;;  %v4304_v22 = vsel %vm2060_vm1, %v4187_v30, %v4303_v47 }
 0x2a7   : > { %8522 = vmatprep.subr.mxu1 %v10703_v61  ;;  %8488 = vmatpush3.msra.mxu0 %v10703_v61 }
 0x2a8   : > { %2903 = vst.msk [vmem:[#allocation3 + $0x58] sm:$0x1f] %vm2197_vm8, %v2900_v7  ;;  %v2899_v4 = vmax.f32 %v2897_v8, 0.0  ;;  %v10936_v5 = vld [vmem:[#allocation3 + $0x48] sm:$0x1f]  ;;  %8489 = vmatprep.subr.mxu0 %v10708_v18 }
 0x2a9   : > { %9081 = vrot.lane.b32.xlu1 %v9080_v40, %s9320_s15  ;;  %v4435_v15 = vrot.slane %v10936_v5, 1  ;;  %8490 = vmatpush3.msra.mxu0 %v10708_v18  ;;  %v4299_v50 = vld [vmem:[#allocation3 + $0x48] sm:$0x1f] }
 0x2aa   : > { %9071 = vrot.lane.b32.xlu0 %v9070_v25, %s9320_s15  ;;  %2902 = vst.msk [vmem:[#allocation3 + $0x50] sm:$0xff] %vm1927_vm0, %v2899_v4  ;;  %v10944_v20 = vld [vmem:[#allocation3 + $0x40] sm:$0xff]  ;;  %8491 = vmatprep.subr.mxu0 %v10723_v29  ;;  %v4320_v17 = vrot.slane %v4299_v50, 1 }
 0x2ab   : > { %v4434_v23 = vrot.slane %v10944_v20, 1  ;;  %8492 = vmatpush3.msra.mxu0 %v10723_v29  ;;  %v9095_v56 = vpack.i.bf16 %v4435_v15, %v4303_v47 }
 0x2ac   : > { %8493 = vmatprep.subr.mxu0 %v10735_v10 }
 0x2ad   : > { %9086 = vrot.lane.b32.xlu1 %v9085_v11, %s9321_s22  ;;  %v4436_v21 = vsel %vm2060_vm1, %v4434_v23, %v4435_v15  ;;  %8494 = vmatpush3.msra.mxu0 %v10735_v10  ;;  %v4321_v42 = vsel %vm2060_vm1, %v4434_v23, %v4320_v17 }
 0x2ae   : > { %9091 = vrot.lane.b32.xlu0 %v9090_v33, %s9321_s22  ;;  %v9100_v31 = vpack.i.bf16 %v4436_v21, %v4304_v22  ;;  %8495 = vmatprep.subr.mxu0 %v10746_v52 }
 0x2af   : > { %v4431_v38 = vld [vmem:[#allocation3 + $0x58] sm:$0x1f]  ;;  %8496 = vmatpush3.msra.mxu0 %v10746_v52 }
 0x2b0   : > { %v4452_v44 = vrot.slane %v4431_v38, 1  ;;  %8497 = vmatprep.subr.mxu0 %v10760_v46  ;;  %v9105_v14 = vpack.i.bf16 %v4431_v38, %v4299_v50  ;;  %v10999_v7 = vld [vmem:[#allocation3 + $0x58] sm:$0x1f] }
 0x2b1   : > { %9101 = vrot.lane.b32.xlu1 %v9100_v31, %s9320_s15  ;;  %v10959_v45 = vld [vmem:[#allocation3 + $0x50] sm:$0xff]  ;;  %8498 = vmatpush3.msra.mxu0 %v10760_v46  ;;  %v4567_v8 = vrot.slane %v10999_v7, 1 }
 0x2b2   : > { %9096 = vrot.lane.b32.xlu0 %v9095_v56, %s9320_s15  ;;  %v4451_v39 = vrot.slane %v10959_v45, 1  ;;  %v9110_v41 = vpack.i.bf16 %v10959_v45, %v10944_v20  ;;  %8499 = vmatprep.subr.mxu0 %v10773_v63  ;;  %v9120_v51 = vpack.i.bf16 %v4452_v44, %v4320_v17 }
 0x2b3   : > { %8500 = vmatpush3.msra.mxu0 %v10773_v63 }
 0x2b4   : > { %v4453_v43 = vsel %vm2060_vm1, %v4451_v39, %v4452_v44  ;;  %8501 = vmatprep.subr.mxu0 %v10784_v0  ;;  %v4568_v15 = vsel %vm2060_vm1, %v4451_v39, %v4567_v8 }
 0x2b5   : > { %9111 = vrot.lane.b32.xlu1 %v9110_v41, %s13281_s27  ;;  %v9115_v30 = vpack.i.bf16 %v4453_v43, %v4321_v42  ;;  %8502 = vmatpush3.msra.mxu0 %v10784_v0 }
 0x2b6   : > { %9106 = vrot.lane.b32.xlu0 %v9105_v14, %s13281_s27  ;;  %8503 = vmatprep.subr.mxu0 %v10800_v12 }
 0x2b7   : > { %8504 = vmatpush3.msra.mxu0 %v10800_v12 }
 0x2b8   : > { %8505 = vmatprep.subr.mxu0 %v10814_v34 }
 0x2b9   : > { %9116 = vrot.lane.b32.xlu1 %v9115_v30, %s9321_s22  ;;  %8506 = vmatpush3.msra.mxu0 %v10814_v34 }
 0x2ba   : > { %9121 = vrot.lane.b32.xlu0 %v9120_v51, %s9321_s22  ;;  %8507 = vmatprep.subr.mxu0 %v10829_v62 }
 0x2bb   : > { %8508 = vmatpush3.msra.mxu0 %v10829_v62 }
 0x2bc   : > { %8509 = vmatprep.subr.mxu0 %v10845_v54 }
 0x2bd   : > { %v8385_v35 = vpop.f32.mrf.mxu0  ;;  %8510 = vmatpush3.msra.mxu0 %v10845_v54 }
 0x2be   : > { %v3037_v59 = vmul.f32 %v8385_v35, %v10717_v53  ;;  %8511 = vmatprep.subr.mxu0 %v10864_v1 }
 0x2bf   : > { %v3027_v6 = vpop.f32.mrf.mxu0  ;;  %8512 = vmatpush3.msra.mxu0 %v10864_v1 }
 0x2c0   : > { %v3039_v13 = vadd.f32 %v10728_v24, %v3037_v59  ;;  %v3036_v40 = vmul.f32 %v10717_v53, %v3027_v6  ;;  %8513 = vmatprep.subr.mxu0 %v10882_v26 }
 0x2c1   : > { %8514 = vmatpush3.msra.mxu0 %v10882_v26 }
 0x2c2   : > { %v3041_v25 = vmax.f32 %v3039_v13, 0.0  ;;  %v3038_v60 = vadd.f32 %v10728_v24, %v3036_v40  ;;  %8515 = vmatprep.subr.mxu0 %v10893_v58 }
 0x2c3   : > { %8516 = vmatpush3.msra.mxu0 %v10893_v58 }
 0x2c4   : > { %3044 = vst.msk [vmem:[#allocation3 + $0x68] sm:$0x1f] %vm2197_vm8, %v3041_v25  ;;  %v3040_v28 = vmax.f32 %v3038_v60, 0.0  ;;  %8517 = vmatprep.subr.mxu0 %v10911_v36 }
 0x2c5   : > { %8518 = vmatpush3.msra.mxu0 %v10911_v36 }
 0x2c6   : > { %3043 = vst.msk [vmem:[#allocation3 + $0x60] sm:$0xff] %vm1927_vm0, %v3040_v28  ;;  %8557 = vmatprep.subr.mxu0 %v10703_v61 }
 0x2cb   : > { %v11002_v47 = vld [vmem:[#allocation3 + $0x68] sm:$0x1f] }
 0x2cc   : > { %v4699_v4 = vrot.slane %v11002_v47, 1  ;;  %v4563_v14 = vld [vmem:[#allocation3 + $0x68] sm:$0x1f] }
 0x2cd   : > { %v11005_v11 = vld [vmem:[#allocation3 + $0x60] sm:$0xff]  ;;  %v4584_v42 = vrot.slane %v4563_v14, 1 }
 0x2ce   : > { %v4698_v33 = vrot.slane %v11005_v11, 1  ;;  %v9125_v22 = vpack.i.bf16 %v4699_v4, %v4567_v8 }
 0x2d0   : > { %v4700_v23 = vsel %vm2060_vm1, %v4698_v33, %v4699_v4  ;;  %9126 = vrot.lane.b32.xlu0 %v9125_v22, %s9320_s15  ;;  %v4585_v13 = vsel %vm2060_vm1, %v4698_v33, %v4584_v42 }
 0x2d1   : > { %v9130_v50 = vpack.i.bf16 %v4700_v23, %v4568_v15 }
 0x2d3   : > { %9131 = vrot.lane.b32.xlu1 %v9130_v50, %s9320_s15 }
 0x2d9   : > { %v8396_v21 = vpop.f32.mrf.mxu1 }
 0x2da   : > { %v3178_v31 = vmul.f32 %v8396_v21, %v10717_v53 }
 0x2db   : > { %v3168_v56 = vpop.f32.mrf.mxu1 }
 0x2dc   : > { %v3180_v17 = vadd.f32 %v10728_v24, %v3178_v31  ;;  %v3177_v38 = vmul.f32 %v10717_v53, %v3168_v56 }
 0x2de   : > { %v3182_v44 = vmax.f32 %v3180_v17, 0.0  ;;  %v3179_v39 = vadd.f32 %v10728_v24, %v3177_v38 }
 0x2e0   : > { %3185 = vst.msk [vmem:[#allocation3 + $0x78] sm:$0x1f] %vm2197_vm8, %v3182_v44  ;;  %v3181_v41 = vmax.f32 %v3179_v39, 0.0 }
 0x2e2   : > { %3184 = vst.msk [vmem:[#allocation3 + $0x70] sm:$0xff] %vm1927_vm0, %v3181_v41 }
 0x2e7   : > { %v4695_v43 = vld [vmem:[#allocation3 + $0x78] sm:$0x1f] }
 0x2e8   : > { %v4716_v30 = vrot.slane %v4695_v43, 1  ;;  %v9135_v51 = vpack.i.bf16 %v4695_v43, %v4563_v14  ;;  %v11035_v21 = vld [vmem:[#allocation3 + $0x78] sm:$0x1f] }
 0x2e9   : > { %v11018_v35 = vld [vmem:[#allocation3 + $0x70] sm:$0xff]  ;;  %v4831_v31 = vrot.slane %v11035_v21, 1 }
 0x2ea   : > { %v4715_v59 = vrot.slane %v11018_v35, 1  ;;  %v9140_v6 = vpack.i.bf16 %v11018_v35, %v11005_v11  ;;  %9136 = vrot.lane.b32.xlu0 %v9135_v51, %s13281_s27  ;;  %v9150_v40 = vpack.i.bf16 %v4716_v30, %v4584_v42 }
 0x2ec   : > { %9141 = vrot.lane.b32.xlu1 %v9140_v6, %s13281_s27  ;;  %v4717_v25 = vsel %vm2060_vm1, %v4715_v59, %v4716_v30  ;;  %v4832_v44 = vsel %vm2060_vm1, %v4715_v59, %v4831_v31 }
 0x2ed   : > { %v9145_v60 = vpack.i.bf16 %v4717_v25, %v4585_v13 }
 0x2ee   : > { %9151 = vrot.lane.b32.xlu0 %v9150_v40, %s9321_s22 }
 0x2f0   : > { %9146 = vrot.lane.b32.xlu1 %v9145_v60, %s9321_s22 }
 0x2f5   : > { %v8407_v28 = vpop.f32.mrf.mxu0 }
 0x2f6   : > { %v3319_v8 = vmul.f32 %v8407_v28, %v10717_v53 }
 0x2f7   : > { %v3309_v4 = vpop.f32.mrf.mxu0 }
 0x2f8   : > { %v3321_v15 = vadd.f32 %v10728_v24, %v3319_v8  ;;  %v3318_v22 = vmul.f32 %v10717_v53, %v3309_v4 }
 0x2fa   : > { %v3323_v23 = vmax.f32 %v3321_v15, 0.0  ;;  %v3320_v33 = vadd.f32 %v10728_v24, %v3318_v22 }
 0x2fc   : > { %3326 = vst.msk [vmem:[#allocation3 + $0x88] sm:$0x1f] %vm2197_vm8, %v3323_v23  ;;  %v3322_v50 = vmax.f32 %v3320_v33, 0.0 }
 0x2fe   : > { %3325 = vst.msk [vmem:[#allocation3 + $0x80] sm:$0xff] %vm1927_vm0, %v3322_v50 }
 0x303   : > { %v11038_v56 = vld [vmem:[#allocation3 + $0x88] sm:$0x1f] }
 0x304   : > { %v4963_v17 = vrot.slane %v11038_v56, 1 }
 0x305   : > { %v11041_v38 = vld [vmem:[#allocation3 + $0x80] sm:$0xff] }
 0x306   : > { %v4962_v39 = vrot.slane %v11041_v38, 1  ;;  %v9155_v41 = vpack.i.bf16 %v4963_v17, %v4831_v31 }
 0x308   : > { %v4964_v14 = vsel %vm2060_vm1, %v4962_v39, %v4963_v17  ;;  %9156 = vrot.lane.b32.xlu0 %v9155_v41, %s9320_s15 }
 0x309   : > { %v9160_v42 = vpack.i.bf16 %v4964_v14, %v4832_v44  ;;  %v4827_v44 = vld [vmem:[#allocation3 + $0x88] sm:$0x1f] }
 0x30b   : > { %9161 = vrot.lane.b32.xlu1 %v9160_v42, %s9320_s15  ;;  %v4848_v42 = vrot.slane %v4827_v44, 1 }
 0x30d   : > { %v8418_v43 = vpop.f32.mrf.mxu1 }
 0x30e   : > { %v3460_v30 = vmul.f32 %v8418_v43, %v10717_v53 }
 0x30f   : > { %v3450_v51 = vpop.f32.mrf.mxu1 }
 0x310   : > { %v3462_v6 = vadd.f32 %v10728_v24, %v3460_v30  ;;  %v3459_v13 = vmul.f32 %v10717_v53, %v3450_v51  ;;  %v9052_v40 = vpop.permute.xlu0 %9051 }
 0x311   : > { %v9062_v59 = vpop.permute.xlu1 %9061  ;;  %v9054_v28 = vunpack.i.h.bf16 %v9052_v40  ;;  %v9053_v8 = vunpack.i.l.bf16 %v9052_v40 }
 0x312   : > { %v3464_v25 = vmax.f32 %v3462_v6, 0.0  ;;  %v3461_v60 = vadd.f32 %v10728_v24, %v3459_v13  ;;  %v9064_v22 = vunpack.i.h.bf16 %v9062_v59  ;;  %v9063_v23 = vunpack.i.l.bf16 %v9062_v59 }
 0x313   : > { %v3925_v31 = vsel %vm1927_vm0, %v10820_v3, %v9054_v28  ;;  %v3924_v17 = vsel %vm1927_vm0, %v10836_v32, %v9053_v8  ;;  %v4849_v32 = vsel %vm2060_vm1, %v4962_v39, %v4848_v42 }
 0x314   : > { %3467 = vst.msk [vmem:[#allocation3 + $0x98] sm:$0x1f] %vm2197_vm8, %v3464_v25  ;;  %v3463_v4 = vmax.f32 %v3461_v60, 0.0  ;;  %v9057_v15 = vpop.permute.xlu0 %9056 }
 0x315   : > { %v9059_v33 = vunpack.i.h.bf16 %v9057_v15  ;;  %v9058_v50 = vunpack.i.l.bf16 %v9057_v15 }
 0x316   : > { %3466 = vst.msk [vmem:[#allocation3 + $0x90] sm:$0xff] %vm1927_vm0, %v3463_v4 }
 0x317   : > { %v3928_v41 = vsel %vm3926_vm9, %v3925_v31, %v9059_v33  ;;  %v3927_v14 = vsel %vm3926_vm9, %v3924_v17, %v9058_v50  ;;  %v9077_v43 = vpop.permute.xlu1 %9076 }
 0x318   : > { %v3930_v30 = vsel %vm3929_vm10, %v3927_v14, %v9063_v23  ;;  %v3931_v51 = vsel %vm3929_vm10, %v3928_v41, %v9064_v22  ;;  %v11062_v6 = vpop.permute.xlu0 %9066  ;;  %v9079_v4 = vunpack.i.h.bf16 %v9077_v43  ;;  %v9078_v15 = vunpack.i.l.bf16 %v9077_v43 }
 0x319   : > { %8484 = vmatprep.mubr.f32.mxu1 %v3930_v30  ;;  %v9068_v22 = vunpack.i.l.bf16 %v11062_v6 }
 0x31a   : > { %8485 = vmatmul.mubr.f32.vlgmr.msra.gmra.mxu1 %v3931_v51 }
 0x31b   : > { %8523 = vmatpush3.msra.mxu1 %v10703_v61  ;;  %v4959_v3 = vld [vmem:[#allocation3 + $0x98] sm:$0x1f]  ;;  %v9082_v13 = vpop.permute.xlu1 %9081 }
 0x31c   : > { %8524 = vmatprep.subr.mxu1 %v10708_v18  ;;  %v4980_v40 = vrot.slane %v4959_v3, 1  ;;  %v9165_v59 = vpack.i.bf16 %v4959_v3, %v4827_v44  ;;  %v9084_v25 = vunpack.i.h.bf16 %v9082_v13  ;;  %v9083_v60 = vunpack.i.l.bf16 %v9082_v13  ;;  %v11067_v28 = vpop.permute.xlu0 %9071 }
 0x31d   : > { %8525 = vmatpush3.msra.mxu1 %v10708_v18  ;;  %v11070_v8 = vld [vmem:[#allocation3 + $0x90] sm:$0xff]  ;;  %v9073_v23 = vunpack.i.l.bf16 %v11067_v28 }
 0x31e   : > { %8526 = vmatprep.subr.mxu1 %v10723_v29  ;;  %v4979_v39 = vrot.slane %v11070_v8, 1  ;;  %v9170_v33 = vpack.i.bf16 %v11070_v8, %v11041_v38  ;;  %9166 = vrot.lane.b32.xlu0 %v9165_v59, %s13281_s27  ;;  %v9180_v50 = vpack.i.bf16 %v4980_v40, %v4848_v42  ;;  %v4064_v31 = vsel %vm1927_vm0, %v10848_v55, %v9083_v60 }
 0x31f   : > { %8527 = vmatpush3.msra.mxu1 %v10723_v29  ;;  %v4065_v17 = vsel %vm1927_vm0, %v10855_v27, %v9073_v23  ;;  %v9087_v44 = vpop.permute.xlu1 %9086  ;;  %v4196_v41 = vsel %vm1927_vm0, %v10895_v48, %v9084_v25  ;;  %v4066_v51 = vsel %vm3926_vm9, %v4064_v31, %v9078_v15  ;;  %v11148_v31 = vld [vmem:[#allocation3 + $0x98] sm:$0x1f] }
 0x320   : > { %9171 = vrot.lane.b32.xlu1 %v9170_v33, %s13281_s27  ;;  %8528 = vmatprep.subr.mxu1 %v10735_v10  ;;  %v4981_v14 = vsel %vm2060_vm1, %v4979_v39, %v4980_v40  ;;  %v9089_v42 = vunpack.i.h.bf16 %v9087_v44  ;;  %v9088_v43 = vunpack.i.l.bf16 %v9087_v44  ;;  %v11091_v55 = vpop.permute.xlu0 %9091  ;;  %v4198_v48 = vsel %vm3926_vm9, %v4196_v41, %v9079_v4 }
 0x321   : > { %8529 = vmatpush3.msra.mxu1 %v10735_v10  ;;  %v9175_v30 = vpack.i.bf16 %v4981_v14, %v4849_v32  ;;  %v9093_v27 = vunpack.i.l.bf16 %v11091_v55  ;;  %v4067_v40 = vsel %vm3926_vm9, %v4065_v17, %v9068_v22  ;;  %v9074_v33 = vunpack.i.h.bf16 %v11067_v28 }
 0x322   : > { %8530 = vmatprep.subr.mxu1 %v10746_v52  ;;  %9181 = vrot.lane.b32.xlu0 %v9180_v50, %s9321_s22  ;;  %v4068_v3 = vsel %vm3929_vm10, %v4066_v51, %v9088_v43  ;;  %v4200_v13 = vsel %vm3929_vm10, %v4198_v48, %v9089_v42  ;;  %v9094_v50 = vunpack.i.h.bf16 %v11091_v55 }
 0x323   : > { %8531 = vmatpush3.msra.mxu1 %v10746_v52  ;;  %8519 = vmatprep.mubr.f32.mxu0 %v4068_v3  ;;  %v4069_v32 = vsel %vm3929_vm10, %v4067_v40, %v9093_v27  ;;  %v4197_v28 = vsel %vm1927_vm0, %v10885_v57, %v9074_v33  ;;  %v11151_v17 = vpop.permute.xlu1 %9101  ;;  %v5095_v57 = vrot.slane %v11148_v31, 1  ;;  %v11229_v33 = vld [vmem:[%s13270_s4] ss:$0 sm:$0xff] }
 0x324   : > { %9176 = vrot.lane.b32.xlu1 %v9175_v30, %s9321_s22  ;;  %8532 = vmatprep.subr.mxu1 %v10760_v46  ;;  %v11164_v14 = vpop.permute.xlu0 %9096 }
 0x325   : > { %8533 = vmatpush3.msra.mxu1 %v10760_v46  ;;  %8554 = vmatprep.mubr.f32.mxu1 %v4200_v13  ;;  %v5096_v51 = vsel %vm2060_vm1, %v4979_v39, %v5095_v57  ;;  %v9103_v39 = vunpack.i.l.bf16 %v11151_v17 }
 0x326   : > { %8534 = vmatprep.subr.mxu1 %v10773_v63  ;;  %8520 = vmatmul.mubr.f32.vlgmr.msra.gmra.mxu0 %v4069_v32 }
 0x327   : > { %8535 = vmatpush3.msra.mxu1 %v10773_v63  ;;  %8558 = vmatpush3.msra.mxu0 %v10703_v61  ;;  %v9112_v55 = vpop.permute.xlu1 %9111  ;;  %v4328_v32 = vsel %vm1927_vm0, %v10903_v49, %v9103_v39 }
 0x328   : > { %8536 = vmatprep.subr.mxu1 %v10784_v0  ;;  %8559 = vmatprep.subr.mxu0 %v10708_v18  ;;  %v9114_v40 = vunpack.i.h.bf16 %v9112_v55 }
 0x329   : > { %v8429_v59 = vpop.f32.mrf.mxu0  ;;  %8537 = vmatpush3.msra.mxu1 %v10784_v0  ;;  %8560 = vmatpush3.msra.mxu0 %v10708_v18 }
 0x32a   : > { %v3601_v25 = vmul.f32 %v8429_v59, %v10717_v53  ;;  %8538 = vmatprep.subr.mxu1 %v10800_v12  ;;  %8561 = vmatprep.subr.mxu0 %v10723_v29 }
 0x32b   : > { %v3591_v60 = vpop.f32.mrf.mxu0  ;;  %8539 = vmatpush3.msra.mxu1 %v10800_v12  ;;  %8562 = vmatpush3.msra.mxu0 %v10723_v29  ;;  %v9117_v8 = vpop.permute.xlu1 %9116 }
 0x32c   : > { %v3603_v4 = vadd.f32 %v10728_v24, %v3601_v25  ;;  %v3600_v15 = vmul.f32 %v10717_v53, %v3591_v60  ;;  %8540 = vmatprep.subr.mxu1 %v10814_v34  ;;  %8563 = vmatprep.subr.mxu0 %v10735_v10  ;;  %v9118_v13 = vunpack.i.l.bf16 %v9117_v8  ;;  %v9098_v25 = vunpack.i.l.bf16 %v11164_v14 }
 0x32d   : > { %8541 = vmatpush3.msra.mxu1 %v10814_v34  ;;  %8564 = vmatpush3.msra.mxu0 %v10735_v10 }
 0x32e   : > { %v3605_v22 = vmax.f32 %v3603_v4, 0.0  ;;  %v3602_v23 = vadd.f32 %v10728_v24, %v3600_v15  ;;  %8542 = vmatprep.subr.mxu1 %v10829_v62  ;;  %8565 = vmatprep.subr.mxu0 %v10746_v52  ;;  %v9069_v24 = vunpack.i.h.bf16 %v11062_v6  ;;  %v11214_v4 = vld [vmem:[%s13269_s3] ss:$0 sm:$0xff] }
 0x32f   : > { %8543 = vmatpush3.msra.mxu1 %v10829_v62  ;;  %8566 = vmatpush3.msra.mxu0 %v10746_v52 }
 0x330   : > { %3608 = vst.msk [vmem:[#allocation3 + $0xa8] sm:$0x1f] %vm2197_vm8, %v3605_v22  ;;  %v3604_v53 = vmax.f32 %v3602_v23, 0.0  ;;  %8544 = vmatprep.subr.mxu1 %v10845_v54  ;;  %8567 = vmatprep.subr.mxu0 %v10760_v46  ;;  %v4199_v41 = vsel %vm3926_vm9, %v4197_v28, %v9069_v24 }
 0x331   : > { %8545 = vmatpush3.msra.mxu1 %v10845_v54  ;;  %8568 = vmatpush3.msra.mxu0 %v10760_v46  ;;  %v4201_v43 = vsel %vm3929_vm10, %v4199_v41, %v9094_v50 }
 0x332   : > { %3607 = vst.msk [vmem:[#allocation3 + $0xa0] sm:$0xff] %vm1927_vm0, %v3604_v53  ;;  %8546 = vmatprep.subr.mxu1 %v10864_v1  ;;  %8569 = vmatprep.subr.mxu0 %v10773_v63 }
 0x333   : > { %8547 = vmatpush3.msra.mxu1 %v10864_v1  ;;  %8570 = vmatpush3.msra.mxu0 %v10773_v63 }
 0x334   : > { %8548 = vmatprep.subr.mxu1 %v10882_v26  ;;  %8571 = vmatprep.subr.mxu0 %v10784_v0 }
 0x335   : > { %8549 = vmatpush3.msra.mxu1 %v10882_v26  ;;  %8572 = vmatpush3.msra.mxu0 %v10784_v0 }
 0x336   : > { %8550 = vmatprep.subr.mxu1 %v10893_v58  ;;  %8573 = vmatprep.subr.mxu0 %v10800_v12 }
 0x337   : > { %8551 = vmatpush3.msra.mxu1 %v10893_v58  ;;  %v11156_v6 = vld [vmem:[#allocation3 + $0xa8] sm:$0x1f]  ;;  %8574 = vmatpush3.msra.mxu0 %v10800_v12 }
 0x338   : > { %8552 = vmatprep.subr.mxu1 %v10911_v36  ;;  %v5227_v44 = vrot.slane %v11156_v6, 1  ;;  %8575 = vmatprep.subr.mxu0 %v10814_v34 }
 0x339   : > { %8553 = vmatpush3.msra.mxu1 %v10911_v36  ;;  %v11167_v42 = vld [vmem:[#allocation3 + $0xa0] sm:$0xff]  ;;  %8576 = vmatpush3.msra.mxu0 %v10814_v34 }
 0x33a   : > { %8592 = vmatprep.subr.mxu1 %v10703_v61  ;;  %v5226_v30 = vrot.slane %v11167_v42, 1  ;;  %8555 = vmatmul.mubr.f32.vlgmr.msra.gmra.mxu1 %v4201_v43  ;;  %v9185_v27 = vpack.i.bf16 %v5227_v44, %v5095_v57  ;;  %v9242_v43 = vld [vmem:[%s13271_s5 + $0x68] sm:$0xff] }
 0x33b   : > { %8593 = vmatpush3.msra.mxu1 %v10703_v61  ;;  %8577 = vmatprep.subr.mxu0 %v10829_v62  ;;  %v11187_v61 = vpop.permute.xlu0 %9106 }
 0x33c   : > { %v5228_v48 = vsel %vm2060_vm1, %v5226_v30, %v5227_v44  ;;  %9186 = vrot.lane.b32.xlu0 %v9185_v27, %s9320_s15  ;;  %8594 = vmatprep.subr.mxu1 %v10708_v18  ;;  %v9108_v49 = vunpack.i.l.bf16 %v11187_v61  ;;  %v9099_v27 = vunpack.i.h.bf16 %v11164_v14  ;;  %v9109_v39 = vunpack.i.h.bf16 %v11187_v61  ;;  %v9245_v61 = vld [vmem:[%s13271_s5 + $0x50] sm:$0xff] }
 0x33d   : > { %v9190_v3 = vpack.i.bf16 %v5228_v48, %v5096_v51  ;;  %8595 = vmatpush3.msra.mxu1 %v10708_v18  ;;  %8578 = vmatpush3.msra.mxu0 %v10829_v62  ;;  %v9113_v18 = vunpack.i.l.bf16 %v9112_v55  ;;  %v9243_v55 = vld [vmem:[%s13271_s5 + $0x60] sm:$0xff] }
 0x33e   : > { %8596 = vmatprep.subr.mxu1 %v10723_v29  ;;  %8579 = vmatprep.subr.mxu0 %v10845_v54 }
 0x33f   : > { %9191 = vrot.lane.b32.xlu1 %v9190_v3, %s9320_s15  ;;  %8597 = vmatpush3.msra.mxu1 %v10723_v29  ;;  %v9104_v29 = vunpack.i.h.bf16 %v11151_v17  ;;  %v4330_v60 = vsel %vm3926_vm9, %v4328_v32, %v9113_v18 }
 0x340   : > { %8598 = vmatprep.subr.mxu1 %v10735_v10  ;;  %8580 = vmatpush3.msra.mxu0 %v10845_v54 }
 0x341   : > { %8599 = vmatpush3.msra.mxu1 %v10735_v10  ;;  %8581 = vmatprep.subr.mxu0 %v10864_v1  ;;  %v11203_v10 = vpop.permute.xlu0 %9121  ;;  %v4460_v53 = vsel %vm1927_vm0, %v10944_v20, %v9104_v29  ;;  %v4329_v20 = vsel %vm1927_vm0, %v10922_v37, %v9098_v25 }
 0x342   : > { %8600 = vmatprep.subr.mxu1 %v10746_v52  ;;  %8582 = vmatpush3.msra.mxu0 %v10864_v1  ;;  %v9123_v23 = vunpack.i.l.bf16 %v11203_v10  ;;  %v4331_v44 = vsel %vm3926_vm9, %v4329_v20, %v9108_v49  ;;  %v9124_v18 = vunpack.i.h.bf16 %v11203_v10 }
 0x343   : > { %8601 = vmatpush3.msra.mxu1 %v10746_v52  ;;  %8583 = vmatprep.subr.mxu0 %v10882_v26  ;;  %v9119_v52 = vunpack.i.h.bf16 %v9117_v8 }
 0x344   : > { %8602 = vmatprep.subr.mxu1 %v10760_v46  ;;  %8584 = vmatpush3.msra.mxu0 %v10882_v26  ;;  %v4333_v37 = vsel %vm3929_vm10, %v4331_v44, %v9123_v23 }
 0x345   : > { %v8440_v59 = vpop.f32.mrf.mxu1  ;;  %8603 = vmatpush3.msra.mxu1 %v10760_v46  ;;  %8585 = vmatprep.subr.mxu0 %v10893_v58  ;;  %v4332_v46 = vsel %vm3929_vm10, %v4330_v60, %v9118_v13  ;;  %v4461_v13 = vsel %vm1927_vm0, %v10936_v5, %v9099_v27  ;;  %v11304_v25 = vpop.permute.xlu1 %9131  ;;  %v9248_v60 = vld [vmem:[%s13271_s5 + $0x38] sm:$0xff] }
 0x346   : > { %v3742_v15 = vmul.f32 %v11214_v4, %v8440_v59  ;;  %8604 = vmatprep.subr.mxu1 %v10773_v63  ;;  %8586 = vmatpush3.msra.mxu0 %v10893_v58  ;;  %v4463_v32 = vsel %vm3926_vm9, %v4461_v13, %v9109_v39  ;;  %v11312_v49 = vpop.permute.xlu0 %9126  ;;  %v11372_v13 = vld [vmem:[%s13271_s5 + $0x68] sm:$0xff] }
 0x347   : > { %v3732_v22 = vpop.f32.mrf.mxu1  ;;  %8605 = vmatpush3.msra.mxu1 %v10773_v63  ;;  %8587 = vmatprep.subr.mxu0 %v10911_v36  ;;  %v4462_v63 = vsel %vm3926_vm9, %v4460_v53, %v9114_v40  ;;  %v4465_v59 = vsel %vm3929_vm10, %v4463_v32, %v9124_v18  ;;  %v9128_v27 = vunpack.i.l.bf16 %v11312_v49 }
 0x348   : > { %v3744_v24 = vadd.f32 %v11229_v33, %v3742_v15  ;;  %v3741_v28 = vmul.f32 %v11214_v4, %v3732_v22  ;;  %8606 = vmatprep.subr.mxu1 %v10784_v0  ;;  %8588 = vmatpush3.msra.mxu0 %v10911_v36  ;;  %v4464_v50 = vsel %vm3929_vm10, %v4462_v63, %v9119_v52  ;;  %v9247_v52 = vld [vmem:[%s13271_s5 + $0x40] sm:$0xff]  ;;  %v9249_v22 = vld [vmem:[%s13271_s5 + $0x30] sm:$0xff] }
 0x349   : > { %8607 = vmatpush3.msra.mxu1 %v10784_v0  ;;  %8589 = vmatprep.mubr.f32.mxu0 %v4332_v46  ;;  %v9240_v0 = vld [vmem:[%s13271_s5 + $0x78] sm:$0xff] }
 0x34a   : > { %v3746_v17 = vmax.f32 %v3744_v24, 0.0  ;;  %v3743_v57 = vadd.f32 %v11229_v33, %v3741_v28  ;;  %8608 = vmatprep.subr.mxu1 %v10800_v12  ;;  %8624 = vmatprep.mubr.f32.mxu1 %v4464_v50  ;;  %v9250_v24 = vld [vmem:[%s13271_s5 + $0x28] sm:$0xff]  ;;  %v9251_v50 = vld [vmem:[%s13271_s5 + $0x20] sm:$0xff] }
 0x34b   : > { %8609 = vmatpush3.msra.mxu1 %v10800_v12  ;;  %8627 = vmatprep.subr.mxu0 %v9240_v0  ;;  %v9241_v12 = vld [vmem:[%s13271_s5 + $0x70] sm:$0xff] }
 0x34c   : > { %3749 = vst.msk [vmem:[#allocation3 + $0xb8] sm:$0x1f] %vm2197_vm8, %v3746_v17  ;;  %v3745_v41 = vmax.f32 %v3743_v57, 0.0  ;;  %8610 = vmatprep.subr.mxu1 %v10814_v34  ;;  %8590 = vmatmul.mubr.f32.vlgmr.msra.gmra.mxu0 %v4333_v37 }
 0x34d   : > { %8611 = vmatpush3.msra.mxu1 %v10814_v34  ;;  %8628 = vmatpush3.msra.mxu0 %v9240_v0  ;;  %v5091_v34 = vld [vmem:[#allocation3 + $0xa8] sm:$0x1f] }
 0x34e   : > { %3748 = vst.msk [vmem:[#allocation3 + $0xb0] sm:$0xff] %vm1927_vm0, %v3745_v41  ;;  %8612 = vmatprep.subr.mxu1 %v10829_v62  ;;  %8629 = vmatprep.subr.mxu0 %v9241_v12  ;;  %v5112_v3 = vrot.slane %v5091_v34, 1  ;;  %v9252_v41 = vld [vmem:[%s13271_s5 + $0x18] sm:$0xff] }
 0x34f   : > { %8613 = vmatpush3.msra.mxu1 %v10829_v62  ;;  %8630 = vmatpush3.msra.mxu0 %v9241_v12 }
 0x350   : > { %8614 = vmatprep.subr.mxu1 %v10845_v54  ;;  %8631 = vmatprep.subr.mxu0 %v9242_v43  ;;  %v5113_v29 = vsel %vm2060_vm1, %v5226_v30, %v5112_v3  ;;  %v9246_v30 = vld [vmem:[%s13271_s5 + $0x48] sm:$0xff] }
 0x351   : > { %8615 = vmatpush3.msra.mxu1 %v10845_v54  ;;  %8632 = vmatpush3.msra.mxu0 %v9242_v43  ;;  %v9244_v54 = vld [vmem:[%s13271_s5 + $0x58] sm:$0xff] }
 0x352   : > { %8616 = vmatprep.subr.mxu1 %v10864_v1  ;;  %8633 = vmatprep.subr.mxu0 %v9243_v55 }
 0x353   : > { %v5223_v62 = vld [vmem:[#allocation3 + $0xb8] sm:$0x1f]  ;;  %8617 = vmatpush3.msra.mxu1 %v10864_v1  ;;  %8634 = vmatpush3.msra.mxu0 %v9243_v55 }
 0x354   : > { %v5244_v51 = vrot.slane %v5223_v62, 1  ;;  %v9195_v48 = vpack.i.bf16 %v5223_v62, %v5091_v34  ;;  %8618 = vmatprep.subr.mxu1 %v10882_v26  ;;  %8635 = vmatprep.subr.mxu0 %v9244_v54 }
 0x355   : > { %v11272_v8 = vld [vmem:[#allocation3 + $0xb0] sm:$0xff]  ;;  %8619 = vmatpush3.msra.mxu1 %v10882_v26  ;;  %8636 = vmatpush3.msra.mxu0 %v9244_v54 }
 0x356   : > { %v5243_v1 = vrot.slane %v11272_v8, 1  ;;  %v9200_v14 = vpack.i.bf16 %v11272_v8, %v11167_v42  ;;  %9196 = vrot.lane.b32.xlu0 %v9195_v48, %s13281_s27  ;;  %8620 = vmatprep.subr.mxu1 %v10893_v58  ;;  %v9210_v10 = vpack.i.bf16 %v5244_v51, %v5112_v3 }
 0x357   : > { %8621 = vmatpush3.msra.mxu1 %v10893_v58  ;;  %8637 = vmatprep.subr.mxu0 %v9245_v61 }
 0x358   : > { %9201 = vrot.lane.b32.xlu1 %v9200_v14, %s13281_s27  ;;  %v5245_v40 = vsel %vm2060_vm1, %v5243_v1, %v5244_v51  ;;  %8622 = vmatprep.subr.mxu1 %v10911_v36 }
 0x359   : > { %v9205_v5 = vpack.i.bf16 %v5245_v40, %v5113_v29  ;;  %8623 = vmatpush3.msra.mxu1 %v10911_v36  ;;  %8638 = vmatpush3.msra.mxu0 %v9245_v61  ;;  %v9253_v29 = vld [vmem:[%s13271_s5 + $0x10] sm:$0xff] }
 0x35a   : > { %9211 = vrot.lane.b32.xlu0 %v9210_v10, %s9321_s22  ;;  %8662 = vmatprep.subr.mxu1 %v9240_v0  ;;  %v11383_v10 = vld [vmem:[%s13271_s5 + $0x60] sm:$0xff] }
 0x35b   : > { %8625 = vmatmul.mubr.f32.vlgmr.msra.gmra.mxu1 %v4465_v59  ;;  %8639 = vmatprep.subr.mxu0 %v9246_v30 }
 0x35c   : > { %9206 = vrot.lane.b32.xlu1 %v9205_v5, %s9321_s22  ;;  %8663 = vmatpush3.msra.mxu1 %v9240_v0  ;;  %v11323_v20 = vpop.permute.xlu0 %9136  ;;  %v9133_v0 = vunpack.i.l.bf16 %v11304_v25  ;;  %v9254_v5 = vld [vmem:[%s13271_s5 + $0x8] sm:$0xff] }
 0x35d   : > { %8664 = vmatprep.subr.mxu1 %v9241_v12  ;;  %8640 = vmatpush3.msra.mxu0 %v9246_v30  ;;  %v9138_v3 = vunpack.i.l.bf16 %v11323_v20 }
 0x35e   : > { %8665 = vmatpush3.msra.mxu1 %v9241_v12  ;;  %8641 = vmatprep.subr.mxu0 %v9247_v52  ;;  %v9142_v15 = vpop.permute.xlu1 %9141  ;;  %v4592_v62 = vsel %vm1927_vm0, %v10959_v45, %v9133_v0 }
 0x35f   : > { %8666 = vmatprep.subr.mxu1 %v9242_v43  ;;  %8642 = vmatpush3.msra.mxu0 %v9247_v52  ;;  %v9143_v37 = vunpack.i.l.bf16 %v9142_v15 }
 0x360   : > { %8667 = vmatpush3.msra.mxu1 %v9242_v43  ;;  %8643 = vmatprep.subr.mxu0 %v9248_v60  ;;  %v9144_v43 = vunpack.i.h.bf16 %v9142_v15  ;;  %v11426_v15 = vld [vmem:[%s13271_s5 + $0x40] sm:$0xff] }
 0x361   : > { %8668 = vmatprep.subr.mxu1 %v9243_v55  ;;  %8644 = vmatpush3.msra.mxu0 %v9248_v60  ;;  %v8451_v46 = vpop.f32.mrf.mxu0  ;;  %v4594_v51 = vsel %vm3926_vm9, %v4592_v62, %v9143_v37  ;;  %v11501_v37 = vld [vmem:[%s13271_s5] sm:$0xff] }
 0x362   : > { %8669 = vmatpush3.msra.mxu1 %v9243_v55  ;;  %8645 = vmatprep.subr.mxu0 %v9249_v22  ;;  %v3883_v23 = vmul.f32 %v11214_v4, %v8451_v46  ;;  %v9147_v17 = vpop.permute.xlu1 %9146  ;;  %v9152_v55 = vpop.permute.xlu0 %9151  ;;  %v11444_v46 = vld [vmem:[%s13271_s5 + $0x30] sm:$0xff] }
 0x363   : > { %8670 = vmatprep.subr.mxu1 %v9244_v54  ;;  %8646 = vmatpush3.msra.mxu0 %v9249_v22  ;;  %v3873_v53 = vpop.f32.mrf.mxu0  ;;  %v9149_v34 = vunpack.i.h.bf16 %v9147_v17  ;;  %v9153_v45 = vunpack.i.l.bf16 %v9152_v55  ;;  %v9154_v40 = vunpack.i.h.bf16 %v9152_v55 }
 0x364   : > { %8671 = vmatpush3.msra.mxu1 %v9244_v54  ;;  %8647 = vmatprep.subr.mxu0 %v9250_v24  ;;  %v3885_v28 = vadd.f32 %v11229_v33, %v3883_v23  ;;  %v3882_v63 = vmul.f32 %v11214_v4, %v3873_v53  ;;  %v9134_v4 = vunpack.i.h.bf16 %v11304_v25  ;;  %v11400_v25 = vld [vmem:[%s13271_s5 + $0x58] sm:$0xff]  ;;  %v11462_v23 = vld [vmem:[%s13271_s5 + $0x20] sm:$0xff] }
 0x365   : > { %8672 = vmatprep.subr.mxu1 %v9245_v61  ;;  %8648 = vmatpush3.msra.mxu0 %v9250_v24  ;;  %v11471_v53 = vld [vmem:[%s13271_s5 + $0x18] sm:$0xff] }
 0x366   : > { %8673 = vmatpush3.msra.mxu1 %v9245_v61  ;;  %8649 = vmatprep.subr.mxu0 %v9251_v50  ;;  %v3887_v57 = vmax.f32 %v3885_v28, 0.0  ;;  %v3884_v44 = vadd.f32 %v11229_v33, %v3882_v63  ;;  %v9148_v33 = vunpack.i.l.bf16 %v9147_v17  ;;  %v4724_v48 = vsel %vm1927_vm0, %v11005_v11, %v9134_v4  ;;  %v11355_v11 = vld [vmem:[%s13271_s5 + $0x78] sm:$0xff]  ;;  %v11491_v17 = vld [vmem:[%s13271_s5 + $0x8] sm:$0xff] }
 0x367   : > { %8674 = vmatprep.subr.mxu1 %v9246_v30  ;;  %8650 = vmatpush3.msra.mxu0 %v9251_v50  ;;  %v4726_v54 = vsel %vm3926_vm9, %v4724_v48, %v9144_v43  ;;  %v9139_v61 = vunpack.i.h.bf16 %v11323_v20  ;;  %v11482_v28 = vld [vmem:[#allocation3 + $0xb8] sm:$0x1f] }
 0x368   : > { %8675 = vmatpush3.msra.mxu1 %v9246_v30  ;;  %8651 = vmatprep.subr.mxu0 %v9252_v41  ;;  %3890 = vst.msk [vmem:[#allocation3 + $0xc8] sm:$0x1f] %vm2197_vm8, %v3887_v57  ;;  %v3886_v12 = vmax.f32 %v3884_v44, 0.0  ;;  %v4728_v39 = vsel %vm3929_vm10, %v4726_v54, %v9149_v34  ;;  %v9255_v30 = vld [vmem:[%s13271_s5] sm:$0xff]  ;;  %v5359_v44 = vrot.slane %v11482_v28, 1 }
 0x369   : > { %8676 = vmatprep.subr.mxu1 %v9247_v52  ;;  %8652 = vmatpush3.msra.mxu0 %v9252_v41 }
 0x36a   : > { %8677 = vmatpush3.msra.mxu1 %v9247_v52  ;;  %8653 = vmatprep.subr.mxu0 %v10882_v26  ;;  %3889 = vst.msk [vmem:[#allocation3 + $0xc0] sm:$0xff] %vm1927_vm0, %v3886_v12  ;;  %v11408_v52 = vld [vmem:[%s13271_s5 + $0x50] sm:$0xff]  ;;  %v5360_v12 = vsel %vm2060_vm1, %v5243_v1, %v5359_v44 }
 0x36b   : > { %8678 = vmatprep.subr.mxu1 %v9248_v60  ;;  %8654 = vmatpush3.msra.mxu0 %v10882_v26  ;;  %v4596_v26 = vsel %vm3929_vm10, %v4594_v51, %v9148_v33 }
 0x36c   : > { %8679 = vmatpush3.msra.mxu1 %v9248_v60  ;;  %8655 = vmatprep.subr.mxu0 %v10893_v58  ;;  %v11417_v60 = vld [vmem:[%s13271_s5 + $0x48] sm:$0xff] }
 0x36d   : > { %8680 = vmatprep.subr.mxu1 %v9249_v22  ;;  %8656 = vmatpush3.msra.mxu0 %v10893_v58  ;;  %v4593_v58 = vsel %vm1927_vm0, %v10999_v7, %v9128_v27  ;;  %v9129_v7 = vunpack.i.h.bf16 %v11312_v49  ;;  %v11435_v49 = vld [vmem:[%s13271_s5 + $0x38] sm:$0xff]  ;;  %v9215_v27 = vpack.i.bf16 %v5359_v44, %v5360_v12 }
 0x36e   : > { %8681 = vmatpush3.msra.mxu1 %v9249_v22  ;;  %8657 = vmatprep.subr.mxu0 %v10911_v36  ;;  %v4595_v14 = vsel %vm3926_vm9, %v4593_v58, %v9138_v3  ;;  %v11453_v22 = vld [vmem:[%s13271_s5 + $0x28] sm:$0xff] }
 0x36f   : > { %8682 = vmatprep.subr.mxu1 %v9250_v24  ;;  %8658 = vmatpush3.msra.mxu0 %v10911_v36  ;;  %v4597_v18 = vsel %vm3929_vm10, %v4595_v14, %v9153_v45  ;;  %v11365_v36 = vld [vmem:[%s13271_s5 + $0x70] sm:$0xff]  ;;  %v4725_v32 = vsel %vm1927_vm0, %v11002_v47, %v9129_v7  ;;  %v5355_v20 = vld [vmem:[#allocation3 + $0xc8] sm:$0x1f] }
 0x370   : > { %8683 = vmatpush3.msra.mxu1 %v9250_v24  ;;  %8659 = vmatprep.mubr.f32.mxu0 %v4596_v26  ;;  %v4727_v59 = vsel %vm3926_vm9, %v4725_v32, %v9139_v61  ;;  %v11478_v24 = vld [vmem:[%s13271_s5 + $0x10] sm:$0xff]  ;;  %v5376_v4 = vrot.slane %v5355_v20, 1 }
 0x371   : > { %8684 = vmatprep.subr.mxu1 %v9251_v50  ;;  %8694 = vmatprep.mubr.f32.mxu1 %v4728_v39  ;;  %v4729_v47 = vsel %vm3929_vm10, %v4727_v59, %v9154_v40  ;;  %v5354_v63 = vld [vmem:[#allocation3 + $0xc0] sm:$0xff] }
 0x372   : > { %8685 = vmatpush3.msra.mxu1 %v9251_v50  ;;  %8697 = vmatprep.subr.mxu0 %v11355_v11  ;;  %v5375_v0 = vrot.slane %v5354_v63, 1  ;;  %v9220_v55 = vpack.i.bf16 %v5355_v20, %v5354_v63 }
 0x373   : > { %8686 = vmatprep.subr.mxu1 %v9252_v41  ;;  %8660 = vmatmul.mubr.f32.vlgmr.msra.gmra.mxu0 %v4597_v18 }
 0x374   : > { %8687 = vmatpush3.msra.mxu1 %v9252_v41  ;;  %8698 = vmatpush3.msra.mxu0 %v11355_v11  ;;  %v5377_v62 = vsel %vm2060_vm1, %v5375_v0, %v5376_v4 }
 0x375   : > { %8688 = vmatprep.subr.mxu1 %v9253_v29  ;;  %8699 = vmatprep.subr.mxu0 %v11365_v36  ;;  %v9225_v54 = vpack.i.bf16 %v5376_v4, %v5377_v62 }
 0x376   : > { %8689 = vmatpush3.msra.mxu1 %v9253_v29  ;;  %8700 = vmatpush3.msra.mxu0 %v11365_v36 }
 0x377   : > { %8690 = vmatprep.subr.mxu1 %v9254_v5  ;;  %8701 = vmatprep.subr.mxu0 %v11372_v13 }
 0x378   : > { %8691 = vmatpush3.msra.mxu1 %v9254_v5  ;;  %8702 = vmatpush3.msra.mxu0 %v11372_v13 }
 0x379   : > { %8692 = vmatprep.subr.mxu1 %v9255_v30  ;;  %8703 = vmatprep.subr.mxu0 %v11383_v10 }
 0x37a   : > { %8693 = vmatpush3.msra.mxu1 %v9255_v30  ;;  %8704 = vmatpush3.msra.mxu0 %v11383_v10  ;;  %v9157_v50 = vpop.permute.xlu0 %9156 }
 0x37b   : > { %8732 = vmatprep.subr.mxu1 %v11355_v11  ;;  %8695 = vmatmul.mubr.f32.vlgmr.msra.gmra.mxu1 %v4729_v47  ;;  %v9159_v1 = vunpack.i.h.bf16 %v9157_v50  ;;  %v9158_v26 = vunpack.i.l.bf16 %v9157_v50 }
 0x37c   : > { %8733 = vmatpush3.msra.mxu1 %v11355_v11  ;;  %8705 = vmatprep.subr.mxu0 %v11400_v25 }
 0x37d   : > { %8734 = vmatprep.subr.mxu1 %v11365_v36  ;;  %8706 = vmatpush3.msra.mxu0 %v11400_v25  ;;  %v9162_v57 = vpop.permute.xlu1 %9161  ;;  %v4989_v5 = vsel %vm1927_vm0, %v11038_v56, %v9159_v1 }
 0x37e   : > { %8735 = vmatpush3.msra.mxu1 %v11365_v36  ;;  %8707 = vmatprep.subr.mxu0 %v11408_v52  ;;  %v9164_v43 = vunpack.i.h.bf16 %v9162_v57  ;;  %v9163_v33 = vunpack.i.l.bf16 %v9162_v57 }
 0x37f   : > { %8736 = vmatprep.subr.mxu1 %v11372_v13  ;;  %8708 = vmatpush3.msra.mxu0 %v11408_v52 }
 0x380   : > { %8737 = vmatpush3.msra.mxu1 %v11372_v13  ;;  %8709 = vmatprep.subr.mxu0 %v11417_v60  ;;  %v4856_v14 = vsel %vm1927_vm0, %v11018_v35, %v9163_v33  ;;  %v4988_v18 = vsel %vm1927_vm0, %v11041_v38, %v9164_v43  ;;  %v4857_v38 = vsel %vm1927_vm0, %v11035_v21, %v9158_v26  ;;  %v9256_v26 = vld [vmem:[#allocation3 + $0x90] sm:$0xff] }
 0x381   : > { %8738 = vmatprep.subr.mxu1 %v11383_v10  ;;  %8710 = vmatpush3.msra.mxu0 %v11417_v60 }
 0x382   : > { %8739 = vmatpush3.msra.mxu1 %v11383_v10  ;;  %8711 = vmatprep.subr.mxu0 %v11426_v15 }
 0x383   : > { %8740 = vmatprep.subr.mxu1 %v11400_v25  ;;  %8712 = vmatpush3.msra.mxu0 %v11426_v15 }
 0x384   : > { %8741 = vmatpush3.msra.mxu1 %v11400_v25  ;;  %8713 = vmatprep.subr.mxu0 %v11435_v49 }
 0x385   : > { %8742 = vmatprep.subr.mxu1 %v11408_v52  ;;  %8714 = vmatpush3.msra.mxu0 %v11435_v49 }
 0x386   : > { %8743 = vmatpush3.msra.mxu1 %v11408_v52  ;;  %8715 = vmatprep.subr.mxu0 %v11444_v46 }
 0x387   : > { %8744 = vmatprep.subr.mxu1 %v11417_v60  ;;  %8716 = vmatpush3.msra.mxu0 %v11444_v46 }
 0x388   : > { %8745 = vmatpush3.msra.mxu1 %v11417_v60  ;;  %8717 = vmatprep.subr.mxu0 %v11453_v22 }
 0x389   : > { %8746 = vmatprep.subr.mxu1 %v11426_v15  ;;  %8718 = vmatpush3.msra.mxu0 %v11453_v22 }
 0x38a   : > { %8747 = vmatpush3.msra.mxu1 %v11426_v15  ;;  %8719 = vmatprep.subr.mxu0 %v11462_v23 }
 0x38b   : > { %8748 = vmatprep.subr.mxu1 %v11435_v49  ;;  %8720 = vmatpush3.msra.mxu0 %v11462_v23 }
 0x38c   : > { %8749 = vmatpush3.msra.mxu1 %v11435_v49  ;;  %8721 = vmatprep.subr.mxu0 %v11471_v53 }
 0x38d   : > { %8750 = vmatprep.subr.mxu1 %v11444_v46  ;;  %8722 = vmatpush3.msra.mxu0 %v11471_v53 }
 0x38e   : > { %8751 = vmatpush3.msra.mxu1 %v11444_v46  ;;  %8723 = vmatprep.subr.mxu0 %v11478_v24 }
 0x38f   : > { %8752 = vmatprep.subr.mxu1 %v11453_v22  ;;  %8724 = vmatpush3.msra.mxu0 %v11478_v24 }
 0x390   : > { %8753 = vmatpush3.msra.mxu1 %v11453_v22  ;;  %v9167_v41 = vpop.permute.xlu0 %9166  ;;  %8725 = vmatprep.subr.mxu0 %v11491_v17 }
 0x391   : > { %8754 = vmatprep.subr.mxu1 %v11462_v23  ;;  %8726 = vmatpush3.msra.mxu0 %v11491_v17  ;;  %v9169_v45 = vunpack.i.h.bf16 %v9167_v41  ;;  %v9168_v39 = vunpack.i.l.bf16 %v9167_v41 }
 0x392   : > { %8755 = vmatpush3.msra.mxu1 %v11462_v23  ;;  %v9172_v34 = vpop.permute.xlu1 %9171  ;;  %8727 = vmatprep.subr.mxu0 %v11501_v37 }
 0x393   : > { %8756 = vmatprep.subr.mxu1 %v11471_v53  ;;  %8728 = vmatpush3.msra.mxu0 %v11501_v37  ;;  %v9174_v51 = vunpack.i.h.bf16 %v9172_v34  ;;  %v9173_v48 = vunpack.i.l.bf16 %v9172_v34  ;;  %v4859_v47 = vsel %vm3926_vm9, %v4857_v38, %v9168_v39  ;;  %v4991_v56 = vsel %vm3926_vm9, %v4989_v5, %v9169_v45  ;;  %v11633_v5 = vld [vmem:[%s13272_s6] ss:$0 sm:$0xff] }
 0x394   : > { %8757 = vmatpush3.msra.mxu1 %v11471_v53  ;;  %v9182_v3 = vpop.permute.xlu0 %9181  ;;  %8767 = vmatprep.subr.mxu0 %v11355_v11  ;;  %v5493_v38 = vsel %vm5492_vm15, %v10272_v19, 0 }
 0x395   : > { %8758 = vmatprep.subr.mxu1 %v11478_v24  ;;  %9216 = vrot.lane.b32.xlu1 %v9215_v27, %s9320_s15  ;;  %v9184_v29 = vunpack.i.h.bf16 %v9182_v3  ;;  %v9183_v40 = vunpack.i.l.bf16 %v9182_v3  ;;  %v4858_v32 = vsel %vm3926_vm9, %v4856_v14, %v9173_v48  ;;  %v4990_v35 = vsel %vm3926_vm9, %v4988_v18, %v9174_v51  ;;  %s7757_s15 = scalar_lea.sflag [#allocation6], %s431_s0 }
 0x396   : > { %8759 = vmatpush3.msra.mxu1 %v11478_v24  ;;  %v9177_v58 = vpop.permute.xlu1 %9176  ;;  %9221 = vrot.lane.b32.xlu0 %v9220_v55, %s13281_s27  ;;  %vm5494_vm4 = vcmp.lt.s32.totalorder %v5493_v38, 11 }
 0x397   : > { %v9179_v7 = vunpack.i.h.bf16 %v9177_v58  ;;  %v9178_v61 = vunpack.i.l.bf16 %v9177_v58  ;;  %8760 = vmatprep.subr.mxu1 %v11491_v17  ;;  %v4861_v21 = vsel %vm3929_vm10, %v4859_v47, %v9183_v40  ;;  %v4993_v63 = vsel %vm3929_vm10, %v4991_v56, %v9184_v29 }
 0x398   : > { %8761 = vmatpush3.msra.mxu1 %v11491_v17 }
 0x399   : > { %8762 = vmatprep.subr.mxu1 %v11501_v37  ;;  %v4860_v59 = vsel %vm3929_vm10, %v4858_v32, %v9178_v61  ;;  %v4992_v30 = vsel %vm3929_vm10, %v4990_v35, %v9179_v7  ;;  %9226 = vrot.lane.b32.xlu1 %v9225_v54, %s9321_s22  ;;  %s9324_s22 = smov [#allocation5]  }
 0x39a   : > { %8763 = vmatpush3.msra.mxu1 %v11501_v37  ;;  %8729 = vmatprep.mubr.f32.mxu0 %v4860_v59  ;;  %s9261_s29 = sshll.u32 %s9324_s22, 4  ;;  %s9262_s29 = int_to_ptr.vmem [resolvable:$false] %s9261_s29 }
 0x39b   : > { %8764 = vmatprep.mubr.f32.mxu1 %v4992_v30  ;;  %8802 = vmatprep.subr.mxu1 %v11355_v11  ;;  %s9263_s21 = scalar_lea.vmem %s9262_s29, 32 }
 0x39c   : > { %8730 = vmatmul.mubr.f32.vlgmr.msra.gmra.mxu0 %v4861_v21  ;;  %8765 = vmatmul.mubr.f32.vlgmr.msra.gmra.mxu1 %v4993_v63 }
 0x39d   : > { %8768 = vmatpush3.msra.mxu0 %v11355_v11  ;;  %8803 = vmatpush3.msra.mxu1 %v11355_v11 }
 0x39e   : > { %8769 = vmatprep.subr.mxu0 %v11365_v36  ;;  %8804 = vmatprep.subr.mxu1 %v11365_v36 }
 0x39f   : > { %8770 = vmatpush3.msra.mxu0 %v11365_v36  ;;  %8805 = vmatpush3.msra.mxu1 %v11365_v36 }
 0x3a0   : > { %8771 = vmatprep.subr.mxu0 %v11372_v13  ;;  %8806 = vmatprep.subr.mxu1 %v11372_v13 }
 0x3a1   : > { %8772 = vmatpush3.msra.mxu0 %v11372_v13  ;;  %8807 = vmatpush3.msra.mxu1 %v11372_v13 }
 0x3a2   : > { %8773 = vmatprep.subr.mxu0 %v11383_v10  ;;  %8808 = vmatprep.subr.mxu1 %v11383_v10 }
 0x3a3   : > { %8774 = vmatpush3.msra.mxu0 %v11383_v10  ;;  %8809 = vmatpush3.msra.mxu1 %v11383_v10 }
 0x3a4   : > { %8775 = vmatprep.subr.mxu0 %v11400_v25  ;;  %8810 = vmatprep.subr.mxu1 %v11400_v25 }
 0x3a5   : > { %8776 = vmatpush3.msra.mxu0 %v11400_v25  ;;  %8811 = vmatpush3.msra.mxu1 %v11400_v25 }
 0x3a6   : > { %8777 = vmatprep.subr.mxu0 %v11408_v52  ;;  %8812 = vmatprep.subr.mxu1 %v11408_v52 }
 0x3a7   : > { %8778 = vmatpush3.msra.mxu0 %v11408_v52  ;;  %8813 = vmatpush3.msra.mxu1 %v11408_v52 }
 0x3a8   : > { %8779 = vmatprep.subr.mxu0 %v11417_v60  ;;  %8814 = vmatprep.subr.mxu1 %v11417_v60 }
 0x3a9   : > { %8780 = vmatpush3.msra.mxu0 %v11417_v60  ;;  %8815 = vmatpush3.msra.mxu1 %v11417_v60 }
 0x3aa   : > { %8781 = vmatprep.subr.mxu0 %v11426_v15  ;;  %8816 = vmatprep.subr.mxu1 %v11426_v15 }
 0x3ab   : > { %8782 = vmatpush3.msra.mxu0 %v11426_v15  ;;  %8817 = vmatpush3.msra.mxu1 %v11426_v15 }
 0x3ac   : > { %8783 = vmatprep.subr.mxu0 %v11435_v49  ;;  %8818 = vmatprep.subr.mxu1 %v11435_v49 }
 0x3ad   : > { %8784 = vmatpush3.msra.mxu0 %v11435_v49  ;;  %8819 = vmatpush3.msra.mxu1 %v11435_v49 }
 0x3ae   : > { %8785 = vmatprep.subr.mxu0 %v11444_v46  ;;  %8820 = vmatprep.subr.mxu1 %v11444_v46  ;;  %v9187_v20 = vpop.permute.xlu0 %9186 }
 0x3af   : > { %8786 = vmatpush3.msra.mxu0 %v11444_v46  ;;  %8821 = vmatpush3.msra.mxu1 %v11444_v46  ;;  %v9189_v41 = vunpack.i.h.bf16 %v9187_v20  ;;  %v9188_v12 = vunpack.i.l.bf16 %v9187_v20 }
 0x3b0   : > { %8787 = vmatprep.subr.mxu0 %v11453_v22  ;;  %8822 = vmatprep.subr.mxu1 %v11453_v22 }
 0x3b1   : > { %8788 = vmatpush3.msra.mxu0 %v11453_v22  ;;  %8823 = vmatpush3.msra.mxu1 %v11453_v22  ;;  %v9192_v50 = vpop.permute.xlu1 %9191  ;;  %v5253_v39 = vsel %vm1927_vm0, %v11156_v6, %v9189_v41  ;;  %v5121_v58 = vsel %vm1927_vm0, %v11148_v31, %v9188_v12  ;;  %v7874_v31 = vadd.s32 4294967295, %v10272_v19 }
 0x3b2   : > { %8789 = vmatprep.subr.mxu0 %v11462_v23  ;;  %8824 = vmatprep.subr.mxu1 %v11462_v23  ;;  %v9194_v0 = vunpack.i.h.bf16 %v9192_v50  ;;  %v9193_v4 = vunpack.i.l.bf16 %v9192_v50 }
 0x3b3   : > { %8790 = vmatpush3.msra.mxu0 %v11462_v23  ;;  %8825 = vmatpush3.msra.mxu1 %v11462_v23  ;;  %vm5485_vm12 = vcmp.gt.s32.totalorder %v7874_v31, 0 }
 0x3b4   : > { %8791 = vmatprep.subr.mxu0 %v11471_v53  ;;  %8826 = vmatprep.subr.mxu1 %v11471_v53  ;;  %v5120_v54 = vsel %vm1927_vm0, %v9256_v26, %v9193_v4  ;;  %v5252_v45 = vsel %vm1927_vm0, %v11167_v42, %v9194_v0 }
 0x3b5   : > { %8792 = vmatpush3.msra.mxu0 %v11471_v53  ;;  %8827 = vmatpush3.msra.mxu1 %v11471_v53 }
 0x3b6   : > { %8793 = vmatprep.subr.mxu0 %v11478_v24  ;;  %8828 = vmatprep.subr.mxu1 %v11478_v24 }
 0x3b7   : > { %8794 = vmatpush3.msra.mxu0 %v11478_v24  ;;  %8829 = vmatpush3.msra.mxu1 %v11478_v24 }
 0x3b8   : > { %8795 = vmatprep.subr.mxu0 %v11491_v17  ;;  %8830 = vmatprep.subr.mxu1 %v11491_v17 }
 0x3b9   : > { %8796 = vmatpush3.msra.mxu0 %v11491_v17  ;;  %8831 = vmatpush3.msra.mxu1 %v11491_v17 }
 0x3ba   : > { %8797 = vmatprep.subr.mxu0 %v11501_v37  ;;  %8832 = vmatprep.subr.mxu1 %v11501_v37 }
 0x3bb   : > { %8798 = vmatpush3.msra.mxu0 %v11501_v37  ;;  %8833 = vmatpush3.msra.mxu1 %v11501_v37 }
 0x3bc   : > { %8837 = vmatprep.subr.mxu0 %v11355_v11  ;;  %8872 = vmatprep.subr.mxu1 %v9319_v2 }
 0x3c8   : > { %v9197_v57 = vpop.permute.xlu0 %9196 }
 0x3c9   : > { %v9199_v55 = vunpack.i.h.bf16 %v9197_v57  ;;  %v9198_v62 = vunpack.i.l.bf16 %v9197_v57 }
 0x3ca   : > { %v9202_v44 = vpop.permute.xlu1 %9201 }
 0x3cb   : > { %v9204_v43 = vunpack.i.h.bf16 %v9202_v44  ;;  %v9203_v33 = vunpack.i.l.bf16 %v9202_v44  ;;  %v5123_v7 = vsel %vm3926_vm9, %v5121_v58, %v9198_v62  ;;  %v5255_v61 = vsel %vm3926_vm9, %v5253_v39, %v9199_v55 }
 0x3cc   : > { %v9212_v34 = vpop.permute.xlu0 %9211 }
 0x3cd   : > { %v9214_v1 = vunpack.i.h.bf16 %v9212_v34  ;;  %v9213_v51 = vunpack.i.l.bf16 %v9212_v34  ;;  %v5122_v14 = vsel %vm3926_vm9, %v5120_v54, %v9203_v33  ;;  %v5254_v18 = vsel %vm3926_vm9, %v5252_v45, %v9204_v43 }
 0x3ce   : > { %v9207_v27 = vpop.permute.xlu1 %9206 }
 0x3cf   : > { %v9209_v48 = vunpack.i.h.bf16 %v9207_v27  ;;  %v9208_v3 = vunpack.i.l.bf16 %v9207_v27  ;;  %v5125_v42 = vsel %vm3929_vm10, %v5123_v7, %v9213_v51  ;;  %v5257_v6 = vsel %vm3929_vm10, %v5255_v61, %v9214_v1 }
 0x3d1   : > { %v5124_v29 = vsel %vm3929_vm10, %v5122_v14, %v9208_v3  ;;  %v5256_v40 = vsel %vm3929_vm10, %v5254_v18, %v9209_v48 }
 0x3d2   : > { %8799 = vmatprep.mubr.f32.mxu0 %v5124_v29  ;;  %8834 = vmatprep.mubr.f32.mxu1 %v5256_v40 }
 0x3d3   : > { %8800 = vmatmul.mubr.f32.vlgmr.msra.gmra.mxu0 %v5125_v42  ;;  %8835 = vmatmul.mubr.f32.vlgmr.msra.gmra.mxu1 %v5257_v6 }
 0x3d4   : > { %8838 = vmatpush3.msra.mxu0 %v11355_v11  ;;  %8876 = vmatprep.mubr.msk.f32.mxu1 %vm9323_vm11, %v9319_v2  ;;  %v5486_v11 = vsel %vm5485_vm12, %v7874_v31, 0 }
 0x3d5   : > { %8839 = vmatprep.subr.mxu0 %v11365_v36  ;;  %vm5487_vm14 = vcmp.lt.s32.totalorder %v5486_v11, 11 }
 0x3d6   : > { %8840 = vmatpush3.msra.mxu0 %v11365_v36 }
 0x3d7   : > { %8841 = vmatprep.subr.mxu0 %v11372_v13 }
 0x3d8   : > { %8842 = vmatpush3.msra.mxu0 %v11372_v13 }
 0x3d9   : > { %8843 = vmatprep.subr.mxu0 %v11383_v10 }
 0x3da   : > { %8844 = vmatpush3.msra.mxu0 %v11383_v10  ;;  %v8486_v32 = vpop.f32.mrf.mxu1  ;;  %v5488_v10 = vsel %vm5487_vm14, %v5486_v11, 11 }
 0x3db   : > { %8845 = vmatprep.subr.mxu0 %v11400_v25  ;;  %v4026_v36 = vadd.f32 %v8486_v32, %v11633_v5  ;;  %vm5489_vm3 = vcmp.eq.s32.totalorder %v10269_v16, %v5488_v10 }
 0x3dc   : > { %8846 = vmatpush3.msra.mxu0 %v11400_v25  ;;  %v4020_v35 = vpop.f32.mrf.mxu1  ;;  %v11657_v19 = vsel %vm5489_vm3, 1.0, %v9319_v2 }
 0x3dd   : > { %8847 = vmatprep.subr.mxu0 %v11408_v52  ;;  %4031 = vst.msk [vmem:[#allocation4 + $0x8] sm:$0xf] %vm4030_vm13, %v4026_v36  ;;  %v4021_v13 = vadd.f32 %v11633_v5, %v4020_v35 }
 0x3de   : > { %8848 = vmatpush3.msra.mxu0 %v11408_v52  ;;  %v5495_v52 = vsel %vm5494_vm4, %v5493_v38, 11 }
 0x3df   : > { %8849 = vmatprep.subr.mxu0 %v11417_v60  ;;  %4029 = vst.msk [vmem:[#allocation4] sm:$0xff] %vm3926_vm9, %v4021_v13  ;;  %vm5496_vm6 = vcmp.eq.s32.totalorder %v10269_v16, %v5495_v52 }
 0x3e0   : > { %8850 = vmatpush3.msra.mxu0 %v11417_v60 }
 0x3e1   : > { %8851 = vmatprep.subr.mxu0 %v11426_v15 }
 0x3e2   : > { %8852 = vmatpush3.msra.mxu0 %v11426_v15 }
 0x3e3   : > { %8853 = vmatprep.subr.mxu0 %v11435_v49 }
 0x3e4   : > { %8854 = vmatpush3.msra.mxu0 %v11435_v49  ;;  %v5502_v25 = vld [vmem:[#allocation4 + $0x8] sm:$0xf] }
 0x3e5   : > { %8855 = vmatprep.subr.mxu0 %v11444_v46  ;;  %8873 = vmatpush3.msk.msra.mxu1 %vm5507_vm2, %v5502_v25 }
 0x3e6   : > { %8856 = vmatpush3.msra.mxu0 %v11444_v46  ;;  %v8521_v60 = vpop.f32.mrf.mxu0  ;;  %8874 = vmatprep.subr.mxu1 %v9319_v2  ;;  %v5501_v15 = vld [vmem:[#allocation4] sm:$0xff] }
 0x3e7   : > { %8857 = vmatprep.subr.mxu0 %v11453_v22  ;;  %v4158_v49 = vadd.f32 %v8521_v60, %v11633_v5  ;;  %8875 = vmatpush3.msra.mxu1 %v5501_v15 }
 0x3e8   : > { %8858 = vmatpush3.msra.mxu0 %v11453_v22  ;;  %v4152_v59 = vpop.f32.mrf.mxu0  ;;  %8877 = vmatmul.mubr.msk.f32.vlgmr.msra.gmra.mxu1 %vm5503_vm5, %v11657_v19  ;;  %v11677_v22 = vsel %vm5496_vm6, 1.0, %v9319_v2 }
 0x3e9   : > { %8859 = vmatprep.subr.mxu0 %v11462_v23  ;;  %4163 = vst.msk [vmem:[#allocation4 + $0x18] sm:$0xf] %vm4030_vm13, %v4158_v49  ;;  %v4153_v46 = vadd.f32 %v11633_v5, %v4152_v59  ;;  %8879 = vmatprep.subr.mxu1 %v9319_v2 }
 0x3ea   : > { %8860 = vmatpush3.msra.mxu0 %v11462_v23  ;;  %8880 = vmatpush3.msk.msra.mxu1 %vm5507_vm2, %v5502_v25 }
 0x3eb   : > { %8861 = vmatprep.subr.mxu0 %v11471_v53  ;;  %4162 = vst.msk [vmem:[#allocation4 + $0x10] sm:$0xff] %vm3926_vm9, %v4153_v46  ;;  %8881 = vmatprep.subr.mxu1 %v9319_v2 }
 0x3ec   : > { %8862 = vmatpush3.msra.mxu0 %v11471_v53  ;;  %8882 = vmatpush3.msra.mxu1 %v5501_v15 }
 0x3ed   : > { %8863 = vmatprep.subr.mxu0 %v11478_v24  ;;  %8883 = vmatprep.mubr.msk.f32.mxu1 %vm9323_vm11, %v9319_v2 }
 0x3ee   : > { %8864 = vmatpush3.msra.mxu0 %v11478_v24  ;;  %8884 = vmatmul.mubr.msk.f32.vlgmr.msra.gmra.mxu1 %vm5503_vm5, %v11677_v22 }
 0x3ef   : > { %8865 = vmatprep.subr.mxu0 %v11491_v17  ;;  %8893 = vmatprep.subr.mxu1 %v9319_v2 }
 0x3f0   : > { %8866 = vmatpush3.msra.mxu0 %v11491_v17  ;;  %8897 = vmatprep.mubr.msk.f32.mxu1 %vm9323_vm11, %v9319_v2  ;;  %v5671_v17 = vld [vmem:[#allocation4 + $0x18] sm:$0xf] }
 0x3f1   : > { %8867 = vmatprep.subr.mxu0 %v11501_v37 }
 0x3f2   : > { %8868 = vmatpush3.msra.mxu0 %v11501_v37  ;;  %v5670_v21 = vld [vmem:[#allocation4 + $0x10] sm:$0xff] }
 0x3f3   : > { %8886 = vmatprep.subr.mxu0 %v9319_v2 }
 0x3fa   : > { %v8556_v23 = vpop.f32.mrf.mxu1 }
 0x3fb   : > { %v4290_v53 = vadd.f32 %v8556_v23, %v11633_v5 }
 0x3fc   : > { %v4284_v24 = vpop.f32.mrf.mxu1 }
 0x3fd   : > { %4295 = vst.msk [vmem:[#allocation4 + $0x28] sm:$0xf] %vm4030_vm13, %v4290_v53  ;;  %v4285_v30 = vadd.f32 %v11633_v5, %v4284_v24 }
 0x3ff   : > { %4294 = vst.msk [vmem:[#allocation4 + $0x20] sm:$0xff] %vm3926_vm9, %v4285_v30 }
 0x404   : > { %v5673_v47 = vld [vmem:[#allocation4 + $0x28] sm:$0xf] }
 0x405   : > { %v5675_v56 = vmax.f32 %v5671_v17, %v5673_v47 }
 0x406   : > { %v5672_v63 = vld [vmem:[#allocation4 + $0x20] sm:$0xff] }
 0x407   : > { %v9217_v20 = vpop.permute.xlu1 %9216  ;;  %8894 = vmatpush3.msk.msra.mxu1 %vm5507_vm2, %v5675_v56  ;;  %v5674_v37 = vmax.f32 %v5670_v21, %v5672_v63 }
 0x408   : > { %v9218_v50 = vunpack.i.l.bf16 %v9217_v20  ;;  %v9222_v57 = vpop.permute.xlu0 %9221  ;;  %8895 = vmatprep.subr.mxu1 %v9319_v2  ;;  %v9219_v44 = vunpack.i.h.bf16 %v9217_v20 }
 0x409   : > { %v9223_v0 = vunpack.i.l.bf16 %v9222_v57  ;;  %8896 = vmatpush3.msra.mxu1 %v5674_v37  ;;  %v9224_v4 = vunpack.i.h.bf16 %v9222_v57 }
 0x40a   : > { %8898 = vmatmul.mubr.msk.f32.vlgmr.msra.gmra.mxu1 %vm5503_vm5, %v11677_v22  ;;  %8907 = vmatprep.subr.mxu1 %v9319_v2  ;;  %v5384_v33 = vsel %vm1927_vm0, %v11272_v8, %v9218_v50  ;;  %v5385_v55 = vsel %vm1927_vm0, %v11482_v28, %v9219_v44 }
 0x40b   : > { %v9227_v41 = vpop.permute.xlu1 %9226  ;;  %8911 = vmatprep.mubr.msk.f32.mxu1 %vm9323_vm11, %v9319_v2  ;;  %v5386_v62 = vsel %vm3926_vm9, %v5384_v33, %v9223_v0  ;;  %v5387_v1 = vsel %vm3926_vm9, %v5385_v55, %v9224_v4 }
 0x40c   : > { %v9229_v12 = vunpack.i.h.bf16 %v9227_v41  ;;  %v9228_v43 = vunpack.i.l.bf16 %v9227_v41  ;;  %v8591_v34 = vpop.f32.mrf.mxu0 }
 0x40d   : > { %v4422_v27 = vadd.f32 %v8591_v34, %v11633_v5 }
 0x40e   : > { %v5388_v51 = vsel %vm3929_vm10, %v5386_v62, %v9228_v43  ;;  %v4416_v48 = vpop.f32.mrf.mxu0  ;;  %v5389_v3 = vsel %vm3929_vm10, %v5387_v1, %v9229_v12 }
 0x40f   : > { %8869 = vmatprep.mubr.f32.mxu0 %v5388_v51  ;;  %4427 = vst.msk [vmem:[#allocation4 + $0x38] sm:$0xf] %vm4030_vm13, %v4422_v27  ;;  %v4417_v8 = vadd.f32 %v11633_v5, %v4416_v48 }
 0x410   : > { %8870 = vmatmul.mubr.f32.vlgmr.msra.gmra.mxu0 %v5389_v3 }
 0x411   : > { %4426 = vst.msk [vmem:[#allocation4 + $0x30] sm:$0xff] %vm3926_vm9, %v4417_v8  ;;  %8887 = vmatpush3.msk.msra.mxu0 %vm5507_vm2, %v5675_v56  ;;  %8890 = vmatprep.mubr.msk.f32.mxu0 %vm9323_vm11, %v9319_v2 }
 0x412   : > { %8888 = vmatprep.subr.mxu0 %v9319_v2 }
 0x413   : > { %8889 = vmatpush3.msra.mxu0 %v5674_v37 }
 0x414   : > { %8891 = vmatmul.mubr.msk.f32.vlgmr.msra.gmra.mxu0 %vm5503_vm5, %v11657_v19  ;;  %8900 = vmatprep.subr.mxu0 %v9319_v2 }
 0x415   : > { %8904 = vmatprep.mubr.msk.f32.mxu0 %vm9323_vm11, %v9319_v2 }
 0x416   : > { %v5824_v39 = vld [vmem:[#allocation4 + $0x38] sm:$0xf] }
 0x418   : > { %v5823_v18 = vld [vmem:[#allocation4 + $0x30] sm:$0xff] }
 0x41b   : > { %v8626_v28 = vpop.f32.mrf.mxu1 }
 0x41c   : > { %v4554_v26 = vadd.f32 %v8626_v28, %v11633_v5 }
 0x41d   : > { %v4548_v54 = vpop.f32.mrf.mxu1 }
 0x41e   : > { %4559 = vst.msk [vmem:[#allocation4 + $0x48] sm:$0xf] %vm4030_vm13, %v4554_v26  ;;  %v4549_v45 = vadd.f32 %v11633_v5, %v4548_v54 }
 0x420   : > { %4558 = vst.msk [vmem:[#allocation4 + $0x40] sm:$0xff] %vm3926_vm9, %v4549_v45 }
 0x425   : > { %v5826_v58 = vld [vmem:[#allocation4 + $0x48] sm:$0xf] }
 0x426   : > { %v5828_v14 = vmax.f32 %v5824_v39, %v5826_v58 }
 0x427   : > { %v5825_v7 = vld [vmem:[#allocation4 + $0x40] sm:$0xff] }
 0x428   : > { %8901 = vmatpush3.msk.msra.mxu0 %vm5507_vm2, %v5828_v14  ;;  %8908 = vmatpush3.msk.msra.mxu1 %vm5507_vm2, %v5828_v14  ;;  %v5827_v61 = vmax.f32 %v5823_v18, %v5825_v7 }
 0x429   : > { %8902 = vmatprep.subr.mxu0 %v9319_v2  ;;  %8909 = vmatprep.subr.mxu1 %v9319_v2 }
 0x42a   : > { %8903 = vmatpush3.msra.mxu0 %v5827_v61  ;;  %8910 = vmatpush3.msra.mxu1 %v5827_v61 }
 0x42b   : > { %8905 = vmatmul.mubr.msk.f32.vlgmr.msra.gmra.mxu0 %vm5503_vm5, %v11657_v19  ;;  %8912 = vmatmul.mubr.msk.f32.vlgmr.msra.gmra.mxu1 %vm5503_vm5, %v11677_v22 }
 0x42c   : > { %8914 = vmatprep.subr.mxu0 %v9319_v2  ;;  %8921 = vmatprep.subr.mxu1 %v9319_v2 }
 0x42d   : > { %8918 = vmatprep.mubr.msk.f32.mxu0 %vm9323_vm11, %v9319_v2  ;;  %8925 = vmatprep.mubr.msk.f32.mxu1 %vm9323_vm11, %v9319_v2 }
 0x433   : > { %v8661_v29 = vpop.f32.mrf.mxu0 }
 0x434   : > { %v4686_v40 = vadd.f32 %v8661_v29, %v11633_v5 }
 0x435   : > { %v4680_v42 = vpop.f32.mrf.mxu0 }
 0x436   : > { %4691 = vst.msk [vmem:[#allocation4 + $0x58] sm:$0xf] %vm4030_vm13, %v4686_v40  ;;  %v4681_v6 = vadd.f32 %v11633_v5, %v4680_v42  ;;  %v6705_v40 = vld [vmem:[%s13275_s9 + $0x350] sm:$0xff]  ;;  %v6704_v42 = vld [vmem:[%s13275_s9 + $0x348] sm:$0xff] }
 0x438   : > { %4690 = vst.msk [vmem:[#allocation4 + $0x50] sm:$0xff] %vm3926_vm9, %v4681_v6 }
 0x43b   : > { %v8696_v31 = vpop.f32.mrf.mxu1 }
 0x43c   : > { %v4818_v11 = vadd.f32 %v8696_v31, %v11633_v5  ;;  %v6697_v31 = vld [vmem:[%s13275_s9 + $0x310] sm:$0xff] }
 0x43d   : > { %v4812_v32 = vpop.f32.mrf.mxu1  ;;  %v5977_v35 = vld [vmem:[#allocation4 + $0x58] sm:$0xf] }
 0x43e   : > { %4823 = vst.msk [vmem:[#allocation4 + $0x68] sm:$0xf] %vm4030_vm13, %v4818_v11  ;;  %v4813_v36 = vadd.f32 %v11633_v5, %v4812_v32  ;;  %v6691_v11 = vld [vmem:[%s13275_s9 + $0x2e0] sm:$0xff]  ;;  %v6690_v32 = vld [vmem:[%s13275_s9 + $0x2d8] sm:$0xff] }
 0x43f   : > { %v5976_v38 = vld [vmem:[#allocation4 + $0x50] sm:$0xff] }
 0x440   : > { %4822 = vst.msk [vmem:[#allocation4 + $0x60] sm:$0xff] %vm3926_vm9, %v4813_v36  ;;  %v6684_v36 = vld [vmem:[%s13275_s9 + $0x2a8] sm:$0xff] }
 0x445   : > { %v5979_v13 = vld [vmem:[#allocation4 + $0x68] sm:$0xf] }
 0x446   : > { %v5981_v10 = vmax.f32 %v5977_v35, %v5979_v13  ;;  %v6683_v35 = vld [vmem:[%s13275_s9 + $0x2a0] sm:$0xff]  ;;  %v6677_v13 = vld [vmem:[%s13275_s9 + $0x270] sm:$0xff] }
 0x447   : > { %v5978_v25 = vld [vmem:[#allocation4 + $0x60] sm:$0xff] }
 0x448   : > { %8915 = vmatpush3.msk.msra.mxu0 %vm5507_vm2, %v5981_v10  ;;  %8922 = vmatpush3.msk.msra.mxu1 %vm5507_vm2, %v5981_v10  ;;  %v5980_v52 = vmax.f32 %v5976_v38, %v5978_v25  ;;  %v6676_v10 = vld [vmem:[%s13275_s9 + $0x268] sm:$0xff]  ;;  %v6670_v38 = vld [vmem:[%s13275_s9 + $0x238] sm:$0xff]  ;;  %v6669_v25 = vld [vmem:[%s13275_s9 + $0x230] sm:$0xff] }
 0x449   : > { %8916 = vmatprep.subr.mxu0 %v9319_v2  ;;  %8923 = vmatprep.subr.mxu1 %v9319_v2 }
 0x44a   : > { %8917 = vmatpush3.msra.mxu0 %v5980_v52  ;;  %8924 = vmatpush3.msra.mxu1 %v5980_v52  ;;  %v6663_v52 = vld [vmem:[%s13275_s9 + $0x200] sm:$0xff] }
 0x44b   : > { %8919 = vmatmul.mubr.msk.f32.vlgmr.msra.gmra.mxu0 %vm5503_vm5, %v11657_v19  ;;  %8926 = vmatmul.mubr.msk.f32.vlgmr.msra.gmra.mxu1 %vm5503_vm5, %v11677_v22 }
 0x44c   : > { %8928 = vmatprep.subr.mxu0 %v9319_v2  ;;  %8935 = vmatprep.subr.mxu1 %v9319_v2 }
 0x44d   : > { %8932 = vmatprep.mubr.msk.f32.mxu0 %vm9323_vm11, %v9319_v2  ;;  %8939 = vmatprep.mubr.msk.f32.mxu1 %vm9323_vm11, %v9319_v2 }
 0x45c   : > { %v8731_v60 = vpop.f32.mrf.mxu0  ;;  %v8766_v15 = vpop.f32.mrf.mxu1 }
 0x45d   : > { %v4950_v49 = vadd.f32 %v8731_v60, %v11633_v5  ;;  %v5082_v59 = vadd.f32 %v8766_v15, %v11633_v5  ;;  %v6662_v60 = vld [vmem:[%s13275_s9 + $0x1f8] sm:$0xff]  ;;  %v6656_v15 = vld [vmem:[%s13275_s9 + $0x1c8] sm:$0xff] }
 0x45e   : > { %v4944_v46 = vpop.f32.mrf.mxu0  ;;  %v5076_v23 = vpop.f32.mrf.mxu1 }
 0x45f   : > { %4955 = vst.msk [vmem:[#allocation4 + $0x78] sm:$0xf] %vm4030_vm13, %v4950_v49  ;;  %5087 = vst.msk [vmem:[#allocation4 + $0x88] sm:$0xf] %vm4030_vm13, %v5082_v59  ;;  %v4945_v53 = vadd.f32 %v11633_v5, %v4944_v46  ;;  %v5077_v24 = vadd.f32 %v11633_v5, %v5076_v23  ;;  %v6655_v49 = vld [vmem:[%s13275_s9 + $0x1c0] sm:$0xff]  ;;  %v6649_v59 = vld [vmem:[%s13275_s9 + $0x190] sm:$0xff] }
 0x460   : > { %v6648_v46 = vld [vmem:[%s13275_s9 + $0x188] sm:$0xff]  ;;  %v6642_v23 = vld [vmem:[%s13275_s9 + $0x158] sm:$0xff] }
 0x461   : > { %4954 = vst.msk [vmem:[#allocation4 + $0x70] sm:$0xff] %vm3926_vm9, %v4945_v53  ;;  %5086 = vst.msk [vmem:[#allocation4 + $0x80] sm:$0xff] %vm3926_vm9, %v5077_v24  ;;  %v6929_v53 = vld [vmem:[%s13275_s9 + $0xa50] sm:$0xff] }
 0x462   : > { %v6641_v24 = vld [vmem:[%s13275_s9 + $0x150] sm:$0xff] }
 0x466   : > { %v6130_v30 = vld [vmem:[#allocation4 + $0x78] sm:$0xf]  ;;  %v6132_v17 = vld [vmem:[#allocation4 + $0x88] sm:$0xf] }
 0x467   : > { %v6134_v47 = vmax.f32 %v6130_v30, %v6132_v17  ;;  %v6928_v30 = vld [vmem:[%s13275_s9 + $0xa48] sm:$0xff]  ;;  %v6635_v17 = vld [vmem:[%s13275_s9 + $0x120] sm:$0xff] }
 0x468   : > { %v6129_v56 = vld [vmem:[#allocation4 + $0x70] sm:$0xff]  ;;  %v6131_v21 = vld [vmem:[#allocation4 + $0x80] sm:$0xff] }
 0x469   : > { %8929 = vmatpush3.msk.msra.mxu0 %vm5507_vm2, %v6134_v47  ;;  %8936 = vmatpush3.msk.msra.mxu1 %vm5507_vm2, %v6134_v47  ;;  %v6133_v63 = vmax.f32 %v6129_v56, %v6131_v21  ;;  %v6922_v47 = vld [vmem:[%s13275_s9 + $0xa18] sm:$0xff]  ;;  %v6921_v56 = vld [vmem:[%s13275_s9 + $0xa10] sm:$0xff] }
 0x46a   : > { %8930 = vmatprep.subr.mxu0 %v9319_v2  ;;  %8937 = vmatprep.subr.mxu1 %v9319_v2  ;;  %v6634_v21 = vld [vmem:[%s13275_s9 + $0x118] sm:$0xff] }
 0x46b   : > { %8931 = vmatpush3.msra.mxu0 %v6133_v63  ;;  %8938 = vmatpush3.msra.mxu1 %v6133_v63  ;;  %v6915_v63 = vld [vmem:[%s13275_s9 + $0x9e0] sm:$0xff] }
 0x46c   : > { %8933 = vmatmul.mubr.msk.f32.vlgmr.msra.gmra.mxu0 %vm5503_vm5, %v11657_v19  ;;  %8940 = vmatmul.mubr.msk.f32.vlgmr.msra.gmra.mxu1 %vm5503_vm5, %v11677_v22 }
 0x46d   : > { %8942 = vmatprep.subr.mxu0 %v9319_v2  ;;  %8949 = vmatprep.subr.mxu1 %v9319_v2 }
 0x46e   : > { %8946 = vmatprep.mubr.msk.f32.mxu0 %vm9323_vm11, %v9319_v2  ;;  %8953 = vmatprep.mubr.msk.f32.mxu1 %vm9323_vm11, %v9319_v2 }
 0x493   : > { %v8801_v20 = vpop.f32.mrf.mxu0  ;;  %v8836_v37 = vpop.f32.mrf.mxu1 }
 0x494   : > { %v5214_v50 = vadd.f32 %v8801_v20, %v11633_v5  ;;  %v5346_v57 = vadd.f32 %v8836_v37, %v11633_v5  ;;  %v6628_v20 = vld [vmem:[%s13275_s9 + $0xe8] sm:$0xff]  ;;  %v6914_v37 = vld [vmem:[%s13275_s9 + $0x9d8] sm:$0xff] }
 0x495   : > { %v5208_v44 = vpop.f32.mrf.mxu0  ;;  %v5340_v0 = vpop.f32.mrf.mxu1 }
 0x496   : > { %5219 = vst.msk [vmem:[#allocation4 + $0x98] sm:$0xf] %vm4030_vm13, %v5214_v50  ;;  %5351 = vst.msk [vmem:[#allocation4 + $0xa8] sm:$0xf] %vm4030_vm13, %v5346_v57  ;;  %v5209_v4 = vadd.f32 %v11633_v5, %v5208_v44  ;;  %v5341_v41 = vadd.f32 %v11633_v5, %v5340_v0  ;;  %v6908_v50 = vld [vmem:[%s13275_s9 + $0x9a8] sm:$0xff]  ;;  %v6627_v57 = vld [vmem:[%s13275_s9 + $0xe0] sm:$0xff] }
 0x497   : > { %v6907_v44 = vld [vmem:[%s13275_s9 + $0x9a0] sm:$0xff]  ;;  %v6621_v0 = vld [vmem:[%s13275_s9 + $0xb0] sm:$0xff] }
 0x498   : > { %5218 = vst.msk [vmem:[#allocation4 + $0x90] sm:$0xff] %vm3926_vm9, %v5209_v4  ;;  %5350 = vst.msk [vmem:[#allocation4 + $0xa0] sm:$0xff] %vm3926_vm9, %v5341_v41  ;;  %v6901_v4 = vld [vmem:[%s13275_s9 + $0x970] sm:$0xff]  ;;  %v6620_v41 = vld [vmem:[%s13275_s9 + $0xa8] sm:$0xff] }
 0x49d   : > { %v6283_v12 = vld [vmem:[#allocation4 + $0x98] sm:$0xf]  ;;  %v6285_v43 = vld [vmem:[#allocation4 + $0xa8] sm:$0xf] }
 0x49e   : > { %v6287_v33 = vmax.f32 %v6283_v12, %v6285_v43  ;;  %v6900_v12 = vld [vmem:[%s13275_s9 + $0x968] sm:$0xff] }
 0x49f   : > { %v6282_v34 = vld [vmem:[#allocation4 + $0x90] sm:$0xff]  ;;  %v6284_v55 = vld [vmem:[#allocation4 + $0xa0] sm:$0xff] }
 0x4a0   : > { %8943 = vmatpush3.msk.msra.mxu0 %vm5507_vm2, %v6287_v33  ;;  %8950 = vmatpush3.msk.msra.mxu1 %vm5507_vm2, %v6287_v33  ;;  %v6286_v62 = vmax.f32 %v6282_v34, %v6284_v55  ;;  %v6614_v33 = vld [vmem:[%s13275_s9 + $0x78] sm:$0xff]  ;;  %v11957_v55 = vld [vmem:[%s13273_s7] ss:$0 sm:$0xff] }
 0x4a1   : > { %8944 = vmatprep.subr.mxu0 %v9319_v2  ;;  %8951 = vmatprep.subr.mxu1 %v9319_v2  ;;  %v6894_v34 = vld [vmem:[%s13275_s9 + $0x938] sm:$0xff] }
 0x4a2   : > { %8945 = vmatpush3.msra.mxu0 %v6286_v62  ;;  %8952 = vmatpush3.msra.mxu1 %v6286_v62  ;;  %v6613_v62 = vld [vmem:[%s13275_s9 + $0x70] sm:$0xff] }
 0x4a3   : > { %8947 = vmatmul.mubr.msk.f32.vlgmr.msra.gmra.mxu0 %vm5503_vm5, %v11657_v19  ;;  %8954 = vmatmul.mubr.msk.f32.vlgmr.msra.gmra.mxu1 %vm5503_vm5, %v11677_v22 }
 0x4a4   : > { %8956 = vmatprep.subr.mxu0 %v9319_v2  ;;  %8963 = vmatprep.subr.mxu1 %v9319_v2 }
 0x4a5   : > { %8960 = vmatprep.mubr.msk.f32.mxu0 %vm9323_vm11, %v9319_v2  ;;  %8967 = vmatprep.mubr.msk.f32.mxu1 %vm9323_vm11, %v9319_v2 }
 0x4a8   : > { %v11810_v27 = vpop.f32.mrf.mxu1 }
 0x4aa   : > { %v8878_v1 = vpop.f32.mrf.mxu1 }
 0x4ab   : > { %v6893_v1 = vld [vmem:[%s13275_s9 + $0x930] sm:$0xff] }
 0x4ae   : > { %v11812_v51 = vpop.f32.mrf.mxu1 }
 0x4af   : > { %v5654_v48 = vmax.f32 %v11810_v27, %v11812_v51  ;;  %v6930_v51 = vld [vmem:[%s13275_s9 + $0xa58] sm:$0xff] }
 0x4b0   : > { %v8885_v3 = vpop.f32.mrf.mxu1 }
 0x4b1   : > { %v6607_v3 = vld [vmem:[%s13275_s9 + $0x40] sm:$0xff] }
 0x4ca   : > { %v11816_v8 = vpop.f32.mrf.mxu1 }
 0x4cc   : > { %v8899_v28 = vpop.f32.mrf.mxu1 }
 0x4d0   : > { %v8871_v26 = vpop.f32.mrf.mxu0 }
 0x4d1   : > { %v5478_v54 = vadd.f32 %v8871_v26, %v11633_v5  ;;  %v6600_v26 = vld [vmem:[%s13275_s9 + $0x8] sm:$0xff] }
 0x4d2   : > { %v5472_v45 = vpop.f32.mrf.mxu0 }
 0x4d3   : > { %5483 = vst.msk [vmem:[#allocation4 + $0xb8] sm:$0xf] %vm4030_vm13, %v5478_v54  ;;  %v5473_v39 = vadd.f32 %v11633_v5, %v5472_v45  ;;  %v11978_v54 = vld [vmem:[%s13274_s8] ss:$0 sm:$0xff] }
 0x4d4   : > { %v11821_v58 = vpop.f32.mrf.mxu0  ;;  %v6599_v45 = vld [vmem:[%s13275_s9] sm:$0xff] }
 0x4d5   : > { %5482 = vst.msk [vmem:[#allocation4 + $0xb0] sm:$0xff] %vm3926_vm9, %v5473_v39  ;;  %v5819_v43 = vmax.f32 %v11821_v58, %v11816_v8  ;;  %v6606_v8 = vld [vmem:[%s13275_s9 + $0x38] sm:$0xff]  ;;  %v6817_v39 = vld [vmem:[%s13275_s9 + $0x6d0] sm:$0xff] }
 0x4d6   : > { %v8892_v14 = vpop.f32.mrf.mxu0 }
 0x4d7   : > { %v5820_v28 = vmul.f32 %v11957_v55, %v5819_v43  ;;  %v6761_v43 = vld [vmem:[%s13275_s9 + $0x510] sm:$0xff] }
 0x4da   : > { %v6436_v18 = vld [vmem:[#allocation4 + $0xb8] sm:$0xf] }
 0x4db   : > { %8957 = vmatpush3.msk.msra.mxu0 %vm5507_vm2, %v6436_v18  ;;  %8964 = vmatpush3.msk.msra.mxu1 %vm5507_vm2, %v6436_v18  ;;  %v6816_v18 = vld [vmem:[%s13275_s9 + $0x6c8] sm:$0xff] }
 0x4dc   : > { %8958 = vmatprep.subr.mxu0 %v9319_v2  ;;  %8965 = vmatprep.subr.mxu1 %v9319_v2  ;;  %v6435_v7 = vld [vmem:[#allocation4 + $0xb0] sm:$0xff] }
 0x4dd   : > { %8959 = vmatpush3.msra.mxu0 %v6435_v7  ;;  %8966 = vmatpush3.msra.mxu1 %v6435_v7  ;;  %v6887_v7 = vld [vmem:[%s13275_s9 + $0x900] sm:$0xff] }
 0x4de   : > { %8961 = vmatmul.mubr.msk.f32.vlgmr.msra.gmra.mxu0 %vm5503_vm5, %v11657_v19  ;;  %8968 = vmatmul.mubr.msk.f32.vlgmr.msra.gmra.mxu1 %vm5503_vm5, %v11677_v22  ;;  %v6698_v19 = vld [vmem:[%s13275_s9 + $0x318] sm:$0xff] }
 0x4df   : > { %6994 = vmatprep.subr.mxu0 %v6705_v40  ;;  %7065 = vmatprep.subr.mxu1 %v6929_v53  ;;  %v5821_v40 = vadd.f32 %v11978_v54, %v5820_v28  ;;  %v6823_v28 = vld [vmem:[%s13275_s9 + $0x700] sm:$0xff] }
 0x4e0   : > { %6995 = vmatpush1.msra.mxu0 %v6704_v42  ;;  %7066 = vmatpush1.msra.mxu1 %v6928_v30  ;;  %v6858_v30 = vld [vmem:[%s13275_s9 + $0x818] sm:$0xff] }
 0x4e1   : > { %6996 = vmatprep.subr.mxu0 %v6698_v19  ;;  %7067 = vmatprep.subr.mxu1 %v6922_v47  ;;  %v6810_v19 = vld [vmem:[%s13275_s9 + $0x698] sm:$0xff] }
 0x4e2   : > { %6997 = vmatpush1.msra.mxu0 %v6697_v31  ;;  %7068 = vmatpush1.msra.mxu1 %v6921_v56  ;;  %v6782_v56 = vld [vmem:[%s13275_s9 + $0x5b8] sm:$0xff] }
 0x4e3   : > { %6998 = vmatprep.subr.mxu0 %v6691_v11  ;;  %7069 = vmatprep.subr.mxu1 %v6915_v63  ;;  %v6781_v63 = vld [vmem:[%s13275_s9 + $0x5b0] sm:$0xff] }
 0x4e4   : > { %6999 = vmatpush1.msra.mxu0 %v6690_v32  ;;  %7070 = vmatpush1.msra.mxu1 %v6914_v37  ;;  %v6809_v32 = vld [vmem:[%s13275_s9 + $0x690] sm:$0xff]  ;;  %v6775_v37 = vld [vmem:[%s13275_s9 + $0x580] sm:$0xff] }
 0x4e5   : > { %7000 = vmatprep.subr.mxu0 %v6684_v36  ;;  %7071 = vmatprep.subr.mxu1 %v6908_v50  ;;  %v6879_v36 = vld [vmem:[%s13275_s9 + $0x8c0] sm:$0xff]  ;;  %v6845_v50 = vld [vmem:[%s13275_s9 + $0x7b0] sm:$0xff] }
 0x4e6   : > { %7001 = vmatpush1.msra.mxu0 %v6683_v35  ;;  %7072 = vmatpush1.msra.mxu1 %v6907_v44  ;;  %v6873_v35 = vld [vmem:[%s13275_s9 + $0x890] sm:$0xff]  ;;  %v6844_v44 = vld [vmem:[%s13275_s9 + $0x7a8] sm:$0xff] }
 0x4e7   : > { %7002 = vmatprep.subr.mxu0 %v6677_v13  ;;  %7073 = vmatprep.subr.mxu1 %v6901_v4  ;;  %v6838_v4 = vld [vmem:[%s13275_s9 + $0x778] sm:$0xff] }
 0x4e8   : > { %7003 = vmatpush1.msra.mxu0 %v6676_v10  ;;  %7074 = vmatpush1.msra.mxu1 %v6900_v12  ;;  %v6803_v10 = vld [vmem:[%s13275_s9 + $0x660] sm:$0xff]  ;;  %v6837_v12 = vld [vmem:[%s13275_s9 + $0x770] sm:$0xff] }
 0x4e9   : > { %7004 = vmatprep.subr.mxu0 %v6670_v38  ;;  %7075 = vmatprep.subr.mxu1 %v6894_v34  ;;  %v6872_v38 = vld [vmem:[%s13275_s9 + $0x888] sm:$0xff] }
 0x4ea   : > { %7005 = vmatpush1.msra.mxu0 %v6669_v25  ;;  %7076 = vmatpush1.msra.mxu1 %v6893_v1  ;;  %v6802_v25 = vld [vmem:[%s13275_s9 + $0x658] sm:$0xff]  ;;  %v6760_v34 = vld [vmem:[%s13275_s9 + $0x508] sm:$0xff] }
 0x4eb   : > { %v11832_v5 = vpop.f32.mrf.mxu0  ;;  %v11834_v61 = vpop.f32.mrf.mxu1  ;;  %7006 = vmatprep.subr.mxu0 %v6663_v52  ;;  %7077 = vmatprep.subr.mxu1 %v6887_v7  ;;  %v6866_v52 = vld [vmem:[%s13275_s9 + $0x858] sm:$0xff]  ;;  %v6739_v7 = vld [vmem:[%s13275_s9 + $0x460] sm:$0xff] }
 0x4ec   : > { %v5972_v29 = vmax.f32 %v11832_v5, %v11834_v61  ;;  %7007 = vmatpush1.msra.mxu0 %v6662_v60  ;;  %v5822_v60 = vmax.f32 %v5821_v40, 0.0  ;;  %v6754_v1 = vld [vmem:[%s13275_s9 + $0x4d8] sm:$0xff]  ;;  %v6977_v40 = vld [vmem:[%s13275_s9 + $0xbd0] sm:$0xff]  ;;  %v6923_v5 = vld [vmem:[%s13275_s9 + $0xa20] sm:$0xff] }
 0x4ed   : > { %v8906_v22 = vpop.f32.mrf.mxu0  ;;  %v8913_v6 = vpop.f32.mrf.mxu1  ;;  %7008 = vmatprep.subr.mxu0 %v6656_v15  ;;  %v6917_v61 = vld [vmem:[%s13275_s9 + $0x9f0] sm:$0xff] }
 0x4ee   : > { %7009 = vmatpush1.msra.mxu0 %v6655_v49  ;;  %v6886_v22 = vld [vmem:[%s13275_s9 + $0x8f8] sm:$0xff]  ;;  %v6880_v6 = vld [vmem:[%s13275_s9 + $0x8c8] sm:$0xff] }
 0x4ef   : > { %7010 = vmatprep.subr.mxu0 %v6649_v59  ;;  %7078 = vmatpush1.msra.mxu1 %v6886_v22  ;;  %v6796_v49 = vld [vmem:[%s13275_s9 + $0x628] sm:$0xff]  ;;  %v6865_v59 = vld [vmem:[%s13275_s9 + $0x850] sm:$0xff] }
 0x4f0   : > { %7011 = vmatpush1.msra.mxu0 %v6648_v46  ;;  %7079 = vmatprep.subr.mxu1 %v6880_v6  ;;  %v6795_v46 = vld [vmem:[%s13275_s9 + $0x620] sm:$0xff]  ;;  %v6732_v22 = vld [vmem:[%s13275_s9 + $0x428] sm:$0xff]  ;;  %v6970_v6 = vld [vmem:[%s13275_s9 + $0xb98] sm:$0xff] }
 0x4f1   : > { %7012 = vmatprep.subr.mxu0 %v6642_v23  ;;  %7080 = vmatpush1.msra.mxu1 %v6879_v36  ;;  %v6859_v23 = vld [vmem:[%s13275_s9 + $0x820] sm:$0xff] }
 0x4f2   : > { %7013 = vmatpush1.msra.mxu0 %v6641_v24  ;;  %7081 = vmatprep.subr.mxu1 %v6873_v35  ;;  %v6789_v24 = vld [vmem:[%s13275_s9 + $0x5f0] sm:$0xff]  ;;  %v6963_v36 = vld [vmem:[%s13275_s9 + $0xb60] sm:$0xff] }
 0x4f3   : > { %7014 = vmatprep.subr.mxu0 %v6635_v17  ;;  %7082 = vmatpush1.msra.mxu1 %v6872_v38  ;;  %v6788_v17 = vld [vmem:[%s13275_s9 + $0x5e8] sm:$0xff]  ;;  %v6719_v35 = vld [vmem:[%s13275_s9 + $0x3c0] sm:$0xff] }
 0x4f4   : > { %7015 = vmatpush1.msra.mxu0 %v6634_v21  ;;  %7083 = vmatprep.subr.mxu1 %v6866_v52  ;;  %v6852_v21 = vld [vmem:[%s13275_s9 + $0x7e8] sm:$0xff]  ;;  %v6950_v52 = vld [vmem:[%s13275_s9 + $0xaf8] sm:$0xff] }
 0x4f5   : > { %7016 = vmatprep.subr.mxu0 %v6628_v20  ;;  %7084 = vmatpush1.msra.mxu1 %v6865_v59  ;;  %v6851_v20 = vld [vmem:[%s13275_s9 + $0x7e0] sm:$0xff]  ;;  %v6956_v38 = vld [vmem:[%s13275_s9 + $0xb28] sm:$0xff] }
 0x4f6   : > { %7017 = vmatpush1.msra.mxu0 %v6627_v57  ;;  %7085 = vmatprep.subr.mxu1 %v6859_v23  ;;  %v6774_v57 = vld [vmem:[%s13275_s9 + $0x578] sm:$0xff]  ;;  %v6943_v59 = vld [vmem:[%s13275_s9 + $0xac0] sm:$0xff] }
 0x4f7   : > { %7018 = vmatprep.subr.mxu0 %v6621_v0  ;;  %7086 = vmatpush1.msra.mxu1 %v6858_v30  ;;  %v6768_v0 = vld [vmem:[%s13275_s9 + $0x548] sm:$0xff] }
 0x4f8   : > { %7019 = vmatpush1.msra.mxu0 %v6620_v41  ;;  %7087 = vmatprep.subr.mxu1 %v6852_v21  ;;  %v6767_v41 = vld [vmem:[%s13275_s9 + $0x540] sm:$0xff] }
 0x4f9   : > { %7020 = vmatprep.subr.mxu0 %v6614_v33  ;;  %7088 = vmatpush1.msra.mxu1 %v6851_v20  ;;  %v6831_v33 = vld [vmem:[%s13275_s9 + $0x740] sm:$0xff] }
 0x4fa   : > { %7021 = vmatpush1.msra.mxu0 %v6613_v62  ;;  %7089 = vmatprep.subr.mxu1 %v6845_v50  ;;  %v6830_v62 = vld [vmem:[%s13275_s9 + $0x738] sm:$0xff]  ;;  %v6707_v21 = vld [vmem:[%s13275_s9 + $0x360] sm:$0xff] }
 0x4fb   : > { %7022 = vmatprep.subr.mxu0 %v6607_v3  ;;  %7090 = vmatpush1.msra.mxu1 %v6844_v44  ;;  %v6824_v3 = vld [vmem:[%s13275_s9 + $0x708] sm:$0xff] }
 0x4fc   : > { %7023 = vmatpush1.msra.mxu0 %v6606_v8  ;;  %7091 = vmatprep.subr.mxu1 %v6838_v4  ;;  %v6753_v8 = vld [vmem:[%s13275_s9 + $0x4d0] sm:$0xff] }
 0x4fd   : > { %7024 = vmatprep.subr.mxu0 %v6600_v26  ;;  %7092 = vmatpush1.msra.mxu1 %v6837_v12  ;;  %v6747_v26 = vld [vmem:[%s13275_s9 + $0x4a0] sm:$0xff]  ;;  %v5973_v12 = vmul.f32 %v11957_v55, %v5972_v29  ;;  %v6916_v29 = vld [vmem:[%s13275_s9 + $0x9e8] sm:$0xff] }
 0x4fe   : > { %7025 = vmatpush1.msra.mxu0 %v6599_v45  ;;  %7093 = vmatprep.subr.mxu1 %v6831_v33  ;;  %v6985_v45 = vld [vmem:[%s13275_s9 + $0xc10] sm:$0xff] }
 0x4ff   : > { %7026 = vmatprep.subr.mxu0 %v6817_v39  ;;  %7094 = vmatpush1.msra.mxu1 %v6830_v62  ;;  %v6746_v39 = vld [vmem:[%s13275_s9 + $0x498] sm:$0xff]  ;;  %v5974_v33 = vadd.f32 %v11978_v54, %v5973_v12  ;;  %v6965_v12 = vld [vmem:[%s13275_s9 + $0xb70] sm:$0xff] }
 0x500   : > { %7027 = vmatpush2.msra.mxu0 %v6816_v18  ;;  %7095 = vmatprep.subr.mxu1 %v6824_v3  ;;  %v6978_v18 = vld [vmem:[%s13275_s9 + $0xbd8] sm:$0xff] }
 0x501   : > { %7028 = vmatprep.subr.mxu0 %v6810_v19  ;;  %7096 = vmatpush1.msra.mxu1 %v6823_v28  ;;  %v6971_v19 = vld [vmem:[%s13275_s9 + $0xba0] sm:$0xff] }
 0x502   : > { %7029 = vmatpush2.msra.mxu0 %v6809_v32  ;;  %7113 = vmatprep.subr.mxu1 %v6985_v45  ;;  %v6725_v32 = vld [vmem:[%s13275_s9 + $0x3f0] sm:$0xff] }
 0x503   : > { %7030 = vmatprep.subr.mxu0 %v6803_v10  ;;  %v6718_v10 = vld [vmem:[%s13275_s9 + $0x3b8] sm:$0xff]  ;;  %v6909_v45 = vld [vmem:[%s13275_s9 + $0x9b0] sm:$0xff] }
 0x504   : > { %7031 = vmatpush2.msra.mxu0 %v6802_v25  ;;  %v6712_v25 = vld [vmem:[%s13275_s9 + $0x388] sm:$0xff] }
 0x505   : > { %7032 = vmatprep.subr.mxu0 %v6796_v49  ;;  %v6931_v49 = vld [vmem:[%s13275_s9 + $0xa60] sm:$0xff] }
 0x506   : > { %7033 = vmatpush2.msra.mxu0 %v6795_v46  ;;  %v6942_v46 = vld [vmem:[%s13275_s9 + $0xab8] sm:$0xff] }
 0x507   : > { %7034 = vmatprep.subr.mxu0 %v6789_v24  ;;  %v6936_v24 = vld [vmem:[%s13275_s9 + $0xa88] sm:$0xff] }
 0x508   : > { %7035 = vmatpush2.msra.mxu0 %v6788_v17  ;;  %v6935_v17 = vld [vmem:[%s13275_s9 + $0xa80] sm:$0xff] }
 0x509   : > { %7036 = vmatprep.subr.mxu0 %v6782_v56 }
 0x50a   : > { %7037 = vmatpush2.msra.mxu0 %v6781_v63 }
 0x50b   : > { %v6051_v58 = vpop.f32.mrf.mxu0  ;;  %v6121_v14 = vpop.f32.mrf.mxu1  ;;  %7038 = vmatprep.subr.mxu0 %v6775_v37 }
 0x50c   : > { %v6125_v42 = vmax.f32 %v6051_v58, %v6121_v14  ;;  %7039 = vmatpush2.msra.mxu0 %v6774_v57  ;;  %v6984_v58 = vld [vmem:[%s13275_s9 + $0xc08] sm:$0xff] }
 0x50d   : > { %v8920_v31 = vpop.f32.mrf.mxu0  ;;  %v8927_v11 = vpop.f32.mrf.mxu1  ;;  %7040 = vmatprep.subr.mxu0 %v6768_v0  ;;  %v6740_v14 = vld [vmem:[%s13275_s9 + $0x468] sm:$0xff]  ;;  %7114 = vmatpush2.msra.mxu1 %v6984_v58  ;;  %v6902_v58 = vld [vmem:[%s13275_s9 + $0x978] sm:$0xff] }
 0x50e   : > { %v6126_v13 = vmul.f32 %v11957_v55, %v6125_v42  ;;  %7041 = vmatpush2.msra.mxu0 %v6767_v41  ;;  %v6733_v42 = vld [vmem:[%s13275_s9 + $0x430] sm:$0xff]  ;;  %7115 = vmatprep.subr.mxu1 %v6978_v18  ;;  %v6726_v31 = vld [vmem:[%s13275_s9 + $0x3f8] sm:$0xff]  ;;  %v6964_v11 = vld [vmem:[%s13275_s9 + $0xb68] sm:$0xff]  ;;  %v5661_v41 = vmul.f32 %v11957_v55, %v5654_v48 }
 0x50f   : > { %7042 = vmatprep.subr.mxu0 %v6761_v43  ;;  %7116 = vmatpush2.msra.mxu1 %v6977_v40  ;;  %v6924_v48 = vld [vmem:[%s13275_s9 + $0xa28] sm:$0xff]  ;;  %v6895_v18 = vld [vmem:[%s13275_s9 + $0x940] sm:$0xff] }
 0x510   : > { %v6127_v15 = vadd.f32 %v11978_v54, %v6126_v13  ;;  %7043 = vmatpush2.msra.mxu0 %v6760_v34  ;;  %7117 = vmatprep.subr.mxu1 %v6971_v19  ;;  %v6957_v13 = vld [vmem:[%s13275_s9 + $0xb30] sm:$0xff]  ;;  %v5668_v43 = vadd.f32 %v11978_v54, %v5661_v41  ;;  %v6888_v40 = vld [vmem:[%s13275_s9 + $0x908] sm:$0xff]  ;;  %v6966_v41 = vld [vmem:[%s13275_s9 + $0xb78] sm:$0xff] }
 0x511   : > { %7044 = vmatprep.subr.mxu0 %v6754_v1  ;;  %7118 = vmatpush2.msra.mxu1 %v6970_v6  ;;  %v5975_v1 = vmax.f32 %v5974_v33, 0.0  ;;  %v6881_v19 = vld [vmem:[%s13275_s9 + $0x8d0] sm:$0xff]  ;;  %v6874_v6 = vld [vmem:[%s13275_s9 + $0x898] sm:$0xff] }
 0x512   : > { %v6128_v53 = vmax.f32 %v6127_v15, 0.0  ;;  %7045 = vmatpush2.msra.mxu0 %v6753_v8  ;;  %7119 = vmatprep.subr.mxu1 %v6964_v11  ;;  %v6949_v15 = vld [vmem:[%s13275_s9 + $0xaf0] sm:$0xff]  ;;  %v5669_v62 = vmax.f32 %v5668_v43, 0.0  ;;  %v6867_v11 = vld [vmem:[%s13275_s9 + $0x860] sm:$0xff]  ;;  %v6958_v33 = vld [vmem:[%s13275_s9 + $0xb38] sm:$0xff] }
 0x513   : > { %7046 = vmatprep.subr.mxu0 %v6747_v26  ;;  %7120 = vmatpush2.msra.mxu1 %v6963_v36  ;;  %v6910_v26 = vld [vmem:[%s13275_s9 + $0x9b8] sm:$0xff]  ;;  %v6959_v43 = vld [vmem:[%s13275_s9 + $0xb40] sm:$0xff] }
 0x514   : > { %v9230_v47 = vpack.i.bf16 %v5822_v60, %v6128_v53  ;;  %7047 = vmatpush2.msra.mxu0 %v6746_v39  ;;  %v6711_v60 = vld [vmem:[%s13275_s9 + $0x380] sm:$0xff]  ;;  %7121 = vmatprep.subr.mxu1 %v6957_v13  ;;  %v6860_v13 = vld [vmem:[%s13275_s9 + $0x828] sm:$0xff] }
 0x515   : > { %7048 = vmatprep.subr.mxu0 %v6740_v14  ;;  %7122 = vmatpush2.msra.mxu1 %v6956_v38  ;;  %v6903_v39 = vld [vmem:[%s13275_s9 + $0x980] sm:$0xff]  ;;  %v6896_v14 = vld [vmem:[%s13275_s9 + $0x948] sm:$0xff]  ;;  %v6854_v38 = vld [vmem:[%s13275_s9 + $0x7f8] sm:$0xff] }
 0x516   : > { %9231 = vrot.lane.b32.xlu0 %v9230_v47, %s13291_s20  ;;  %7049 = vmatpush2.msra.mxu0 %v6739_v7  ;;  %v6889_v7 = vld [vmem:[%s13275_s9 + $0x910] sm:$0xff] }
 0x517   : > { %7050 = vmatprep.subr.mxu0 %v6733_v42  ;;  %7123 = vmatprep.subr.mxu1 %v6950_v52  ;;  %v6882_v42 = vld [vmem:[%s13275_s9 + $0x8d8] sm:$0xff] }
 0x518   : > { %7051 = vmatpush2.msra.mxu0 %v6732_v22  ;;  %7124 = vmatpush2.msra.mxu1 %v6949_v15  ;;  %v6875_v22 = vld [vmem:[%s13275_s9 + $0x8a0] sm:$0xff] }
 0x519   : > { %7052 = vmatprep.subr.mxu0 %v6726_v31  ;;  %7125 = vmatprep.subr.mxu1 %v6943_v59  ;;  %v6868_v31 = vld [vmem:[%s13275_s9 + $0x868] sm:$0xff] }
 0x51a   : > { %7053 = vmatpush2.msra.mxu0 %v6725_v32  ;;  %7126 = vmatpush2.msra.mxu1 %v6942_v46  ;;  %v6861_v32 = vld [vmem:[%s13275_s9 + $0x830] sm:$0xff]  ;;  %v6846_v46 = vld [vmem:[%s13275_s9 + $0x7b8] sm:$0xff] }
 0x51b   : > { %7054 = vmatprep.subr.mxu0 %v6719_v35  ;;  %7127 = vmatprep.subr.mxu1 %v6936_v24  ;;  %v6840_v24 = vld [vmem:[%s13275_s9 + $0x788] sm:$0xff] }
 0x51c   : > { %7055 = vmatpush2.msra.mxu0 %v6718_v10  ;;  %7128 = vmatpush2.msra.mxu1 %v6935_v17 }
 0x51d   : > { %7056 = vmatprep.subr.mxu0 %v6712_v25  ;;  %7136 = vmatprep.subr.mxu1 %v6707_v21  ;;  %v6832_v21 = vld [vmem:[%s13275_s9 + $0x748] sm:$0xff] }
 0x51e   : > { %7057 = vmatpush2.msra.mxu0 %v6711_v60  ;;  %v6853_v60 = vld [vmem:[%s13275_s9 + $0x7f0] sm:$0xff] }
 0x51f   : > { %7207 = vmatprep.subr.mxu0 %v6931_v49  ;;  %v6847_v49 = vld [vmem:[%s13275_s9 + $0x7c0] sm:$0xff] }
 0x52c   : > { %v12188_v23 = vpop.f32.mrf.mxu0  ;;  %v12190_v53 = vpop.f32.mrf.mxu1 }
 0x52d   : > { %v6278_v30 = vmax.f32 %v12188_v23, %v12190_v53  ;;  %v6700_v23 = vld [vmem:[%s13275_s9 + $0x328] sm:$0xff]  ;;  %v6701_v53 = vld [vmem:[%s13275_s9 + $0x330] sm:$0xff] }
 0x52e   : > { %v8934_v47 = vpop.f32.mrf.mxu0  ;;  %v8941_v56 = vpop.f32.mrf.mxu1 }
 0x52f   : > { %v6839_v47 = vld [vmem:[%s13275_s9 + $0x780] sm:$0xff]  ;;  %v6833_v56 = vld [vmem:[%s13275_s9 + $0x750] sm:$0xff] }
 0x563   : > { %v6357_v63 = vpop.f32.mrf.mxu0  ;;  %v6427_v20 = vpop.f32.mrf.mxu1 }
 0x564   : > { %v6431_v37 = vmax.f32 %v6357_v63, %v6427_v20  ;;  %v6826_v63 = vld [vmem:[%s13275_s9 + $0x718] sm:$0xff]  ;;  %v6825_v20 = vld [vmem:[%s13275_s9 + $0x710] sm:$0xff] }
 0x565   : > { %v8948_v50 = vpop.f32.mrf.mxu0  ;;  %v8955_v57 = vpop.f32.mrf.mxu1 }
 0x566   : > { %v6432_v44 = vmul.f32 %v11957_v55, %v6431_v37  ;;  %v6987_v37 = vld [vmem:[%s13275_s9 + $0xc20] sm:$0xff]  ;;  %v6986_v50 = vld [vmem:[%s13275_s9 + $0xc18] sm:$0xff]  ;;  %v6980_v57 = vld [vmem:[%s13275_s9 + $0xbe8] sm:$0xff] }
 0x568   : > { %v6433_v0 = vadd.f32 %v11978_v54, %v6432_v44  ;;  %v6979_v44 = vld [vmem:[%s13275_s9 + $0xbe0] sm:$0xff] }
 0x56a   : > { %v6434_v4 = vmax.f32 %v6433_v0, 0.0  ;;  %v6973_v0 = vld [vmem:[%s13275_s9 + $0xbb0] sm:$0xff] }
 0x56c   : > { %6593 = vrot.lane.b32.xlu1 %v6434_v4, %s13291_s20  ;;  %v6972_v4 = vld [vmem:[%s13275_s9 + $0xba8] sm:$0xff]  ;;  %s432_s20 = scalar_lea.vmem [#allocation5], %s431_s0 }
 0x56d   : > { %s7769_s16 = sshll.u32 %s432_s20, 4  ;;  %s7770_s16 = int_to_ptr.vmem [resolvable:$true] %s7769_s16 }
 0x56e   : > { %s9257_s27 = scalar_lea.vmem %s7770_s16, 16  ;;  %p9264_p0 = scmp.lt.s32.totalorder %s7770_s16, %s9262_s29 }
 0x56f   : > { %p9258_p11 = scmp.ne.s32.totalorder %s7770_s16, %s9257_s27  ;;  %p9265_p1 = scmp.lt.s32.totalorder %s9263_s21, %s9257_s27 }
 0x571   : > { %p9259_p12 = pnand %p9258_p11, %p9433_p5  ;;  %p9266_p2 = por %p9265_p1, %p9264_p0 }
 0x573   : > { %p9260_p13 = pneg %p9259_p12 }
 0x575   : > { %p9267_p3 = pnand %p9266_p2, %p9260_p13 }
 0x588   : > { %v9232_v34 = vpop.permute.xlu0 %9231 }
 0x589   : > { %v9234_v3 = vunpack.i.h.bf16 %v9232_v34  ;;  %v9233_v8 = vunpack.i.l.bf16 %v9232_v34  ;;  %v6952_v34 = vld [vmem:[%s13275_s9 + $0xb08] sm:$0xff] }
 0x58b   : > { %v12217_v28 = vsel %vm3926_vm9, %v5669_v62, %v9234_v3  ;;  %v12220_v27 = vsel %vm3926_vm9, %v5975_v1, %v9233_v8  ;;  %v6951_v62 = vld [vmem:[%s13275_s9 + $0xb00] sm:$0xff]  ;;  %v6945_v1 = vld [vmem:[%s13275_s9 + $0xad0] sm:$0xff]  ;;  %v6944_v3 = vld [vmem:[%s13275_s9 + $0xac8] sm:$0xff] }
 0x58c   : > { %7058 = vmatprep.mubr.f32.mxu0 %v12220_v27  ;;  %v6938_v8 = vld [vmem:[%s13275_s9 + $0xa98] sm:$0xff] }
 0x58d   : > { %7059 = vmatmul.mubr.f32.vlgmr.msra.gmra.mxu0 %v12217_v28 }
 0x58e   : > { %7208 = vmatpush1.msra.mxu0 %v6930_v51  ;;  %v6937_v51 = vld [vmem:[%s13275_s9 + $0xa90] sm:$0xff] }
 0x58f   : > { %7209 = vmatprep.subr.mxu0 %v6924_v48  ;;  %v6709_v48 = vld [vmem:[%s13275_s9 + $0x370] sm:$0xff] }
 0x590   : > { %7210 = vmatpush1.msra.mxu0 %v6923_v5  ;;  %v6279_v5 = vmul.f32 %v11957_v55, %v6278_v30  ;;  %v6693_v30 = vld [vmem:[%s13275_s9 + $0x2f0] sm:$0xff] }
 0x591   : > { %7211 = vmatprep.subr.mxu0 %v6917_v61 }
 0x592   : > { %7212 = vmatpush1.msra.mxu0 %v6916_v29  ;;  %v6280_v61 = vadd.f32 %v11978_v54, %v6279_v5  ;;  %v6617_v5 = vld [vmem:[%s13275_s9 + $0x90] sm:$0xff] }
 0x593   : > { %7213 = vmatprep.subr.mxu0 %v6910_v26 }
 0x594   : > { %7214 = vmatpush1.msra.mxu0 %v6909_v45  ;;  %v6281_v29 = vmax.f32 %v6280_v61, 0.0  ;;  %v6706_v45 = vld [vmem:[%s13275_s9 + $0x358] sm:$0xff]  ;;  %v6609_v61 = vld [vmem:[%s13275_s9 + $0x50] sm:$0xff] }
 0x595   : > { %7215 = vmatprep.subr.mxu0 %v6903_v39  ;;  %v6708_v39 = vld [vmem:[%s13275_s9 + $0x368] sm:$0xff] }
 0x596   : > { %7216 = vmatpush1.msra.mxu0 %v6902_v58 }
 0x597   : > { %7217 = vmatprep.subr.mxu0 %v6896_v14  ;;  %v6695_v14 = vld [vmem:[%s13275_s9 + $0x300] sm:$0xff] }
 0x598   : > { %7218 = vmatpush1.msra.mxu0 %v6895_v18  ;;  %v6692_v18 = vld [vmem:[%s13275_s9 + $0x2e8] sm:$0xff] }
 0x599   : > { %7219 = vmatprep.subr.mxu0 %v6889_v7  ;;  %v6694_v7 = vld [vmem:[%s13275_s9 + $0x2f8] sm:$0xff] }
 0x59a   : > { %7220 = vmatpush1.msra.mxu0 %v6888_v40  ;;  %v6686_v40 = vld [vmem:[%s13275_s9 + $0x2b8] sm:$0xff] }
 0x59b   : > { %7221 = vmatprep.subr.mxu0 %v6882_v42  ;;  %v6688_v42 = vld [vmem:[%s13275_s9 + $0x2c8] sm:$0xff] }
 0x59c   : > { %7222 = vmatpush1.msra.mxu0 %v6881_v19  ;;  %v6685_v19 = vld [vmem:[%s13275_s9 + $0x2b0] sm:$0xff] }
 0x59d   : > { %7223 = vmatprep.subr.mxu0 %v6875_v22  ;;  %v6687_v22 = vld [vmem:[%s13275_s9 + $0x2c0] sm:$0xff] }
 0x59e   : > { %7224 = vmatpush1.msra.mxu0 %v6874_v6  ;;  %v6506_v36 = vpop.f32.mrf.mxu0  ;;  %v6576_v35 = vpop.f32.mrf.mxu1  ;;  %v6679_v6 = vld [vmem:[%s13275_s9 + $0x280] sm:$0xff] }
 0x59f   : > { %7225 = vmatprep.subr.mxu0 %v6868_v31  ;;  %v6580_v10 = vmax.f32 %v6506_v36, %v6576_v35  ;;  %v6681_v31 = vld [vmem:[%s13275_s9 + $0x290] sm:$0xff]  ;;  %v6672_v36 = vld [vmem:[%s13275_s9 + $0x248] sm:$0xff]  ;;  %v6674_v35 = vld [vmem:[%s13275_s9 + $0x258] sm:$0xff] }
 0x5a0   : > { %7226 = vmatpush1.msra.mxu0 %v6867_v11  ;;  %v8962_v25 = vpop.f32.mrf.mxu0  ;;  %v8969_v52 = vpop.f32.mrf.mxu1  ;;  %v6678_v11 = vld [vmem:[%s13275_s9 + $0x278] sm:$0xff] }
 0x5a1   : > { %7227 = vmatprep.subr.mxu0 %v6861_v32  ;;  %v6581_v15 = vmul.f32 %v11957_v55, %v6580_v10  ;;  %v6702_v55 = vld [vmem:[%s13275_s9 + $0x338] sm:$0xff]  ;;  %v6680_v32 = vld [vmem:[%s13275_s9 + $0x288] sm:$0xff]  ;;  %v6673_v10 = vld [vmem:[%s13275_s9 + $0x250] sm:$0xff] }
 0x5a2   : > { %7228 = vmatpush1.msra.mxu0 %v6860_v13  ;;  %v6671_v13 = vld [vmem:[%s13275_s9 + $0x240] sm:$0xff]  ;;  %v6664_v52 = vld [vmem:[%s13275_s9 + $0x208] sm:$0xff] }
 0x5a3   : > { %7229 = vmatprep.subr.mxu0 %v6854_v38  ;;  %v6582_v59 = vadd.f32 %v11978_v54, %v6581_v15  ;;  %v6699_v54 = vld [vmem:[%s13275_s9 + $0x320] sm:$0xff]  ;;  %v6665_v38 = vld [vmem:[%s13275_s9 + $0x210] sm:$0xff]  ;;  %v6658_v15 = vld [vmem:[%s13275_s9 + $0x1d8] sm:$0xff] }
 0x5a4   : > { %7230 = vmatpush1.msra.mxu0 %v6853_v60  ;;  %v6667_v25 = vld [vmem:[%s13275_s9 + $0x220] sm:$0xff]  ;;  %v6666_v60 = vld [vmem:[%s13275_s9 + $0x218] sm:$0xff] }
 0x5a5   : > { %v12304_v17 = vmax.f32 %v6582_v59, 0.0  ;;  %7231 = vmatprep.subr.mxu0 %v6847_v49  ;;  %v6660_v49 = vld [vmem:[%s13275_s9 + $0x1e8] sm:$0xff]  ;;  %v6657_v59 = vld [vmem:[%s13275_s9 + $0x1d0] sm:$0xff] }
 0x5a6   : > { %7232 = vmatpush1.msra.mxu0 %v6846_v46  ;;  %v6659_v46 = vld [vmem:[%s13275_s9 + $0x1e0] sm:$0xff] }
 0x5a7   : > { %7233 = vmatprep.subr.mxu0 %v6840_v24  ;;  %7907 = vmatprep.mubr.msk.f32.mxu1 %vm3926_vm9, %v12304_v17  ;;  %v6651_v24 = vld [vmem:[%s13275_s9 + $0x1a0] sm:$0xff] }
 0x5a8   : > { %7234 = vmatpush1.msra.mxu0 %v6839_v47  ;;  %7908 = vmatprep.mubr.msk.f32.mxu0 %vm3926_vm9, %v12304_v17  ;;  %v6653_v47 = vld [vmem:[%s13275_s9 + $0x1b0] sm:$0xff] }
 0x5a9   : > { %7235 = vmatprep.subr.mxu0 %v6833_v56  ;;  %v6650_v56 = vld [vmem:[%s13275_s9 + $0x198] sm:$0xff] }
 0x5aa   : > { %7236 = vmatpush1.msra.mxu0 %v6832_v21  ;;  %v6652_v21 = vld [vmem:[%s13275_s9 + $0x1a8] sm:$0xff] }
 0x5ab   : > { %7237 = vmatprep.subr.mxu0 %v6826_v63  ;;  %v6644_v63 = vld [vmem:[%s13275_s9 + $0x168] sm:$0xff] }
 0x5ac   : > { %7238 = vmatpush1.msra.mxu0 %v6825_v20  ;;  %v6646_v20 = vld [vmem:[%s13275_s9 + $0x178] sm:$0xff] }
 0x5ad   : > { %7255 = vmatprep.subr.mxu0 %v6987_v37  ;;  %v6643_v37 = vld [vmem:[%s13275_s9 + $0x160] sm:$0xff] }
 0x5ae   : > { %7256 = vmatpush2.msra.mxu0 %v6986_v50  ;;  %v6645_v50 = vld [vmem:[%s13275_s9 + $0x170] sm:$0xff] }
 0x5af   : > { %7257 = vmatprep.subr.mxu0 %v6980_v57  ;;  %v6637_v57 = vld [vmem:[%s13275_s9 + $0x130] sm:$0xff] }
 0x5b0   : > { %7258 = vmatpush2.msra.mxu0 %v6979_v44  ;;  %v6639_v44 = vld [vmem:[%s13275_s9 + $0x140] sm:$0xff] }
 0x5b1   : > { %7259 = vmatprep.subr.mxu0 %v6973_v0  ;;  %v6636_v0 = vld [vmem:[%s13275_s9 + $0x128] sm:$0xff] }
 0x5b2   : > { %7260 = vmatpush2.msra.mxu0 %v6972_v4  ;;  %v6638_v4 = vld [vmem:[%s13275_s9 + $0x138] sm:$0xff] }
 0x5b3   : > { %7261 = vmatprep.subr.mxu0 %v6966_v41  ;;  %v6630_v41 = vld [vmem:[%s13275_s9 + $0xf8] sm:$0xff] }
 0x5b4   : > { %7262 = vmatpush2.msra.mxu0 %v6965_v12  ;;  %v6632_v12 = vld [vmem:[%s13275_s9 + $0x108] sm:$0xff] }
 0x5b5   : > { %7263 = vmatprep.subr.mxu0 %v6959_v43  ;;  %v6629_v43 = vld [vmem:[%s13275_s9 + $0xf0] sm:$0xff] }
 0x5b6   : > { %7264 = vmatpush2.msra.mxu0 %v6958_v33  ;;  %v6631_v33 = vld [vmem:[%s13275_s9 + $0x100] sm:$0xff] }
 0x5b7   : > { %7265 = vmatprep.subr.mxu0 %v6952_v34  ;;  %v6623_v34 = vld [vmem:[%s13275_s9 + $0xc0] sm:$0xff] }
 0x5b8   : > { %7266 = vmatpush2.msra.mxu0 %v6951_v62  ;;  %v6625_v62 = vld [vmem:[%s13275_s9 + $0xd0] sm:$0xff] }
 0x5b9   : > { %7267 = vmatprep.subr.mxu0 %v6945_v1  ;;  %v6622_v1 = vld [vmem:[%s13275_s9 + $0xb8] sm:$0xff] }
 0x5ba   : > { %7268 = vmatpush2.msra.mxu0 %v6944_v3  ;;  %v6624_v3 = vld [vmem:[%s13275_s9 + $0xc8] sm:$0xff] }
 0x5bb   : > { %7269 = vmatprep.subr.mxu0 %v6938_v8  ;;  %v6616_v8 = vld [vmem:[%s13275_s9 + $0x88] sm:$0xff] }
 0x5bc   : > { %7270 = vmatpush2.msra.mxu0 %v6937_v51  ;;  %v6618_v51 = vld [vmem:[%s13275_s9 + $0x98] sm:$0xff] }
 0x5bd   : > { %7278 = vmatprep.subr.mxu0 %v6709_v48  ;;  %v6615_v48 = vld [vmem:[%s13275_s9 + $0x80] sm:$0xff] }
 0x5de   : > { %v6594_v26 = vpop.permute.xlu1 %6593 }
 0x5df   : > { %v12388_v58 = vsel %vm3926_vm9, %v6281_v29, %v6594_v26  ;;  %v6611_v29 = vld [vmem:[%s13275_s9 + $0x60] sm:$0xff]  ;;  %v6608_v26 = vld [vmem:[%s13275_s9 + $0x48] sm:$0xff] }
 0x5e0   : > { %7130 = vmatmul.mubr.f32.vlgmr.msra.gmra.mxu1 %v12388_v58  ;;  %7272 = vmatmul.mubr.f32.vlgmr.msra.gmra.mxu0 %v12388_v58 }
 0x5e1   : > { %7137 = vmatpush1.msra.mxu1 %v6706_v45  ;;  %7279 = vmatpush1.msra.mxu0 %v6708_v39  ;;  %v6610_v45 = vld [vmem:[%s13275_s9 + $0x58] sm:$0xff] }
 0x5e2   : > { %7138 = vmatprep.subr.mxu1 %v6700_v23  ;;  %7280 = vmatprep.subr.mxu0 %v6702_v55  ;;  %v6602_v39 = vld [vmem:[%s13275_s9 + $0x18] sm:$0xff]  ;;  %v6604_v23 = vld [vmem:[%s13275_s9 + $0x28] sm:$0xff]  ;;  %v6601_v55 = vld [vmem:[%s13275_s9 + $0x10] sm:$0xff] }
 0x5e3   : > { %7139 = vmatpush1.msra.mxu1 %v6699_v54  ;;  %7281 = vmatpush1.msra.mxu0 %v6701_v53  ;;  %v6603_v54 = vld [vmem:[%s13275_s9 + $0x20] sm:$0xff] }
 0x5e4   : > { %7140 = vmatprep.subr.mxu1 %v6693_v30  ;;  %7282 = vmatprep.subr.mxu0 %v6695_v14  ;;  %v6819_v53 = vld [vmem:[%s13275_s9 + $0x6e0] sm:$0xff]  ;;  %v6821_v30 = vld [vmem:[%s13275_s9 + $0x6f0] sm:$0xff]  ;;  %v6818_v14 = vld [vmem:[%s13275_s9 + $0x6d8] sm:$0xff] }
 0x5e5   : > { %7141 = vmatpush1.msra.mxu1 %v6692_v18  ;;  %7283 = vmatpush1.msra.mxu0 %v6694_v7  ;;  %v6820_v18 = vld [vmem:[%s13275_s9 + $0x6e8] sm:$0xff] }
 0x5e6   : > { %7142 = vmatprep.subr.mxu1 %v6686_v40  ;;  %7284 = vmatprep.subr.mxu0 %v6688_v42  ;;  %v6812_v7 = vld [vmem:[%s13275_s9 + $0x6a8] sm:$0xff]  ;;  %v6814_v40 = vld [vmem:[%s13275_s9 + $0x6b8] sm:$0xff]  ;;  %v6811_v42 = vld [vmem:[%s13275_s9 + $0x6a0] sm:$0xff] }
 0x5e7   : > { %7143 = vmatpush1.msra.mxu1 %v6685_v19  ;;  %7285 = vmatpush1.msra.mxu0 %v6687_v22  ;;  %v6813_v19 = vld [vmem:[%s13275_s9 + $0x6b0] sm:$0xff] }
 0x5e8   : > { %7144 = vmatprep.subr.mxu1 %v6679_v6  ;;  %7286 = vmatprep.subr.mxu0 %v6681_v31  ;;  %v6805_v22 = vld [vmem:[%s13275_s9 + $0x670] sm:$0xff]  ;;  %v6807_v6 = vld [vmem:[%s13275_s9 + $0x680] sm:$0xff]  ;;  %v6804_v31 = vld [vmem:[%s13275_s9 + $0x668] sm:$0xff] }
 0x5e9   : > { %7145 = vmatpush1.msra.mxu1 %v6678_v11  ;;  %7287 = vmatpush1.msra.mxu0 %v6680_v32  ;;  %v6806_v11 = vld [vmem:[%s13275_s9 + $0x678] sm:$0xff] }
 0x5ea   : > { %7146 = vmatprep.subr.mxu1 %v6672_v36  ;;  %7288 = vmatprep.subr.mxu0 %v6674_v35  ;;  %v6798_v32 = vld [vmem:[%s13275_s9 + $0x638] sm:$0xff]  ;;  %v6800_v36 = vld [vmem:[%s13275_s9 + $0x648] sm:$0xff]  ;;  %v6797_v35 = vld [vmem:[%s13275_s9 + $0x630] sm:$0xff] }
 0x5eb   : > { %7147 = vmatpush1.msra.mxu1 %v6671_v13  ;;  %7289 = vmatpush1.msra.mxu0 %v6673_v10  ;;  %v6799_v13 = vld [vmem:[%s13275_s9 + $0x640] sm:$0xff] }
 0x5ec   : > { %7148 = vmatprep.subr.mxu1 %v6665_v38  ;;  %7290 = vmatprep.subr.mxu0 %v6667_v25  ;;  %v6791_v10 = vld [vmem:[%s13275_s9 + $0x600] sm:$0xff]  ;;  %v6793_v38 = vld [vmem:[%s13275_s9 + $0x610] sm:$0xff]  ;;  %v6790_v25 = vld [vmem:[%s13275_s9 + $0x5f8] sm:$0xff] }
 0x5ed   : > { %7149 = vmatpush1.msra.mxu1 %v6664_v52  ;;  %7291 = vmatpush1.msra.mxu0 %v6666_v60  ;;  %v6792_v52 = vld [vmem:[%s13275_s9 + $0x608] sm:$0xff] }
 0x5ee   : > { %7150 = vmatprep.subr.mxu1 %v6658_v15  ;;  %7292 = vmatprep.subr.mxu0 %v6660_v49  ;;  %v6784_v60 = vld [vmem:[%s13275_s9 + $0x5c8] sm:$0xff]  ;;  %v6786_v15 = vld [vmem:[%s13275_s9 + $0x5d8] sm:$0xff]  ;;  %v6783_v49 = vld [vmem:[%s13275_s9 + $0x5c0] sm:$0xff] }
 0x5ef   : > { %7151 = vmatpush1.msra.mxu1 %v6657_v59  ;;  %7293 = vmatpush1.msra.mxu0 %v6659_v46  ;;  %v6785_v59 = vld [vmem:[%s13275_s9 + $0x5d0] sm:$0xff] }
 0x5f0   : > { %7152 = vmatprep.subr.mxu1 %v6651_v24  ;;  %7294 = vmatprep.subr.mxu0 %v6653_v47  ;;  %v6777_v46 = vld [vmem:[%s13275_s9 + $0x590] sm:$0xff]  ;;  %v6779_v24 = vld [vmem:[%s13275_s9 + $0x5a0] sm:$0xff]  ;;  %v6776_v47 = vld [vmem:[%s13275_s9 + $0x588] sm:$0xff] }
 0x5f1   : > { %7153 = vmatpush1.msra.mxu1 %v6650_v56  ;;  %7295 = vmatpush1.msra.mxu0 %v6652_v21  ;;  %v6778_v56 = vld [vmem:[%s13275_s9 + $0x598] sm:$0xff] }
 0x5f2   : > { %7154 = vmatprep.subr.mxu1 %v6644_v63  ;;  %7296 = vmatprep.subr.mxu0 %v6646_v20  ;;  %v6770_v21 = vld [vmem:[%s13275_s9 + $0x558] sm:$0xff]  ;;  %v6772_v63 = vld [vmem:[%s13275_s9 + $0x568] sm:$0xff]  ;;  %v6769_v20 = vld [vmem:[%s13275_s9 + $0x550] sm:$0xff] }
 0x5f3   : > { %7155 = vmatpush1.msra.mxu1 %v6643_v37  ;;  %7297 = vmatpush1.msra.mxu0 %v6645_v50  ;;  %v6771_v37 = vld [vmem:[%s13275_s9 + $0x560] sm:$0xff] }
 0x5f4   : > { %7156 = vmatprep.subr.mxu1 %v6637_v57  ;;  %7298 = vmatprep.subr.mxu0 %v6639_v44  ;;  %v6763_v50 = vld [vmem:[%s13275_s9 + $0x520] sm:$0xff]  ;;  %v6765_v57 = vld [vmem:[%s13275_s9 + $0x530] sm:$0xff]  ;;  %v6762_v44 = vld [vmem:[%s13275_s9 + $0x518] sm:$0xff] }
 0x5f5   : > { %7157 = vmatpush1.msra.mxu1 %v6636_v0  ;;  %7299 = vmatpush1.msra.mxu0 %v6638_v4  ;;  %v6756_v0 = vld [vmem:[%s13275_s9 + $0x4e8] sm:$0xff] }
 0x5f6   : > { %7158 = vmatprep.subr.mxu1 %v6630_v41  ;;  %7300 = vmatprep.subr.mxu0 %v6632_v12  ;;  %v6764_v4 = vld [vmem:[%s13275_s9 + $0x528] sm:$0xff]  ;;  %v6755_v41 = vld [vmem:[%s13275_s9 + $0x4e0] sm:$0xff]  ;;  %v6758_v12 = vld [vmem:[%s13275_s9 + $0x4f8] sm:$0xff] }
 0x5f7   : > { %7159 = vmatpush1.msra.mxu1 %v6629_v43  ;;  %7301 = vmatpush1.msra.mxu0 %v6631_v33  ;;  %v6749_v43 = vld [vmem:[%s13275_s9 + $0x4b0] sm:$0xff] }
 0x5f8   : > { %7160 = vmatprep.subr.mxu1 %v6623_v34  ;;  %7302 = vmatprep.subr.mxu0 %v6625_v62  ;;  %v6757_v33 = vld [vmem:[%s13275_s9 + $0x4f0] sm:$0xff]  ;;  %v6748_v34 = vld [vmem:[%s13275_s9 + $0x4a8] sm:$0xff]  ;;  %v6751_v62 = vld [vmem:[%s13275_s9 + $0x4c0] sm:$0xff] }
 0x5f9   : > { %7161 = vmatpush1.msra.mxu1 %v6622_v1  ;;  %7303 = vmatpush1.msra.mxu0 %v6624_v3  ;;  %v6742_v1 = vld [vmem:[%s13275_s9 + $0x478] sm:$0xff] }
 0x5fa   : > { %7162 = vmatprep.subr.mxu1 %v6616_v8  ;;  %7304 = vmatprep.subr.mxu0 %v6618_v51  ;;  %v6750_v3 = vld [vmem:[%s13275_s9 + $0x4b8] sm:$0xff]  ;;  %v6741_v8 = vld [vmem:[%s13275_s9 + $0x470] sm:$0xff]  ;;  %v6744_v51 = vld [vmem:[%s13275_s9 + $0x488] sm:$0xff] }
 0x5fb   : > { %7163 = vmatpush1.msra.mxu1 %v6615_v48  ;;  %7305 = vmatpush1.msra.mxu0 %v6617_v5  ;;  %v6735_v48 = vld [vmem:[%s13275_s9 + $0x440] sm:$0xff] }
 0x5fc   : > { %7164 = vmatprep.subr.mxu1 %v6609_v61  ;;  %7306 = vmatprep.subr.mxu0 %v6611_v29  ;;  %v6743_v5 = vld [vmem:[%s13275_s9 + $0x480] sm:$0xff]  ;;  %v6734_v61 = vld [vmem:[%s13275_s9 + $0x438] sm:$0xff]  ;;  %v6737_v29 = vld [vmem:[%s13275_s9 + $0x450] sm:$0xff] }
 0x5fd   : > { %7165 = vmatpush1.msra.mxu1 %v6608_v26  ;;  %7307 = vmatpush1.msra.mxu0 %v6610_v45  ;;  %v6728_v26 = vld [vmem:[%s13275_s9 + $0x408] sm:$0xff] }
 0x5fe   : > { %7166 = vmatprep.subr.mxu1 %v6602_v39  ;;  %7308 = vmatprep.subr.mxu0 %v6604_v23  ;;  %v6736_v45 = vld [vmem:[%s13275_s9 + $0x448] sm:$0xff]  ;;  %v6727_v39 = vld [vmem:[%s13275_s9 + $0x400] sm:$0xff]  ;;  %v6730_v23 = vld [vmem:[%s13275_s9 + $0x418] sm:$0xff] }
 0x5ff   : > { %7167 = vmatpush1.msra.mxu1 %v6601_v55  ;;  %7309 = vmatpush1.msra.mxu0 %v6603_v54  ;;  %v6721_v55 = vld [vmem:[%s13275_s9 + $0x3d0] sm:$0xff] }
 0x600   : > { %7168 = vmatprep.subr.mxu1 %v6819_v53  ;;  %7310 = vmatprep.subr.mxu0 %v6821_v30  ;;  %v6729_v54 = vld [vmem:[%s13275_s9 + $0x410] sm:$0xff]  ;;  %v6720_v53 = vld [vmem:[%s13275_s9 + $0x3c8] sm:$0xff]  ;;  %v6723_v30 = vld [vmem:[%s13275_s9 + $0x3e0] sm:$0xff] }
 0x601   : > { %7169 = vmatpush2.msra.mxu1 %v6818_v14  ;;  %7311 = vmatpush2.msra.mxu0 %v6820_v18  ;;  %v6714_v14 = vld [vmem:[%s13275_s9 + $0x398] sm:$0xff] }
 0x602   : > { %7170 = vmatprep.subr.mxu1 %v6812_v7  ;;  %7312 = vmatprep.subr.mxu0 %v6814_v40  ;;  %v6722_v18 = vld [vmem:[%s13275_s9 + $0x3d8] sm:$0xff]  ;;  %v6713_v7 = vld [vmem:[%s13275_s9 + $0x390] sm:$0xff]  ;;  %v6716_v40 = vld [vmem:[%s13275_s9 + $0x3a8] sm:$0xff] }
 0x603   : > { %7171 = vmatpush2.msra.mxu1 %v6811_v42  ;;  %7313 = vmatpush2.msra.mxu0 %v6813_v19  ;;  %v6933_v42 = vld [vmem:[%s13275_s9 + $0xa70] sm:$0xff]  ;;  %v6932_v19 = vld [vmem:[%s13275_s9 + $0xa68] sm:$0xff] }
 0x604   : > { %7172 = vmatprep.subr.mxu1 %v6805_v22  ;;  %7314 = vmatprep.subr.mxu0 %v6807_v6  ;;  %v6715_v22 = vld [vmem:[%s13275_s9 + $0x3a0] sm:$0xff]  ;;  %v6926_v6 = vld [vmem:[%s13275_s9 + $0xa38] sm:$0xff] }
 0x605   : > { %7173 = vmatpush2.msra.mxu1 %v6804_v31  ;;  %7315 = vmatpush2.msra.mxu0 %v6806_v11  ;;  %v6925_v31 = vld [vmem:[%s13275_s9 + $0xa30] sm:$0xff]  ;;  %v6919_v11 = vld [vmem:[%s13275_s9 + $0xa00] sm:$0xff] }
 0x606   : > { %7174 = vmatprep.subr.mxu1 %v6798_v32  ;;  %7316 = vmatprep.subr.mxu0 %v6800_v36  ;;  %v6918_v32 = vld [vmem:[%s13275_s9 + $0x9f8] sm:$0xff] }
 0x607   : > { %7175 = vmatpush2.msra.mxu1 %v6797_v35  ;;  %7317 = vmatpush2.msra.mxu0 %v6799_v13  ;;  %v6934_v36 = vld [vmem:[%s13275_s9 + $0xa78] sm:$0xff]  ;;  %v6912_v35 = vld [vmem:[%s13275_s9 + $0x9c8] sm:$0xff]  ;;  %v6911_v13 = vld [vmem:[%s13275_s9 + $0x9c0] sm:$0xff] }
 0x608   : > { %7176 = vmatprep.subr.mxu1 %v6791_v10  ;;  %7318 = vmatprep.subr.mxu0 %v6793_v38  ;;  %v6927_v10 = vld [vmem:[%s13275_s9 + $0xa40] sm:$0xff]  ;;  %v6905_v38 = vld [vmem:[%s13275_s9 + $0x990] sm:$0xff] }
 0x609   : > { %7177 = vmatpush2.msra.mxu1 %v6790_v25  ;;  %7319 = vmatpush2.msra.mxu0 %v6792_v52  ;;  %v6904_v25 = vld [vmem:[%s13275_s9 + $0x988] sm:$0xff] }
 0x60a   : > { %7178 = vmatprep.subr.mxu1 %v6784_v60  ;;  %7320 = vmatprep.subr.mxu0 %v6786_v15  ;;  %v6920_v52 = vld [vmem:[%s13275_s9 + $0xa08] sm:$0xff]  ;;  %v6898_v60 = vld [vmem:[%s13275_s9 + $0x958] sm:$0xff]  ;;  %v6897_v15 = vld [vmem:[%s13275_s9 + $0x950] sm:$0xff] }
 0x60b   : > { %7179 = vmatpush2.msra.mxu1 %v6783_v49  ;;  %7321 = vmatpush2.msra.mxu0 %v6785_v59  ;;  %v6913_v49 = vld [vmem:[%s13275_s9 + $0x9d0] sm:$0xff]  ;;  %v6891_v59 = vld [vmem:[%s13275_s9 + $0x920] sm:$0xff] }
 0x60c   : > { %7180 = vmatprep.subr.mxu1 %v6777_v46  ;;  %7322 = vmatprep.subr.mxu0 %v6779_v24  ;;  %v6890_v46 = vld [vmem:[%s13275_s9 + $0x918] sm:$0xff] }
 0x60d   : > { %7181 = vmatpush2.msra.mxu1 %v6776_v47  ;;  %7323 = vmatpush2.msra.mxu0 %v6778_v56  ;;  %v6906_v24 = vld [vmem:[%s13275_s9 + $0x998] sm:$0xff]  ;;  %v6884_v47 = vld [vmem:[%s13275_s9 + $0x8e8] sm:$0xff]  ;;  %v6883_v56 = vld [vmem:[%s13275_s9 + $0x8e0] sm:$0xff] }
 0x60e   : > { %7182 = vmatprep.subr.mxu1 %v6770_v21  ;;  %7324 = vmatprep.subr.mxu0 %v6772_v63  ;;  %v6899_v21 = vld [vmem:[%s13275_s9 + $0x960] sm:$0xff]  ;;  %v6877_v63 = vld [vmem:[%s13275_s9 + $0x8b0] sm:$0xff] }
 0x60f   : > { %7183 = vmatpush2.msra.mxu1 %v6769_v20  ;;  %7325 = vmatpush2.msra.mxu0 %v6771_v37  ;;  %v6876_v20 = vld [vmem:[%s13275_s9 + $0x8a8] sm:$0xff] }
 0x610   : > { %7184 = vmatprep.subr.mxu1 %v6763_v50  ;;  %7326 = vmatprep.subr.mxu0 %v6765_v57  ;;  %v6892_v37 = vld [vmem:[%s13275_s9 + $0x928] sm:$0xff]  ;;  %v6870_v50 = vld [vmem:[%s13275_s9 + $0x878] sm:$0xff]  ;;  %v6869_v57 = vld [vmem:[%s13275_s9 + $0x870] sm:$0xff] }
 0x611   : > { %7185 = vmatpush2.msra.mxu1 %v6762_v44  ;;  %7200 = vmatprep.mubr.f32.mxu1 %v12220_v27  ;;  %v6885_v44 = vld [vmem:[%s13275_s9 + $0x8f0] sm:$0xff] }
 0x612   : > { %7186 = vmatprep.subr.mxu1 %v6756_v0  ;;  %7327 = vmatpush2.msra.mxu0 %v6764_v4  ;;  %v6863_v0 = vld [vmem:[%s13275_s9 + $0x840] sm:$0xff]  ;;  %v6862_v4 = vld [vmem:[%s13275_s9 + $0x838] sm:$0xff] }
 0x613   : > { %7187 = vmatpush2.msra.mxu1 %v6755_v41  ;;  %7328 = vmatprep.subr.mxu0 %v6758_v12  ;;  %v6878_v41 = vld [vmem:[%s13275_s9 + $0x8b8] sm:$0xff]  ;;  %v6856_v12 = vld [vmem:[%s13275_s9 + $0x808] sm:$0xff] }
 0x614   : > { %7188 = vmatprep.subr.mxu1 %v6749_v43  ;;  %7329 = vmatpush2.msra.mxu0 %v6757_v33  ;;  %v6855_v43 = vld [vmem:[%s13275_s9 + $0x800] sm:$0xff] }
 0x615   : > { %7189 = vmatpush2.msra.mxu1 %v6748_v34  ;;  %7330 = vmatprep.subr.mxu0 %v6751_v62  ;;  %v6871_v33 = vld [vmem:[%s13275_s9 + $0x880] sm:$0xff]  ;;  %v6849_v34 = vld [vmem:[%s13275_s9 + $0x7d0] sm:$0xff]  ;;  %v6848_v62 = vld [vmem:[%s13275_s9 + $0x7c8] sm:$0xff] }
 0x616   : > { %7190 = vmatprep.subr.mxu1 %v6742_v1  ;;  %7331 = vmatpush2.msra.mxu0 %v6750_v3  ;;  %v6864_v1 = vld [vmem:[%s13275_s9 + $0x848] sm:$0xff]  ;;  %v6842_v3 = vld [vmem:[%s13275_s9 + $0x798] sm:$0xff] }
 0x617   : > { %7191 = vmatpush2.msra.mxu1 %v6741_v8  ;;  %7332 = vmatprep.subr.mxu0 %v6744_v51  ;;  %v6841_v8 = vld [vmem:[%s13275_s9 + $0x790] sm:$0xff] }
 0x618   : > { %7192 = vmatprep.subr.mxu1 %v6735_v48  ;;  %7333 = vmatpush2.msra.mxu0 %v6743_v5  ;;  %v6857_v51 = vld [vmem:[%s13275_s9 + $0x810] sm:$0xff]  ;;  %v6835_v48 = vld [vmem:[%s13275_s9 + $0x760] sm:$0xff]  ;;  %v6834_v5 = vld [vmem:[%s13275_s9 + $0x758] sm:$0xff] }
 0x619   : > { %7193 = vmatpush2.msra.mxu1 %v6734_v61  ;;  %7334 = vmatprep.subr.mxu0 %v6737_v29  ;;  %v6850_v61 = vld [vmem:[%s13275_s9 + $0x7d8] sm:$0xff]  ;;  %v6828_v29 = vld [vmem:[%s13275_s9 + $0x728] sm:$0xff] }
 0x61a   : > { %7194 = vmatprep.subr.mxu1 %v6728_v26  ;;  %7335 = vmatpush2.msra.mxu0 %v6736_v45  ;;  %v6827_v26 = vld [vmem:[%s13275_s9 + $0x720] sm:$0xff] }
 0x61b   : > { %7195 = vmatpush2.msra.mxu1 %v6727_v39  ;;  %7336 = vmatprep.subr.mxu0 %v6730_v23  ;;  %v6843_v45 = vld [vmem:[%s13275_s9 + $0x7a0] sm:$0xff]  ;;  %v6989_v39 = vld [vmem:[%s13275_s9 + $0xc30] sm:$0xff]  ;;  %v6988_v23 = vld [vmem:[%s13275_s9 + $0xc28] sm:$0xff] }
 0x61c   : > { %7196 = vmatprep.subr.mxu1 %v6721_v55  ;;  %7337 = vmatpush2.msra.mxu0 %v6729_v54  ;;  %v6836_v55 = vld [vmem:[%s13275_s9 + $0x768] sm:$0xff]  ;;  %v6982_v54 = vld [vmem:[%s13275_s9 + $0xbf8] sm:$0xff] }
 0x61d   : > { %7197 = vmatpush2.msra.mxu1 %v6720_v53  ;;  %7338 = vmatprep.subr.mxu0 %v6723_v30  ;;  %v6981_v53 = vld [vmem:[%s13275_s9 + $0xbf0] sm:$0xff] }
 0x61e   : > { %7198 = vmatprep.subr.mxu1 %v6714_v14  ;;  %7339 = vmatpush2.msra.mxu0 %v6722_v18  ;;  %v6829_v30 = vld [vmem:[%s13275_s9 + $0x730] sm:$0xff]  ;;  %v6975_v14 = vld [vmem:[%s13275_s9 + $0xbc0] sm:$0xff]  ;;  %v6974_v18 = vld [vmem:[%s13275_s9 + $0xbb8] sm:$0xff] }
 0x61f   : > { %7199 = vmatpush2.msra.mxu1 %v6713_v7  ;;  %7340 = vmatprep.subr.mxu0 %v6716_v40  ;;  %v6968_v7 = vld [vmem:[%s13275_s9 + $0xb88] sm:$0xff]  ;;  %v6990_v40 = vld [vmem:[%s13275_s9 + $0xc38] sm:$0xff] }
 0x620   : > { %7349 = vmatprep.subr.mxu1 %v6933_v42  ;;  %7201 = vmatmul.mubr.f32.vlgmr.msra.gmra.mxu1 %v12217_v28  ;;  %v6967_v42 = vld [vmem:[%s13275_s9 + $0xb80] sm:$0xff] }
 0x621   : > { %7350 = vmatpush1.msra.mxu1 %v6932_v19  ;;  %7341 = vmatpush2.msra.mxu0 %v6715_v22  ;;  %v6961_v19 = vld [vmem:[%s13275_s9 + $0xb50] sm:$0xff]  ;;  %v6983_v22 = vld [vmem:[%s13275_s9 + $0xc00] sm:$0xff] }
 0x622   : > { %7351 = vmatprep.subr.mxu1 %v6926_v6  ;;  %7342 = vmatprep.mubr.f32.mxu0 %v12220_v27  ;;  %v6960_v6 = vld [vmem:[%s13275_s9 + $0xb48] sm:$0xff] }
 0x623   : > { %7352 = vmatpush1.msra.mxu1 %v6925_v31  ;;  %7490 = vmatprep.subr.mxu0 %v9319_v2  ;;  %v6954_v31 = vld [vmem:[%s13275_s9 + $0xb18] sm:$0xff] }
 0x624   : > { %7353 = vmatprep.subr.mxu1 %v6919_v11  ;;  %7343 = vmatmul.mubr.f32.vlgmr.msra.gmra.mxu0 %v12217_v28  ;;  %v6976_v11 = vld [vmem:[%s13275_s9 + $0xbc8] sm:$0xff] }
 0x625   : > { %7354 = vmatpush1.msra.mxu1 %v6918_v32  ;;  %7491 = vmatpush1.msra.mxu0 %v6934_v36  ;;  %v6953_v32 = vld [vmem:[%s13275_s9 + $0xb10] sm:$0xff]  ;;  %v6947_v36 = vld [vmem:[%s13275_s9 + $0xae0] sm:$0xff] }
 0x626   : > { %7355 = vmatprep.subr.mxu1 %v6912_v35  ;;  %7492 = vmatprep.subr.mxu0 %v9319_v2  ;;  %v6969_v35 = vld [vmem:[%s13275_s9 + $0xb90] sm:$0xff] }
 0x627   : > { %7356 = vmatpush1.msra.mxu1 %v6911_v13  ;;  %7493 = vmatpush1.msra.mxu0 %v6927_v10  ;;  %v6946_v13 = vld [vmem:[%s13275_s9 + $0xad8] sm:$0xff]  ;;  %v6940_v10 = vld [vmem:[%s13275_s9 + $0xaa8] sm:$0xff] }
 0x628   : > { %7357 = vmatprep.subr.mxu1 %v6905_v38  ;;  %7494 = vmatprep.subr.mxu0 %v9319_v2  ;;  %v6962_v38 = vld [vmem:[%s13275_s9 + $0xb58] sm:$0xff] }
 0x629   : > { %7358 = vmatpush1.msra.mxu1 %v6904_v25  ;;  %7495 = vmatpush1.msra.mxu0 %v6920_v52  ;;  %v6939_v25 = vld [vmem:[%s13275_s9 + $0xaa0] sm:$0xff]  ;;  %v6822_v52 = vld [vmem:[%s13275_s9 + $0x6f8] sm:$0xff] }
 0x62a   : > { %7359 = vmatprep.subr.mxu1 %v6898_v60  ;;  %7496 = vmatprep.subr.mxu0 %v9319_v2  ;;  %v6710_v60 = vld [vmem:[%s13275_s9 + $0x378] sm:$0xff] }
 0x62b   : > { %7360 = vmatpush1.msra.mxu1 %v6897_v15  ;;  %7497 = vmatpush1.msra.mxu0 %v6913_v49  ;;  %v6815_v15 = vld [vmem:[%s13275_s9 + $0x6c0] sm:$0xff] }
 0x62c   : > { %7361 = vmatprep.subr.mxu1 %v6891_v59  ;;  %7498 = vmatprep.subr.mxu0 %v9319_v2  ;;  %v6955_v49 = vld [vmem:[%s13275_s9 + $0xb20] sm:$0xff] }
 0x62d   : > { %7362 = vmatpush1.msra.mxu1 %v6890_v46  ;;  %7499 = vmatpush1.msra.mxu0 %v6906_v24  ;;  %v6703_v59 = vld [vmem:[%s13275_s9 + $0x340] sm:$0xff]  ;;  %v6808_v46 = vld [vmem:[%s13275_s9 + $0x688] sm:$0xff] }
 0x62e   : > { %7363 = vmatprep.subr.mxu1 %v6884_v47  ;;  %7500 = vmatprep.subr.mxu0 %v9319_v2  ;;  %v6948_v24 = vld [vmem:[%s13275_s9 + $0xae8] sm:$0xff] }
 0x62f   : > { %7364 = vmatpush1.msra.mxu1 %v6883_v56  ;;  %7501 = vmatpush1.msra.mxu0 %v6899_v21  ;;  %v6696_v47 = vld [vmem:[%s13275_s9 + $0x308] sm:$0xff]  ;;  %v6801_v56 = vld [vmem:[%s13275_s9 + $0x650] sm:$0xff] }
 0x630   : > { %7365 = vmatprep.subr.mxu1 %v6877_v63  ;;  %7502 = vmatprep.subr.mxu0 %v9319_v2  ;;  %v6689_v21 = vld [vmem:[%s13275_s9 + $0x2d0] sm:$0xff]  ;;  %v6794_v63 = vld [vmem:[%s13275_s9 + $0x618] sm:$0xff] }
 0x631   : > { %7366 = vmatpush1.msra.mxu1 %v6876_v20  ;;  %7503 = vmatpush1.msra.mxu0 %v6892_v37  ;;  %v6682_v20 = vld [vmem:[%s13275_s9 + $0x298] sm:$0xff]  ;;  %v6787_v37 = vld [vmem:[%s13275_s9 + $0x5e0] sm:$0xff] }
 0x632   : > { %7367 = vmatprep.subr.mxu1 %v6870_v50  ;;  %7504 = vmatprep.subr.mxu0 %v9319_v2  ;;  %v6675_v50 = vld [vmem:[%s13275_s9 + $0x260] sm:$0xff] }
 0x633   : > { %7368 = vmatpush1.msra.mxu1 %v6869_v57  ;;  %7505 = vmatpush1.msra.mxu0 %v6885_v44  ;;  %v6780_v57 = vld [vmem:[%s13275_s9 + $0x5a8] sm:$0xff] }
 0x634   : > { %7369 = vmatprep.subr.mxu1 %v6863_v0  ;;  %7506 = vmatprep.subr.mxu0 %v9319_v2  ;;  %v6668_v44 = vld [vmem:[%s13275_s9 + $0x228] sm:$0xff]  ;;  %v6766_v0 = vld [vmem:[%s13275_s9 + $0x538] sm:$0xff] }
 0x635   : > { %7370 = vmatpush1.msra.mxu1 %v6862_v4  ;;  %7507 = vmatpush1.msra.mxu0 %v6878_v41  ;;  %v6654_v4 = vld [vmem:[%s13275_s9 + $0x1b8] sm:$0xff]  ;;  %v6759_v41 = vld [vmem:[%s13275_s9 + $0x500] sm:$0xff] }
 0x636   : > { %7371 = vmatprep.subr.mxu1 %v6856_v12  ;;  %7508 = vmatprep.subr.mxu0 %v9319_v2  ;;  %v6647_v12 = vld [vmem:[%s13275_s9 + $0x180] sm:$0xff] }
 0x637   : > { %7372 = vmatpush1.msra.mxu1 %v6855_v43  ;;  %7509 = vmatpush1.msra.mxu0 %v6871_v33  ;;  %v6752_v43 = vld [vmem:[%s13275_s9 + $0x4c8] sm:$0xff] }
 0x638   : > { %7373 = vmatprep.subr.mxu1 %v6849_v34  ;;  %7510 = vmatprep.subr.mxu0 %v9319_v2  ;;  %v6640_v33 = vld [vmem:[%s13275_s9 + $0x148] sm:$0xff]  ;;  %v6745_v34 = vld [vmem:[%s13275_s9 + $0x490] sm:$0xff] }
 0x639   : > { %7374 = vmatpush1.msra.mxu1 %v6848_v62  ;;  %7511 = vmatpush1.msra.mxu0 %v6864_v1  ;;  %v6633_v62 = vld [vmem:[%s13275_s9 + $0x110] sm:$0xff]  ;;  %v6738_v1 = vld [vmem:[%s13275_s9 + $0x458] sm:$0xff] }
 0x63a   : > { %7375 = vmatprep.subr.mxu1 %v6842_v3  ;;  %7512 = vmatprep.subr.mxu0 %v9319_v2  ;;  %v6626_v3 = vld [vmem:[%s13275_s9 + $0xd8] sm:$0xff] }
 0x63b   : > { %7376 = vmatpush1.msra.mxu1 %v6841_v8  ;;  %7513 = vmatpush1.msra.mxu0 %v6857_v51  ;;  %v6731_v8 = vld [vmem:[%s13275_s9 + $0x420] sm:$0xff] }
 0x63c   : > { %7377 = vmatprep.subr.mxu1 %v6835_v48  ;;  %7514 = vmatprep.subr.mxu0 %v9319_v2  ;;  %v6619_v51 = vld [vmem:[%s13275_s9 + $0xa0] sm:$0xff]  ;;  %v6724_v48 = vld [vmem:[%s13275_s9 + $0x3e8] sm:$0xff] }
 0x63d   : > { %7378 = vmatpush1.msra.mxu1 %v6834_v5  ;;  %7515 = vmatpush1.msra.mxu0 %v6850_v61  ;;  %v6612_v5 = vld [vmem:[%s13275_s9 + $0x68] sm:$0xff]  ;;  %v6717_v61 = vld [vmem:[%s13275_s9 + $0x3b0] sm:$0xff] }
 0x63e   : > { %7379 = vmatprep.subr.mxu1 %v6828_v29  ;;  %7516 = vmatprep.subr.mxu0 %v9319_v2  ;;  %v6605_v29 = vld [vmem:[%s13275_s9 + $0x30] sm:$0xff] }
 0x63f   : > { %7380 = vmatpush1.msra.mxu1 %v6827_v26  ;;  %7517 = vmatpush1.msra.mxu0 %v6843_v45  ;;  %v7683_v26 = vld [vmem:[%s13277_s11 + $0x78] sm:$0xff]  ;;  %v7682_v45 = vld [vmem:[%s13277_s11 + $0x70] sm:$0xff] }
 0x640   : > { %7397 = vmatprep.subr.mxu1 %v6989_v39  ;;  %7518 = vmatprep.subr.mxu0 %v9319_v2  ;;  %v7680_v39 = vld [vmem:[%s13277_s11 + $0x60] sm:$0xff] }
 0x641   : > { %7398 = vmatpush2.msra.mxu1 %v6988_v23  ;;  %7519 = vmatpush1.msra.mxu0 %v6836_v55  ;;  %v7679_v23 = vld [vmem:[%s13277_s11 + $0x58] sm:$0xff]  ;;  %v7678_v55 = vld [vmem:[%s13277_s11 + $0x50] sm:$0xff] }
 0x642   : > { %7399 = vmatprep.subr.mxu1 %v6982_v54  ;;  %7520 = vmatprep.subr.mxu0 %v9319_v2  ;;  %v7677_v54 = vld [vmem:[%s13277_s11 + $0x48] sm:$0xff] }
 0x643   : > { %7400 = vmatpush2.msra.mxu1 %v6981_v53  ;;  %7521 = vmatpush1.msra.mxu0 %v6829_v30  ;;  %v7676_v53 = vld [vmem:[%s13277_s11 + $0x40] sm:$0xff]  ;;  %v7675_v30 = vld [vmem:[%s13277_s11 + $0x38] sm:$0xff] }
 0x644   : > { %7401 = vmatprep.subr.mxu1 %v6975_v14  ;;  %7909 = vmatprep.mubr.msk.f32.mxu1 %vm3926_vm9, %v12304_v17  ;;  %v7674_v14 = vld [vmem:[%s13277_s11 + $0x30] sm:$0xff] }
 0x645   : > { %7402 = vmatpush2.msra.mxu1 %v6974_v18  ;;  %7538 = vmatprep.subr.mxu0 %v9319_v2  ;;  %v7673_v18 = vld [vmem:[%s13277_s11 + $0x28] sm:$0xff] }
 0x646   : > { %7403 = vmatprep.subr.mxu1 %v6968_v7  ;;  %7539 = vmatpush2.msra.mxu0 %v6990_v40  ;;  %v7672_v7 = vld [vmem:[%s13277_s11 + $0x20] sm:$0xff]  ;;  %v7671_v40 = vld [vmem:[%s13277_s11 + $0x18] sm:$0xff] }
 0x647   : > { %7404 = vmatpush2.msra.mxu1 %v6967_v42  ;;  %7540 = vmatprep.subr.mxu0 %v9319_v2  ;;  %v7670_v42 = vld [vmem:[%s13277_s11 + $0x10] sm:$0xff] }
 0x648   : > { %7405 = vmatprep.subr.mxu1 %v6961_v19  ;;  %7541 = vmatpush2.msra.mxu0 %v6983_v22  ;;  %v7669_v19 = vld [vmem:[%s13277_s11 + $0x8] sm:$0xff]  ;;  %v7668_v22 = vld [vmem:[%s13277_s11] sm:$0xff] }
 0x649   : > { %7406 = vmatpush2.msra.mxu1 %v6960_v6  ;;  %7542 = vmatprep.subr.mxu0 %v9319_v2 }
 0x64a   : > { %7407 = vmatprep.subr.mxu1 %v6954_v31  ;;  %7543 = vmatpush2.msra.mxu0 %v6976_v11  ;;  %v13179_v31 = vmul.u32 128, %v10260_v9 }
 0x64b   : > { %7408 = vmatpush2.msra.mxu1 %v6953_v32  ;;  %7544 = vmatprep.subr.mxu0 %v9319_v2  ;;  %v7560_v32 = vadd.s32 128, %v10269_v16 }
 0x64c   : > { %7409 = vmatprep.subr.mxu1 %v6947_v36  ;;  %7545 = vmatpush2.msra.mxu0 %v6969_v35  ;;  %v13183_v35 = vadd.s32 128, %v13179_v31  ;;  %vm7567_vm8 = vcmp.ge.s32.totalorder %v10269_v16, %v13179_v31 }
 0x64d   : > { %7410 = vmatpush2.msra.mxu1 %v6946_v13  ;;  %7546 = vmatprep.subr.mxu0 %v9319_v2  ;;  %v7060_v6 = vpop.f32.mrf.mxu0  ;;  %vm7568_vm0 = vcmp.ge.s32.totalorder %v7560_v32, %v13179_v31 }
 0x64e   : > { %7411 = vmatprep.subr.mxu1 %v6940_v10  ;;  %7547 = vmatpush2.msra.mxu0 %v6962_v38  ;;  %v7561_v10 = vadd.s32 256, %v10269_v16  ;;  %vm7576_vm7 = vcmp.lt.s32.totalorder %v7560_v32, %v13183_v35 }
 0x64f   : > { %7412 = vmatpush2.msra.mxu1 %v6939_v25  ;;  %7548 = vmatprep.subr.mxu0 %v9319_v2  ;;  %v7062_v11 = vpop.f32.mrf.mxu0  ;;  %v7562_v25 = vadd.s32 384, %v10269_v16  ;;  %vm7583_vm12 = vmand %vm7568_vm0, %vm7576_vm7 }
 0x650   : > { %7414 = vmatmul.mubr.f32.vlgmr.msra.gmra.mxu1 %v12388_v58  ;;  %8257 = vmatprep.subr.mxu1 %v6822_v52  ;;  %vm7569_vm10 = vcmp.ge.s32.totalorder %v7561_v10, %v13179_v31 }
 0x651   : > { %8258 = vmatpush3.msra.mxu1 %v6710_v60  ;;  %7484 = vmatprep.mubr.f32.mxu1 %v12220_v27  ;;  %v6941_v27 = vld [vmem:[%s13275_s9 + $0xab0] sm:$0xff]  ;;  %vm7570_vm15 = vcmp.ge.s32.totalorder %v7562_v25, %v13179_v31  ;;  %vm7578_vm2 = vcmp.lt.s32.totalorder %v7562_v25, %v13183_v35 }
 0x652   : > { %8259 = vmatprep.subr.mxu1 %v6815_v15  ;;  %7549 = vmatpush2.msra.mxu0 %v6955_v49  ;;  %v7563_v15 = vadd.s32 512, %v10269_v16  ;;  %vm7585_vm5 = vmand %vm7570_vm15, %vm7578_vm2 }
 0x653   : > { %8260 = vmatpush3.msra.mxu1 %v6703_v59  ;;  %7550 = vmatprep.subr.mxu0 %v9319_v2 }
 0x654   : > { %8261 = vmatprep.subr.mxu1 %v6808_v46  ;;  %7551 = vmatpush2.msra.mxu0 %v6948_v24  ;;  %v7912_v46 = vsel %vm7583_vm12, 1.0, %v9319_v2  ;;  %vm7571_vm3 = vcmp.ge.s32.totalorder %v7563_v15, %v13179_v31  ;;  %vm7579_vm4 = vcmp.lt.s32.totalorder %v7563_v15, %v13183_v35 }
 0x655   : > { %8262 = vmatpush3.msra.mxu1 %v6696_v47  ;;  %7552 = vmatprep.subr.mxu0 %v9319_v2  ;;  %vm7586_vm6 = vmand %vm7571_vm3, %vm7579_vm4 }
 0x656   : > { %8263 = vmatprep.subr.mxu1 %v6801_v56  ;;  %7553 = vmatpush2.msra.mxu0 %v6941_v27 }
 0x657   : > { %8264 = vmatpush3.msra.mxu1 %v6689_v21  ;;  %7910 = vmatprep.mubr.msk.f32.mxu0 %vm3926_vm9, %v12304_v17  ;;  %v6773_v17 = vld [vmem:[%s13275_s9 + $0x570] sm:$0xff]  ;;  %vm7575_vm9 = vcmp.lt.s32.totalorder %v10269_v16, %v13183_v35 }
 0x658   : > { %8265 = vmatprep.subr.mxu1 %v6794_v63  ;;  %7555 = vmatmul.mubr.f32.vlgmr.msra.gmra.mxu0 %v12388_v58  ;;  %v6661_v58 = vld [vmem:[%s13275_s9 + $0x1f0] sm:$0xff]  ;;  %vm7582_vm13 = vmand %vm7567_vm8, %vm7575_vm9  ;;  %v7564_v63 = vadd.s32 640, %v10269_v16 }
 0x659   : > { %8266 = vmatpush3.msra.mxu1 %v6682_v20  ;;  %v7911_v47 = vsel %vm7582_vm13, 1.0, %v9319_v2 }
 0x65a   : > { %8267 = vmatprep.subr.mxu1 %v6787_v37  ;;  %vm7572_vm0 = vcmp.ge.s32.totalorder %v7564_v63, %v13179_v31  ;;  %vm7580_vm7 = vcmp.lt.s32.totalorder %v7564_v63, %v13183_v35 }
 0x65b   : > { %8268 = vmatpush3.msra.mxu1 %v6675_v50  ;;  %vm7587_vm8 = vmand %vm7572_vm0, %vm7580_vm7 }
 0x65c   : > { %8269 = vmatprep.subr.mxu1 %v6780_v57 }
 0x65d   : > { %8270 = vmatpush3.msra.mxu1 %v6668_v44 }
 0x65e   : > { %8271 = vmatprep.subr.mxu1 %v6773_v17 }
 0x65f   : > { %8272 = vmatpush3.msra.mxu1 %v6661_v58 }
 0x660   : > { %8273 = vmatprep.subr.mxu1 %v6766_v0  ;;  %v7914_v0 = vsel %vm7585_vm5, 1.0, %v9319_v2 }
 0x661   : > { %8274 = vmatpush3.msra.mxu1 %v6654_v4 }
 0x662   : > { %8275 = vmatprep.subr.mxu1 %v6759_v41 }
 0x663   : > { %8276 = vmatpush3.msra.mxu1 %v6647_v12 }
 0x664   : > { %8277 = vmatprep.subr.mxu1 %v6752_v43  ;;  %v7915_v43 = vsel %vm7586_vm6, 1.0, %v9319_v2 }
 0x665   : > { %8278 = vmatpush3.msra.mxu1 %v6640_v33 }
 0x666   : > { %8279 = vmatprep.subr.mxu1 %v6745_v34 }
 0x667   : > { %8280 = vmatpush3.msra.mxu1 %v6633_v62 }
 0x668   : > { %8281 = vmatprep.subr.mxu1 %v6738_v1 }
 0x669   : > { %8282 = vmatpush3.msra.mxu1 %v6626_v3 }
 0x66a   : > { %8283 = vmatprep.subr.mxu1 %v6731_v8 }
 0x66b   : > { %8284 = vmatpush3.msra.mxu1 %v6619_v51 }
 0x66c   : > { %8285 = vmatprep.subr.mxu1 %v6724_v48 }
 0x66d   : > { %8286 = vmatpush3.msra.mxu1 %v6612_v5  ;;  %v7916_v5 = vsel %vm7587_vm8, 1.0, %v9319_v2 }
 0x66e   : > { %8287 = vmatprep.subr.mxu1 %v6717_v61 }
 0x66f   : > { %8288 = vmatpush3.msra.mxu1 %v6605_v29 }
 0x670   : > { %7485 = vmatmul.mubr.f32.vlgmr.msra.gmra.mxu1 %v12217_v28  ;;  %8970 = vmatprep.subr.mxu1 %v9319_v2  ;;  %v7681_v28 = vld [vmem:[%s13277_s11 + $0x68] sm:$0xff] }
 0x671   : > { %9002 = vmatprep.mubr.msk.f32.mxu1 %vm9323_vm11, %v9319_v2  ;;  %8971 = vmatpush3.msra.mxu1 %v7683_v26  ;;  %vm7577_vm11 = vcmp.lt.s32.totalorder %v7561_v10, %v13183_v35 }
 0x672   : > { %8972 = vmatprep.subr.mxu1 %v9319_v2  ;;  %vm7584_vm14 = vmand %vm7569_vm10, %vm7577_vm11 }
 0x673   : > { %8973 = vmatpush3.msra.mxu1 %v7682_v45  ;;  %v7913_v27 = vsel %vm7584_vm14, 1.0, %v9319_v2 }
 0x674   : > { %8974 = vmatprep.subr.mxu1 %v9319_v2 }
 0x675   : > { %8975 = vmatpush3.msra.mxu1 %v7681_v28 }
 0x676   : > { %8976 = vmatprep.subr.mxu1 %v9319_v2 }
 0x677   : > { %8977 = vmatpush3.msra.mxu1 %v7680_v39 }
 0x678   : > { %8978 = vmatprep.subr.mxu1 %v9319_v2 }
 0x679   : > { %8979 = vmatpush3.msra.mxu1 %v7679_v23 }
 0x67a   : > { %8980 = vmatprep.subr.mxu1 %v9319_v2 }
 0x67b   : > { %8981 = vmatpush3.msra.mxu1 %v7678_v55 }
 0x67c   : > { %8982 = vmatprep.subr.mxu1 %v9319_v2 }
 0x67d   : > { %8983 = vmatpush3.msra.mxu1 %v7677_v54 }
 0x67e   : > { %8984 = vmatprep.subr.mxu1 %v9319_v2 }
 0x67f   : > { %8985 = vmatpush3.msra.mxu1 %v7676_v53 }
 0x680   : > { %8986 = vmatprep.subr.mxu1 %v9319_v2 }
 0x681   : > { %8987 = vmatpush3.msra.mxu1 %v7675_v30 }
 0x682   : > { %8988 = vmatprep.subr.mxu1 %v9319_v2 }
 0x683   : > { %8989 = vmatpush3.msra.mxu1 %v7674_v14 }
 0x684   : > { %8990 = vmatprep.subr.mxu1 %v9319_v2 }
 0x685   : > { %8991 = vmatpush3.msra.mxu1 %v7673_v18 }
 0x686   : > { %8992 = vmatprep.subr.mxu1 %v9319_v2 }
 0x687   : > { %8993 = vmatpush3.msra.mxu1 %v7672_v7  ;;  %v7565_v7 = vadd.s32 768, %v10269_v16 }
 0x688   : > { %8994 = vmatprep.subr.mxu1 %v9319_v2 }
 0x689   : > { %8995 = vmatpush3.msra.mxu1 %v7671_v40  ;;  %vm7573_vm9 = vcmp.ge.s32.totalorder %v7565_v7, %v13179_v31  ;;  %vm7581_vm10 = vcmp.lt.s32.totalorder %v7565_v7, %v13183_v35 }
 0x68a   : > { %8996 = vmatprep.subr.mxu1 %v9319_v2  ;;  %vm7588_vm11 = vmand %vm7573_vm9, %vm7581_vm10 }
 0x68b   : > { %8997 = vmatpush3.msra.mxu1 %v7670_v42 }
 0x68c   : > { %8998 = vmatprep.subr.mxu1 %v9319_v2 }
 0x68d   : > { %8999 = vmatpush3.msra.mxu1 %v7669_v19 }
 0x68e   : > { %9000 = vmatprep.subr.mxu1 %v9319_v2 }
 0x68f   : > { %9001 = vmatpush3.msra.mxu1 %v7668_v22 }
 0x6a0   : > { %v7273_v36 = vpop.f32.mrf.mxu0  ;;  %v7131_v13 = vpop.f32.mrf.mxu1 }
 0x6a1   : > { %v7132_v59 = vadd.f32 %v7131_v13, %v7060_v6 }
 0x6a2   : > { %v7275_v38 = vpop.f32.mrf.mxu0  ;;  %v7133_v9 = vpop.f32.mrf.mxu1 }
 0x6a3   : > { %v7134_v49 = vadd.f32 %v7133_v9, %v7062_v11  ;;  %v7603_v50 = vmul.f32 %v7911_v47, %v7132_v59  ;;  %v7917_v59 = vsel %vm7588_vm11, 1.0, %v9319_v2 }
 0x6a5   : > { %v7604_v37 = vmul.f32 %v7912_v46, %v7134_v49  ;;  %v7610_v12 = vsel %vm2060_vm1, %v7603_v50, 0.0 }
 0x6a6   : > { %v7611_v3 = vrot.slane %v7610_v12, 4 }
 0x6a7   : > { %v7617_v4 = vsel %vm2060_vm1, %v7604_v37, 0.0 }
 0x6a8   : > { %v7618_v1 = vrot.slane %v7617_v4, 4  ;;  %v7612_v26 = vadd.f32 %v7611_v3, %v7610_v12 }
 0x6aa   : > { %v7619_v29 = vadd.f32 %v7618_v1, %v7617_v4  ;;  %v7613_v53 = vrot.slane %v7612_v26, 2 }
 0x6ac   : > { %v7620_v55 = vrot.slane %v7619_v29, 2  ;;  %v7614_v22 = vadd.f32 %v7613_v53, %v7612_v26 }
 0x6ae   : > { %v7621_v40 = vadd.f32 %v7620_v55, %v7619_v29 }
 0x6b0   : > { %v7622_v32 = vrot.slane %v7621_v40, 1 }
 0x6e0   : > { %v7202_v60 = vpop.f32.mrf.mxu1 }
 0x6e1   : > { %v7274_v56 = vadd.f32 %v7273_v36, %v7202_v60  ;;  %v7623_v60 = vadd.f32 %v7622_v32, %v7621_v40 }
 0x6e2   : > { %v7204_v21 = vpop.f32.mrf.mxu1 }
 0x6e3   : > { %v7605_v17 = vmul.f32 %v7913_v27, %v7274_v56  ;;  %v7276_v58 = vadd.f32 %v7275_v38, %v7204_v21  ;;  %v7615_v38 = vrot.slane %v7614_v22, 1 }
 0x6e4   : > { %v7344_v52 = vpop.f32.mrf.mxu0 }
 0x6e5   : > { %v7624_v34 = vsel %vm2060_vm1, %v7605_v17, 0.0  ;;  %v7606_v62 = vmul.f32 %v7914_v0, %v7276_v58 }
 0x6e6   : > { %v7346_v24 = vpop.f32.mrf.mxu0  ;;  %v7625_v48 = vrot.slane %v7624_v34, 4 }
 0x6e7   : > { %v7631_v61 = vsel %vm2060_vm1, %v7606_v62, 0.0 }
 0x6e8   : > { %v7626_v39 = vadd.f32 %v7625_v48, %v7624_v34  ;;  %v7632_v23 = vrot.slane %v7631_v61, 4  ;;  %v7665_v34 = vld [vmem:[%s13276_s10] sm:$0x1] }
 0x6ea   : > { %v7627_v14 = vrot.slane %v7626_v39, 2  ;;  %v7633_v18 = vadd.f32 %v7632_v23, %v7631_v61 }
 0x6ec   : > { %v7628_v6 = vadd.f32 %v7627_v14, %v7626_v39  ;;  %v7634_v11 = vrot.slane %v7633_v18, 2 }
 0x6ee   : > { %v7629_v9 = vrot.slane %v7628_v6, 1  ;;  %v7635_v25 = vadd.f32 %v7634_v11, %v7633_v18 }
 0x6f0   : > { %v7630_v31 = vadd.f32 %v7629_v9, %v7628_v6  ;;  %v7636_v47 = vrot.slane %v7635_v25, 1 }
 0x6f2   : > { %v7637_v50 = vadd.f32 %v7636_v47, %v7635_v25 }
 0x710   : > { %v7415_v57 = vpop.f32.mrf.mxu1 }
 0x711   : > { %v7416_v41 = vadd.f32 %v7415_v57, %v7344_v52 }
 0x712   : > { %v7417_v33 = vpop.f32.mrf.mxu1 }
 0x713   : > { %v7607_v8 = vmul.f32 %v7915_v43, %v7416_v41  ;;  %v7418_v51 = vadd.f32 %v7417_v33, %v7346_v24  ;;  %v7616_v24 = vadd.f32 %v7615_v38, %v7614_v22 }
 0x715   : > { %v7638_v45 = vsel %vm2060_vm1, %v7607_v8, 0.0  ;;  %v7608_v28 = vmul.f32 %v7916_v5, %v7418_v51  ;;  %v7659_v56 = vadd.f32 %v7623_v60, %v7616_v24  ;;  %v7684_v8 = vld [vmem:[%s13278_s12] sm:$0x1] }
 0x716   : > { %v7639_v54 = vrot.slane %v7638_v45, 4 }
 0x717   : > { %v7645_v30 = vsel %vm2060_vm1, %v7608_v28, 0.0  ;;  %v7660_v37 = vadd.f32 %v7659_v56, %v7630_v31 }
 0x718   : > { %v7556_v20 = vpop.f32.mrf.mxu0  ;;  %v7640_v42 = vadd.f32 %v7639_v54, %v7638_v45  ;;  %v7646_v19 = vrot.slane %v7645_v30, 4 }
 0x719   : > { %v7661_v0 = vadd.f32 %v7660_v37, %v7637_v50 }
 0x71a   : > { %v7558_v44 = vpop.f32.mrf.mxu0  ;;  %v7641_v36 = vrot.slane %v7640_v42, 2  ;;  %v7647_v13 = vadd.f32 %v7646_v19, %v7645_v30 }
 0x71c   : > { %v7642_v15 = vadd.f32 %v7641_v36, %v7640_v42  ;;  %v7648_v49 = vrot.slane %v7647_v13, 2 }
 0x71e   : > { %v7643_v27 = vrot.slane %v7642_v15, 1  ;;  %v7649_v21 = vadd.f32 %v7648_v49, %v7647_v13 }
 0x720   : > { %v7644_v44 = vadd.f32 %v7643_v27, %v7642_v15  ;;  %v7650_v17 = vrot.slane %v7649_v21, 1 }
 0x722   : > { %v7651_v4 = vadd.f32 %v7650_v17, %v7649_v21 }
 0x730   : > { %v8289_v10 = vpop.f32.mrf.mxu1 }
 0x732   : > { %v8290_v52 = vpop.f32.mrf.mxu1 }
 0x733   : > { %v8291_v16 = vadd.f32 %v8290_v52, %v8289_v10 }
 0x735   : > { %v7557_v46 = vadd.f32 %v8291_v16, %v7556_v20  ;;  %v7662_v20 = vadd.f32 %v7661_v0, %v7644_v44 }
 0x737   : > { %v7609_v35 = vmul.f32 %v7917_v59, %v7557_v46  ;;  %v7663_v43 = vadd.f32 %v7662_v20, %v7651_v4 }
 0x739   : > { %v7652_v63 = vsel %vm2060_vm1, %v7609_v35, 0.0 }
 0x73a   : > { %v7653_v57 = vrot.slane %v7652_v63, 4 }
 0x73c   : > { %v7654_v58 = vadd.f32 %v7653_v57, %v7652_v63 }
 0x73e   : > { %v7655_v2 = vrot.slane %v7654_v58, 2 }
 0x740   : > { %v7656_v41 = vadd.f32 %v7655_v2, %v7654_v58 }
 0x742   : > { %v7657_v12 = vrot.slane %v7656_v41, 1 }
 0x744   : > { %v7658_v33 = vadd.f32 %v7657_v12, %v7656_v41 }
 0x746   : > { %v7664_v62 = vadd.f32 %v7663_v43, %v7658_v33 }
 0x748   : > { %v7666_v1 = vadd.f32 %v7665_v34, %v7664_v62 }
 0x74a   : > { %v7667_v3 = vmax.f32 %v7666_v1, 0.0 }
 0x74c   : > { %9003 = vmatmul.mubr.f32.vlgmr.msra.gmra.mxu1 %v7667_v3 }
 0x80c   : > { %v7751_v51 = vpop.f32.mrf.mxu1 }
 0x80d   : > { %v7752_v48 = vadd.f32 %v7751_v51, %v7684_v8 }
 0x80e   : > { %v9004_v5 = vpop.f32.mrf.mxu1 }
 0x80f   : > { %7755 = vst [vmem:[%s432_s20] sm:$0x1] %v7752_v48 }
 0x810   : > { %9270 = shalt.err (!%p9267_p3)
}
 0x811   : > { %s9271_s30 = scalar_lea.hbm %s13231_s24, 16  ;;  %s9275_s17 = scalar_lea.hbm %s13279_s13, 32 }
 0x812   : > { %p9272_p4 = scmp.ne.s32.totalorder %s13231_s24, %s9271_s30  ;;  %p9276_p9 = scmp.lt.s32.totalorder %s13231_s24, %s13279_s13 }
 0x813   : > { %p9277_p10 = scmp.lt.s32.totalorder %s9275_s17, %s9271_s30 }
 0x814   : > { %p9273_p7 = pnand %p9272_p4, %p9433_p5 }
 0x815   : > { %p9278_p11 = por %p9277_p10, %p9276_p9 }
 0x816   : > { %p9274_p8 = pneg %p9273_p7 }
 0x818   : > { %p9279_p12 = pnand %p9278_p11, %p9274_p8 }
 0x81a   : > { %9282 = shalt.err (!%p9279_p12)
}
 0x81b   : > { %9006 = dma.vmem_to_hbm [thread:$0]  (%p9433_p5), %s7770_s16, 16, %s13231_s24, %s7757_s15  }
 0x81c PF: > { %p9012_p13 = scmp.ge.s32.totalorder %s9317_s28, 2  ;;  %s7781_s27 = sand.u32 1, %s9305_s25  }
 0x81d   : > { %s7782_s29 = scalar_lea.sflag [#allocation6], %s7781_s27 }
 0x81e   : > { %p9009_p0 = pnand %p9012_p13, %p9437_p6 }
 0x820   : > { %p9010_p1 = pneg %p9009_p0 }
 0x822   : > { %9300 = dma.done.wait (%p9010_p1), %s7782_s29, 16  }
 0x823   : > { %9302 = vsyncadd (%p9010_p1), %s7782_s29, 4294967280  ;;  %s13292_s21 = sld [smem:[#allocation8_spill]]  ;;  %p23_p2 = scmp.ge.s32.totalorder %s9420_s14, 4  }
 0x824   : > { %s13293_s27 = sld [smem:[#allocation9_spill]]  ;;  %s13294_s25 = smov %s9309_s26 }
 0x825   : > { %s13296_s28 = smov %s9420_s14  ;;  %25 = sbr.rel (!%p23_p2) target bundleno = 5 (0x5), region = 130 }
 0x829   : > { %s13295_s26 = smov %s13292_s21 }
 0x82a   :  { %7786 = vsyncpa [#allocation6], 1 }
 0x82b   :  { %7788 = vsyncpa [#allocation6 + $0x1], 1 }

</bundles_post_ra>
